<compile_context>
chip_gen: v6e
topology: v6e:2x2x1
jax: 0.10.0
libtpu: 0.0.40
codegen_flags: <defaults>
</compile_context>

<pallas_src>
import functools
import math

import jax
import jax.numpy as jnp
from jax.experimental import pallas as pl
from jax.experimental.pallas import tpu as pltpu

_EPS = 1e-5
_K_PAD = 128          # contraction (K) dim padded to multiples of 128
_M_PAD = 128          # lane (M = N*OH*OW) dim padded to multiples of 128
_ROW_PAD = 16         # bf16 sublane tile for the stacked conv1 output

# Architecture constants fixed by the PyTorch module.
_C1, _C2, _C3, _C4 = 8, 16, 32, 32
_KSIZE, _STRIDE = 5, 2
_NTAPS = _KSIZE * _KSIZE

_PARALLEL_1D = pltpu.CompilerParams(dimension_semantics=("parallel",))


def _conv_out(s, k=_KSIZE, stride=_STRIDE):
    return (s - (k - 1) - 1) // stride + 1


def _round_up(x, mult):
    return -(-x // mult) * mult


def _pad_to(x, axis, mult):
    pad = (-x.shape[axis]) % mult
    if pad == 0:
        return x
    widths = [(0, 0)] * x.ndim
    widths[axis] = (0, pad)
    return jnp.pad(x, widths)


# ----------------------------- Pallas kernels ------------------------------ #

def _bn_relu(y, gamma, beta, m_true):
    """Training-mode BatchNorm (per-row stats over the lane axis) + ReLU.

    Zero-padded lane columns contribute exactly 0 to the sums (zero-padded
    patches and no conv bias), so we divide by the true column count.
    """
    inv_m = 1.0 / m_true
    mean = jnp.sum(y, axis=1, keepdims=True) * inv_m
    var = jnp.sum(y * y, axis=1, keepdims=True) * inv_m - mean * mean
    var = jnp.maximum(var, 0.0)          # E[y^2]-E[y]^2 can dip negative in f32
    yhat = (y - mean) * jax.lax.rsqrt(var + _EPS)
    return jnp.maximum(yhat * gamma + beta, 0.0)


def _conv1_stacked_kernel(m_true, p_ref, w_ref, gb_ref, o_ref):
    # One matmul for ALL ensemble members: (n_preds*C1, Kp) @ (Kp, Mp).
    y = jnp.dot(w_ref[...], p_ref[...], preferred_element_type=jnp.float32)
    o_ref[...] = _bn_relu(y, gb_ref[:, 0:1], gb_ref[:, 1:2], m_true
                          ).astype(o_ref.dtype)


def conv1_stacked(p1, w1s, gb1s, m_true):
    """p1: (K1p, M1p) bf16 shared patches; w1s: (rows, K1p) member-stacked bf16;
    gb1s: (rows, 2) f32 (gamma | beta).  Returns (rows, M1p) bf16."""
    rows, k1p = w1s.shape
    assert p1.shape[0] == k1p
    m1p = p1.shape[1]
    return pl.pallas_call(
        functools.partial(_conv1_stacked_kernel, float(m_true)),
        out_shape=jax.ShapeDtypeStruct((rows, m1p), jnp.bfloat16),
    )(p1, w1s, gb1s)


def _conv_bn_relu_kernel(m_true, p_ref, w_ref, gb_ref, o_ref):
    # Transposed, lane-dense conv-as-matmul: (Cout, Kp) @ (Kp, Mp) -> (Cout, Mp).
    y = jnp.dot(w_ref[0], p_ref[0], preferred_element_type=jnp.float32)
    gb = gb_ref[0]
    o_ref[0] = _bn_relu(y, gb[:, 0:1], gb[:, 1:2], m_true).astype(o_ref.dtype)


def conv_bn_relu_members(p, w, gb, m_true):
    """p: (n_preds, Kp, Mp) bf16; w: (n_preds, Cout, Kp) bf16; gb: (n_preds, Cout, 2)."""
    n_preds, cout, kp = w.shape
    assert p.shape[0] == n_preds and p.shape[1] == kp
    mp = p.shape[2]
    member = lambda e: (e, 0, 0)
    return pl.pallas_call(
        functools.partial(_conv_bn_relu_kernel, float(m_true)),
        out_shape=jax.ShapeDtypeStruct((n_preds, cout, mp), jnp.bfloat16),
        grid=(n_preds,),
        in_specs=[pl.BlockSpec((1, kp, mp), member),
                  pl.BlockSpec((1, cout, kp), member),
                  pl.BlockSpec((1, cout, 2), member)],
        out_specs=pl.BlockSpec((1, cout, mp), member),
        compiler_params=_PARALLEL_1D,
    )(p, w, gb)


def _tail_kernel(m3_true, n_frames, n_pairs, seg_len, k3p, k4p,
                 p3_ref, w34_ref, gb_ref, h1w_ref, hp_ref, o_ref):
    nf = n_frames
    w34 = w34_ref[0]                       # (32, k3p + k4p) bf16
    gb = gb_ref[0]                         # (64, 2) f32: rows 0..31 BN3, 32..63 BN4
    c34 = w34.shape[0]

    # conv3 (lane-dense): columns ordered (oh3*OW3 + ow3)*n_frames + n.
    y3 = jnp.dot(w34[:, :k3p], p3_ref[0], preferred_element_type=jnp.float32)
    y3 = _bn_relu(y3, gb[:c34, 0:1], gb[:c34, 1:2], m3_true)

    # conv4 output is 1x1 spatial, so its 5x5 receptive field covers the whole
    # conv3 map: stack the 25 true spatial column blocks tap-major and do ONE
    # K = 25*C3 matmul (single MXU push instead of 25 tap matmuls + add chain).
    pieces = [y3[:, s * nf:(s + 1) * nf] for s in range(_NTAPS)]
    pad_rows = k4p - _NTAPS * c34
    if pad_rows:
        pieces.append(jnp.zeros((pad_rows, nf), jnp.float32))
    y3t = jnp.concatenate(pieces, axis=0).astype(jnp.bfloat16)     # (k4p, nf)
    z4 = jnp.dot(w34[:, k3p:k3p + k4p], y3t, preferred_element_type=jnp.float32)
    z4 = _bn_relu(z4, gb[c34:2 * c34, 0:1], gb[c34:2 * c34, 1:2], float(nf))

    # head1 (Linear lin_in -> 16) + ReLU, lane-dense (16, N); head params packed
    # into hp = (h1b | h2w | h2b-in-row-0-of-col-2).
    hp = hp_ref[0]
    h = jnp.dot(h1w_ref[0], z4.astype(jnp.bfloat16),
                preferred_element_type=jnp.float32) + hp[:, 0:1]
    h = jnp.maximum(h, 0.0)
    # head2 (Linear 16 -> 1) on the VPU: weighted sublane reduce, no 16x1 matvec.
    r = jnp.sum(h * hp[:, 1:2], axis=0, keepdims=True) + hp[0:1, 2:3]   # (1, N)

    # Per-segment reward sums as lane reduces (no aggregation matmul, no extra
    # input block), then pairwise softmax over (sum_seg1, sum_seg2).
    sums = [jnp.sum(r[:, k * seg_len:(k + 1) * seg_len], axis=1, keepdims=True)
            for k in range(2 * n_pairs)]
    s1 = jnp.concatenate(sums[:n_pairs], axis=1)                        # (1, B)
    s2 = jnp.concatenate(sums[n_pairs:], axis=1)                        # (1, B)
    m = jnp.maximum(s1, s2)
    e1 = jnp.exp(s1 - m)
    e2 = jnp.exp(s2 - m)
    inv = 1.0 / (e1 + e2)

    # Single lane-dense packed output per member: row 0 = per-frame rewards,
    # rows 1/2 = softmax preference probs; remaining rows zero.
    rows, width = o_ref.shape[-2], o_ref.shape[-1]

    def lane_pad(v):
        return jnp.concatenate(
            [v, jnp.zeros((v.shape[0], width - v.shape[1]), jnp.float32)], axis=1)

    o_ref[0] = jnp.concatenate(
        [lane_pad(r), lane_pad(e1 * inv), lane_pad(e2 * inv),
         jnp.zeros((rows - 3, width), jnp.float32)], axis=0)


def tail_members(p3, w34, gb34, h1w, hprm, m3_true, n_frames, n_pairs, seg_len,
                 k3p, k4p):
    n_preds, kp, m3p = p3.shape
    assert kp == k3p and w34.shape[2] == k3p + k4p and hprm.shape[2] == 3
    member = lambda e: (e, 0, 0)
    return pl.pallas_call(
        functools.partial(_tail_kernel, float(m3_true), int(n_frames),
                          int(n_pairs), int(seg_len), int(k3p), int(k4p)),
        out_shape=jax.ShapeDtypeStruct((n_preds, 8, 128), jnp.float32),
        grid=(n_preds,),
        in_specs=[pl.BlockSpec((1, kp, m3p), member),
                  pl.BlockSpec((1,) + w34.shape[1:], member),
                  pl.BlockSpec((1,) + gb34.shape[1:], member),
                  pl.BlockSpec((1,) + h1w.shape[1:], member),
                  pl.BlockSpec((1,) + hprm.shape[1:], member)],
        out_specs=pl.BlockSpec((1, 8, 128), member),
        compiler_params=_PARALLEL_1D,
    )(p3, w34, gb34, h1w, hprm)


# ------------------------------- JAX glue ---------------------------------- #

def _im2col_t(act, k=_KSIZE, stride=_STRIDE, spatial_major=False):
    """Transposed im2col.

    act: (..., C, N, H, W) -> (..., C*k*k, M).  Row order is (c, ki, kj),
    matching conv weights reshaped to (Cout, Cin*k*k).  Columns are ordered
    (n, oh, ow) by default, or (oh, ow, n) when spatial_major=True.
    # TODO(synk): move this gather inside the Pallas kernels for large batches.
    """
    C, N, H, W = act.shape[-4:]
    lead = act.shape[:-4]
    OH = (H - k) // stride + 1
    OW = (W - k) // stride + 1
    taps = []
    for ki in range(k):
        for kj in range(k):
            taps.append(act[..., ki:ki + stride * OH:stride,
                            kj:kj + stride * OW:stride])
    p = jnp.stack(taps, axis=act.ndim - 3)            # (..., C, k*k, N, OH, OW)
    if spatial_major:
        p = jnp.moveaxis(p, -3, -1)                   # (..., C, k*k, OH, OW, N)
    return p.reshape(lead + (C * k * k, N * OH * OW))


def _prep_patches(p):
    # zero-pad K and M to 128-lane/row multiples; operands stay bf16.
    p = _pad_to(p, p.ndim - 2, _K_PAD)
    p = _pad_to(p, p.ndim - 1, _M_PAD)
    return p.astype(jnp.bfloat16)


def init_ensemble_params(key, n_preds, nc, nh, nw):
    """Deterministic synthetic init, pre-laid-out for the Pallas matmuls."""
    convw, convh = nw, nh
    for _ in range(4):
        convw, convh = _conv_out(convw), _conv_out(convh)
    lin_in = convw * convh * _C4

    def conv_w(k, cout, cin):
        return (jax.random.normal(k, (n_preds, cout, cin, _KSIZE, _KSIZE),
                                  jnp.float32) / math.sqrt(cin * _NTAPS))

    def gb3(rows):
        return jnp.concatenate([jnp.ones((n_preds, rows, 1), jnp.float32),
                                jnp.zeros((n_preds, rows, 1), jnp.float32)],
                               axis=2)

    key, k1, k2, k3, k4, k5, k6, k7, k8 = jax.random.split(key, 9)
    w1 = conv_w(k1, _C1, nc)
    w2 = conv_w(k2, _C2, _C1)
    w3 = conv_w(k3, _C3, _C2)
    w4 = conv_w(k4, _C4, _C3)

    params = {}
    # Conv biases omitted on purpose: training-mode BatchNorm subtracts the
    # per-channel batch mean immediately after the conv, so a per-channel bias
    # cancels exactly (fold any bias into BN beta if ever needed).

    # conv1: member-stacked rows (member-major), K padded to 128, rows padded
    # to a 16-row bf16 sublane tile.
    w1s = w1.reshape(n_preds * _C1, nc * _NTAPS)
    w1s = _pad_to(_pad_to(w1s, 1, _K_PAD), 0, _ROW_PAD)
    params["w1s"] = w1s.astype(jnp.bfloat16)
    params["gb1s"] = jnp.concatenate(
        [jnp.ones((w1s.shape[0], 1), jnp.float32),
         jnp.zeros((w1s.shape[0], 1), jnp.float32)], axis=1)

    # conv2: per member, (gamma|beta) merged into one block.
    params["w2"] = _pad_to(w2.reshape(n_preds, _C2, _C1 * _NTAPS),
                           2, _K_PAD).astype(jnp.bfloat16)
    params["gb2"] = gb3(_C2)

    # conv3 (matmul-major rows) and conv4 (tap-major: K = (ki*5+kj)*C3 + c)
    # merged along lanes into one weight block; BN3/BN4 (gamma|beta) stacked.
    w3m = _pad_to(w3.reshape(n_preds, _C3, _C2 * _NTAPS), 2, _K_PAD)
    w4m = _pad_to(jnp.transpose(w4, (0, 1, 3, 4, 2)
                                ).reshape(n_preds, _C4, _NTAPS * _C3), 2, _K_PAD)
    params["w34"] = jnp.concatenate([w3m, w4m], axis=2).astype(jnp.bfloat16)
    params["gb34"] = gb3(_C3 + _C4)

    # heads: h1w separate block; (h1b | h2w | h2b) packed into one (16, 3) block.
    params["h1w"] = (jax.random.normal(k5, (n_preds, 16, lin_in), jnp.float32)
                     / math.sqrt(lin_in)).astype(jnp.bfloat16)
    h1b = 0.01 * jax.random.normal(k6, (n_preds, 16, 1), jnp.float32)
    h2w = jax.random.normal(k7, (n_preds, 16, 1), jnp.float32) / math.sqrt(16)
    h2b = 0.01 * jax.random.normal(k8, (n_preds, 1, 1), jnp.float32)
    h2b_col = jnp.concatenate([h2b, jnp.zeros((n_preds, 15, 1), jnp.float32)],
                              axis=1)
    params["hprm"] = jnp.concatenate([h1b, h2w, h2b_col], axis=2)
    return params


def reward_predictor_ensemble_forward(params, s1s, s2s):
    """Matches RewardPredictorEnsemble.forward (training-mode BatchNorm)."""
    assert s1s.shape == s2s.shape, "segments should be the same shape"
    B, T, C, H, W = s1s.shape
    n_frames = 2 * B * T
    n_preds = params["w2"].shape[0]
    assert n_frames <= 128 and B <= 126, "packed-output lane budget"
    # TODO(synk): tile frames for n_frames > 128.

    sizes = [(H, W)]
    for _ in range(4):
        sizes.append((_conv_out(sizes[-1][0]), _conv_out(sizes[-1][1])))
    (oh1, ow1), (oh2, ow2), (oh3, ow3), (oh4, ow4) = sizes[1:]
    assert oh4 == 1 and ow4 == 1 and oh3 == _KSIZE and ow3 == _KSIZE, (
        "fused conv3/conv4/head tail kernel assumes conv4 sees the whole "
        "5x5 conv3 map (1x1 conv4 output)")
    # TODO(synk): other spatial sizes need an un-fused conv4 whose flatten
    # matches torch's NCHW x.view(N, -1) ordering.

    # Both segments concatenated (s1 frames then s2 frames); NCHW -> (C,N,H,W).
    # Cast to bf16 BEFORE im2col so the gather moves half the bytes.
    x = jnp.concatenate([s1s.reshape(B * T, C, H, W),
                         s2s.reshape(B * T, C, H, W)], axis=0)
    x = jnp.transpose(x, (1, 0, 2, 3)).astype(jnp.bfloat16)

    # conv1: one member-stacked matmul over shared patches.
    m1 = n_frames * oh1 * ow1
    p1 = _prep_patches(_im2col_t(x))                           # (K1p, M1p)
    y1 = conv1_stacked(p1, params["w1s"], params["gb1s"], m1)
    a1 = y1[:n_preds * _C1, :m1].reshape(n_preds, _C1, n_frames, oh1, ow1)

    # conv2: per-member patches, "parallel" member grid.
    m2 = n_frames * oh2 * ow2
    p2 = _prep_patches(_im2col_t(a1))
    y2 = conv_bn_relu_members(p2, params["w2"], params["gb2"], m2)
    a2 = y2[:, :, :m2].reshape(n_preds, _C2, n_frames, oh2, ow2)

    # fused conv3 + conv4 + heads + per-segment sums + softmax preference.
    m3 = n_frames * oh3 * ow3
    p3 = _prep_patches(_im2col_t(a2, spatial_major=True))
    k3p = _round_up(_C2 * _NTAPS, _K_PAD)
    k4p = _round_up(_NTAPS * _C3, _K_PAD)
    packed = tail_members(p3, params["w34"], params["gb34"],
                          params["h1w"], params["hprm"],
                          m3, n_frames, B, T, k3p, k4p)

    r = packed[:, 0, :n_frames]                                # per-frame rewards
    r1s = r[:, :B * T].reshape(n_preds, B, T, 1)
    r2s = r[:, B * T:].reshape(n_preds, B, T, 1)
    pred = jnp.stack([packed[:, 1, :B], packed[:, 2, :B]], axis=-1)  # (n_preds,B,2)
    return r1s, r2s, pred


# --------------------------------- main ------------------------------------ #

if __name__ == "__main__":
    # 61x61 is the smallest spatial size for which 4 stride-2 k=5 convs give 1x1.
    B, T, C, H, W = 2, 2, 3, 61, 61
    n_preds = 2

    key = jax.random.PRNGKey(0)
    key, k1, k2, k3 = jax.random.split(key, 4)
    s1s = jax.random.uniform(k1, (B, T, C, H, W), jnp.float32)
    s2s = jax.random.uniform(k2, (B, T, C, H, W), jnp.float32)
    params = init_ensemble_params(k3, n_preds, C, H, W)

    fwd = jax.jit(reward_predictor_ensemble_forward)
    r1s, r2s, pred = fwd(params, s1s, s2s)
    jax.block_until_ready((r1s, r2s, pred))

    assert r1s.shape == (n_preds, B, T, 1)
    assert r2s.shape == (n_preds, B, T, 1)
    assert pred.shape == (n_preds, B, 2)
    assert bool(jnp.all(jnp.isfinite(r1s)))
    assert bool(jnp.all(jnp.isfinite(r2s)))
    assert bool(jnp.all(jnp.isfinite(pred)))
    assert bool(jnp.allclose(jnp.sum(pred, axis=-1), 1.0, atol=1e-5))

    print("KERNEL_OK")
</pallas_src>

<mosaic_0001>
module attributes {stable_mosaic.version = 11 : i64} {
  func.func @_conv1_stacked_kernel(%arg0: memref<128x6784xbf16, #tpu.memory_space<vmem>>, %arg1: memref<16x128xbf16, #tpu.memory_space<vmem>>, %arg2: memref<16x2xf32, #tpu.memory_space<vmem>>, %arg3: memref<16x6784xbf16, #tpu.memory_space<vmem>>) attributes {dimension_semantics = [], scalar_prefetch = 0 : i64, scratch_operands = 0 : i64, tpu.core_type = #tpu.core_type<tc>} {
    %c0 = arith.constant 0 : index
    %c0_0 = arith.constant 0 : index
    %0 = vector.load %arg1[%c0, %c0_0] : memref<16x128xbf16, #tpu.memory_space<vmem>>, vector<16x128xbf16>
    %c0_1 = arith.constant 0 : index
    %c0_2 = arith.constant 0 : index
    %1 = vector.load %arg0[%c0_1, %c0_2] : memref<128x6784xbf16, #tpu.memory_space<vmem>>, vector<128x6784xbf16>
    %cst = arith.constant dense<0.000000e+00> : vector<16x6784xf32>
    %2 = tpu.matmul %0, %1, %cst {dimension_numbers = #tpu.dot_dimension_numbers<[1], [0], [0], [1], [0, 0, 1, 1], [], []>} : vector<16x128xbf16>, vector<128x6784xbf16>, vector<16x6784xf32> -> vector<16x6784xf32>
    %c0_3 = arith.constant 0 : index
    %c0_4 = arith.constant 0 : index
    %3 = vector.load %arg2[%c0_3, %c0_4] : memref<16x2xf32, #tpu.memory_space<vmem>>, vector<16x1xf32>
    %c0_5 = arith.constant 0 : index
    %c1 = arith.constant 1 : index
    %4 = vector.load %arg2[%c0_5, %c1] : memref<16x2xf32, #tpu.memory_space<vmem>>, vector<16x1xf32>
    %cst_6 = arith.constant dense<0.000000e+00> : vector<16xf32>
    %5 = vector.multi_reduction <add>, %2, %cst_6 [1] : vector<16x6784xf32> to vector<16xf32>
    %6 = vector.shape_cast %5 : vector<16xf32> to vector<16x1xf32>
    %cst_7 = arith.constant 1.48632578E-4 : f32
    %7 = vector.broadcast %cst_7 : f32 to vector<16x1xf32>
    %8 = arith.mulf %6, %7 : vector<16x1xf32>
    %9 = arith.mulf %2, %2 : vector<16x6784xf32>
    %cst_8 = arith.constant dense<0.000000e+00> : vector<16xf32>
    %10 = vector.multi_reduction <add>, %9, %cst_8 [1] : vector<16x6784xf32> to vector<16xf32>
    %11 = vector.shape_cast %10 : vector<16xf32> to vector<16x1xf32>
    %cst_9 = arith.constant 1.48632578E-4 : f32
    %12 = vector.broadcast %cst_9 : f32 to vector<16x1xf32>
    %13 = arith.mulf %11, %12 : vector<16x1xf32>
    %14 = arith.mulf %8, %8 : vector<16x1xf32>
    %15 = arith.subf %13, %14 : vector<16x1xf32>
    %cst_10 = arith.constant 0.000000e+00 : f32
    %16 = vector.broadcast %cst_10 : f32 to vector<16x1xf32>
    %17 = arith.maximumf %15, %16 : vector<16x1xf32>
    %18 = vector.broadcast %8 : vector<16x1xf32> to vector<16x6784xf32>
    %19 = arith.subf %2, %18 : vector<16x6784xf32>
    %cst_11 = arith.constant 9.99999974E-6 : f32
    %20 = vector.broadcast %cst_11 : f32 to vector<16x1xf32>
    %21 = arith.addf %17, %20 : vector<16x1xf32>
    %22 = math.rsqrt %21 : vector<16x1xf32>
    %23 = vector.broadcast %22 : vector<16x1xf32> to vector<16x6784xf32>
    %24 = arith.mulf %19, %23 : vector<16x6784xf32>
    %25 = vector.broadcast %3 : vector<16x1xf32> to vector<16x6784xf32>
    %26 = arith.mulf %24, %25 : vector<16x6784xf32>
    %27 = vector.broadcast %4 : vector<16x1xf32> to vector<16x6784xf32>
    %28 = arith.addf %26, %27 : vector<16x6784xf32>
    %cst_12 = arith.constant 0.000000e+00 : f32
    %29 = vector.broadcast %cst_12 : f32 to vector<16x6784xf32>
    %30 = arith.maximumf %28, %29 : vector<16x6784xf32>
    %31 = arith.truncf %30 : vector<16x6784xf32> to vector<16x6784xbf16>
    %c0_13 = arith.constant 0 : index
    %c0_14 = arith.constant 0 : index
    %32 = vector.load %arg3[%c0_13, %c0_14] : memref<16x6784xbf16, #tpu.memory_space<vmem>>, vector<16x6784xbf16>
    tpu.vector_store %arg3[%c0_13, %c0_14], %31 {strides = array<i32>} : memref<16x6784xbf16, #tpu.memory_space<vmem>>, vector<16x6784xbf16>,
    return
  }
}

module attributes {stable_mosaic.version = 11 : i64} {
  func.func @_conv_bn_relu_kernel(%arg0: i32, %arg1: memref<1x256x1408xbf16, #tpu.memory_space<vmem>>, %arg2: memref<1x16x256xbf16, #tpu.memory_space<vmem>>, %arg3: memref<1x16x2xf32, #tpu.memory_space<vmem>>, %arg4: memref<1x16x1408xbf16, #tpu.memory_space<vmem>>) attributes {dimension_semantics = [#tpu.dimension_semantics<parallel>], iteration_bounds = array<i64: 2>, scalar_prefetch = 0 : i64, scratch_operands = 0 : i64, tpu.core_type = #tpu.core_type<tc>, window_params = [{transform_indices = @transform_0, window_bounds = array<i64: 1, 256, 1408>}, {transform_indices = @transform_1, window_bounds = array<i64: 1, 16, 256>}, {transform_indices = @transform_2, window_bounds = array<i64: 1, 16, 2>}, {transform_indices = @transform_3, window_bounds = array<i64: 1, 16, 1408>}]} {
    %c0 = arith.constant 0 : index
    %c0_0 = arith.constant 0 : index
    %c0_1 = arith.constant 0 : index
    %0 = vector.load %arg2[%c0, %c0_0, %c0_1] : memref<1x16x256xbf16, #tpu.memory_space<vmem>>, vector<1x16x256xbf16>
    %1 = vector.shape_cast %0 : vector<1x16x256xbf16> to vector<16x256xbf16>
    %c0_2 = arith.constant 0 : index
    %c0_3 = arith.constant 0 : index
    %c0_4 = arith.constant 0 : index
    %2 = vector.load %arg1[%c0_2, %c0_3, %c0_4] : memref<1x256x1408xbf16, #tpu.memory_space<vmem>>, vector<1x256x1408xbf16>
    %3 = vector.shape_cast %2 : vector<1x256x1408xbf16> to vector<256x1408xbf16>
    %cst = arith.constant dense<0.000000e+00> : vector<16x1408xf32>
    %4 = tpu.matmul %1, %3, %cst {dimension_numbers = #tpu.dot_dimension_numbers<[1], [0], [0], [1], [0, 0, 1, 1], [], []>} : vector<16x256xbf16>, vector<256x1408xbf16>, vector<16x1408xf32> -> vector<16x1408xf32>
    %c0_5 = arith.constant 0 : index
    %c0_6 = arith.constant 0 : index
    %c0_7 = arith.constant 0 : index
    %5 = vector.load %arg3[%c0_5, %c0_6, %c0_7] : memref<1x16x2xf32, #tpu.memory_space<vmem>>, vector<1x16x2xf32>
    %6 = vector.shape_cast %5 : vector<1x16x2xf32> to vector<16x2xf32>
    %7 = vector.extract_strided_slice %6 {offsets = [0, 0], sizes = [16, 1], strides = [1, 1]} : vector<16x2xf32> to vector<16x1xf32>
    %8 = vector.extract_strided_slice %6 {offsets = [0, 1], sizes = [16, 1], strides = [1, 1]} : vector<16x2xf32> to vector<16x1xf32>
    %cst_8 = arith.constant dense<0.000000e+00> : vector<16xf32>
    %9 = vector.multi_reduction <add>, %4, %cst_8 [1] : vector<16x1408xf32> to vector<16xf32>
    %10 = vector.shape_cast %9 : vector<16xf32> to vector<16x1xf32>
    %cst_9 = arith.constant 7.396450e-04 : f32
    %11 = vector.broadcast %cst_9 : f32 to vector<16x1xf32>
    %12 = arith.mulf %10, %11 : vector<16x1xf32>
    %13 = arith.mulf %4, %4 : vector<16x1408xf32>
    %cst_10 = arith.constant dense<0.000000e+00> : vector<16xf32>
    %14 = vector.multi_reduction <add>, %13, %cst_10 [1] : vector<16x1408xf32> to vector<16xf32>
    %15 = vector.shape_cast %14 : vector<16xf32> to vector<16x1xf32>
    %cst_11 = arith.constant 7.396450e-04 : f32
    %16 = vector.broadcast %cst_11 : f32 to vector<16x1xf32>
    %17 = arith.mulf %15, %16 : vector<16x1xf32>
    %18 = arith.mulf %12, %12 : vector<16x1xf32>
    %19 = arith.subf %17, %18 : vector<16x1xf32>
    %cst_12 = arith.constant 0.000000e+00 : f32
    %20 = vector.broadcast %cst_12 : f32 to vector<16x1xf32>
    %21 = arith.maximumf %19, %20 : vector<16x1xf32>
    %22 = vector.broadcast %12 : vector<16x1xf32> to vector<16x1408xf32>
    %23 = arith.subf %4, %22 : vector<16x1408xf32>
    %cst_13 = arith.constant 9.99999974E-6 : f32
    %24 = vector.broadcast %cst_13 : f32 to vector<16x1xf32>
    %25 = arith.addf %21, %24 : vector<16x1xf32>
    %26 = math.rsqrt %25 : vector<16x1xf32>
    %27 = vector.broadcast %26 : vector<16x1xf32> to vector<16x1408xf32>
    %28 = arith.mulf %23, %27 : vector<16x1408xf32>
    %29 = vector.broadcast %7 : vector<16x1xf32> to vector<16x1408xf32>
    %30 = arith.mulf %28, %29 : vector<16x1408xf32>
    %31 = vector.broadcast %8 : vector<16x1xf32> to vector<16x1408xf32>
    %32 = arith.addf %30, %31 : vector<16x1408xf32>
    %cst_14 = arith.constant 0.000000e+00 : f32
    %33 = vector.broadcast %cst_14 : f32 to vector<16x1408xf32>
    %34 = arith.maximumf %32, %33 : vector<16x1408xf32>
    %35 = arith.truncf %34 : vector<16x1408xf32> to vector<16x1408xbf16>
    %c0_15 = arith.constant 0 : index
    %c0_16 = arith.constant 0 : index
    %c0_17 = arith.constant 0 : index
    %36 = vector.load %arg4[%c0_15, %c0_16, %c0_17] : memref<1x16x1408xbf16, #tpu.memory_space<vmem>>, vector<1x16x1408xbf16>
    %37 = vector.shape_cast %36 : vector<1x16x1408xbf16> to vector<16x1408xbf16>
    %38 = vector.shape_cast %35 : vector<16x1408xbf16> to vector<1x16x1408xbf16>
    tpu.vector_store %arg4[%c0_15, %c0_16, %c0_17], %38 {strides = array<i32>} : memref<1x16x1408xbf16, #tpu.memory_space<vmem>>, vector<1x16x1408xbf16>,
    return
  }
  func.func @transform_0(%arg0: i32) -> (i32, i32, i32) {
    %c0_i32 = arith.constant 0 : i32
    %c0_i32_0 = arith.constant 0 : i32
    %c0_i32_1 = arith.constant 0 : i32
    return %arg0, %c0_i32, %c0_i32_0 : i32, i32, i32
  }
  func.func @transform_1(%arg0: i32) -> (i32, i32, i32) {
    %c0_i32 = arith.constant 0 : i32
    %c0_i32_0 = arith.constant 0 : i32
    %c0_i32_1 = arith.constant 0 : i32
    return %arg0, %c0_i32, %c0_i32_0 : i32, i32, i32
  }
  func.func @transform_2(%arg0: i32) -> (i32, i32, i32) {
    %c0_i32 = arith.constant 0 : i32
    %c0_i32_0 = arith.constant 0 : i32
    %c0_i32_1 = arith.constant 0 : i32
    return %arg0, %c0_i32, %c0_i32_0 : i32, i32, i32
  }
  func.func @transform_3(%arg0: i32) -> (i32, i32, i32) {
    %c0_i32 = arith.constant 0 : i32
    %c0_i32_0 = arith.constant 0 : i32
    %c0_i32_1 = arith.constant 0 : i32
    return %arg0, %c0_i32, %c0_i32_0 : i32, i32, i32
  }
}

module attributes {stable_mosaic.version = 11 : i64} {
  func.func @_tail_kernel(%arg0: i32, %arg1: memref<1x512x256xbf16, #tpu.memory_space<vmem>>, %arg2: memref<1x32x1408xbf16, #tpu.memory_space<vmem>>, %arg3: memref<1x64x2xf32, #tpu.memory_space<vmem>>, %arg4: memref<1x16x32xbf16, #tpu.memory_space<vmem>>, %arg5: memref<1x16x3xf32, #tpu.memory_space<vmem>>, %arg6: memref<1x8x128xf32, #tpu.memory_space<vmem>>) attributes {dimension_semantics = [#tpu.dimension_semantics<parallel>], iteration_bounds = array<i64: 2>, scalar_prefetch = 0 : i64, scratch_operands = 0 : i64, tpu.core_type = #tpu.core_type<tc>, window_params = [{transform_indices = @transform_0, window_bounds = array<i64: 1, 512, 256>}, {transform_indices = @transform_1, window_bounds = array<i64: 1, 32, 1408>}, {transform_indices = @transform_2, window_bounds = array<i64: 1, 64, 2>}, {transform_indices = @transform_3, window_bounds = array<i64: 1, 16, 32>}, {transform_indices = @transform_4, window_bounds = array<i64: 1, 16, 3>}, {transform_indices = @transform_5, window_bounds = array<i64: 1, 8, 128>}]} {
    %c0 = arith.constant 0 : index
    %c0_0 = arith.constant 0 : index
    %c0_1 = arith.constant 0 : index
    %0 = vector.load %arg2[%c0, %c0_0, %c0_1] : memref<1x32x1408xbf16, #tpu.memory_space<vmem>>, vector<1x32x1408xbf16>
    %1 = vector.shape_cast %0 : vector<1x32x1408xbf16> to vector<32x1408xbf16>
    %c0_2 = arith.constant 0 : index
    %c0_3 = arith.constant 0 : index
    %c0_4 = arith.constant 0 : index
    %2 = vector.load %arg3[%c0_2, %c0_3, %c0_4] : memref<1x64x2xf32, #tpu.memory_space<vmem>>, vector<1x64x2xf32>
    %3 = vector.shape_cast %2 : vector<1x64x2xf32> to vector<64x2xf32>
    %4 = vector.extract_strided_slice %1 {offsets = [0, 0], sizes = [32, 512], strides = [1, 1]} : vector<32x1408xbf16> to vector<32x512xbf16>
    %c0_5 = arith.constant 0 : index
    %c0_6 = arith.constant 0 : index
    %c0_7 = arith.constant 0 : index
    %5 = vector.load %arg1[%c0_5, %c0_6, %c0_7] : memref<1x512x256xbf16, #tpu.memory_space<vmem>>, vector<1x512x256xbf16>
    %6 = vector.shape_cast %5 : vector<1x512x256xbf16> to vector<512x256xbf16>
    %cst = arith.constant dense<0.000000e+00> : vector<32x256xf32>
    %7 = tpu.matmul %4, %6, %cst {dimension_numbers = #tpu.dot_dimension_numbers<[1], [0], [0], [1], [0, 0, 1, 1], [], []>} : vector<32x512xbf16>, vector<512x256xbf16>, vector<32x256xf32> -> vector<32x256xf32>
    %8 = vector.extract_strided_slice %3 {offsets = [0, 0], sizes = [32, 1], strides = [1, 1]} : vector<64x2xf32> to vector<32x1xf32>
    %9 = vector.extract_strided_slice %3 {offsets = [0, 1], sizes = [32, 1], strides = [1, 1]} : vector<64x2xf32> to vector<32x1xf32>
    %cst_8 = arith.constant dense<0.000000e+00> : vector<32xf32>
    %10 = vector.multi_reduction <add>, %7, %cst_8 [1] : vector<32x256xf32> to vector<32xf32>
    %11 = vector.shape_cast %10 : vector<32xf32> to vector<32x1xf32>
    %cst_9 = arith.constant 5.000000e-03 : f32
    %12 = vector.broadcast %cst_9 : f32 to vector<32x1xf32>
    %13 = arith.mulf %11, %12 : vector<32x1xf32>
    %14 = arith.mulf %7, %7 : vector<32x256xf32>
    %cst_10 = arith.constant dense<0.000000e+00> : vector<32xf32>
    %15 = vector.multi_reduction <add>, %14, %cst_10 [1] : vector<32x256xf32> to vector<32xf32>
    %16 = vector.shape_cast %15 : vector<32xf32> to vector<32x1xf32>
    %cst_11 = arith.constant 5.000000e-03 : f32
    %17 = vector.broadcast %cst_11 : f32 to vector<32x1xf32>
    %18 = arith.mulf %16, %17 : vector<32x1xf32>
    %19 = arith.mulf %13, %13 : vector<32x1xf32>
    %20 = arith.subf %18, %19 : vector<32x1xf32>
    %cst_12 = arith.constant 0.000000e+00 : f32
    %21 = vector.broadcast %cst_12 : f32 to vector<32x1xf32>
    %22 = arith.maximumf %20, %21 : vector<32x1xf32>
    %23 = vector.broadcast %13 : vector<32x1xf32> to vector<32x256xf32>
    %24 = arith.subf %7, %23 : vector<32x256xf32>
    %cst_13 = arith.constant 9.99999974E-6 : f32
    %25 = vector.broadcast %cst_13 : f32 to vector<32x1xf32>
    %26 = arith.addf %22, %25 : vector<32x1xf32>
    %27 = math.rsqrt %26 : vector<32x1xf32>
    %28 = vector.broadcast %27 : vector<32x1xf32> to vector<32x256xf32>
    %29 = arith.mulf %24, %28 : vector<32x256xf32>
    %30 = vector.broadcast %8 : vector<32x1xf32> to vector<32x256xf32>
    %31 = arith.mulf %29, %30 : vector<32x256xf32>
    %32 = vector.broadcast %9 : vector<32x1xf32> to vector<32x256xf32>
    %33 = arith.addf %31, %32 : vector<32x256xf32>
    %cst_14 = arith.constant 0.000000e+00 : f32
    %34 = vector.broadcast %cst_14 : f32 to vector<32x256xf32>
    %35 = arith.maximumf %33, %34 : vector<32x256xf32>
    %36 = vector.extract_strided_slice %35 {offsets = [0, 0], sizes = [32, 8], strides = [1, 1]} : vector<32x256xf32> to vector<32x8xf32>
    %37 = vector.extract_strided_slice %35 {offsets = [0, 8], sizes = [32, 8], strides = [1, 1]} : vector<32x256xf32> to vector<32x8xf32>
    %38 = vector.extract_strided_slice %35 {offsets = [0, 16], sizes = [32, 8], strides = [1, 1]} : vector<32x256xf32> to vector<32x8xf32>
    %39 = vector.extract_strided_slice %35 {offsets = [0, 24], sizes = [32, 8], strides = [1, 1]} : vector<32x256xf32> to vector<32x8xf32>
    %40 = vector.extract_strided_slice %35 {offsets = [0, 32], sizes = [32, 8], strides = [1, 1]} : vector<32x256xf32> to vector<32x8xf32>
    %41 = vector.extract_strided_slice %35 {offsets = [0, 40], sizes = [32, 8], strides = [1, 1]} : vector<32x256xf32> to vector<32x8xf32>
    %42 = vector.extract_strided_slice %35 {offsets = [0, 48], sizes = [32, 8], strides = [1, 1]} : vector<32x256xf32> to vector<32x8xf32>
    %43 = vector.extract_strided_slice %35 {offsets = [0, 56], sizes = [32, 8], strides = [1, 1]} : vector<32x256xf32> to vector<32x8xf32>
    %44 = vector.extract_strided_slice %35 {offsets = [0, 64], sizes = [32, 8], strides = [1, 1]} : vector<32x256xf32> to vector<32x8xf32>
    %45 = vector.extract_strided_slice %35 {offsets = [0, 72], sizes = [32, 8], strides = [1, 1]} : vector<32x256xf32> to vector<32x8xf32>
    %46 = vector.extract_strided_slice %35 {offsets = [0, 80], sizes = [32, 8], strides = [1, 1]} : vector<32x256xf32> to vector<32x8xf32>
    %47 = vector.extract_strided_slice %35 {offsets = [0, 88], sizes = [32, 8], strides = [1, 1]} : vector<32x256xf32> to vector<32x8xf32>
    %48 = vector.extract_strided_slice %35 {offsets = [0, 96], sizes = [32, 8], strides = [1, 1]} : vector<32x256xf32> to vector<32x8xf32>
    %49 = vector.extract_strided_slice %35 {offsets = [0, 104], sizes = [32, 8], strides = [1, 1]} : vector<32x256xf32> to vector<32x8xf32>
    %50 = vector.extract_strided_slice %35 {offsets = [0, 112], sizes = [32, 8], strides = [1, 1]} : vector<32x256xf32> to vector<32x8xf32>
    %51 = vector.extract_strided_slice %35 {offsets = [0, 120], sizes = [32, 8], strides = [1, 1]} : vector<32x256xf32> to vector<32x8xf32>
    %52 = vector.extract_strided_slice %35 {offsets = [0, 128], sizes = [32, 8], strides = [1, 1]} : vector<32x256xf32> to vector<32x8xf32>
    %53 = vector.extract_strided_slice %35 {offsets = [0, 136], sizes = [32, 8], strides = [1, 1]} : vector<32x256xf32> to vector<32x8xf32>
    %54 = vector.extract_strided_slice %35 {offsets = [0, 144], sizes = [32, 8], strides = [1, 1]} : vector<32x256xf32> to vector<32x8xf32>
    %55 = vector.extract_strided_slice %35 {offsets = [0, 152], sizes = [32, 8], strides = [1, 1]} : vector<32x256xf32> to vector<32x8xf32>
    %56 = vector.extract_strided_slice %35 {offsets = [0, 160], sizes = [32, 8], strides = [1, 1]} : vector<32x256xf32> to vector<32x8xf32>
    %57 = vector.extract_strided_slice %35 {offsets = [0, 168], sizes = [32, 8], strides = [1, 1]} : vector<32x256xf32> to vector<32x8xf32>
    %58 = vector.extract_strided_slice %35 {offsets = [0, 176], sizes = [32, 8], strides = [1, 1]} : vector<32x256xf32> to vector<32x8xf32>
    %59 = vector.extract_strided_slice %35 {offsets = [0, 184], sizes = [32, 8], strides = [1, 1]} : vector<32x256xf32> to vector<32x8xf32>
    %60 = vector.extract_strided_slice %35 {offsets = [0, 192], sizes = [32, 8], strides = [1, 1]} : vector<32x256xf32> to vector<32x8xf32>
    %cst_15 = arith.constant 0.000000e+00 : f32
    %61 = vector.broadcast %cst_15 : f32 to vector<96x8xf32>
    %62 = tpu.concatenate %36, %37, %38, %39, %40, %41, %42, %43, %44, %45, %46, %47, %48, %49, %50, %51 in 0 : vector<32x8xf32>, vector<32x8xf32>, vector<32x8xf32>, vector<32x8xf32>, vector<32x8xf32>, vector<32x8xf32>, vector<32x8xf32>, vector<32x8xf32>, vector<32x8xf32>, vector<32x8xf32>, vector<32x8xf32>, vector<32x8xf32>, vector<32x8xf32>, vector<32x8xf32>, vector<32x8xf32>, vector<32x8xf32> -> vector<512x8xf32>
    %63 = tpu.concatenate %52, %53, %54, %55, %56, %57, %58, %59, %60, %61 in 0 : vector<32x8xf32>, vector<32x8xf32>, vector<32x8xf32>, vector<32x8xf32>, vector<32x8xf32>, vector<32x8xf32>, vector<32x8xf32>, vector<32x8xf32>, vector<32x8xf32>, vector<96x8xf32> -> vector<384x8xf32>
    %64 = tpu.concatenate %62, %63 in 0 : vector<512x8xf32>, vector<384x8xf32> -> vector<896x8xf32>
    %65 = arith.truncf %64 : vector<896x8xf32> to vector<896x8xbf16>
    %66 = vector.extract_strided_slice %1 {offsets = [0, 512], sizes = [32, 896], strides = [1, 1]} : vector<32x1408xbf16> to vector<32x896xbf16>
    %cst_16 = arith.constant dense<0.000000e+00> : vector<32x8xf32>
    %67 = tpu.matmul %66, %65, %cst_16 {dimension_numbers = #tpu.dot_dimension_numbers<[1], [0], [0], [1], [0, 0, 1, 1], [], []>} : vector<32x896xbf16>, vector<896x8xbf16>, vector<32x8xf32> -> vector<32x8xf32>
    %68 = vector.extract_strided_slice %3 {offsets = [32, 0], sizes = [32, 1], strides = [1, 1]} : vector<64x2xf32> to vector<32x1xf32>
    %69 = vector.extract_strided_slice %3 {offsets = [32, 1], sizes = [32, 1], strides = [1, 1]} : vector<64x2xf32> to vector<32x1xf32>
    %cst_17 = arith.constant dense<0.000000e+00> : vector<32xf32>
    %70 = vector.multi_reduction <add>, %67, %cst_17 [1] : vector<32x8xf32> to vector<32xf32>
    %71 = vector.shape_cast %70 : vector<32xf32> to vector<32x1xf32>
    %cst_18 = arith.constant 1.250000e-01 : f32
    %72 = vector.broadcast %cst_18 : f32 to vector<32x1xf32>
    %73 = arith.mulf %71, %72 : vector<32x1xf32>
    %74 = arith.mulf %67, %67 : vector<32x8xf32>
    %cst_19 = arith.constant dense<0.000000e+00> : vector<32xf32>
    %75 = vector.multi_reduction <add>, %74, %cst_19 [1] : vector<32x8xf32> to vector<32xf32>
    %76 = vector.shape_cast %75 : vector<32xf32> to vector<32x1xf32>
    %cst_20 = arith.constant 1.250000e-01 : f32
    %77 = vector.broadcast %cst_20 : f32 to vector<32x1xf32>
    %78 = arith.mulf %76, %77 : vector<32x1xf32>
    %79 = arith.mulf %73, %73 : vector<32x1xf32>
    %80 = arith.subf %78, %79 : vector<32x1xf32>
    %cst_21 = arith.constant 0.000000e+00 : f32
    %81 = vector.broadcast %cst_21 : f32 to vector<32x1xf32>
    %82 = arith.maximumf %80, %81 : vector<32x1xf32>
    %83 = vector.broadcast %73 : vector<32x1xf32> to vector<32x8xf32>
    %84 = arith.subf %67, %83 : vector<32x8xf32>
    %cst_22 = arith.constant 9.99999974E-6 : f32
    %85 = vector.broadcast %cst_22 : f32 to vector<32x1xf32>
    %86 = arith.addf %82, %85 : vector<32x1xf32>
    %87 = math.rsqrt %86 : vector<32x1xf32>
    %88 = vector.broadcast %87 : vector<32x1xf32> to vector<32x8xf32>
    %89 = arith.mulf %84, %88 : vector<32x8xf32>
    %90 = vector.broadcast %68 : vector<32x1xf32> to vector<32x8xf32>
    %91 = arith.mulf %89, %90 : vector<32x8xf32>
    %92 = vector.broadcast %69 : vector<32x1xf32> to vector<32x8xf32>
    %93 = arith.addf %91, %92 : vector<32x8xf32>
    %cst_23 = arith.constant 0.000000e+00 : f32
    %94 = vector.broadcast %cst_23 : f32 to vector<32x8xf32>
    %95 = arith.maximumf %93, %94 : vector<32x8xf32>
    %c0_24 = arith.constant 0 : index
    %c0_25 = arith.constant 0 : index
    %c0_26 = arith.constant 0 : index
    %96 = vector.load %arg5[%c0_24, %c0_25, %c0_26] : memref<1x16x3xf32, #tpu.memory_space<vmem>>, vector<1x16x3xf32>
    %97 = vector.shape_cast %96 : vector<1x16x3xf32> to vector<16x3xf32>
    %c0_27 = arith.constant 0 : index
    %c0_28 = arith.constant 0 : index
    %c0_29 = arith.constant 0 : index
    %98 = vector.load %arg4[%c0_27, %c0_28, %c0_29] : memref<1x16x32xbf16, #tpu.memory_space<vmem>>, vector<1x16x32xbf16>
    %99 = vector.shape_cast %98 : vector<1x16x32xbf16> to vector<16x32xbf16>
    %100 = arith.truncf %95 : vector<32x8xf32> to vector<32x8xbf16>
    %cst_30 = arith.constant dense<0.000000e+00> : vector<16x8xf32>
    %101 = tpu.matmul %99, %100, %cst_30 {dimension_numbers = #tpu.dot_dimension_numbers<[1], [0], [0], [1], [0, 0, 1, 1], [], []>} : vector<16x32xbf16>, vector<32x8xbf16>, vector<16x8xf32> -> vector<16x8xf32>
    %102 = vector.extract_strided_slice %97 {offsets = [0, 0], sizes = [16, 1], strides = [1, 1]} : vector<16x3xf32> to vector<16x1xf32>
    %103 = vector.broadcast %102 : vector<16x1xf32> to vector<16x8xf32>
    %104 = arith.addf %101, %103 : vector<16x8xf32>
    %cst_31 = arith.constant 0.000000e+00 : f32
    %105 = vector.broadcast %cst_31 : f32 to vector<16x8xf32>
    %106 = arith.maximumf %104, %105 : vector<16x8xf32>
    %107 = vector.extract_strided_slice %97 {offsets = [0, 1], sizes = [16, 1], strides = [1, 1]} : vector<16x3xf32> to vector<16x1xf32>
    %108 = vector.broadcast %107 : vector<16x1xf32> to vector<16x8xf32>
    %109 = arith.mulf %106, %108 : vector<16x8xf32>
    %cst_32 = arith.constant dense<0.000000e+00> : vector<8xf32>
    %110 = vector.multi_reduction <add>, %109, %cst_32 [0] : vector<16x8xf32> to vector<8xf32>
    %111 = vector.shape_cast %110 : vector<8xf32> to vector<1x8xf32>
    %112 = vector.extract_strided_slice %97 {offsets = [0, 2], sizes = [1, 1], strides = [1, 1]} : vector<16x3xf32> to vector<1x1xf32>
    %113 = vector.broadcast %112 : vector<1x1xf32> to vector<1x8xf32>
    %114 = arith.addf %111, %113 : vector<1x8xf32>
    %115 = vector.extract_strided_slice %114 {offsets = [0, 0], sizes = [1, 2], strides = [1, 1]} : vector<1x8xf32> to vector<1x2xf32>
    %cst_33 = arith.constant dense<0.000000e+00> : vector<1xf32>
    %116 = vector.multi_reduction <add>, %115, %cst_33 [1] : vector<1x2xf32> to vector<1xf32>
    %117 = vector.shape_cast %116 : vector<1xf32> to vector<1x1xf32>
    %118 = vector.extract_strided_slice %114 {offsets = [0, 2], sizes = [1, 2], strides = [1, 1]} : vector<1x8xf32> to vector<1x2xf32>
    %cst_34 = arith.constant dense<0.000000e+00> : vector<1xf32>
    %119 = vector.multi_reduction <add>, %118, %cst_34 [1] : vector<1x2xf32> to vector<1xf32>
    %120 = vector.shape_cast %119 : vector<1xf32> to vector<1x1xf32>
    %121 = vector.extract_strided_slice %114 {offsets = [0, 4], sizes = [1, 2], strides = [1, 1]} : vector<1x8xf32> to vector<1x2xf32>
    %cst_35 = arith.constant dense<0.000000e+00> : vector<1xf32>
    %122 = vector.multi_reduction <add>, %121, %cst_35 [1] : vector<1x2xf32> to vector<1xf32>
    %123 = vector.shape_cast %122 : vector<1xf32> to vector<1x1xf32>
    %124 = vector.extract_strided_slice %114 {offsets = [0, 6], sizes = [1, 2], strides = [1, 1]} : vector<1x8xf32> to vector<1x2xf32>
    %cst_36 = arith.constant dense<0.000000e+00> : vector<1xf32>
    %125 = vector.multi_reduction <add>, %124, %cst_36 [1] : vector<1x2xf32> to vector<1xf32>
    %126 = vector.shape_cast %125 : vector<1xf32> to vector<1x1xf32>
    %127 = tpu.concatenate %117, %120 in 1 : vector<1x1xf32>, vector<1x1xf32> -> vector<1x2xf32>
    %128 = tpu.concatenate %123, %126 in 1 : vector<1x1xf32>, vector<1x1xf32> -> vector<1x2xf32>
    %129 = arith.maximumf %127, %128 : vector<1x2xf32>
    %130 = arith.subf %127, %129 : vector<1x2xf32>
    %131 = math.exp %130 : vector<1x2xf32>
    %132 = arith.subf %128, %129 : vector<1x2xf32>
    %133 = math.exp %132 : vector<1x2xf32>
    %134 = arith.addf %131, %133 : vector<1x2xf32>
    %cst_37 = arith.constant 1.000000e+00 : f32
    %135 = vector.broadcast %cst_37 : f32 to vector<1x2xf32>
    %136 = arith.divf %135, %134 : vector<1x2xf32>
    %cst_38 = arith.constant 0.000000e+00 : f32
    %137 = vector.broadcast %cst_38 : f32 to vector<1x120xf32>
    %138 = tpu.concatenate %114, %137 in 1 : vector<1x8xf32>, vector<1x120xf32> -> vector<1x128xf32>
    %139 = arith.mulf %131, %136 : vector<1x2xf32>
    %cst_39 = arith.constant 0.000000e+00 : f32
    %140 = vector.broadcast %cst_39 : f32 to vector<1x126xf32>
    %141 = tpu.concatenate %139, %140 in 1 : vector<1x2xf32>, vector<1x126xf32> -> vector<1x128xf32>
    %142 = arith.mulf %133, %136 : vector<1x2xf32>
    %cst_40 = arith.constant 0.000000e+00 : f32
    %143 = vector.broadcast %cst_40 : f32 to vector<1x126xf32>
    %144 = tpu.concatenate %142, %143 in 1 : vector<1x2xf32>, vector<1x126xf32> -> vector<1x128xf32>
    %cst_41 = arith.constant 0.000000e+00 : f32
    %145 = vector.broadcast %cst_41 : f32 to vector<5x128xf32>
    %146 = tpu.concatenate %138, %141, %144, %145 in 0 : vector<1x128xf32>, vector<1x128xf32>, vector<1x128xf32>, vector<5x128xf32> -> vector<8x128xf32>
    %c0_42 = arith.constant 0 : index
    %c0_43 = arith.constant 0 : index
    %c0_44 = arith.constant 0 : index
    %147 = vector.load %arg6[%c0_42, %c0_43, %c0_44] : memref<1x8x128xf32, #tpu.memory_space<vmem>>, vector<1x8x128xf32>
    %148 = vector.shape_cast %147 : vector<1x8x128xf32> to vector<8x128xf32>
    %149 = vector.shape_cast %146 : vector<8x128xf32> to vector<1x8x128xf32>
    tpu.vector_store %arg6[%c0_42, %c0_43, %c0_44], %149 {strides = array<i32>} : memref<1x8x128xf32, #tpu.memory_space<vmem>>, vector<1x8x128xf32>,
    return
  }
  func.func @transform_0(%arg0: i32) -> (i32, i32, i32) {
    %c0_i32 = arith.constant 0 : i32
    %c0_i32_0 = arith.constant 0 : i32
    %c0_i32_1 = arith.constant 0 : i32
    return %arg0, %c0_i32, %c0_i32_0 : i32, i32, i32
  }
  func.func @transform_1(%arg0: i32) -> (i32, i32, i32) {
    %c0_i32 = arith.constant 0 : i32
    %c0_i32_0 = arith.constant 0 : i32
    %c0_i32_1 = arith.constant 0 : i32
    return %arg0, %c0_i32, %c0_i32_0 : i32, i32, i32
  }
  func.func @transform_2(%arg0: i32) -> (i32, i32, i32) {
    %c0_i32 = arith.constant 0 : i32
    %c0_i32_0 = arith.constant 0 : i32
    %c0_i32_1 = arith.constant 0 : i32
    return %arg0, %c0_i32, %c0_i32_0 : i32, i32, i32
  }
  func.func @transform_3(%arg0: i32) -> (i32, i32, i32) {
    %c0_i32 = arith.constant 0 : i32
    %c0_i32_0 = arith.constant 0 : i32
    %c0_i32_1 = arith.constant 0 : i32
    return %arg0, %c0_i32, %c0_i32_0 : i32, i32, i32
  }
  func.func @transform_4(%arg0: i32) -> (i32, i32, i32) {
    %c0_i32 = arith.constant 0 : i32
    %c0_i32_0 = arith.constant 0 : i32
    %c0_i32_1 = arith.constant 0 : i32
    return %arg0, %c0_i32, %c0_i32_0 : i32, i32, i32
  }
  func.func @transform_5(%arg0: i32) -> (i32, i32, i32) {
    %c0_i32 = arith.constant 0 : i32
    %c0_i32_0 = arith.constant 0 : i32
    %c0_i32_1 = arith.constant 0 : i32
    return %arg0, %c0_i32, %c0_i32_0 : i32, i32, i32
  }
}

</mosaic_0001>

<bundles_post_ra>
// kernel: reward_predictor_ensemble_forward.3
= control target key start
LH: loop header
LB: loop body
LE: loop exit
PB: predicated region body
PF: predicated region fallthrough
CT: control target
= control target key end

     0   :  { %v6215_v1 = vmov 0   ;;  %vm6217_vm0 = vmmov 0   ;;  %s8930_s0 = inlined_call_operand.vmem [shape: bf16[128,6784], index: 0, kind: input, shape index: {}]   ;;  %s8931_s1 = inlined_call_operand.vmem [shape: bf16[16,128], index: 1, kind: input, shape index: {}]   ;;  %s8932_s2 = inlined_call_operand.vmem [shape: f32[16,2], index: 2, kind: input, shape index: {}]   ;;  %s8933_s3 = inlined_call_operand.vmem [shape: bf16[16,6784], index: 3, kind: output, shape index: {}]  }
   0x1   :  { %v5576_v0 = vld [vmem:[%s8930_s0 + $0xb9c] ss:$212 sps:$4 sm:$0xff]   ;;  %2615 = vmatprep.mubr.bf16.mxu0 %v6215_v1  ;;  %2658 = vmatprep.mubr.bf16.mxu1 %v6215_v1  ;;  %v5578_v2 = vld [vmem:[%s8930_s0 + $0xb98] ss:$212 sps:$4 sm:$0xff]   ;;  %v5579_v3 = vld [vmem:[%s8930_s0 + $0x9f4] ss:$212 sps:$4 sm:$0xff]  }
   0x2   :  { %5573 = vset.pattern.permute.xlu1 %v6215_v1  ;;  %5572 = vset.pattern.permute.xlu0 %v6215_v1  ;;  %v5581_v4 = vld [vmem:[%s8930_s0 + $0xba4] ss:$212 sps:$4 sm:$0xff]   ;;  %v5584_v6 = vld [vmem:[%s8930_s0 + $0xba0] ss:$212 sps:$4 sm:$0xff]   ;;  %v5587_v8 = vld [vmem:[%s8930_s0 + $0x9fc] ss:$212 sps:$4 sm:$0xff]  }
   0x3   :  { %2583 = vmatprep.subr.bf16.mxu0 %v5576_v0  ;;  %v5583_v5 = vld [vmem:[%s8930_s0 + $0x9f0] ss:$212 sps:$4 sm:$0xff]   ;;  %v5585_v7 = vld [vmem:[%s8930_s0 + $0x84c] ss:$212 sps:$4 sm:$0xff]   ;;  %2626 = vmatprep.subr.bf16.mxu1 %v5581_v4  ;;  %v5589_v10 = vld [vmem:[%s8930_s0 + $0x848] ss:$212 sps:$4 sm:$0xff]  }
   0x4   :  { %2584 = vmatpush1.bf16.msra.mxu0 %v5578_v2  ;;  %2627 = vmatpush1.bf16.msra.mxu1 %v5584_v6  ;;  %v5590_v9 = vld [vmem:[%s8930_s0 + $0x9f8] ss:$212 sps:$4 sm:$0xff]   ;;  %v5593_v12 = vld [vmem:[%s8930_s0 + $0x854] ss:$212 sps:$4 sm:$0xff]   ;;  %v5596_v13 = vld [vmem:[%s8930_s0 + $0x850] ss:$212 sps:$4 sm:$0xff]  }
   0x5   :  { %2585 = vmatprep.subr.bf16.mxu0 %v5579_v3  ;;  %2628 = vmatprep.subr.bf16.mxu1 %v5587_v8  ;;  %v5591_v11 = vld [vmem:[%s8930_s0 + $0x6a4] ss:$212 sps:$4 sm:$0xff]   ;;  %v5595_v14 = vld [vmem:[%s8930_s0 + $0x6a0] ss:$212 sps:$4 sm:$0xff]   ;;  %v5597_v16 = vld [vmem:[%s8930_s0 + $0x4fc] ss:$212 sps:$4 sm:$0xff]  }
   0x6   :  { %v5599_v15 = vld [vmem:[%s8930_s0 + $0x6ac] ss:$212 sps:$4 sm:$0xff]   ;;  %v5602_v18 = vld [vmem:[%s8930_s0 + $0x6a8] ss:$212 sps:$4 sm:$0xff]   ;;  %v5605_v19 = vld [vmem:[%s8930_s0 + $0x504] ss:$212 sps:$4 sm:$0xff]  }
   0x7   :  { %v5601_v17 = vld [vmem:[%s8930_s0 + $0x4f8] ss:$212 sps:$4 sm:$0xff]   ;;  %v5603_v20 = vld [vmem:[%s8930_s0 + $0x354] ss:$212 sps:$4 sm:$0xff]   ;;  %v5607_v22 = vld [vmem:[%s8930_s0 + $0x350] ss:$212 sps:$4 sm:$0xff]  }
   0x8   :  { %2586 = vmatpush1.bf16.msra.mxu0 %v5583_v5  ;;  %2629 = vmatpush1.bf16.msra.mxu1 %v5590_v9  ;;  %v5608_v21 = vld [vmem:[%s8930_s0 + $0x500] ss:$212 sps:$4 sm:$0xff]   ;;  %v5611_v23 = vld [vmem:[%s8930_s0 + $0x35c] ss:$212 sps:$4 sm:$0xff]   ;;  %v5614_v25 = vld [vmem:[%s8930_s0 + $0x358] ss:$212 sps:$4 sm:$0xff]  }
   0x9   :  { %2587 = vmatprep.subr.bf16.mxu0 %v5585_v7  ;;  %2630 = vmatprep.subr.bf16.mxu1 %v5593_v12  ;;  %v5609_v24 = vld [vmem:[%s8930_s0 + $0x1ac] ss:$212 sps:$4 sm:$0xff]   ;;  %v5613_v26 = vld [vmem:[%s8930_s0 + $0x1a8] ss:$212 sps:$4 sm:$0xff]   ;;  %v5615_v28 = vld [vmem:[%s8930_s0 + $0x4] ss:$212 sps:$4 sm:$0xff]  }
   0xa   :  { %v5617_v27 = vld [vmem:[%s8930_s0 + $0x1b4] ss:$212 sps:$4 sm:$0xff]   ;;  %v5620_v29 = vld [vmem:[%s8930_s0 + $0x1b0] ss:$212 sps:$4 sm:$0xff]   ;;  %v5622_v31 = vld [vmem:[%s8930_s0 + $0xc] ss:$212 sps:$4 sm:$0xff]  }
   0xb   :  { %v5619_v30 = vld [vmem:[%s8930_s0] ss:$212 sps:$4 sm:$0xff]   ;;  %v5627_v34 = vld [vmem:[%s8930_s0 + $0x8] ss:$212 sps:$4 sm:$0xff]   ;;  %v5630_v37 = vld [vmem:[%s8930_s0 + $0xa04] ss:$212 sps:$4 sm:$0xff]  }
   0xc   :  { %2588 = vmatpush1.bf16.msra.mxu0 %v5589_v10  ;;  %2631 = vmatpush1.bf16.msra.mxu1 %v5596_v13  ;;  %v5626_v32 = vld [vmem:[%s8930_s0 + $0xbac] ss:$212 sps:$4 sm:$0xff]   ;;  %v5624_v35 = vld [vmem:[%s8930_s0 + $0xba8] ss:$212 sps:$4 sm:$0xff]   ;;  %v5631_v38 = vld [vmem:[%s8930_s0 + $0xbb0] ss:$212 sps:$4 sm:$0xff]  }
   0xd   :  { %2589 = vmatprep.subr.bf16.mxu0 %v5591_v11  ;;  %2632 = vmatprep.subr.bf16.mxu1 %v5599_v15  ;;  %v6342_v33 = vld [vmem:[%s8931_s1] sm:$0xff]   ;;  %v5633_v36 = vld [vmem:[%s8930_s0 + $0xbb4] ss:$212 sps:$4 sm:$0xff]   ;;  %v5636_v41 = vld [vmem:[%s8930_s0 + $0x85c] ss:$212 sps:$4 sm:$0xff]  }
   0xe   :  { %v5628_v39 = vld [vmem:[%s8930_s0 + $0xa00] ss:$212 sps:$4 sm:$0xff]   ;;  %v5637_v42 = vld [vmem:[%s8930_s0 + $0xa08] ss:$212 sps:$4 sm:$0xff]   ;;  %v5634_v43 = vld [vmem:[%s8930_s0 + $0x858] ss:$212 sps:$4 sm:$0xff]  }
   0xf   :  { %v5639_v40 = vld [vmem:[%s8930_s0 + $0xa0c] ss:$212 sps:$4 sm:$0xff]   ;;  %v5645_v44 = vld [vmem:[%s8930_s0 + $0x864] ss:$212 sps:$4 sm:$0xff]   ;;  %v5642_v45 = vld [vmem:[%s8930_s0 + $0x6b4] ss:$212 sps:$4 sm:$0xff]  }
  0x10   :  { %2590 = vmatpush1.bf16.msra.mxu0 %v5595_v14  ;;  %2633 = vmatpush1.bf16.msra.mxu1 %v5602_v18  ;;  %v5643_v46 = vld [vmem:[%s8930_s0 + $0x860] ss:$212 sps:$4 sm:$0xff]   ;;  %v5640_v47 = vld [vmem:[%s8930_s0 + $0x6b0] ss:$212 sps:$4 sm:$0xff]   ;;  %v5649_v50 = vld [vmem:[%s8930_s0 + $0x6b8] ss:$212 sps:$4 sm:$0xff]  }
  0x11   :  { %2591 = vmatprep.subr.bf16.mxu0 %v5597_v16  ;;  %2634 = vmatprep.subr.bf16.mxu1 %v5605_v19  ;;  %v5651_v48 = vld [vmem:[%s8930_s0 + $0x6bc] ss:$212 sps:$4 sm:$0xff]   ;;  %v5648_v49 = vld [vmem:[%s8930_s0 + $0x50c] ss:$212 sps:$4 sm:$0xff]   ;;  %v5657_v52 = vld [vmem:[%s8930_s0 + $0x514] ss:$212 sps:$4 sm:$0xff]  }
  0x12   :  { %v5646_v51 = vld [vmem:[%s8930_s0 + $0x508] ss:$212 sps:$4 sm:$0xff]   ;;  %v5654_v53 = vld [vmem:[%s8930_s0 + $0x364] ss:$212 sps:$4 sm:$0xff]   ;;  %v5652_v55 = vld [vmem:[%s8930_s0 + $0x360] ss:$212 sps:$4 sm:$0xff]  }
  0x13   :  { %v5655_v54 = vld [vmem:[%s8930_s0 + $0x510] ss:$212 sps:$4 sm:$0xff]   ;;  %v5663_v56 = vld [vmem:[%s8930_s0 + $0x36c] ss:$212 sps:$4 sm:$0xff]   ;;  %v5661_v58 = vld [vmem:[%s8930_s0 + $0x368] ss:$212 sps:$4 sm:$0xff]  }
  0x14   :  { %2592 = vmatpush1.bf16.msra.mxu0 %v5601_v17  ;;  %2635 = vmatpush1.bf16.msra.mxu1 %v5608_v21  ;;  %v5660_v57 = vld [vmem:[%s8930_s0 + $0x1bc] ss:$212 sps:$4 sm:$0xff]   ;;  %v5658_v59 = vld [vmem:[%s8930_s0 + $0x1b8] ss:$212 sps:$4 sm:$0xff]   ;;  %v5666_v61 = vld [vmem:[%s8930_s0 + $0x14] ss:$212 sps:$4 sm:$0xff]  }
  0x15   :  { %2593 = vmatprep.subr.bf16.mxu0 %v5603_v20  ;;  %2636 = vmatprep.subr.bf16.mxu1 %v5611_v23  ;;  %v5669_v60 = vld [vmem:[%s8930_s0 + $0x1c4] ss:$212 sps:$4 sm:$0xff]   ;;  %v5667_v62 = vld [vmem:[%s8930_s0 + $0x1c0] ss:$212 sps:$4 sm:$0xff]   ;;  %v5672_v0 = vld [vmem:[%s8930_s0 + $0x1c] ss:$212 sps:$4 sm:$0xff]  }
  0x16   :  { %v5664_v63 = vld [vmem:[%s8930_s0 + $0x10] ss:$212 sps:$4 sm:$0xff]   ;;  %v5670_v3 = vld [vmem:[%s8930_s0 + $0x18] ss:$212 sps:$4 sm:$0xff]   ;;  %v5678_v6 = vld [vmem:[%s8930_s0 + $0xa14] ss:$212 sps:$4 sm:$0xff]  }
  0x17   :  { %v5675_v2 = vld [vmem:[%s8930_s0 + $0xbbc] ss:$212 sps:$4 sm:$0xff]   ;;  %v5673_v4 = vld [vmem:[%s8930_s0 + $0xbb8] ss:$212 sps:$4 sm:$0xff]   ;;  %v5679_v7 = vld [vmem:[%s8930_s0 + $0xbc0] ss:$212 sps:$4 sm:$0xff]  }
  0x18   :  { %2594 = vmatpush1.bf16.msra.mxu0 %v5607_v22  ;;  %2637 = vmatpush1.bf16.msra.mxu1 %v5614_v25  ;;  %v5681_v5 = vld [vmem:[%s8930_s0 + $0xbc4] ss:$212 sps:$4 sm:$0xff]   ;;  %v5687_v9 = vld [vmem:[%s8930_s0 + $0xa1c] ss:$212 sps:$4 sm:$0xff]   ;;  %v5684_v10 = vld [vmem:[%s8930_s0 + $0x86c] ss:$212 sps:$4 sm:$0xff]  }
  0x19   :  { %2595 = vmatprep.subr.bf16.mxu0 %v5609_v24  ;;  %2638 = vmatprep.subr.bf16.mxu1 %v5617_v27  ;;  %v5676_v8 = vld [vmem:[%s8930_s0 + $0xa10] ss:$212 sps:$4 sm:$0xff]   ;;  %v5685_v11 = vld [vmem:[%s8930_s0 + $0xa18] ss:$212 sps:$4 sm:$0xff]   ;;  %v5682_v12 = vld [vmem:[%s8930_s0 + $0x868] ss:$212 sps:$4 sm:$0xff]  }
  0x1a   :  { %v5693_v13 = vld [vmem:[%s8930_s0 + $0x874] ss:$212 sps:$4 sm:$0xff]   ;;  %v5690_v14 = vld [vmem:[%s8930_s0 + $0x6c4] ss:$212 sps:$4 sm:$0xff]   ;;  %v5699_v17 = vld [vmem:[%s8930_s0 + $0x6cc] ss:$212 sps:$4 sm:$0xff]  }
  0x1b   :  { %v5691_v15 = vld [vmem:[%s8930_s0 + $0x870] ss:$212 sps:$4 sm:$0xff]   ;;  %v5688_v16 = vld [vmem:[%s8930_s0 + $0x6c0] ss:$212 sps:$4 sm:$0xff]   ;;  %v5697_v19 = vld [vmem:[%s8930_s0 + $0x6c8] ss:$212 sps:$4 sm:$0xff]  }
  0x1c   :  { %2596 = vmatpush1.bf16.msra.mxu0 %v5613_v26  ;;  %2639 = vmatpush1.bf16.msra.mxu1 %v5620_v29  ;;  %v5696_v18 = vld [vmem:[%s8930_s0 + $0x51c] ss:$212 sps:$4 sm:$0xff]   ;;  %v5694_v20 = vld [vmem:[%s8930_s0 + $0x518] ss:$212 sps:$4 sm:$0xff]   ;;  %v5702_v22 = vld [vmem:[%s8930_s0 + $0x374] ss:$212 sps:$4 sm:$0xff]  }
  0x1d   :  { %2597 = vmatprep.subr.bf16.mxu0 %v5615_v28  ;;  %2640 = vmatprep.subr.bf16.mxu1 %v5622_v31  ;;  %v5705_v21 = vld [vmem:[%s8930_s0 + $0x524] ss:$212 sps:$4 sm:$0xff]   ;;  %v5703_v23 = vld [vmem:[%s8930_s0 + $0x520] ss:$212 sps:$4 sm:$0xff]   ;;  %v5711_v25 = vld [vmem:[%s8930_s0 + $0x37c] ss:$212 sps:$4 sm:$0xff]  }
  0x1e   :  { %v5700_v24 = vld [vmem:[%s8930_s0 + $0x370] ss:$212 sps:$4 sm:$0xff]   ;;  %v5708_v26 = vld [vmem:[%s8930_s0 + $0x1cc] ss:$212 sps:$4 sm:$0xff]   ;;  %v5706_v28 = vld [vmem:[%s8930_s0 + $0x1c8] ss:$212 sps:$4 sm:$0xff]  }
  0x1f   :  { %v5709_v27 = vld [vmem:[%s8930_s0 + $0x378] ss:$212 sps:$4 sm:$0xff]   ;;  %v5717_v29 = vld [vmem:[%s8930_s0 + $0x1d4] ss:$212 sps:$4 sm:$0xff]   ;;  %v5715_v31 = vld [vmem:[%s8930_s0 + $0x1d0] ss:$212 sps:$4 sm:$0xff]  }
  0x20   :  { %2598 = vmatpush1.bf16.msra.mxu0 %v5619_v30  ;;  %2641 = vmatpush1.bf16.msra.mxu1 %v5627_v34  ;;  %v5714_v30 = vld [vmem:[%s8930_s0 + $0x24] ss:$212 sps:$4 sm:$0xff]   ;;  %v5720_v34 = vld [vmem:[%s8930_s0 + $0x2c] ss:$212 sps:$4 sm:$0xff]  }
  0x21   :  { %2669 = vmatprep.subr.bf16.mxu0 %v5626_v32  ;;  %2712 = vmatprep.subr.bf16.mxu1 %v5633_v36  ;;  %v5712_v32 = vld [vmem:[%s8930_s0 + $0x20] ss:$212 sps:$4 sm:$0xff]   ;;  %v5718_v36 = vld [vmem:[%s8930_s0 + $0x28] ss:$212 sps:$4 sm:$0xff]  }
  0x23   :  { %2616 = vmatmul.mubr.bf16.vlgmr.msra.gmra.mxu0 %v6342_v33  ;;  %2659 = vmatmul.mubr.bf16.vlgmr.msra.gmra.mxu1 %v6342_v33 }
  0x24   :  { %2670 = vmatpush1.bf16.msra.mxu0 %v5624_v35  ;;  %2701 = vmatprep.mubr.bf16.mxu0 %v6215_v1  ;;  %v5723_v35 = vld [vmem:[%s8930_s0 + $0xbcc] ss:$212 sps:$4 sm:$0xff]  }
  0x25   :  { %2671 = vmatprep.subr.bf16.mxu0 %v5630_v37  ;;  %2713 = vmatpush1.bf16.msra.mxu1 %v5631_v38  ;;  %v5721_v37 = vld [vmem:[%s8930_s0 + $0xbc8] ss:$212 sps:$4 sm:$0xff]  }
  0x26   :  { %2744 = vmatprep.mubr.bf16.mxu1 %v6215_v1  ;;  %2714 = vmatprep.subr.bf16.mxu1 %v5639_v40  ;;  %v5729_v38 = vld [vmem:[%s8930_s0 + $0xbd4] ss:$212 sps:$4 sm:$0xff]   ;;  %v5727_v40 = vld [vmem:[%s8930_s0 + $0xbd0] ss:$212 sps:$4 sm:$0xff]  }
  0x28   :  { %2672 = vmatpush1.bf16.msra.mxu0 %v5628_v39  ;;  %v5726_v39 = vld [vmem:[%s8930_s0 + $0xa24] ss:$212 sps:$4 sm:$0xff]  }
  0x29   :  { %2673 = vmatprep.subr.bf16.mxu0 %v5636_v41  ;;  %2715 = vmatpush1.bf16.msra.mxu1 %v5637_v42  ;;  %v5724_v41 = vld [vmem:[%s8930_s0 + $0xa20] ss:$212 sps:$4 sm:$0xff]  }
  0x2a   :  { %2716 = vmatprep.subr.bf16.mxu1 %v5645_v44  ;;  %v5735_v42 = vld [vmem:[%s8930_s0 + $0xa2c] ss:$212 sps:$4 sm:$0xff]   ;;  %v5733_v44 = vld [vmem:[%s8930_s0 + $0xa28] ss:$212 sps:$4 sm:$0xff]  }
  0x2c   :  { %2674 = vmatpush1.bf16.msra.mxu0 %v5634_v43  ;;  %v5732_v43 = vld [vmem:[%s8930_s0 + $0x87c] ss:$212 sps:$4 sm:$0xff]  }
  0x2d   :  { %2675 = vmatprep.subr.bf16.mxu0 %v5642_v45  ;;  %2717 = vmatpush1.bf16.msra.mxu1 %v5643_v46  ;;  %v5730_v45 = vld [vmem:[%s8930_s0 + $0x878] ss:$212 sps:$4 sm:$0xff]  }
  0x2e   :  { %2718 = vmatprep.subr.bf16.mxu1 %v5651_v48  ;;  %v5741_v46 = vld [vmem:[%s8930_s0 + $0x884] ss:$212 sps:$4 sm:$0xff]   ;;  %v5739_v48 = vld [vmem:[%s8930_s0 + $0x880] ss:$212 sps:$4 sm:$0xff]  }
  0x30   :  { %2676 = vmatpush1.bf16.msra.mxu0 %v5640_v47  ;;  %v5738_v47 = vld [vmem:[%s8930_s0 + $0x6d4] ss:$212 sps:$4 sm:$0xff]  }
  0x31   :  { %2677 = vmatprep.subr.bf16.mxu0 %v5648_v49  ;;  %2719 = vmatpush1.bf16.msra.mxu1 %v5649_v50  ;;  %v5736_v49 = vld [vmem:[%s8930_s0 + $0x6d0] ss:$212 sps:$4 sm:$0xff]  }
  0x32   :  { %2720 = vmatprep.subr.bf16.mxu1 %v5657_v52  ;;  %v5747_v50 = vld [vmem:[%s8930_s0 + $0x6dc] ss:$212 sps:$4 sm:$0xff]   ;;  %v5745_v52 = vld [vmem:[%s8930_s0 + $0x6d8] ss:$212 sps:$4 sm:$0xff]  }
  0x34   :  { %2678 = vmatpush1.bf16.msra.mxu0 %v5646_v51  ;;  %v5744_v51 = vld [vmem:[%s8930_s0 + $0x52c] ss:$212 sps:$4 sm:$0xff]  }
  0x35   :  { %2679 = vmatprep.subr.bf16.mxu0 %v5654_v53  ;;  %2721 = vmatpush1.bf16.msra.mxu1 %v5655_v54  ;;  %v5742_v53 = vld [vmem:[%s8930_s0 + $0x528] ss:$212 sps:$4 sm:$0xff]  }
  0x36   :  { %2722 = vmatprep.subr.bf16.mxu1 %v5663_v56  ;;  %v5753_v54 = vld [vmem:[%s8930_s0 + $0x534] ss:$212 sps:$4 sm:$0xff]   ;;  %v5751_v56 = vld [vmem:[%s8930_s0 + $0x530] ss:$212 sps:$4 sm:$0xff]  }
  0x38   :  { %2680 = vmatpush1.bf16.msra.mxu0 %v5652_v55  ;;  %v5750_v55 = vld [vmem:[%s8930_s0 + $0x384] ss:$212 sps:$4 sm:$0xff]  }
  0x39   :  { %2681 = vmatprep.subr.bf16.mxu0 %v5660_v57  ;;  %2723 = vmatpush1.bf16.msra.mxu1 %v5661_v58  ;;  %v5748_v57 = vld [vmem:[%s8930_s0 + $0x380] ss:$212 sps:$4 sm:$0xff]  }
  0x3a   :  { %2724 = vmatprep.subr.bf16.mxu1 %v5669_v60  ;;  %v5759_v58 = vld [vmem:[%s8930_s0 + $0x38c] ss:$212 sps:$4 sm:$0xff]   ;;  %v5757_v60 = vld [vmem:[%s8930_s0 + $0x388] ss:$212 sps:$4 sm:$0xff]  }
  0x3c   :  { %2682 = vmatpush1.bf16.msra.mxu0 %v5658_v59  ;;  %v5756_v59 = vld [vmem:[%s8930_s0 + $0x1dc] ss:$212 sps:$4 sm:$0xff]  }
  0x3d   :  { %2683 = vmatprep.subr.bf16.mxu0 %v5666_v61  ;;  %2725 = vmatpush1.bf16.msra.mxu1 %v5667_v62  ;;  %v5754_v61 = vld [vmem:[%s8930_s0 + $0x1d8] ss:$212 sps:$4 sm:$0xff]  }
  0x3e   :  { %2726 = vmatprep.subr.bf16.mxu1 %v5672_v0  ;;  %v5765_v62 = vld [vmem:[%s8930_s0 + $0x1e4] ss:$212 sps:$4 sm:$0xff]   ;;  %v5763_v0 = vld [vmem:[%s8930_s0 + $0x1e0] ss:$212 sps:$4 sm:$0xff]  }
  0x40   :  { %2684 = vmatpush1.bf16.msra.mxu0 %v5664_v63  ;;  %v5762_v63 = vld [vmem:[%s8930_s0 + $0x34] ss:$212 sps:$4 sm:$0xff]  }
  0x41   :  { %2755 = vmatprep.subr.bf16.mxu0 %v5675_v2  ;;  %2727 = vmatpush1.bf16.msra.mxu1 %v5670_v3  ;;  %v5760_v2 = vld [vmem:[%s8930_s0 + $0x30] ss:$212 sps:$4 sm:$0xff]  }
  0x42   :  { %2798 = vmatprep.subr.bf16.mxu1 %v5681_v5  ;;  %v5768_v3 = vld [vmem:[%s8930_s0 + $0x3c] ss:$212 sps:$4 sm:$0xff]   ;;  %v5766_v5 = vld [vmem:[%s8930_s0 + $0x38] ss:$212 sps:$4 sm:$0xff]  }
  0x43   :  { %2702 = vmatmul.mubr.bf16.vlgmr.msra.gmra.mxu0 %v6342_v33 }
  0x44   :  { %2756 = vmatpush1.bf16.msra.mxu0 %v5673_v4  ;;  %2787 = vmatprep.mubr.bf16.mxu0 %v6215_v1  ;;  %v5771_v4 = vld [vmem:[%s8930_s0 + $0xbdc] ss:$212 sps:$4 sm:$0xff]  }
  0x45   :  { %2757 = vmatprep.subr.bf16.mxu0 %v5678_v6  ;;  %2745 = vmatmul.mubr.bf16.vlgmr.msra.gmra.mxu1 %v6342_v33  ;;  %v5769_v6 = vld [vmem:[%s8930_s0 + $0xbd8] ss:$212 sps:$4 sm:$0xff]  }
  0x46   :  { %2799 = vmatpush1.bf16.msra.mxu1 %v5679_v7  ;;  %2830 = vmatprep.mubr.bf16.mxu1 %v6215_v1  ;;  %v5777_v7 = vld [vmem:[%s8930_s0 + $0xbe4] ss:$212 sps:$4 sm:$0xff]  }
  0x47   :  { %2800 = vmatprep.subr.bf16.mxu1 %v5687_v9  ;;  %v5775_v9 = vld [vmem:[%s8930_s0 + $0xbe0] ss:$212 sps:$4 sm:$0xff]  }
  0x48   :  { %2758 = vmatpush1.bf16.msra.mxu0 %v5676_v8  ;;  %v5774_v8 = vld [vmem:[%s8930_s0 + $0xa34] ss:$212 sps:$4 sm:$0xff]  }
  0x49   :  { %2759 = vmatprep.subr.bf16.mxu0 %v5684_v10  ;;  %v5772_v10 = vld [vmem:[%s8930_s0 + $0xa30] ss:$212 sps:$4 sm:$0xff]  }
  0x4a   :  { %2801 = vmatpush1.bf16.msra.mxu1 %v5685_v11  ;;  %v5783_v11 = vld [vmem:[%s8930_s0 + $0xa3c] ss:$212 sps:$4 sm:$0xff]  }
  0x4b   :  { %2802 = vmatprep.subr.bf16.mxu1 %v5693_v13  ;;  %v5781_v13 = vld [vmem:[%s8930_s0 + $0xa38] ss:$212 sps:$4 sm:$0xff]  }
  0x4c   :  { %2760 = vmatpush1.bf16.msra.mxu0 %v5682_v12  ;;  %v5780_v12 = vld [vmem:[%s8930_s0 + $0x88c] ss:$212 sps:$4 sm:$0xff]  }
  0x4d   :  { %2761 = vmatprep.subr.bf16.mxu0 %v5690_v14  ;;  %v5778_v14 = vld [vmem:[%s8930_s0 + $0x888] ss:$212 sps:$4 sm:$0xff]  }
  0x4e   :  { %2803 = vmatpush1.bf16.msra.mxu1 %v5691_v15  ;;  %v5789_v15 = vld [vmem:[%s8930_s0 + $0x894] ss:$212 sps:$4 sm:$0xff]  }
  0x4f   :  { %2804 = vmatprep.subr.bf16.mxu1 %v5699_v17  ;;  %v5787_v17 = vld [vmem:[%s8930_s0 + $0x890] ss:$212 sps:$4 sm:$0xff]  }
  0x50   :  { %2762 = vmatpush1.bf16.msra.mxu0 %v5688_v16  ;;  %v5786_v16 = vld [vmem:[%s8930_s0 + $0x6e4] ss:$212 sps:$4 sm:$0xff]  }
  0x51   :  { %2763 = vmatprep.subr.bf16.mxu0 %v5696_v18  ;;  %v5784_v18 = vld [vmem:[%s8930_s0 + $0x6e0] ss:$212 sps:$4 sm:$0xff]  }
  0x52   :  { %2805 = vmatpush1.bf16.msra.mxu1 %v5697_v19  ;;  %v5795_v19 = vld [vmem:[%s8930_s0 + $0x6ec] ss:$212 sps:$4 sm:$0xff]  }
  0x53   :  { %2806 = vmatprep.subr.bf16.mxu1 %v5705_v21  ;;  %v5793_v21 = vld [vmem:[%s8930_s0 + $0x6e8] ss:$212 sps:$4 sm:$0xff]  }
  0x54   :  { %2764 = vmatpush1.bf16.msra.mxu0 %v5694_v20  ;;  %v5792_v20 = vld [vmem:[%s8930_s0 + $0x53c] ss:$212 sps:$4 sm:$0xff]  }
  0x55   :  { %2765 = vmatprep.subr.bf16.mxu0 %v5702_v22  ;;  %v5790_v22 = vld [vmem:[%s8930_s0 + $0x538] ss:$212 sps:$4 sm:$0xff]  }
  0x56   :  { %2807 = vmatpush1.bf16.msra.mxu1 %v5703_v23  ;;  %v5801_v23 = vld [vmem:[%s8930_s0 + $0x544] ss:$212 sps:$4 sm:$0xff]  }
  0x57   :  { %2808 = vmatprep.subr.bf16.mxu1 %v5711_v25  ;;  %v5799_v25 = vld [vmem:[%s8930_s0 + $0x540] ss:$212 sps:$4 sm:$0xff]  }
  0x58   :  { %2766 = vmatpush1.bf16.msra.mxu0 %v5700_v24  ;;  %v5798_v24 = vld [vmem:[%s8930_s0 + $0x394] ss:$212 sps:$4 sm:$0xff]  }
  0x59   :  { %2767 = vmatprep.subr.bf16.mxu0 %v5708_v26  ;;  %v5796_v26 = vld [vmem:[%s8930_s0 + $0x390] ss:$212 sps:$4 sm:$0xff]  }
  0x5a   :  { %2809 = vmatpush1.bf16.msra.mxu1 %v5709_v27  ;;  %v5807_v27 = vld [vmem:[%s8930_s0 + $0x39c] ss:$212 sps:$4 sm:$0xff]  }
  0x5b   :  { %2810 = vmatprep.subr.bf16.mxu1 %v5717_v29  ;;  %v5805_v29 = vld [vmem:[%s8930_s0 + $0x398] ss:$212 sps:$4 sm:$0xff]  }
  0x5c   :  { %2768 = vmatpush1.bf16.msra.mxu0 %v5706_v28  ;;  %v5804_v28 = vld [vmem:[%s8930_s0 + $0x1ec] ss:$212 sps:$4 sm:$0xff]  }
  0x5d   :  { %2769 = vmatprep.subr.bf16.mxu0 %v5714_v30  ;;  %v5802_v30 = vld [vmem:[%s8930_s0 + $0x1e8] ss:$212 sps:$4 sm:$0xff]  }
  0x5e   :  { %2811 = vmatpush1.bf16.msra.mxu1 %v5715_v31  ;;  %v5813_v31 = vld [vmem:[%s8930_s0 + $0x1f4] ss:$212 sps:$4 sm:$0xff]  }
  0x5f   :  { %2812 = vmatprep.subr.bf16.mxu1 %v5720_v34  ;;  %v5811_v34 = vld [vmem:[%s8930_s0 + $0x1f0] ss:$212 sps:$4 sm:$0xff]  }
  0x60   :  { %2770 = vmatpush1.bf16.msra.mxu0 %v5712_v32  ;;  %v5810_v32 = vld [vmem:[%s8930_s0 + $0x44] ss:$212 sps:$4 sm:$0xff]  }
  0x61   :  { %2841 = vmatprep.subr.bf16.mxu0 %v5723_v35  ;;  %v5808_v35 = vld [vmem:[%s8930_s0 + $0x40] ss:$212 sps:$4 sm:$0xff]  }
  0x62   :  { %2813 = vmatpush1.bf16.msra.mxu1 %v5718_v36  ;;  %v5816_v36 = vld [vmem:[%s8930_s0 + $0x4c] ss:$212 sps:$4 sm:$0xff]  }
  0x63   :  { %2788 = vmatmul.mubr.bf16.vlgmr.msra.gmra.mxu0 %v6342_v33  ;;  %2884 = vmatprep.subr.bf16.mxu1 %v5729_v38  ;;  %v5814_v38 = vld [vmem:[%s8930_s0 + $0x48] ss:$212 sps:$4 sm:$0xff]  }
  0x64   :  { %2842 = vmatpush1.bf16.msra.mxu0 %v5721_v37  ;;  %2873 = vmatprep.mubr.bf16.mxu0 %v6215_v1  ;;  %v5819_v37 = vld [vmem:[%s8930_s0 + $0xbec] ss:$212 sps:$4 sm:$0xff]  }
  0x65   :  { %2843 = vmatprep.subr.bf16.mxu0 %v5726_v39  ;;  %2831 = vmatmul.mubr.bf16.vlgmr.msra.gmra.mxu1 %v6342_v33  ;;  %v5817_v39 = vld [vmem:[%s8930_s0 + $0xbe8] ss:$212 sps:$4 sm:$0xff]  }
  0x66   :  { %2885 = vmatpush1.bf16.msra.mxu1 %v5727_v40  ;;  %2916 = vmatprep.mubr.bf16.mxu1 %v6215_v1  ;;  %v5825_v40 = vld [vmem:[%s8930_s0 + $0xbf4] ss:$212 sps:$4 sm:$0xff]  }
  0x67   :  { %2886 = vmatprep.subr.bf16.mxu1 %v5735_v42  ;;  %v5823_v42 = vld [vmem:[%s8930_s0 + $0xbf0] ss:$212 sps:$4 sm:$0xff]  }
  0x68   :  { %2844 = vmatpush1.bf16.msra.mxu0 %v5724_v41  ;;  %v5822_v41 = vld [vmem:[%s8930_s0 + $0xa44] ss:$212 sps:$4 sm:$0xff]  }
  0x69   :  { %2845 = vmatprep.subr.bf16.mxu0 %v5732_v43  ;;  %v5820_v43 = vld [vmem:[%s8930_s0 + $0xa40] ss:$212 sps:$4 sm:$0xff]  }
  0x6a   :  { %2887 = vmatpush1.bf16.msra.mxu1 %v5733_v44  ;;  %v5831_v44 = vld [vmem:[%s8930_s0 + $0xa4c] ss:$212 sps:$4 sm:$0xff]  }
  0x6b   :  { %2888 = vmatprep.subr.bf16.mxu1 %v5741_v46  ;;  %v5829_v46 = vld [vmem:[%s8930_s0 + $0xa48] ss:$212 sps:$4 sm:$0xff]  }
  0x6c   :  { %2846 = vmatpush1.bf16.msra.mxu0 %v5730_v45  ;;  %v5828_v45 = vld [vmem:[%s8930_s0 + $0x89c] ss:$212 sps:$4 sm:$0xff]  }
  0x6d   :  { %2847 = vmatprep.subr.bf16.mxu0 %v5738_v47  ;;  %v5826_v47 = vld [vmem:[%s8930_s0 + $0x898] ss:$212 sps:$4 sm:$0xff]  }
  0x6e   :  { %2889 = vmatpush1.bf16.msra.mxu1 %v5739_v48  ;;  %v5837_v48 = vld [vmem:[%s8930_s0 + $0x8a4] ss:$212 sps:$4 sm:$0xff]  }
  0x6f   :  { %2890 = vmatprep.subr.bf16.mxu1 %v5747_v50  ;;  %v5832_v50 = vld [vmem:[%s8930_s0 + $0x6f0] ss:$212 sps:$4 sm:$0xff]  }
  0x70   :  { %2848 = vmatpush1.bf16.msra.mxu0 %v5736_v49  ;;  %v5835_v49 = vld [vmem:[%s8930_s0 + $0x8a0] ss:$212 sps:$4 sm:$0xff]  }
  0x71   :  { %2849 = vmatprep.subr.bf16.mxu0 %v5744_v51  ;;  %v5843_v51 = vld [vmem:[%s8930_s0 + $0x6fc] ss:$212 sps:$4 sm:$0xff]  }
  0x72   :  { %2891 = vmatpush1.bf16.msra.mxu1 %v5745_v52  ;;  %v5840_v52 = vld [vmem:[%s8930_s0 + $0x54c] ss:$212 sps:$4 sm:$0xff]  }
  0x73   :  { %2892 = vmatprep.subr.bf16.mxu1 %v5753_v54  ;;  %v5838_v54 = vld [vmem:[%s8930_s0 + $0x548] ss:$212 sps:$4 sm:$0xff]  }
  0x74   :  { %2850 = vmatpush1.bf16.msra.mxu0 %v5742_v53  ;;  %v5841_v53 = vld [vmem:[%s8930_s0 + $0x6f8] ss:$212 sps:$4 sm:$0xff]  }
  0x75   :  { %2851 = vmatprep.subr.bf16.mxu0 %v5750_v55  ;;  %v5849_v55 = vld [vmem:[%s8930_s0 + $0x554] ss:$212 sps:$4 sm:$0xff]  }
  0x76   :  { %2893 = vmatpush1.bf16.msra.mxu1 %v5751_v56  ;;  %v5846_v56 = vld [vmem:[%s8930_s0 + $0x3a4] ss:$212 sps:$4 sm:$0xff]  }
  0x77   :  { %2894 = vmatprep.subr.bf16.mxu1 %v5759_v58  ;;  %v5844_v58 = vld [vmem:[%s8930_s0 + $0x3a0] ss:$212 sps:$4 sm:$0xff]  }
  0x78   :  { %2852 = vmatpush1.bf16.msra.mxu0 %v5748_v57  ;;  %v5847_v57 = vld [vmem:[%s8930_s0 + $0x550] ss:$212 sps:$4 sm:$0xff]  }
  0x79   :  { %2853 = vmatprep.subr.bf16.mxu0 %v5756_v59  ;;  %v5855_v59 = vld [vmem:[%s8930_s0 + $0x3ac] ss:$212 sps:$4 sm:$0xff]  }
  0x7a   :  { %2895 = vmatpush1.bf16.msra.mxu1 %v5757_v60  ;;  %v5852_v60 = vld [vmem:[%s8930_s0 + $0x1fc] ss:$212 sps:$4 sm:$0xff]  }
  0x7b   :  { %2896 = vmatprep.subr.bf16.mxu1 %v5765_v62  ;;  %v5850_v62 = vld [vmem:[%s8930_s0 + $0x1f8] ss:$212 sps:$4 sm:$0xff]  }
  0x7c   :  { %2854 = vmatpush1.bf16.msra.mxu0 %v5754_v61  ;;  %v5853_v61 = vld [vmem:[%s8930_s0 + $0x3a8] ss:$212 sps:$4 sm:$0xff]  }
  0x7d   :  { %2855 = vmatprep.subr.bf16.mxu0 %v5762_v63  ;;  %v5861_v63 = vld [vmem:[%s8930_s0 + $0x204] ss:$212 sps:$4 sm:$0xff]  }
  0x7e   :  { %2897 = vmatpush1.bf16.msra.mxu1 %v5763_v0  ;;  %v5858_v0 = vld [vmem:[%s8930_s0 + $0x54] ss:$212 sps:$4 sm:$0xff]  }
  0x7f   :  { %2898 = vmatprep.subr.bf16.mxu1 %v5768_v3  ;;  %v5856_v3 = vld [vmem:[%s8930_s0 + $0x50] ss:$212 sps:$4 sm:$0xff]  }
  0x80   :  { %2856 = vmatpush1.bf16.msra.mxu0 %v5760_v2  ;;  %v5859_v2 = vld [vmem:[%s8930_s0 + $0x200] ss:$212 sps:$4 sm:$0xff]  }
  0x81   :  { %2927 = vmatprep.subr.bf16.mxu0 %v5771_v4  ;;  %v5864_v4 = vld [vmem:[%s8930_s0 + $0x5c] ss:$212 sps:$4 sm:$0xff]  }
  0x82   :  { %2899 = vmatpush1.bf16.msra.mxu1 %v5766_v5  ;;  %v5867_v5 = vld [vmem:[%s8930_s0 + $0xbfc] ss:$212 sps:$4 sm:$0xff]  }
  0x83   :  { %2874 = vmatmul.mubr.bf16.vlgmr.msra.gmra.mxu0 %v6342_v33  ;;  %2970 = vmatprep.subr.bf16.mxu1 %v5777_v7  ;;  %v5865_v7 = vld [vmem:[%s8930_s0 + $0xbf8] ss:$212 sps:$4 sm:$0xff]  }
  0x84   :  { %2928 = vmatpush1.bf16.msra.mxu0 %v5769_v6  ;;  %2959 = vmatprep.mubr.bf16.mxu0 %v6215_v1  ;;  %v5862_v6 = vld [vmem:[%s8930_s0 + $0x58] ss:$212 sps:$4 sm:$0xff]  }
  0x85   :  { %2929 = vmatprep.subr.bf16.mxu0 %v5774_v8  ;;  %2917 = vmatmul.mubr.bf16.vlgmr.msra.gmra.mxu1 %v6342_v33  ;;  %v5873_v8 = vld [vmem:[%s8930_s0 + $0xc04] ss:$212 sps:$4 sm:$0xff]  }
  0x86   :  { %2971 = vmatpush1.bf16.msra.mxu1 %v5775_v9  ;;  %3002 = vmatprep.mubr.bf16.mxu1 %v6215_v1  ;;  %v5870_v9 = vld [vmem:[%s8930_s0 + $0xa54] ss:$212 sps:$4 sm:$0xff]  }
  0x87   :  { %2972 = vmatprep.subr.bf16.mxu1 %v5783_v11  ;;  %v5871_v11 = vld [vmem:[%s8930_s0 + $0xc00] ss:$212 sps:$4 sm:$0xff]  }
  0x88   :  { %2930 = vmatpush1.bf16.msra.mxu0 %v5772_v10  ;;  %v6859_v10 = vld [vmem:[%s8931_s1] sm:$0xff]  }
  0x89   :  { %2931 = vmatprep.subr.bf16.mxu0 %v5780_v12  ;;  %v5868_v12 = vld [vmem:[%s8930_s0 + $0xa50] ss:$212 sps:$4 sm:$0xff]  }
  0x8a   :  { %2973 = vmatpush1.bf16.msra.mxu1 %v5781_v13  ;;  %v5879_v13 = vld [vmem:[%s8930_s0 + $0xa5c] ss:$212 sps:$4 sm:$0xff]  }
  0x8b   :  { %2974 = vmatprep.subr.bf16.mxu1 %v5789_v15  ;;  %v5877_v15 = vld [vmem:[%s8930_s0 + $0xa58] ss:$212 sps:$4 sm:$0xff]  }
  0x8c   :  { %2932 = vmatpush1.bf16.msra.mxu0 %v5778_v14  ;;  %v5876_v14 = vld [vmem:[%s8930_s0 + $0x8ac] ss:$212 sps:$4 sm:$0xff]  }
  0x8d   :  { %2933 = vmatprep.subr.bf16.mxu0 %v5786_v16  ;;  %v5874_v16 = vld [vmem:[%s8930_s0 + $0x8a8] ss:$212 sps:$4 sm:$0xff]  }
  0x8e   :  { %2975 = vmatpush1.bf16.msra.mxu1 %v5787_v17  ;;  %v5885_v17 = vld [vmem:[%s8930_s0 + $0x8b4] ss:$212 sps:$4 sm:$0xff]  }
  0x8f   :  { %2976 = vmatprep.subr.bf16.mxu1 %v5795_v19  ;;  %v5883_v19 = vld [vmem:[%s8930_s0 + $0x8b0] ss:$212 sps:$4 sm:$0xff]  }
  0x90   :  { %2934 = vmatpush1.bf16.msra.mxu0 %v5784_v18  ;;  %v5882_v18 = vld [vmem:[%s8930_s0 + $0x704] ss:$212 sps:$4 sm:$0xff]  }
  0x91   :  { %2935 = vmatprep.subr.bf16.mxu0 %v5792_v20  ;;  %v5880_v20 = vld [vmem:[%s8930_s0 + $0x700] ss:$212 sps:$4 sm:$0xff]  }
  0x92   :  { %2977 = vmatpush1.bf16.msra.mxu1 %v5793_v21  ;;  %v5891_v21 = vld [vmem:[%s8930_s0 + $0x70c] ss:$212 sps:$4 sm:$0xff]  }
  0x93   :  { %2978 = vmatprep.subr.bf16.mxu1 %v5801_v23  ;;  %v5889_v23 = vld [vmem:[%s8930_s0 + $0x708] ss:$212 sps:$4 sm:$0xff]  }
  0x94   :  { %2936 = vmatpush1.bf16.msra.mxu0 %v5790_v22  ;;  %v5888_v22 = vld [vmem:[%s8930_s0 + $0x55c] ss:$212 sps:$4 sm:$0xff]  }
  0x95   :  { %2937 = vmatprep.subr.bf16.mxu0 %v5798_v24  ;;  %v5886_v24 = vld [vmem:[%s8930_s0 + $0x558] ss:$212 sps:$4 sm:$0xff]  }
  0x96   :  { %2979 = vmatpush1.bf16.msra.mxu1 %v5799_v25  ;;  %v5897_v25 = vld [vmem:[%s8930_s0 + $0x564] ss:$212 sps:$4 sm:$0xff]  }
  0x97   :  { %2980 = vmatprep.subr.bf16.mxu1 %v5807_v27  ;;  %v5895_v27 = vld [vmem:[%s8930_s0 + $0x560] ss:$212 sps:$4 sm:$0xff]  }
  0x98   :  { %2938 = vmatpush1.bf16.msra.mxu0 %v5796_v26  ;;  %v5894_v26 = vld [vmem:[%s8930_s0 + $0x3b4] ss:$212 sps:$4 sm:$0xff]  }
  0x99   :  { %2939 = vmatprep.subr.bf16.mxu0 %v5804_v28  ;;  %v5892_v28 = vld [vmem:[%s8930_s0 + $0x3b0] ss:$212 sps:$4 sm:$0xff]  }
  0x9a   :  { %2981 = vmatpush1.bf16.msra.mxu1 %v5805_v29  ;;  %v5903_v29 = vld [vmem:[%s8930_s0 + $0x3bc] ss:$212 sps:$4 sm:$0xff]  }
  0x9b   :  { %2982 = vmatprep.subr.bf16.mxu1 %v5813_v31  ;;  %v5901_v31 = vld [vmem:[%s8930_s0 + $0x3b8] ss:$212 sps:$4 sm:$0xff]  }
  0x9c   :  { %2940 = vmatpush1.bf16.msra.mxu0 %v5802_v30  ;;  %v5900_v30 = vld [vmem:[%s8930_s0 + $0x20c] ss:$212 sps:$4 sm:$0xff]  }
  0x9d   :  { %2941 = vmatprep.subr.bf16.mxu0 %v5810_v32  ;;  %v5898_v32 = vld [vmem:[%s8930_s0 + $0x208] ss:$212 sps:$4 sm:$0xff]  }
  0x9e   :  { %2983 = vmatpush1.bf16.msra.mxu1 %v5811_v34  ;;  %v5909_v34 = vld [vmem:[%s8930_s0 + $0x214] ss:$212 sps:$4 sm:$0xff]  }
  0x9f   :  { %2984 = vmatprep.subr.bf16.mxu1 %v5816_v36  ;;  %v5907_v36 = vld [vmem:[%s8930_s0 + $0x210] ss:$212 sps:$4 sm:$0xff]  }
  0xa0   :  { %2942 = vmatpush1.bf16.msra.mxu0 %v5808_v35  ;;  %v5906_v35 = vld [vmem:[%s8930_s0 + $0x64] ss:$212 sps:$4 sm:$0xff]  }
  0xa1   :  { %3013 = vmatprep.subr.bf16.mxu0 %v5819_v37  ;;  %v5904_v37 = vld [vmem:[%s8930_s0 + $0x60] ss:$212 sps:$4 sm:$0xff]  }
  0xa2   :  { %2985 = vmatpush1.bf16.msra.mxu1 %v5814_v38  ;;  %v5912_v38 = vld [vmem:[%s8930_s0 + $0x6c] ss:$212 sps:$4 sm:$0xff]  }
  0xa3   :  { %2960 = vmatmul.mubr.bf16.vlgmr.msra.gmra.mxu0 %v6342_v33  ;;  %3056 = vmatprep.subr.bf16.mxu1 %v5825_v40  ;;  %v5910_v40 = vld [vmem:[%s8930_s0 + $0x68] ss:$212 sps:$4 sm:$0xff]  }
  0xa4   :  { %3014 = vmatpush1.bf16.msra.mxu0 %v5817_v39  ;;  %3045 = vmatprep.mubr.bf16.mxu0 %v6215_v1  ;;  %v5915_v39 = vld [vmem:[%s8930_s0 + $0xc0c] ss:$212 sps:$4 sm:$0xff]  }
  0xa5   :  { %3015 = vmatprep.subr.bf16.mxu0 %v5822_v41  ;;  %3003 = vmatmul.mubr.bf16.vlgmr.msra.gmra.mxu1 %v6342_v33  ;;  %v5834_v33 = vld [vmem:[%s8930_s0 + $0x6f4] ss:$212 sps:$4 sm:$0xff]  }
  0xa6   :  { %3057 = vmatpush1.bf16.msra.mxu1 %v5823_v42  ;;  %3088 = vmatprep.mubr.bf16.mxu1 %v6215_v1  ;;  %v5913_v41 = vld [vmem:[%s8930_s0 + $0xc08] ss:$212 sps:$4 sm:$0xff]  }
  0xa7   :  { %3058 = vmatprep.subr.bf16.mxu1 %v5831_v44  ;;  %v5921_v42 = vld [vmem:[%s8930_s0 + $0xc14] ss:$212 sps:$4 sm:$0xff]   ;;  %v5919_v44 = vld [vmem:[%s8930_s0 + $0xc10] ss:$212 sps:$4 sm:$0xff]  }
  0xa8   :  { %3016 = vmatpush1.bf16.msra.mxu0 %v5820_v43  ;;  %v5918_v43 = vld [vmem:[%s8930_s0 + $0xa64] ss:$212 sps:$4 sm:$0xff]  }
  0xa9   :  { %3017 = vmatprep.subr.bf16.mxu0 %v5828_v45  ;;  %v5916_v45 = vld [vmem:[%s8930_s0 + $0xa60] ss:$212 sps:$4 sm:$0xff]  }
  0xaa   :  { %3059 = vmatpush1.bf16.msra.mxu1 %v5829_v46  ;;  %v5927_v46 = vld [vmem:[%s8930_s0 + $0xa6c] ss:$212 sps:$4 sm:$0xff]  }
  0xab   :  { %3060 = vmatprep.subr.bf16.mxu1 %v5837_v48  ;;  %v5925_v48 = vld [vmem:[%s8930_s0 + $0xa68] ss:$212 sps:$4 sm:$0xff]  }
  0xac   :  { %3018 = vmatpush1.bf16.msra.mxu0 %v5826_v47  ;;  %v5924_v47 = vld [vmem:[%s8930_s0 + $0x8bc] ss:$212 sps:$4 sm:$0xff]  }
  0xad   :  { %3019 = vmatprep.subr.bf16.mxu0 %v5834_v33  ;;  %v5922_v33 = vld [vmem:[%s8930_s0 + $0x8b8] ss:$212 sps:$4 sm:$0xff]  }
  0xae   :  { %3061 = vmatpush1.bf16.msra.mxu1 %v5835_v49  ;;  %v5933_v49 = vld [vmem:[%s8930_s0 + $0x8c4] ss:$212 sps:$4 sm:$0xff]  }
  0xaf   :  { %3062 = vmatprep.subr.bf16.mxu1 %v5843_v51  ;;  %v5931_v51 = vld [vmem:[%s8930_s0 + $0x8c0] ss:$212 sps:$4 sm:$0xff]  }
  0xb0   :  { %3020 = vmatpush1.bf16.msra.mxu0 %v5832_v50  ;;  %v5930_v50 = vld [vmem:[%s8930_s0 + $0x714] ss:$212 sps:$4 sm:$0xff]  }
  0xb1   :  { %3021 = vmatprep.subr.bf16.mxu0 %v5840_v52  ;;  %v5928_v52 = vld [vmem:[%s8930_s0 + $0x710] ss:$212 sps:$4 sm:$0xff]  }
  0xb2   :  { %3063 = vmatpush1.bf16.msra.mxu1 %v5841_v53  ;;  %v5939_v53 = vld [vmem:[%s8930_s0 + $0x71c] ss:$212 sps:$4 sm:$0xff]  }
  0xb3   :  { %3064 = vmatprep.subr.bf16.mxu1 %v5849_v55  ;;  %v5937_v55 = vld [vmem:[%s8930_s0 + $0x718] ss:$212 sps:$4 sm:$0xff]  }
  0xb4   :  { %3022 = vmatpush1.bf16.msra.mxu0 %v5838_v54  ;;  %v5936_v54 = vld [vmem:[%s8930_s0 + $0x56c] ss:$212 sps:$4 sm:$0xff]  }
  0xb5   :  { %3023 = vmatprep.subr.bf16.mxu0 %v5846_v56  ;;  %v5934_v56 = vld [vmem:[%s8930_s0 + $0x568] ss:$212 sps:$4 sm:$0xff]  }
  0xb6   :  { %3065 = vmatpush1.bf16.msra.mxu1 %v5847_v57  ;;  %v5945_v57 = vld [vmem:[%s8930_s0 + $0x574] ss:$212 sps:$4 sm:$0xff]  }
  0xb7   :  { %3066 = vmatprep.subr.bf16.mxu1 %v5855_v59  ;;  %v5943_v59 = vld [vmem:[%s8930_s0 + $0x570] ss:$212 sps:$4 sm:$0xff]  }
  0xb8   :  { %3024 = vmatpush1.bf16.msra.mxu0 %v5844_v58  ;;  %v5942_v58 = vld [vmem:[%s8930_s0 + $0x3c4] ss:$212 sps:$4 sm:$0xff]  }
  0xb9   :  { %3025 = vmatprep.subr.bf16.mxu0 %v5852_v60  ;;  %v5940_v60 = vld [vmem:[%s8930_s0 + $0x3c0] ss:$212 sps:$4 sm:$0xff]  }
  0xba   :  { %3067 = vmatpush1.bf16.msra.mxu1 %v5853_v61  ;;  %v5951_v61 = vld [vmem:[%s8930_s0 + $0x3cc] ss:$212 sps:$4 sm:$0xff]  }
  0xbb   :  { %3068 = vmatprep.subr.bf16.mxu1 %v5861_v63  ;;  %v5949_v63 = vld [vmem:[%s8930_s0 + $0x3c8] ss:$212 sps:$4 sm:$0xff]  }
  0xbc   :  { %3026 = vmatpush1.bf16.msra.mxu0 %v5850_v62  ;;  %v5948_v62 = vld [vmem:[%s8930_s0 + $0x21c] ss:$212 sps:$4 sm:$0xff]  }
  0xbd   :  { %3027 = vmatprep.subr.bf16.mxu0 %v5858_v0  ;;  %v5946_v0 = vld [vmem:[%s8930_s0 + $0x218] ss:$212 sps:$4 sm:$0xff]  }
  0xbe   :  { %3069 = vmatpush1.bf16.msra.mxu1 %v5859_v2  ;;  %v5957_v2 = vld [vmem:[%s8930_s0 + $0x224] ss:$212 sps:$4 sm:$0xff]  }
  0xbf   :  { %3070 = vmatprep.subr.bf16.mxu1 %v5864_v4  ;;  %v5955_v4 = vld [vmem:[%s8930_s0 + $0x220] ss:$212 sps:$4 sm:$0xff]  }
  0xc0   :  { %3028 = vmatpush1.bf16.msra.mxu0 %v5856_v3  ;;  %v5954_v3 = vld [vmem:[%s8930_s0 + $0x74] ss:$212 sps:$4 sm:$0xff]  }
  0xc1   :  { %3099 = vmatprep.subr.bf16.mxu0 %v5867_v5  ;;  %v5952_v5 = vld [vmem:[%s8930_s0 + $0x70] ss:$212 sps:$4 sm:$0xff]  }
  0xc2   :  { %3071 = vmatpush1.bf16.msra.mxu1 %v5862_v6  ;;  %v5960_v6 = vld [vmem:[%s8930_s0 + $0x7c] ss:$212 sps:$4 sm:$0xff]  }
  0xc3   :  { %3046 = vmatmul.mubr.bf16.vlgmr.msra.gmra.mxu0 %v6859_v10  ;;  %3142 = vmatprep.subr.bf16.mxu1 %v5873_v8  ;;  %v5958_v8 = vld [vmem:[%s8930_s0 + $0x78] ss:$212 sps:$4 sm:$0xff]  }
  0xc4   :  { %3100 = vmatpush1.bf16.msra.mxu0 %v5865_v7  ;;  %3131 = vmatprep.mubr.bf16.mxu0 %v6215_v1  ;;  %v5963_v7 = vld [vmem:[%s8930_s0 + $0xc1c] ss:$212 sps:$4 sm:$0xff]  }
  0xc5   :  { %3101 = vmatprep.subr.bf16.mxu0 %v5870_v9  ;;  %3089 = vmatmul.mubr.bf16.vlgmr.msra.gmra.mxu1 %v6859_v10  ;;  %v5961_v9 = vld [vmem:[%s8930_s0 + $0xc18] ss:$212 sps:$4 sm:$0xff]  }
  0xc6   :  { %3143 = vmatpush1.bf16.msra.mxu1 %v5871_v11  ;;  %3174 = vmatprep.mubr.bf16.mxu1 %v6215_v1  ;;  %v5966_v11 = vld [vmem:[%s8930_s0 + $0xa74] ss:$212 sps:$4 sm:$0xff]  }
  0xc7   :  { %3144 = vmatprep.subr.bf16.mxu1 %v5879_v13  ;;  %v5964_v13 = vld [vmem:[%s8930_s0 + $0xa70] ss:$212 sps:$4 sm:$0xff]  }
  0xc8   :  { %3102 = vmatpush1.bf16.msra.mxu0 %v5868_v12  ;;  %v5969_v12 = vld [vmem:[%s8930_s0 + $0xc24] ss:$212 sps:$4 sm:$0xff]  }
  0xc9   :  { %3103 = vmatprep.subr.bf16.mxu0 %v5876_v14  ;;  %v5967_v14 = vld [vmem:[%s8930_s0 + $0xc20] ss:$212 sps:$4 sm:$0xff]  }
  0xca   :  { %3145 = vmatpush1.bf16.msra.mxu1 %v5877_v15  ;;  %v5972_v15 = vld [vmem:[%s8930_s0 + $0x8cc] ss:$212 sps:$4 sm:$0xff]  }
  0xcb   :  { %3146 = vmatprep.subr.bf16.mxu1 %v5885_v17  ;;  %v5970_v17 = vld [vmem:[%s8930_s0 + $0x8c8] ss:$212 sps:$4 sm:$0xff]  }
  0xcc   :  { %3104 = vmatpush1.bf16.msra.mxu0 %v5874_v16  ;;  %v5975_v16 = vld [vmem:[%s8930_s0 + $0xa7c] ss:$212 sps:$4 sm:$0xff]  }
  0xcd   :  { %3105 = vmatprep.subr.bf16.mxu0 %v5882_v18  ;;  %v5973_v18 = vld [vmem:[%s8930_s0 + $0xa78] ss:$212 sps:$4 sm:$0xff]  }
  0xce   :  { %3147 = vmatpush1.bf16.msra.mxu1 %v5883_v19  ;;  %v5978_v19 = vld [vmem:[%s8930_s0 + $0x724] ss:$212 sps:$4 sm:$0xff]  }
  0xcf   :  { %3148 = vmatprep.subr.bf16.mxu1 %v5891_v21  ;;  %v5976_v21 = vld [vmem:[%s8930_s0 + $0x720] ss:$212 sps:$4 sm:$0xff]  }
  0xd0   :  { %3106 = vmatpush1.bf16.msra.mxu0 %v5880_v20  ;;  %v5981_v20 = vld [vmem:[%s8930_s0 + $0x8d4] ss:$212 sps:$4 sm:$0xff]  }
  0xd1   :  { %3107 = vmatprep.subr.bf16.mxu0 %v5888_v22  ;;  %v5979_v22 = vld [vmem:[%s8930_s0 + $0x8d0] ss:$212 sps:$4 sm:$0xff]  }
  0xd2   :  { %3149 = vmatpush1.bf16.msra.mxu1 %v5889_v23  ;;  %v5984_v23 = vld [vmem:[%s8930_s0 + $0x57c] ss:$212 sps:$4 sm:$0xff]  }
  0xd3   :  { %3150 = vmatprep.subr.bf16.mxu1 %v5897_v25  ;;  %v5985_v25 = vld [vmem:[%s8930_s0 + $0x728] ss:$212 sps:$4 sm:$0xff]  }
  0xd4   :  { %3108 = vmatpush1.bf16.msra.mxu0 %v5886_v24  ;;  %v5987_v24 = vld [vmem:[%s8930_s0 + $0x72c] ss:$212 sps:$4 sm:$0xff]  }
  0xd5   :  { %3109 = vmatprep.subr.bf16.mxu0 %v5894_v26  ;;  %v5982_v26 = vld [vmem:[%s8930_s0 + $0x578] ss:$212 sps:$4 sm:$0xff]  }
  0xd6   :  { %3151 = vmatpush1.bf16.msra.mxu1 %v5895_v27  ;;  %v5993_v27 = vld [vmem:[%s8930_s0 + $0x584] ss:$212 sps:$4 sm:$0xff]  }
  0xd7   :  { %3152 = vmatprep.subr.bf16.mxu1 %v5903_v29  ;;  %v5991_v29 = vld [vmem:[%s8930_s0 + $0x580] ss:$212 sps:$4 sm:$0xff]  }
  0xd8   :  { %3110 = vmatpush1.bf16.msra.mxu0 %v5892_v28  ;;  %v5990_v28 = vld [vmem:[%s8930_s0 + $0x3d4] ss:$212 sps:$4 sm:$0xff]  }
  0xd9   :  { %3111 = vmatprep.subr.bf16.mxu0 %v5900_v30  ;;  %v5988_v30 = vld [vmem:[%s8930_s0 + $0x3d0] ss:$212 sps:$4 sm:$0xff]  }
  0xda   :  { %3153 = vmatpush1.bf16.msra.mxu1 %v5901_v31  ;;  %v5999_v31 = vld [vmem:[%s8930_s0 + $0x3dc] ss:$212 sps:$4 sm:$0xff]  }
  0xdb   :  { %3154 = vmatprep.subr.bf16.mxu1 %v5909_v34  ;;  %v5997_v34 = vld [vmem:[%s8930_s0 + $0x3d8] ss:$212 sps:$4 sm:$0xff]  }
  0xdc   :  { %3112 = vmatpush1.bf16.msra.mxu0 %v5898_v32  ;;  %v5996_v32 = vld [vmem:[%s8930_s0 + $0x22c] ss:$212 sps:$4 sm:$0xff]  }
  0xdd   :  { %3113 = vmatprep.subr.bf16.mxu0 %v5906_v35  ;;  %v5994_v35 = vld [vmem:[%s8930_s0 + $0x228] ss:$212 sps:$4 sm:$0xff]  }
  0xde   :  { %3155 = vmatpush1.bf16.msra.mxu1 %v5907_v36  ;;  %v6005_v36 = vld [vmem:[%s8930_s0 + $0x234] ss:$212 sps:$4 sm:$0xff]  }
  0xdf   :  { %3156 = vmatprep.subr.bf16.mxu1 %v5912_v38  ;;  %v6003_v38 = vld [vmem:[%s8930_s0 + $0x230] ss:$212 sps:$4 sm:$0xff]  }
  0xe0   :  { %3114 = vmatpush1.bf16.msra.mxu0 %v5904_v37  ;;  %v6002_v37 = vld [vmem:[%s8930_s0 + $0x84] ss:$212 sps:$4 sm:$0xff]  }
  0xe1   :  { %3185 = vmatprep.subr.bf16.mxu0 %v5915_v39  ;;  %v6000_v39 = vld [vmem:[%s8930_s0 + $0x80] ss:$212 sps:$4 sm:$0xff]  }
  0xe2   :  { %3157 = vmatpush1.bf16.msra.mxu1 %v5910_v40  ;;  %v6008_v40 = vld [vmem:[%s8930_s0 + $0x8c] ss:$212 sps:$4 sm:$0xff]  }
  0xe3   :  { %3132 = vmatmul.mubr.bf16.vlgmr.msra.gmra.mxu0 %v6859_v10  ;;  %3228 = vmatprep.subr.bf16.mxu1 %v5921_v42  ;;  %v6006_v42 = vld [vmem:[%s8930_s0 + $0x88] ss:$212 sps:$4 sm:$0xff]  }
  0xe4   :  { %3186 = vmatpush1.bf16.msra.mxu0 %v5913_v41  ;;  %3217 = vmatprep.mubr.bf16.mxu0 %v6215_v1  ;;  %v6011_v41 = vld [vmem:[%s8930_s0 + $0xc2c] ss:$212 sps:$4 sm:$0xff]  }
  0xe5   :  { %3187 = vmatprep.subr.bf16.mxu0 %v5918_v43  ;;  %3175 = vmatmul.mubr.bf16.vlgmr.msra.gmra.mxu1 %v6859_v10  ;;  %v6009_v43 = vld [vmem:[%s8930_s0 + $0xc28] ss:$212 sps:$4 sm:$0xff]  }
  0xe6   :  { %3229 = vmatpush1.bf16.msra.mxu1 %v5919_v44  ;;  %3260 = vmatprep.mubr.bf16.mxu1 %v6215_v1  ;;  %v6017_v44 = vld [vmem:[%s8930_s0 + $0xc34] ss:$212 sps:$4 sm:$0xff]  }
  0xe7   :  { %3230 = vmatprep.subr.bf16.mxu1 %v5927_v46  ;;  %v6015_v46 = vld [vmem:[%s8930_s0 + $0xc30] ss:$212 sps:$4 sm:$0xff]  }
  0xe8   :  { %3188 = vmatpush1.bf16.msra.mxu0 %v5916_v45  ;;  %v6014_v45 = vld [vmem:[%s8930_s0 + $0xa84] ss:$212 sps:$4 sm:$0xff]  }
  0xe9   :  { %3189 = vmatprep.subr.bf16.mxu0 %v5924_v47  ;;  %v6012_v47 = vld [vmem:[%s8930_s0 + $0xa80] ss:$212 sps:$4 sm:$0xff]  }
  0xea   :  { %3231 = vmatpush1.bf16.msra.mxu1 %v5925_v48  ;;  %v6020_v48 = vld [vmem:[%s8930_s0 + $0x8dc] ss:$212 sps:$4 sm:$0xff]  }
  0xeb   :  { %3232 = vmatprep.subr.bf16.mxu1 %v5933_v49  ;;  %v6021_v49 = vld [vmem:[%s8930_s0 + $0xa88] ss:$212 sps:$4 sm:$0xff]  }
  0xec   :  { %3190 = vmatpush1.bf16.msra.mxu0 %v5922_v33  ;;  %v6023_v33 = vld [vmem:[%s8930_s0 + $0xa8c] ss:$212 sps:$4 sm:$0xff]  }
  0xed   :  { %3191 = vmatprep.subr.bf16.mxu0 %v5930_v50  ;;  %v6018_v50 = vld [vmem:[%s8930_s0 + $0x8d8] ss:$212 sps:$4 sm:$0xff]  }
  0xee   :  { %3233 = vmatpush1.bf16.msra.mxu1 %v5931_v51  ;;  %v6029_v51 = vld [vmem:[%s8930_s0 + $0x8e4] ss:$212 sps:$4 sm:$0xff]  }
  0xef   :  { %3234 = vmatprep.subr.bf16.mxu1 %v5939_v53  ;;  %v6027_v53 = vld [vmem:[%s8930_s0 + $0x8e0] ss:$212 sps:$4 sm:$0xff]  }
  0xf0   :  { %3192 = vmatpush1.bf16.msra.mxu0 %v5928_v52  ;;  %v6026_v52 = vld [vmem:[%s8930_s0 + $0x734] ss:$212 sps:$4 sm:$0xff]  }
  0xf1   :  { %3193 = vmatprep.subr.bf16.mxu0 %v5936_v54  ;;  %v6024_v54 = vld [vmem:[%s8930_s0 + $0x730] ss:$212 sps:$4 sm:$0xff]  }
  0xf2   :  { %3235 = vmatpush1.bf16.msra.mxu1 %v5937_v55  ;;  %v6035_v55 = vld [vmem:[%s8930_s0 + $0x73c] ss:$212 sps:$4 sm:$0xff]  }
  0xf3   :  { %3236 = vmatprep.subr.bf16.mxu1 %v5945_v57  ;;  %v6033_v57 = vld [vmem:[%s8930_s0 + $0x738] ss:$212 sps:$4 sm:$0xff]  }
  0xf4   :  { %3194 = vmatpush1.bf16.msra.mxu0 %v5934_v56  ;;  %v6032_v56 = vld [vmem:[%s8930_s0 + $0x58c] ss:$212 sps:$4 sm:$0xff]  }
  0xf5   :  { %3195 = vmatprep.subr.bf16.mxu0 %v5942_v58  ;;  %v6030_v58 = vld [vmem:[%s8930_s0 + $0x588] ss:$212 sps:$4 sm:$0xff]  }
  0xf6   :  { %3237 = vmatpush1.bf16.msra.mxu1 %v5943_v59  ;;  %v6041_v59 = vld [vmem:[%s8930_s0 + $0x594] ss:$212 sps:$4 sm:$0xff]  }
  0xf7   :  { %3238 = vmatprep.subr.bf16.mxu1 %v5951_v61  ;;  %v6039_v61 = vld [vmem:[%s8930_s0 + $0x590] ss:$212 sps:$4 sm:$0xff]  }
  0xf8   :  { %3196 = vmatpush1.bf16.msra.mxu0 %v5940_v60  ;;  %v6038_v60 = vld [vmem:[%s8930_s0 + $0x3e4] ss:$212 sps:$4 sm:$0xff]  }
  0xf9   :  { %3197 = vmatprep.subr.bf16.mxu0 %v5948_v62  ;;  %v6036_v62 = vld [vmem:[%s8930_s0 + $0x3e0] ss:$212 sps:$4 sm:$0xff]  }
  0xfa   :  { %3239 = vmatpush1.bf16.msra.mxu1 %v5949_v63  ;;  %v6047_v63 = vld [vmem:[%s8930_s0 + $0x3ec] ss:$212 sps:$4 sm:$0xff]  }
  0xfb   :  { %3240 = vmatprep.subr.bf16.mxu1 %v5957_v2  ;;  %v6045_v2 = vld [vmem:[%s8930_s0 + $0x3e8] ss:$212 sps:$4 sm:$0xff]  }
  0xfc   :  { %3198 = vmatpush1.bf16.msra.mxu0 %v5946_v0  ;;  %v6044_v0 = vld [vmem:[%s8930_s0 + $0x23c] ss:$212 sps:$4 sm:$0xff]  }
  0xfd   :  { %3199 = vmatprep.subr.bf16.mxu0 %v5954_v3  ;;  %v6042_v3 = vld [vmem:[%s8930_s0 + $0x238] ss:$212 sps:$4 sm:$0xff]  }
  0xfe   :  { %3241 = vmatpush1.bf16.msra.mxu1 %v5955_v4  ;;  %v6053_v4 = vld [vmem:[%s8930_s0 + $0x244] ss:$212 sps:$4 sm:$0xff]  }
  0xff   :  { %3242 = vmatprep.subr.bf16.mxu1 %v5960_v6  ;;  %v6051_v6 = vld [vmem:[%s8930_s0 + $0x240] ss:$212 sps:$4 sm:$0xff]  }
 0x100   :  { %3200 = vmatpush1.bf16.msra.mxu0 %v5952_v5  ;;  %v6050_v5 = vld [vmem:[%s8930_s0 + $0x94] ss:$212 sps:$4 sm:$0xff]  }
 0x101   :  { %3271 = vmatprep.subr.bf16.mxu0 %v5963_v7  ;;  %v6048_v7 = vld [vmem:[%s8930_s0 + $0x90] ss:$212 sps:$4 sm:$0xff]  }
 0x102   :  { %3243 = vmatpush1.bf16.msra.mxu1 %v5958_v8  ;;  %v6056_v8 = vld [vmem:[%s8930_s0 + $0x9c] ss:$212 sps:$4 sm:$0xff]  }
 0x103   :  { %3218 = vmatmul.mubr.bf16.vlgmr.msra.gmra.mxu0 %v6859_v10  ;;  %3314 = vmatprep.subr.bf16.mxu1 %v5969_v12  ;;  %v6057_v12 = vld [vmem:[%s8930_s0 + $0xc38] ss:$212 sps:$4 sm:$0xff]  }
 0x104   :  { %3272 = vmatpush1.bf16.msra.mxu0 %v5961_v9  ;;  %3303 = vmatprep.mubr.bf16.mxu0 %v6215_v1  ;;  %v6059_v9 = vld [vmem:[%s8930_s0 + $0xc3c] ss:$212 sps:$4 sm:$0xff]  }
 0x105   :  { %3273 = vmatprep.subr.bf16.mxu0 %v5966_v11  ;;  %3261 = vmatmul.mubr.bf16.vlgmr.msra.gmra.mxu1 %v6859_v10  ;;  %v6054_v11 = vld [vmem:[%s8930_s0 + $0x98] ss:$212 sps:$4 sm:$0xff]  }
 0x106   :  { %3315 = vmatpush1.bf16.msra.mxu1 %v5967_v14  ;;  %3346 = vmatprep.mubr.bf16.mxu1 %v6215_v1  ;;  %v6062_v14 = vld [vmem:[%s8930_s0 + $0xa94] ss:$212 sps:$4 sm:$0xff]  }
 0x107   :  { %3316 = vmatprep.subr.bf16.mxu1 %v5975_v16  ;;  %v6060_v16 = vld [vmem:[%s8930_s0 + $0xa90] ss:$212 sps:$4 sm:$0xff]  }
 0x108   :  { %3274 = vmatpush1.bf16.msra.mxu0 %v5964_v13  ;;  %v6065_v13 = vld [vmem:[%s8930_s0 + $0xc44] ss:$212 sps:$4 sm:$0xff]  }
 0x109   :  { %3275 = vmatprep.subr.bf16.mxu0 %v5972_v15  ;;  %v6063_v15 = vld [vmem:[%s8930_s0 + $0xc40] ss:$212 sps:$4 sm:$0xff]  }
 0x10a   :  { %3317 = vmatpush1.bf16.msra.mxu1 %v5973_v18  ;;  %v6071_v18 = vld [vmem:[%s8930_s0 + $0xa9c] ss:$212 sps:$4 sm:$0xff]  }
 0x10b   :  { %3318 = vmatprep.subr.bf16.mxu1 %v5981_v20  ;;  %v6066_v20 = vld [vmem:[%s8930_s0 + $0x8e8] ss:$212 sps:$4 sm:$0xff]  }
 0x10c   :  { %3276 = vmatpush1.bf16.msra.mxu0 %v5970_v17  ;;  %v6068_v17 = vld [vmem:[%s8930_s0 + $0x8ec] ss:$212 sps:$4 sm:$0xff]  }
 0x10d   :  { %3277 = vmatprep.subr.bf16.mxu0 %v5978_v19  ;;  %v6069_v19 = vld [vmem:[%s8930_s0 + $0xa98] ss:$212 sps:$4 sm:$0xff]  }
 0x10e   :  { %3319 = vmatpush1.bf16.msra.mxu1 %v5979_v22  ;;  %v6074_v22 = vld [vmem:[%s8930_s0 + $0x744] ss:$212 sps:$4 sm:$0xff]  }
 0x10f   :  { %3320 = vmatprep.subr.bf16.mxu1 %v5987_v24  ;;  %v6072_v24 = vld [vmem:[%s8930_s0 + $0x740] ss:$212 sps:$4 sm:$0xff]  }
 0x110   :  { %3278 = vmatpush1.bf16.msra.mxu0 %v5976_v21  ;;  %v6077_v21 = vld [vmem:[%s8930_s0 + $0x8f4] ss:$212 sps:$4 sm:$0xff]  }
 0x111   :  { %3279 = vmatprep.subr.bf16.mxu0 %v5984_v23  ;;  %v6075_v23 = vld [vmem:[%s8930_s0 + $0x8f0] ss:$212 sps:$4 sm:$0xff]  }
 0x112   :  { %3321 = vmatpush1.bf16.msra.mxu1 %v5985_v25  ;;  %v6083_v25 = vld [vmem:[%s8930_s0 + $0x74c] ss:$212 sps:$4 sm:$0xff]  }
 0x113   :  { %3322 = vmatprep.subr.bf16.mxu1 %v5993_v27  ;;  %v6081_v27 = vld [vmem:[%s8930_s0 + $0x748] ss:$212 sps:$4 sm:$0xff]  }
 0x114   :  { %3280 = vmatpush1.bf16.msra.mxu0 %v5982_v26  ;;  %v6080_v26 = vld [vmem:[%s8930_s0 + $0x59c] ss:$212 sps:$4 sm:$0xff]  }
 0x115   :  { %3281 = vmatprep.subr.bf16.mxu0 %v5990_v28  ;;  %v6078_v28 = vld [vmem:[%s8930_s0 + $0x598] ss:$212 sps:$4 sm:$0xff]  }
 0x116   :  { %3323 = vmatpush1.bf16.msra.mxu1 %v5991_v29  ;;  %v6089_v29 = vld [vmem:[%s8930_s0 + $0x5a4] ss:$212 sps:$4 sm:$0xff]  }
 0x117   :  { %3324 = vmatprep.subr.bf16.mxu1 %v5999_v31  ;;  %v6087_v31 = vld [vmem:[%s8930_s0 + $0x5a0] ss:$212 sps:$4 sm:$0xff]  }
 0x118   :  { %3282 = vmatpush1.bf16.msra.mxu0 %v5988_v30  ;;  %v6086_v30 = vld [vmem:[%s8930_s0 + $0x3f4] ss:$212 sps:$4 sm:$0xff]  }
 0x119   :  { %3283 = vmatprep.subr.bf16.mxu0 %v5996_v32  ;;  %v6084_v32 = vld [vmem:[%s8930_s0 + $0x3f0] ss:$212 sps:$4 sm:$0xff]  }
 0x11a   :  { %3325 = vmatpush1.bf16.msra.mxu1 %v5997_v34  ;;  %v6095_v34 = vld [vmem:[%s8930_s0 + $0x3fc] ss:$212 sps:$4 sm:$0xff]  }
 0x11b   :  { %3326 = vmatprep.subr.bf16.mxu1 %v6005_v36  ;;  %v6093_v36 = vld [vmem:[%s8930_s0 + $0x3f8] ss:$212 sps:$4 sm:$0xff]  }
 0x11c   :  { %3284 = vmatpush1.bf16.msra.mxu0 %v5994_v35  ;;  %v6092_v35 = vld [vmem:[%s8930_s0 + $0x24c] ss:$212 sps:$4 sm:$0xff]  }
 0x11d   :  { %3285 = vmatprep.subr.bf16.mxu0 %v6002_v37  ;;  %v6090_v37 = vld [vmem:[%s8930_s0 + $0x248] ss:$212 sps:$4 sm:$0xff]  }
 0x11e   :  { %3327 = vmatpush1.bf16.msra.mxu1 %v6003_v38  ;;  %v6101_v38 = vld [vmem:[%s8930_s0 + $0x254] ss:$212 sps:$4 sm:$0xff]  }
 0x11f   :  { %3328 = vmatprep.subr.bf16.mxu1 %v6008_v40  ;;  %v6099_v40 = vld [vmem:[%s8930_s0 + $0x250] ss:$212 sps:$4 sm:$0xff]  }
 0x120   :  { %3286 = vmatpush1.bf16.msra.mxu0 %v6000_v39  ;;  %v6098_v39 = vld [vmem:[%s8930_s0 + $0xa4] ss:$212 sps:$4 sm:$0xff]  }
 0x121   :  { %3357 = vmatprep.subr.bf16.mxu0 %v6011_v41  ;;  %v6096_v41 = vld [vmem:[%s8930_s0 + $0xa0] ss:$212 sps:$4 sm:$0xff]  }
 0x122   :  { %3329 = vmatpush1.bf16.msra.mxu1 %v6006_v42  ;;  %v6104_v42 = vld [vmem:[%s8930_s0 + $0xac] ss:$212 sps:$4 sm:$0xff]  }
 0x123   :  { %3304 = vmatmul.mubr.bf16.vlgmr.msra.gmra.mxu0 %v6859_v10  ;;  %3400 = vmatprep.subr.bf16.mxu1 %v6017_v44  ;;  %v6102_v44 = vld [vmem:[%s8930_s0 + $0xa8] ss:$212 sps:$4 sm:$0xff]  }
 0x124   :  { %3358 = vmatpush1.bf16.msra.mxu0 %v6009_v43  ;;  %3389 = vmatprep.mubr.bf16.mxu0 %v6215_v1  ;;  %v6107_v43 = vld [vmem:[%s8930_s0 + $0xc4c] ss:$212 sps:$4 sm:$0xff]  }
 0x125   :  { %3359 = vmatprep.subr.bf16.mxu0 %v6014_v45  ;;  %3347 = vmatmul.mubr.bf16.vlgmr.msra.gmra.mxu1 %v6859_v10  ;;  %v6105_v45 = vld [vmem:[%s8930_s0 + $0xc48] ss:$212 sps:$4 sm:$0xff]  }
 0x126   :  { %3401 = vmatpush1.bf16.msra.mxu1 %v6015_v46  ;;  %3432 = vmatprep.mubr.bf16.mxu1 %v6215_v1  ;;  %v6113_v46 = vld [vmem:[%s8930_s0 + $0xc54] ss:$212 sps:$4 sm:$0xff]  }
 0x127   :  { %3402 = vmatprep.subr.bf16.mxu1 %v6023_v33  ;;  %v6108_v33 = vld [vmem:[%s8930_s0 + $0xaa0] ss:$212 sps:$4 sm:$0xff]  }
 0x128   :  { %3360 = vmatpush1.bf16.msra.mxu0 %v6012_v47  ;;  %v6110_v47 = vld [vmem:[%s8930_s0 + $0xaa4] ss:$212 sps:$4 sm:$0xff]  }
 0x129   :  { %3361 = vmatprep.subr.bf16.mxu0 %v6020_v48  ;;  %v6111_v48 = vld [vmem:[%s8930_s0 + $0xc50] ss:$212 sps:$4 sm:$0xff]  }
 0x12a   :  { %3403 = vmatpush1.bf16.msra.mxu1 %v6021_v49  ;;  %v6116_v49 = vld [vmem:[%s8930_s0 + $0x8fc] ss:$212 sps:$4 sm:$0xff]  }
 0x12b   :  { %3404 = vmatprep.subr.bf16.mxu1 %v6029_v51  ;;  %v6117_v51 = vld [vmem:[%s8930_s0 + $0xaa8] ss:$212 sps:$4 sm:$0xff]  }
 0x12c   :  { %3362 = vmatpush1.bf16.msra.mxu0 %v6018_v50  ;;  %v6119_v50 = vld [vmem:[%s8930_s0 + $0xaac] ss:$212 sps:$4 sm:$0xff]  }
 0x12d   :  { %3363 = vmatprep.subr.bf16.mxu0 %v6026_v52  ;;  %v6114_v52 = vld [vmem:[%s8930_s0 + $0x8f8] ss:$212 sps:$4 sm:$0xff]  }
 0x12e   :  { %3405 = vmatpush1.bf16.msra.mxu1 %v6027_v53  ;;  %v6125_v53 = vld [vmem:[%s8930_s0 + $0x904] ss:$212 sps:$4 sm:$0xff]  }
 0x12f   :  { %3406 = vmatprep.subr.bf16.mxu1 %v6035_v55  ;;  %v6120_v55 = vld [vmem:[%s8930_s0 + $0x750] ss:$212 sps:$4 sm:$0xff]  }
 0x130   :  { %3364 = vmatpush1.bf16.msra.mxu0 %v6024_v54  ;;  %v6123_v54 = vld [vmem:[%s8930_s0 + $0x900] ss:$212 sps:$4 sm:$0xff]  }
 0x131   :  { %3365 = vmatprep.subr.bf16.mxu0 %v6032_v56  ;;  %v6131_v56 = vld [vmem:[%s8930_s0 + $0x75c] ss:$212 sps:$4 sm:$0xff]  }
 0x132   :  { %3407 = vmatpush1.bf16.msra.mxu1 %v6033_v57  ;;  %v6128_v57 = vld [vmem:[%s8930_s0 + $0x5ac] ss:$212 sps:$4 sm:$0xff]  }
 0x133   :  { %3408 = vmatprep.subr.bf16.mxu1 %v6041_v59  ;;  %v6126_v59 = vld [vmem:[%s8930_s0 + $0x5a8] ss:$212 sps:$4 sm:$0xff]  }
 0x134   :  { %3366 = vmatpush1.bf16.msra.mxu0 %v6030_v58  ;;  %v6129_v58 = vld [vmem:[%s8930_s0 + $0x758] ss:$212 sps:$4 sm:$0xff]  }
 0x135   :  { %3367 = vmatprep.subr.bf16.mxu0 %v6038_v60  ;;  %v6137_v60 = vld [vmem:[%s8930_s0 + $0x5b4] ss:$212 sps:$4 sm:$0xff]  }
 0x136   :  { %3409 = vmatpush1.bf16.msra.mxu1 %v6039_v61  ;;  %v6134_v61 = vld [vmem:[%s8930_s0 + $0x404] ss:$212 sps:$4 sm:$0xff]  }
 0x137   :  { %3410 = vmatprep.subr.bf16.mxu1 %v6047_v63  ;;  %v6132_v63 = vld [vmem:[%s8930_s0 + $0x400] ss:$212 sps:$4 sm:$0xff]  }
 0x138   :  { %3368 = vmatpush1.bf16.msra.mxu0 %v6036_v62  ;;  %v6135_v62 = vld [vmem:[%s8930_s0 + $0x5b0] ss:$212 sps:$4 sm:$0xff]  }
 0x139   :  { %3369 = vmatprep.subr.bf16.mxu0 %v6044_v0  ;;  %v6143_v0 = vld [vmem:[%s8930_s0 + $0x40c] ss:$212 sps:$4 sm:$0xff]  }
 0x13a   :  { %3411 = vmatpush1.bf16.msra.mxu1 %v6045_v2  ;;  %v6140_v2 = vld [vmem:[%s8930_s0 + $0x25c] ss:$212 sps:$4 sm:$0xff]  }
 0x13b   :  { %3412 = vmatprep.subr.bf16.mxu1 %v6053_v4  ;;  %v6138_v4 = vld [vmem:[%s8930_s0 + $0x258] ss:$212 sps:$4 sm:$0xff]  }
 0x13c   :  { %3370 = vmatpush1.bf16.msra.mxu0 %v6042_v3  ;;  %v6141_v3 = vld [vmem:[%s8930_s0 + $0x408] ss:$212 sps:$4 sm:$0xff]  }
 0x13d   :  { %3371 = vmatprep.subr.bf16.mxu0 %v6050_v5  ;;  %v6149_v5 = vld [vmem:[%s8930_s0 + $0x264] ss:$212 sps:$4 sm:$0xff]  }
 0x13e   :  { %3413 = vmatpush1.bf16.msra.mxu1 %v6051_v6  ;;  %v6146_v6 = vld [vmem:[%s8930_s0 + $0xb4] ss:$212 sps:$4 sm:$0xff]  }
 0x13f   :  { %3414 = vmatprep.subr.bf16.mxu1 %v6056_v8  ;;  %v6144_v8 = vld [vmem:[%s8930_s0 + $0xb0] ss:$212 sps:$4 sm:$0xff]  }
 0x140   :  { %3372 = vmatpush1.bf16.msra.mxu0 %v6048_v7  ;;  %v6147_v7 = vld [vmem:[%s8930_s0 + $0x260] ss:$212 sps:$4 sm:$0xff]  }
 0x141   :  { %3443 = vmatprep.subr.bf16.mxu0 %v6059_v9  ;;  %v6152_v9 = vld [vmem:[%s8930_s0 + $0xbc] ss:$212 sps:$4 sm:$0xff]  }
 0x142   :  { %3415 = vmatpush1.bf16.msra.mxu1 %v6054_v11  ;;  %v6155_v11 = vld [vmem:[%s8930_s0 + $0xc5c] ss:$212 sps:$4 sm:$0xff]  }
 0x143   :  { %3390 = vmatmul.mubr.bf16.vlgmr.msra.gmra.mxu0 %v6859_v10  ;;  %3486 = vmatprep.subr.bf16.mxu1 %v6065_v13  ;;  %v6153_v13 = vld [vmem:[%s8930_s0 + $0xc58] ss:$212 sps:$4 sm:$0xff]  }
 0x144   :  { %3444 = vmatpush1.bf16.msra.mxu0 %v6057_v12  ;;  %3475 = vmatprep.mubr.bf16.mxu0 %v6215_v1  ;;  %v6150_v12 = vld [vmem:[%s8930_s0 + $0xb8] ss:$212 sps:$4 sm:$0xff]  }
 0x145   :  { %3445 = vmatprep.subr.bf16.mxu0 %v6062_v14  ;;  %3433 = vmatmul.mubr.bf16.vlgmr.msra.gmra.mxu1 %v6859_v10  ;;  %v6161_v14 = vld [vmem:[%s8930_s0 + $0xc64] ss:$212 sps:$4 sm:$0xff]  }
 0x146   :  { %3487 = vmatpush1.bf16.msra.mxu1 %v6063_v15  ;;  %3518 = vmatprep.mubr.bf16.mxu1 %v6215_v1  ;;  %v6158_v15 = vld [vmem:[%s8930_s0 + $0xab4] ss:$212 sps:$4 sm:$0xff]  }
 0x147   :  { %3488 = vmatprep.subr.bf16.mxu1 %v6071_v18  ;;  %v6156_v18 = vld [vmem:[%s8930_s0 + $0xab0] ss:$212 sps:$4 sm:$0xff]  }
 0x148   :  { %3446 = vmatpush1.bf16.msra.mxu0 %v6060_v16  ;;  %v7464_v16 = vld [vmem:[%s8931_s1] sm:$0xff]  }
 0x149   :  { %3447 = vmatprep.subr.bf16.mxu0 %v6068_v17  ;;  %v6159_v17 = vld [vmem:[%s8930_s0 + $0xc60] ss:$212 sps:$4 sm:$0xff]  }
 0x14a   :  { %3489 = vmatpush1.bf16.msra.mxu1 %v6069_v19  ;;  %v6164_v19 = vld [vmem:[%s8930_s0 + $0x90c] ss:$212 sps:$4 sm:$0xff]  }
 0x14b   :  { %3490 = vmatprep.subr.bf16.mxu1 %v6077_v21  ;;  %v6165_v21 = vld [vmem:[%s8930_s0 + $0xab8] ss:$212 sps:$4 sm:$0xff]  }
 0x14c   :  { %3448 = vmatpush1.bf16.msra.mxu0 %v6066_v20  ;;  %v6167_v20 = vld [vmem:[%s8930_s0 + $0xabc] ss:$212 sps:$4 sm:$0xff]  }
 0x14d   :  { %3449 = vmatprep.subr.bf16.mxu0 %v6074_v22  ;;  %v6162_v22 = vld [vmem:[%s8930_s0 + $0x908] ss:$212 sps:$4 sm:$0xff]  }
 0x14e   :  { %3491 = vmatpush1.bf16.msra.mxu1 %v6075_v23  ;;  %v6173_v23 = vld [vmem:[%s8930_s0 + $0x914] ss:$212 sps:$4 sm:$0xff]  }
 0x14f   :  { %3492 = vmatprep.subr.bf16.mxu1 %v6083_v25  ;;  %v6168_v25 = vld [vmem:[%s8930_s0 + $0x760] ss:$212 sps:$4 sm:$0xff]  }
 0x150   :  { %3450 = vmatpush1.bf16.msra.mxu0 %v6072_v24  ;;  %v6170_v24 = vld [vmem:[%s8930_s0 + $0x764] ss:$212 sps:$4 sm:$0xff]  }
 0x151   :  { %3451 = vmatprep.subr.bf16.mxu0 %v6080_v26  ;;  %v6179_v26 = vld [vmem:[%s8930_s0 + $0x76c] ss:$212 sps:$4 sm:$0xff]  }
 0x152   :  { %3493 = vmatpush1.bf16.msra.mxu1 %v6081_v27  ;;  %v6176_v27 = vld [vmem:[%s8930_s0 + $0x5bc] ss:$212 sps:$4 sm:$0xff]  }
 0x153   :  { %3494 = vmatprep.subr.bf16.mxu1 %v6089_v29  ;;  %v6174_v29 = vld [vmem:[%s8930_s0 + $0x5b8] ss:$212 sps:$4 sm:$0xff]  }
 0x154   :  { %3452 = vmatpush1.bf16.msra.mxu0 %v6078_v28  ;;  %v6177_v28 = vld [vmem:[%s8930_s0 + $0x768] ss:$212 sps:$4 sm:$0xff]  }
 0x155   :  { %3453 = vmatprep.subr.bf16.mxu0 %v6086_v30  ;;  %v6185_v30 = vld [vmem:[%s8930_s0 + $0x5c4] ss:$212 sps:$4 sm:$0xff]  }
 0x156   :  { %3495 = vmatpush1.bf16.msra.mxu1 %v6087_v31  ;;  %v6182_v31 = vld [vmem:[%s8930_s0 + $0x414] ss:$212 sps:$4 sm:$0xff]  }
 0x157   :  { %3496 = vmatprep.subr.bf16.mxu1 %v6095_v34  ;;  %v6180_v34 = vld [vmem:[%s8930_s0 + $0x410] ss:$212 sps:$4 sm:$0xff]  }
 0x158   :  { %3454 = vmatpush1.bf16.msra.mxu0 %v6084_v32  ;;  %v6183_v32 = vld [vmem:[%s8930_s0 + $0x5c0] ss:$212 sps:$4 sm:$0xff]  }
 0x159   :  { %3455 = vmatprep.subr.bf16.mxu0 %v6092_v35  ;;  %v6191_v35 = vld [vmem:[%s8930_s0 + $0x41c] ss:$212 sps:$4 sm:$0xff]  }
 0x15a   :  { %3497 = vmatpush1.bf16.msra.mxu1 %v6093_v36  ;;  %v6188_v36 = vld [vmem:[%s8930_s0 + $0x26c] ss:$212 sps:$4 sm:$0xff]  }
 0x15b   :  { %3498 = vmatprep.subr.bf16.mxu1 %v6101_v38  ;;  %v6186_v38 = vld [vmem:[%s8930_s0 + $0x268] ss:$212 sps:$4 sm:$0xff]  }
 0x15c   :  { %3456 = vmatpush1.bf16.msra.mxu0 %v6090_v37  ;;  %v6189_v37 = vld [vmem:[%s8930_s0 + $0x418] ss:$212 sps:$4 sm:$0xff]  }
 0x15d   :  { %3457 = vmatprep.subr.bf16.mxu0 %v6098_v39  ;;  %v6197_v39 = vld [vmem:[%s8930_s0 + $0x274] ss:$212 sps:$4 sm:$0xff]  }
 0x15e   :  { %3499 = vmatpush1.bf16.msra.mxu1 %v6099_v40  ;;  %v6194_v40 = vld [vmem:[%s8930_s0 + $0xc4] ss:$212 sps:$4 sm:$0xff]  }
 0x15f   :  { %3500 = vmatprep.subr.bf16.mxu1 %v6104_v42  ;;  %v6192_v42 = vld [vmem:[%s8930_s0 + $0xc0] ss:$212 sps:$4 sm:$0xff]  }
 0x160   :  { %3458 = vmatpush1.bf16.msra.mxu0 %v6096_v41  ;;  %v6195_v41 = vld [vmem:[%s8930_s0 + $0x270] ss:$212 sps:$4 sm:$0xff]  }
 0x161   :  { %3529 = vmatprep.subr.bf16.mxu0 %v6107_v43  ;;  %v6200_v43 = vld [vmem:[%s8930_s0 + $0xcc] ss:$212 sps:$4 sm:$0xff]  }
 0x162   :  { %3501 = vmatpush1.bf16.msra.mxu1 %v6102_v44  ;;  %v6198_v44 = vld [vmem:[%s8930_s0 + $0xc8] ss:$212 sps:$4 sm:$0xff]  }
 0x163   :  { %3476 = vmatmul.mubr.bf16.vlgmr.msra.gmra.mxu0 %v6859_v10  ;;  %3572 = vmatprep.subr.bf16.mxu1 %v6113_v46  ;;  %v6216_v46 = vmov 0.0  }
 0x164   :  { %3530 = vmatpush1.bf16.msra.mxu0 %v6105_v45  ;;  %3561 = vmatprep.mubr.bf16.mxu0 %v6215_v1  ;;  %v6201_v45 = vld [vmem:[%s8930_s0 + $0xc68] ss:$212 sps:$4 sm:$0xff]  }
 0x165   :  { %3531 = vmatprep.subr.bf16.mxu0 %v6110_v47  ;;  %3519 = vmatmul.mubr.bf16.vlgmr.msra.gmra.mxu1 %v6859_v10  ;;  %v6122_v10 = vld [vmem:[%s8930_s0 + $0x754] ss:$212 sps:$4 sm:$0xff]  }
 0x166   :  { %3573 = vmatpush1.bf16.msra.mxu1 %v6111_v48  ;;  %3604 = vmatprep.mubr.bf16.mxu1 %v6215_v1  ;;  %v6202_v47 = vld [vmem:[%s8930_s0 + $0xac0] ss:$212 sps:$4 sm:$0xff]   ;;  %v6203_v48 = vld [vmem:[%s8930_s0 + $0x918] ss:$212 sps:$4 sm:$0xff]  }
 0x167   :  { %3574 = vmatprep.subr.bf16.mxu1 %v6119_v50  ;;  %v6206_v50 = vld [vmem:[%s8930_s0 + $0x420] ss:$212 sps:$4 sm:$0xff]  }
 0x168   :  { %3532 = vmatpush1.bf16.msra.mxu0 %v6108_v33  ;;  %v6204_v33 = vld [vmem:[%s8930_s0 + $0x770] ss:$212 sps:$4 sm:$0xff]  }
 0x169   :  { %3533 = vmatprep.subr.bf16.mxu0 %v6116_v49  ;;  %v6205_v49 = vld [vmem:[%s8930_s0 + $0x5c8] ss:$212 sps:$4 sm:$0xff]  }
 0x16a   :  { %3575 = vmatpush1.bf16.msra.mxu1 %v6117_v51  ;;  %v6207_v51 = vld [vmem:[%s8930_s0 + $0x278] ss:$212 sps:$4 sm:$0xff]  }
 0x16b   :  { %3576 = vmatprep.subr.bf16.mxu1 %v6125_v53  ;;  %v7581_v53 = vpop.f32.mrf.mxu0 }
 0x16c   :  { %3534 = vmatpush1.bf16.msra.mxu0 %v6114_v52  ;;  %v6208_v52 = vld [vmem:[%s8930_s0 + $0xd0] ss:$212 sps:$4 sm:$0xff]  }
 0x16d   :  { %3535 = vmatprep.subr.bf16.mxu0 %v6122_v10  ;;  %v7583_v10 = vpop.f32.mrf.mxu0 }
 0x16e   :  { %3577 = vmatpush1.bf16.msra.mxu1 %v6123_v54 }
 0x16f   :  { %3578 = vmatprep.subr.bf16.mxu1 %v6131_v56  ;;  %v7585_v54 = vpop.f32.mrf.mxu0  ;;  %v3854_v56 = vmul.f32 %v7581_v53, %v7581_v53 }
 0x170   :  { %3536 = vmatpush1.bf16.msra.mxu0 %v6120_v55  ;;  %9013 = vst [vmem:[#allocation2_spill] sm:$0xff] %v7585_v54  ;;  %v7587_v55 = vpop.f32.mrf.mxu1 }
 0x171   :  { %3537 = vmatprep.subr.bf16.mxu0 %v6128_v57  ;;  %v3855_v57 = vmul.f32 %v7583_v10, %v7583_v10 }
 0x172   :  { %3579 = vmatpush1.bf16.msra.mxu1 %v6129_v58  ;;  %v3744_v58 = vadd.f32 %v7583_v10, %v7581_v53 }
 0x173   :  { %3580 = vmatprep.subr.bf16.mxu1 %v6137_v60  ;;  %v7597_v60 = vpop.f32.mrf.mxu1 }
 0x174   :  { %3538 = vmatpush1.bf16.msra.mxu0 %v6126_v59  ;;  %v7595_v59 = vpop.f32.mrf.mxu0 }
 0x175   :  { %3539 = vmatprep.subr.bf16.mxu0 %v6134_v61  ;;  %9014 = vst [vmem:[#allocation3_spill] sm:$0xff] %v7595_v59  ;;  %v3960_v61 = vadd.f32 %v3855_v57, %v3854_v56 }
 0x176   :  { %3581 = vmatpush1.bf16.msra.mxu1 %v6135_v62  ;;  %v3856_v62 = vmul.f32 %v7587_v55, %v7587_v55 }
 0x177   :  { %3582 = vmatprep.subr.bf16.mxu1 %v6143_v0  ;;  %v3745_v0 = vadd.f32 %v3744_v58, %v7587_v55 }
 0x178   :  { %3540 = vmatpush1.bf16.msra.mxu0 %v6132_v63  ;;  %v7601_v63 = vpop.f32.mrf.mxu0 }
 0x179   :  { %3541 = vmatprep.subr.bf16.mxu0 %v6140_v2  ;;  %v3798_v2 = vadd.f32 %v7595_v59, %v7585_v54 }
 0x17a   :  { %3583 = vmatpush1.bf16.msra.mxu1 %v6141_v3  ;;  %v7606_v3 = vpop.f32.mrf.mxu1 }
 0x17b   :  { %3584 = vmatprep.subr.bf16.mxu1 %v6149_v5  ;;  %9015 = vst [vmem:[#allocation4_spill] sm:$0xff] %v7606_v3  ;;  %v3857_v5 = vmul.f32 %v7597_v60, %v7597_v60 }
 0x17c   :  { %3542 = vmatpush1.bf16.msra.mxu0 %v6138_v4  ;;  %v3961_v4 = vadd.f32 %v3960_v61, %v3856_v62 }
 0x17d   :  { %3543 = vmatprep.subr.bf16.mxu0 %v6146_v6  ;;  %v7610_v6 = vpop.f32.mrf.mxu0 }
 0x17e   :  { %3585 = vmatpush1.bf16.msra.mxu1 %v6147_v7  ;;  %v3746_v7 = vadd.f32 %v3745_v0, %v7597_v60 }
 0x17f   :  { %3586 = vmatprep.subr.bf16.mxu1 %v6152_v9  ;;  %v3858_v9 = vmul.f32 %v7601_v63, %v7601_v63 }
 0x180   :  { %3544 = vmatpush1.bf16.msra.mxu0 %v6144_v8  ;;  %v3799_v8 = vadd.f32 %v3798_v2, %v7606_v3 }
 0x181   :  { %3615 = vmatprep.subr.bf16.mxu0 %v6155_v11  ;;  %v7616_v11 = vpop.f32.mrf.mxu1 }
 0x182   :  { %3587 = vmatpush1.bf16.msra.mxu1 %v6150_v12  ;;  %9016 = vst [vmem:[#allocation5_spill] sm:$0xff] %v7616_v11  ;;  %v3962_v12 = vadd.f32 %v3961_v4, %v3857_v5 }
 0x183   :  { %3562 = vmatmul.mubr.bf16.vlgmr.msra.gmra.mxu0 %v7464_v16  ;;  %3658 = vmatprep.subr.bf16.mxu1 %v6161_v14  ;;  %v7619_v14 = vpop.f32.mrf.mxu0 }
 0x184   :  { %3616 = vmatpush1.bf16.msra.mxu0 %v6153_v13  ;;  %3647 = vmatprep.mubr.bf16.mxu0 %v6215_v1  ;;  %v3747_v13 = vadd.f32 %v3746_v7, %v7601_v63  ;;  %9017 = vst [vmem:[#allocation6_spill] sm:$0xff] %v7619_v14 }
 0x185   :  { %3617 = vmatprep.subr.bf16.mxu0 %v6158_v15  ;;  %3605 = vmatmul.mubr.bf16.vlgmr.msra.gmra.mxu1 %v7464_v16  ;;  %v7621_v15 = vpop.f32.mrf.mxu1 }
 0x186   :  { %3659 = vmatpush1.bf16.msra.mxu1 %v6159_v17  ;;  %3690 = vmatprep.mubr.bf16.mxu1 %v6215_v1  ;;  %v6171_v1 = vld [vmem:[%s8930_s0 + $0x910] ss:$212 sps:$4 sm:$0xff]   ;;  %v3963_v17 = vadd.f32 %v3962_v12, %v3858_v9 }
 0x187   :  { %3660 = vmatprep.subr.bf16.mxu1 %v6167_v20 }
 0x188   :  { %3618 = vmatpush1.bf16.msra.mxu0 %v6156_v18  ;;  %v3859_v18 = vmul.f32 %v7610_v6, %v7610_v6 }
 0x189   :  { %3619 = vmatprep.subr.bf16.mxu0 %v6164_v19  ;;  %v3748_v19 = vadd.f32 %v3747_v13, %v7610_v6 }
 0x18a   :  { %3661 = vmatpush1.bf16.msra.mxu1 %v6165_v21  ;;  %v7628_v21 = vpop.f32.mrf.mxu0 }
 0x18b   :  { %3662 = vmatprep.subr.bf16.mxu1 %v6173_v23  ;;  %9018 = vst [vmem:[#allocation7_spill] sm:$0xff] %v7628_v21  ;;  %v3964_v23 = vadd.f32 %v3963_v17, %v3859_v18 }
 0x18c   :  { %3620 = vmatpush1.bf16.msra.mxu0 %v6162_v22  ;;  %v7630_v22 = vpop.f32.mrf.mxu1 }
 0x18d   :  { %3621 = vmatprep.subr.bf16.mxu0 %v6170_v24  ;;  %v3860_v24 = vmul.f32 %v7621_v15, %v7621_v15 }
 0x18e   :  { %3663 = vmatpush1.bf16.msra.mxu1 %v6171_v1  ;;  %v7634_v1 = vpop.f32.mrf.mxu0 }
 0x18f   :  { %3664 = vmatprep.subr.bf16.mxu1 %v6179_v26 }
 0x190   :  { %3622 = vmatpush1.bf16.msra.mxu0 %v6168_v25  ;;  %v3749_v25 = vadd.f32 %v3748_v19, %v7621_v15 }
 0x191   :  { %3623 = vmatprep.subr.bf16.mxu0 %v6176_v27  ;;  %v7638_v27 = vpop.f32.mrf.mxu1 }
 0x192   :  { %3665 = vmatpush1.bf16.msra.mxu1 %v6177_v28  ;;  %9019 = vst [vmem:[#allocation8_spill] sm:$0xff] %v7638_v27  ;;  %v3965_v28 = vadd.f32 %v3964_v23, %v3860_v24 }
 0x193   :  { %3666 = vmatprep.subr.bf16.mxu1 %v6185_v30  ;;  %v7642_v30 = vpop.f32.mrf.mxu0 }
 0x194   :  { %3624 = vmatpush1.bf16.msra.mxu0 %v6174_v29  ;;  %v3861_v29 = vmul.f32 %v7630_v22, %v7630_v22 }
 0x195   :  { %3625 = vmatprep.subr.bf16.mxu0 %v6182_v31  ;;  %v3750_v31 = vadd.f32 %v3749_v25, %v7630_v22 }
 0x196   :  { %3667 = vmatpush1.bf16.msra.mxu1 %v6183_v32 }
 0x197   :  { %3668 = vmatprep.subr.bf16.mxu1 %v6191_v35  ;;  %v7648_v35 = vpop.f32.mrf.mxu1 }
 0x198   :  { %3626 = vmatpush1.bf16.msra.mxu0 %v6180_v34  ;;  %v3862_v34 = vmul.f32 %v7634_v1, %v7634_v1  ;;  %9020 = vst [vmem:[#allocation9_spill] sm:$0xff] %v7648_v35 }
 0x199   :  { %3627 = vmatprep.subr.bf16.mxu0 %v6188_v36  ;;  %v3966_v36 = vadd.f32 %v3965_v28, %v3861_v29 }
 0x19a   :  { %3669 = vmatpush1.bf16.msra.mxu1 %v6189_v37  ;;  %v3751_v37 = vadd.f32 %v3750_v31, %v7634_v1 }
 0x19b   :  { %3670 = vmatprep.subr.bf16.mxu1 %v6197_v39  ;;  %v7653_v39 = vpop.f32.mrf.mxu1 }
 0x19c   :  { %3628 = vmatpush1.bf16.msra.mxu0 %v6186_v38  ;;  %v7651_v38 = vpop.f32.mrf.mxu0 }
 0x19d   :  { %3629 = vmatprep.subr.bf16.mxu0 %v6194_v40  ;;  %9021 = vst [vmem:[#allocation10_spill] sm:$0xff] %v7651_v38 }
 0x19e   :  { %3671 = vmatpush1.bf16.msra.mxu1 %v6195_v41  ;;  %v3967_v41 = vadd.f32 %v3966_v36, %v3862_v34 }
 0x19f   :  { %3672 = vmatprep.subr.bf16.mxu1 %v6200_v43  ;;  %v3752_v43 = vadd.f32 %v3751_v37, %v7642_v30 }
 0x1a0   :  { %3630 = vmatpush1.bf16.msra.mxu0 %v6192_v42  ;;  %v3863_v42 = vmul.f32 %v7642_v30, %v7642_v30 }
 0x1a1   :  { %5548 = vmatprep.subr.bf16.mxu0 %v6216_v46 }
 0x1a2   :  { %3673 = vmatpush1.bf16.msra.mxu1 %v6198_v44 }
 0x1a3   :  { %3648 = vmatmul.mubr.bf16.vlgmr.msra.gmra.mxu0 %v7464_v16 }
 0x1a4   :  { %5549 = vmatpush3.bf16.msra.mxu0 %v6201_v45  ;;  %5564 = vmatprep.mubr.msk.bf16.mxu0 %vm6217_vm0, %v6216_v46  ;;  %v7660_v45 = vpop.f32.mrf.mxu0 }
 0x1a5   :  { %5550 = vmatprep.subr.bf16.mxu0 %v6216_v46  ;;  %3691 = vmatmul.mubr.bf16.vlgmr.msra.gmra.mxu1 %v7464_v16  ;;  %9022 = vst [vmem:[#allocation11_spill] sm:$0xff] %v7660_v45 }
 0x1a8   :  { %5551 = vmatpush3.bf16.msra.mxu0 %v6202_v47  ;;  %v3968_v47 = vadd.f32 %v3967_v41, %v3863_v42 }
 0x1a9   :  { %5552 = vmatprep.subr.bf16.mxu0 %v6216_v46 }
 0x1ac   :  { %5553 = vmatpush3.bf16.msra.mxu0 %v6203_v48  ;;  %v3864_v48 = vmul.f32 %v7653_v39, %v7653_v39 }
 0x1ad   :  { %5554 = vmatprep.subr.bf16.mxu0 %v6216_v46 }
 0x1b0   :  { %5555 = vmatpush3.bf16.msra.mxu0 %v6204_v33  ;;  %v7666_v33 = vpop.f32.mrf.mxu0 }
 0x1b1   :  { %5556 = vmatprep.subr.bf16.mxu0 %v6216_v46  ;;  %v3866_v62 = vmul.f32 %v7666_v33, %v7666_v33 }
 0x1b2   :  { %v7674_v57 = vpop.f32.mrf.mxu0 }
 0x1b3   :  { %v3867_v12 = vmul.f32 %v7674_v57, %v7674_v57 }
 0x1b4   :  { %5557 = vmatpush3.bf16.msra.mxu0 %v6205_v49  ;;  %v3753_v49 = vadd.f32 %v3752_v43, %v7653_v39  ;;  %v7683_v5 = vpop.f32.mrf.mxu0 }
 0x1b5   :  { %5558 = vmatprep.subr.bf16.mxu0 %v6216_v46  ;;  %9025 = vst [vmem:[#allocation14_spill] sm:$0xff] %v7683_v5 }
 0x1b6   :  { %v7692_v17 = vpop.f32.mrf.mxu0 }
 0x1b7   :  { %9026 = vst [vmem:[#allocation15_spill] sm:$0xff] %v7692_v17 }
 0x1b8   :  { %5559 = vmatpush3.bf16.msra.mxu0 %v6206_v50  ;;  %v7698_v23 = vpop.f32.mrf.mxu0 }
 0x1b9   :  { %5560 = vmatprep.subr.bf16.mxu0 %v6216_v46  ;;  %v3870_v36 = vmul.f32 %v7698_v23, %v7698_v23 }
 0x1ba   :  { %v7706_v31 = vpop.f32.mrf.mxu0 }
 0x1bc   :  { %5561 = vmatpush3.bf16.msra.mxu0 %v6207_v51  ;;  %v7715_v42 = vpop.f32.mrf.mxu0 }
 0x1bd   :  { %5562 = vmatprep.subr.bf16.mxu0 %v6216_v46  ;;  %v7662_v46 = vpop.f32.mrf.mxu1  ;;  %9029 = vst [vmem:[#allocation18_spill] sm:$0xff] %v7715_v42 }
 0x1be   :  { %v3865_v56 = vmul.f32 %v7662_v46, %v7662_v46  ;;  %v3754_v58 = vadd.f32 %v3753_v49, %v7662_v46  ;;  %v3908_v49 = vmul.f32 %v7595_v59, %v7595_v59 }
 0x1bf   :  { %v7670_v51 = vpop.f32.mrf.mxu1 }
 0x1c0   :  { %5563 = vmatpush3.bf16.msra.mxu0 %v6208_v52  ;;  %9023 = vst [vmem:[#allocation12_spill] sm:$0xff] %v7670_v51  ;;  %v3969_v52 = vadd.f32 %v3968_v47, %v3864_v48  ;;  %v3755_v4 = vadd.f32 %v3754_v58, %v7666_v33  ;;  %v3871_v48 = vmul.f32 %v7706_v31, %v7706_v31 }
 0x1c1   :  { %v7680_v0 = vpop.f32.mrf.mxu1 }
 0x1c2   :  { %9024 = vst [vmem:[#allocation13_spill] sm:$0xff] %v7680_v0  ;;  %v3970_v2 = vadd.f32 %v3969_v52, %v3865_v56  ;;  %v3756_v13 = vadd.f32 %v3755_v4, %v7674_v57  ;;  %v7726_v56 = vpop.f32.mrf.mxu0 }
 0x1c3   :  { %5565 = vmatmul.mubr.bf16.vlgmr.msra.gmra.mxu0 %v7464_v16  ;;  %v3800_v16 = vadd.f32 %v3799_v8, %v7616_v11  ;;  %v7685_v7 = vpop.f32.mrf.mxu1  ;;  %9030 = vst [vmem:[#allocation19_spill] sm:$0xff] %v7726_v56 }
 0x1c4   :  { %v3971_v9 = vadd.f32 %v3970_v2, %v3866_v62  ;;  %v3757_v24 = vadd.f32 %v3756_v13, %v7685_v7  ;;  %v7734_v4 = vpop.f32.mrf.mxu0 }
 0x1c5   :  { %v3801_v20 = vadd.f32 %v3800_v16, %v7619_v14  ;;  %v7694_v18 = vpop.f32.mrf.mxu1 }
 0x1c6   :  { %v3972_v19 = vadd.f32 %v3971_v9, %v3867_v12  ;;  %v3869_v29 = vmul.f32 %v7694_v18, %v7694_v18  ;;  %v3909_v9 = vmul.f32 %v7606_v3, %v7606_v3 }
 0x1c7   :  { %v3802_v26 = vadd.f32 %v3801_v20, %v7628_v21  ;;  %v3868_v20 = vmul.f32 %v7685_v7, %v7685_v7 }
 0x1c9   :  { %v3803_v32 = vadd.f32 %v3802_v26, %v7638_v27  ;;  %v7702_v26 = vpop.f32.mrf.mxu1  ;;  %v3973_v28 = vadd.f32 %v3972_v19, %v3868_v20 }
 0x1ca   :  { %9027 = vst [vmem:[#allocation16_spill] sm:$0xff] %v7702_v26 }
 0x1cb   :  { %v3804_v40 = vadd.f32 %v3803_v32, %v7648_v35  ;;  %v3758_v32 = vadd.f32 %v3757_v24, %v7694_v18  ;;  %v7712_v37 = vpop.f32.mrf.mxu1  ;;  %v3910_v24 = vmul.f32 %v7616_v11, %v7616_v11 }
 0x1cc   :  { %9028 = vst [vmem:[#allocation17_spill] sm:$0xff] %v7712_v37 }
 0x1cd   :  { %v3805_v44 = vadd.f32 %v3804_v40, %v7651_v38  ;;  %v3974_v40 = vadd.f32 %v3973_v28, %v3869_v29  ;;  %v3759_v41 = vadd.f32 %v3758_v32, %v7698_v23  ;;  %v7717_v43 = vpop.f32.mrf.mxu1 }
 0x1ce   :  { %v3872_v2 = vmul.f32 %v7717_v43, %v7717_v43 }
 0x1cf   :  { %v3806_v50 = vadd.f32 %v3805_v44, %v7660_v45  ;;  %v3975_v47 = vadd.f32 %v3974_v40, %v3870_v36  ;;  %v7728_v58 = vpop.f32.mrf.mxu1  ;;  %v3911_v40 = vmul.f32 %v7619_v14, %v7619_v14  ;;  %v3916_v14 = vmul.f32 %v7660_v45, %v7660_v45 }
 0x1d0   :  { %v3873_v20 = vmul.f32 %v7728_v58, %v7728_v58 }
 0x1d1   :  { %v3807_v61 = vadd.f32 %v3806_v50, %v7670_v51  ;;  %v3760_v50 = vadd.f32 %v3759_v41, %v7706_v31  ;;  %v3976_v62 = vadd.f32 %v3975_v47, %v3871_v48 }
 0x1d3   :  { %v3808_v8 = vadd.f32 %v3807_v61, %v7680_v0  ;;  %v3907_v61 = vmul.f32 %v7585_v54, %v7585_v54  ;;  %v3761_v12 = vadd.f32 %v3760_v50, %v7717_v43  ;;  %v3977_v19 = vadd.f32 %v3976_v62, %v3872_v2 }
 0x1d4   :  { %v3912_v2 = vmul.f32 %v7628_v21, %v7628_v21  ;;  %v3920_v54 = vmul.f32 %v7692_v17, %v7692_v17 }
 0x1d5   :  { %v3809_v16 = vadd.f32 %v3808_v8, %v7683_v5  ;;  %v4014_v8 = vadd.f32 %v3908_v49, %v3907_v61  ;;  %v3762_v29 = vadd.f32 %v3761_v12, %v7728_v58  ;;  %v3978_v41 = vadd.f32 %v3977_v19, %v3873_v20 }
 0x1d7   :  { %v3810_v25 = vadd.f32 %v3809_v16, %v7692_v17  ;;  %v7740_v16 = vpop.f32.mrf.mxu1  ;;  %v4015_v28 = vadd.f32 %v4014_v8, %v3909_v9 }
 0x1d8   :  { %9031 = vst [vmem:[#allocation20_spill] sm:$0xff] %v7740_v16 }
 0x1d9   :  { %v3811_v34 = vadd.f32 %v3810_v25, %v7702_v26  ;;  %v7746_v25 = vpop.f32.mrf.mxu0  ;;  %v7752_v36 = vpop.f32.mrf.mxu1  ;;  %v4016_v49 = vadd.f32 %v4015_v28, %v3910_v24 }
 0x1da   :  { %9032 = vst [vmem:[#allocation21_spill] sm:$0xff] %v7752_v36  ;;  %v3875_v61 = vmul.f32 %v7746_v25, %v7746_v25 }
 0x1db   :  { %v3812_v44 = vadd.f32 %v3811_v34, %v7712_v37  ;;  %v3874_v34 = vmul.f32 %v7734_v4, %v7734_v4  ;;  %v7757_v47 = vpop.f32.mrf.mxu0  ;;  %v7759_v48 = vpop.f32.mrf.mxu1  ;;  %v4017_v62 = vadd.f32 %v4016_v49, %v3911_v40  ;;  %v3914_v49 = vmul.f32 %v7648_v35, %v7648_v35 }
 0x1dc   :  { %9033 = vst [vmem:[#allocation22_spill] sm:$0xff] %v7757_v47  ;;  %v3876_v20 = vmul.f32 %v7759_v48, %v7759_v48 }
 0x1dd   :  { %v3813_v52 = vadd.f32 %v3812_v44, %v7715_v42  ;;  %v3763_v44 = vadd.f32 %v3762_v29, %v7734_v4  ;;  %v7768_v12 = vpop.f32.mrf.mxu0  ;;  %v4018_v28 = vadd.f32 %v4017_v62, %v3912_v2  ;;  %v3913_v29 = vmul.f32 %v7638_v27, %v7638_v27 }
 0x1de   :  { %9034 = vst [vmem:[#allocation23_spill] sm:$0xff] %v7768_v12 }
 0x1df   :  { %v3814_v13 = vadd.f32 %v3813_v52, %v7726_v56  ;;  %v3979_v52 = vadd.f32 %v3978_v41, %v3874_v34  ;;  %v3764_v8 = vadd.f32 %v3763_v44, %v7746_v25  ;;  %v7774_v24 = vpop.f32.mrf.mxu0 }
 0x1e0   :  { %v3878_v2 = vmul.f32 %v7774_v24, %v7774_v24 }
 0x1e1   :  { %v3815_v32 = vadd.f32 %v3814_v13, %v7740_v16  ;;  %v7770_v13 = vpop.f32.mrf.mxu1  ;;  %v3980_v19 = vadd.f32 %v3979_v52, %v3875_v61  ;;  %v4019_v52 = vadd.f32 %v4018_v28, %v3913_v29 }
 0x1e2   :  { %v3877_v44 = vmul.f32 %v7770_v13, %v7770_v13 }
 0x1e3   :  { %v3816_v50 = vadd.f32 %v3815_v32, %v7752_v36  ;;  %v3765_v32 = vadd.f32 %v3764_v8, %v7759_v48  ;;  %v7780_v40 = vpop.f32.mrf.mxu1  ;;  %v3981_v41 = vadd.f32 %v3980_v19, %v3876_v20  ;;  %v4020_v28 = vadd.f32 %v4019_v52, %v3914_v49 }
 0x1e4   :  { %9035 = vst [vmem:[#allocation24_spill] sm:$0xff] %v7780_v40 }
 0x1e5   :  { %v3817_v9 = vadd.f32 %v3816_v50, %v7757_v47  ;;  %v7786_v50 = vpop.f32.mrf.mxu0  ;;  %v3766_v61 = vadd.f32 %v3765_v32, %v7770_v13  ;;  %v7792_v8 = vpop.f32.mrf.mxu1  ;;  %v3982_v19 = vadd.f32 %v3981_v41, %v3877_v44 }
 0x1e6   :  { %9036 = vst [vmem:[#allocation25_spill] sm:$0xff] %v7792_v8 }
 0x1e7   :  { %v3818_v34 = vadd.f32 %v3817_v9, %v7768_v12  ;;  %v3915_v9 = vmul.f32 %v7651_v38, %v7651_v38  ;;  %v3767_v20 = vadd.f32 %v3766_v61, %v7774_v24  ;;  %v7797_v27 = vpop.f32.mrf.mxu0  ;;  %v7799_v35 = vpop.f32.mrf.mxu1  ;;  %v3983_v32 = vadd.f32 %v3982_v19, %v3878_v2 }
 0x1e8   :  { %9037 = vst [vmem:[#allocation26_spill] sm:$0xff] %v7797_v27  ;;  %v3880_v49 = vmul.f32 %v7799_v35, %v7799_v35  ;;  %v3917_v2 = vmul.f32 %v7670_v51, %v7670_v51 }
 0x1e9   :  { %v3819_v62 = vadd.f32 %v3818_v34, %v7780_v40  ;;  %v3879_v34 = vmul.f32 %v7786_v50, %v7786_v50  ;;  %v4021_v21 = vadd.f32 %v4020_v28, %v3915_v9  ;;  %v3768_v38 = vadd.f32 %v3767_v20, %v7786_v50  ;;  %v7808_v44 = vpop.f32.mrf.mxu0  ;;  %v7810_v61 = vpop.f32.mrf.mxu1 }
 0x1ea   :  { %9038 = vst [vmem:[#allocation27_spill] sm:$0xff] %v7808_v44 }
 0x1eb   :  { %v3820_v29 = vadd.f32 %v3819_v62, %v7792_v8  ;;  %v3984_v11 = vadd.f32 %v3983_v32, %v3879_v34  ;;  %v7814_v52 = vpop.f32.mrf.mxu0  ;;  %v4022_v62 = vadd.f32 %v4021_v21, %v3916_v14  ;;  %v3769_v9 = vadd.f32 %v3768_v38, %v7799_v35  ;;  %v7820_v20 = vpop.f32.mrf.mxu1 }
 0x1ec   :  { %9039 = vst [vmem:[#allocation28_spill] sm:$0xff] %v7814_v52  ;;  %9040 = vst [vmem:[#allocation29_spill] sm:$0xff] %v7820_v20  ;;  %v3918_v32 = vmul.f32 %v7680_v0, %v7680_v0  ;;  %v3882_v38 = vmul.f32 %v7814_v52, %v7814_v52 }
 0x1ed   :  { %v3821_v41 = vadd.f32 %v3820_v29, %v7797_v27  ;;  %v3985_v28 = vadd.f32 %v3984_v11, %v3880_v49  ;;  %v3881_v29 = vmul.f32 %v7810_v61, %v7810_v61  ;;  %v7826_v34 = vpop.f32.mrf.mxu0  ;;  %v4023_v45 = vadd.f32 %v4022_v62, %v3917_v2 }
 0x1ee   :  { %9041 = vst [vmem:[#allocation30_spill] sm:$0xff] %v7826_v34  ;;  %v3770_v14 = vadd.f32 %v3769_v9, %v7810_v61  ;;  %v3919_v11 = vmul.f32 %v7683_v5, %v7683_v5 }
 0x1ef   :  { %v3822_v19 = vadd.f32 %v3821_v41, %v7808_v44  ;;  %v7832_v41 = vpop.f32.mrf.mxu1  ;;  %v3986_v49 = vadd.f32 %v3985_v28, %v3881_v29  ;;  %v7837_v3 = vpop.f32.mrf.mxu0  ;;  %v4024_v62 = vadd.f32 %v4023_v45, %v3918_v32 }
 0x1f0   :  { %9042 = vst [vmem:[#allocation31_spill] sm:$0xff] %v7832_v41  ;;  %v3771_v51 = vadd.f32 %v3770_v14, %v7814_v52  ;;  %9043 = vst [vmem:[#allocation32_spill] sm:$0xff] %v7837_v3 }
 0x1f1   :  { %v3823_v21 = vadd.f32 %v3822_v19, %v7820_v20  ;;  %v7839_v0 = vpop.f32.mrf.mxu1  ;;  %v3987_v9 = vadd.f32 %v3986_v49, %v3882_v38  ;;  %v3883_v19 = vmul.f32 %v7826_v34, %v7826_v34  ;;  %v4025_v59 = vadd.f32 %v4024_v62, %v3919_v11  ;;  %v7848_v29 = vpop.f32.mrf.mxu0 }
 0x1f2   :  { %9044 = vst [vmem:[#allocation33_spill] sm:$0xff] %v7839_v0  ;;  %v3772_v5 = vadd.f32 %v3771_v51, %v7826_v34  ;;  %9045 = vst [vmem:[#allocation34_spill] sm:$0xff] %v7848_v29  ;;  %v3884_v45 = vmul.f32 %v7839_v0, %v7839_v0  ;;  %v3921_v38 = vmul.f32 %v7702_v26, %v7702_v26 }
 0x1f3   :  { %v3824_v2 = vadd.f32 %v3823_v21, %v7832_v41  ;;  %v7850_v14 = vpop.f32.mrf.mxu1  ;;  %v3988_v52 = vadd.f32 %v3987_v9, %v3883_v19  ;;  %v7854_v32 = vpop.f32.mrf.mxu0  ;;  %v4026_v21 = vadd.f32 %v4025_v59, %v3920_v54  ;;  %v3922_v9 = vmul.f32 %v7712_v37, %v7712_v37 }
 0x1f4   :  { %9046 = vst [vmem:[#allocation35_spill] sm:$0xff] %v7850_v14  ;;  %9047 = vst [vmem:[#allocation36_spill] sm:$0xff] %v7854_v32  ;;  %v3773_v11 = vadd.f32 %v3772_v5, %v7839_v0  ;;  %v3886_v5 = vmul.f32 %v7854_v32, %v7854_v32  ;;  %v3924_v34 = vmul.f32 %v7726_v56, %v7726_v56 }
 0x1f5   :  { %v3825_v28 = vadd.f32 %v3824_v2, %v7837_v3  ;;  %v7860_v49 = vpop.f32.mrf.mxu1  ;;  %v3989_v62 = vadd.f32 %v3988_v52, %v3884_v45  ;;  %v3885_v2 = vmul.f32 %v7850_v14, %v7850_v14  ;;  %v7866_v19 = vpop.f32.mrf.mxu0  ;;  %v4027_v17 = vadd.f32 %v4026_v21, %v3921_v38 }
 0x1f6   :  { %9048 = vst [vmem:[#allocation37_spill] sm:$0xff] %v7860_v49  ;;  %9049 = vst [vmem:[#allocation38_spill] sm:$0xff] %v7866_v19  ;;  %v3774_v54 = vadd.f32 %v3773_v11, %v7850_v14  ;;  %v3923_v52 = vmul.f32 %v7715_v42, %v7715_v42 }
 0x1f7   :  { %v3826_v51 = vadd.f32 %v3825_v28, %v7848_v29  ;;  %v7872_v28 = vpop.f32.mrf.mxu1  ;;  %v3990_v45 = vadd.f32 %v3989_v62, %v3885_v2  ;;  %v7877_v0 = vpop.f32.mrf.mxu0  ;;  %v4028_v21 = vadd.f32 %v4027_v17, %v3922_v9 }
 0x1f8   :  { %9050 = vst [vmem:[#allocation39_spill] sm:$0xff] %v7872_v28  ;;  %v3775_v26 = vadd.f32 %v3774_v54, %v7854_v32  ;;  %9051 = vst [vmem:[#allocation40_spill] sm:$0xff] %v7877_v0 }
 0x1f9   :  { %v3827_v59 = vadd.f32 %v3826_v51, %v7860_v49  ;;  %v7879_v37 = vpop.f32.mrf.mxu1  ;;  %v3991_v11 = vadd.f32 %v3990_v45, %v3886_v5  ;;  %v3887_v51 = vmul.f32 %v7866_v19, %v7866_v19  ;;  %v4029_v14 = vadd.f32 %v4028_v21, %v3923_v52  ;;  %v7888_v2 = vpop.f32.mrf.mxu0 }
 0x1fa   :  { %9052 = vst [vmem:[#allocation41_spill] sm:$0xff] %v7879_v37  ;;  %v3776_v42 = vadd.f32 %v3775_v26, %v7866_v19  ;;  %9053 = vst [vmem:[#allocation42_spill] sm:$0xff] %v7888_v2  ;;  %v3888_v17 = vmul.f32 %v7879_v37, %v7879_v37  ;;  %v3925_v5 = vmul.f32 %v7740_v16, %v7740_v16 }
 0x1fb   :  { %v3828_v38 = vadd.f32 %v3827_v59, %v7872_v28  ;;  %v7890_v54 = vpop.f32.mrf.mxu1  ;;  %v3992_v32 = vadd.f32 %v3991_v11, %v3887_v51  ;;  %v4030_v59 = vadd.f32 %v4029_v14, %v3924_v34  ;;  %v3926_v11 = vmul.f32 %v7752_v36, %v7752_v36 }
 0x1fc   :  { %9054 = vst [vmem:[#allocation43_spill] sm:$0xff] %v7890_v54  ;;  %v3777_v52 = vadd.f32 %v3776_v42, %v7879_v37  ;;  %v3928_v19 = vmul.f32 %v7768_v12, %v7768_v12 }
 0x1fd   :  { %v3829_v62 = vadd.f32 %v3828_v38, %v7877_v0  ;;  %v7900_v45 = vpop.f32.mrf.mxu1  ;;  %v3993_v21 = vadd.f32 %v3992_v32, %v3888_v17  ;;  %v3889_v38 = vmul.f32 %v7890_v54, %v7890_v54  ;;  %v4031_v56 = vadd.f32 %v4030_v59, %v3925_v5 }
 0x1fe   :  { %9056 = vst [vmem:[#allocation45_spill] sm:$0xff] %v7900_v45  ;;  %v3778_v34 = vadd.f32 %v3777_v52, %v7890_v54  ;;  %v3927_v32 = vmul.f32 %v7757_v47, %v7757_v47 }
 0x1ff   :  { %v3830_v26 = vadd.f32 %v3829_v62, %v7888_v2  ;;  %v7912_v62 = vpop.f32.mrf.mxu1  ;;  %v3994_v17 = vadd.f32 %v3993_v21, %v3889_v38  ;;  %v4032_v59 = vadd.f32 %v4031_v56, %v3926_v11 }
 0x200   :  { %9058 = vst [vmem:[#allocation47_spill] sm:$0xff] %v7912_v62 }
 0x201   :  { %v3831_v14 = vadd.f32 %v3830_v26, %v7900_v45  ;;  %v4033_v54 = vadd.f32 %v4032_v59, %v3927_v32 }
 0x203   :  { %v7894_v9 = vpop.f32.mrf.mxu0  ;;  %v3832_v5 = vadd.f32 %v3831_v14, %v7912_v62  ;;  %v4034_v14 = vadd.f32 %v4033_v54, %v3928_v19 }
 0x204   :  { %9055 = vst [vmem:[#allocation44_spill] sm:$0xff] %v7894_v9  ;;  %v3890_v42 = vmul.f32 %v7894_v9, %v7894_v9  ;;  %v3779_v16 = vadd.f32 %v3778_v34, %v7894_v9 }
 0x205   :  { %v7906_v51 = vpop.f32.mrf.mxu0  ;;  %v7919_v36 = vpop.f32.mrf.mxu1 }
 0x206   :  { %9057 = vst [vmem:[#allocation46_spill] sm:$0xff] %v7906_v51  ;;  %9060 = vst [vmem:[#allocation49_spill] sm:$0xff] %v7919_v36  ;;  %v3995_v52 = vadd.f32 %v3994_v17, %v3890_v42  ;;  %v3891_v26 = vmul.f32 %v7906_v51, %v7906_v51  ;;  %v3780_v47 = vadd.f32 %v3779_v16, %v7906_v51 }
 0x207   :  { %v7917_v37 = vpop.f32.mrf.mxu0  ;;  %v7930_v34 = vpop.f32.mrf.mxu1  ;;  %v3892_v56 = vmul.f32 %v7919_v36, %v7919_v36  ;;  %v3929_v42 = vmul.f32 %v7780_v40, %v7780_v40  ;;  %v3932_v51 = vmul.f32 %v7808_v44, %v7808_v44 }
 0x208   :  { %9059 = vst [vmem:[#allocation48_spill] sm:$0xff] %v7917_v37  ;;  %v3833_v21 = vadd.f32 %v3832_v5, %v7917_v37  ;;  %9062 = vst [vmem:[#allocation51_spill] sm:$0xff] %v7930_v34  ;;  %v3996_v9 = vadd.f32 %v3995_v52, %v3891_v26  ;;  %v3781_v32 = vadd.f32 %v3780_v47, %v7919_v36 }
 0x209   :  { %v7928_v38 = vpop.f32.mrf.mxu0  ;;  %v7940_v17 = vpop.f32.mrf.mxu1  ;;  %v3893_v5 = vmul.f32 %v7930_v34, %v7930_v34  ;;  %v3930_v52 = vmul.f32 %v7792_v8, %v7792_v8  ;;  %v4035_v12 = vadd.f32 %v4034_v14, %v3929_v42 }
 0x20a   :  { %9061 = vst [vmem:[#allocation50_spill] sm:$0xff] %v7928_v38  ;;  %v3834_v16 = vadd.f32 %v3833_v21, %v7928_v38  ;;  %9064 = vst [vmem:[#allocation53_spill] sm:$0xff] %v7940_v17  ;;  %v3997_v59 = vadd.f32 %v3996_v9, %v3892_v56  ;;  %v3782_v19 = vadd.f32 %v3781_v32, %v7930_v34 }
 0x20b   :  { %v7952_v21 = vpop.f32.mrf.mxu1  ;;  %v3931_v9 = vmul.f32 %v7797_v27, %v7797_v27  ;;  %v4036_v14 = vadd.f32 %v4035_v12, %v3930_v52 }
 0x20c   :  { %v3835_v54 = vadd.f32 %v3834_v16, %v7940_v17  ;;  %9066 = vst [vmem:[#allocation55_spill] sm:$0xff] %v7952_v21  ;;  %v3998_v56 = vadd.f32 %v3997_v59, %v3893_v5 }
 0x20d   :  { %v4037_v34 = vadd.f32 %v4036_v14, %v3931_v9 }
 0x20e   :  { %v3836_v42 = vadd.f32 %v3835_v54, %v7952_v21 }
 0x20f   :  { %v4038_v54 = vadd.f32 %v4037_v34, %v3932_v51 }
 0x223   :  { %v7934_v11 = vpop.f32.mrf.mxu0 }
 0x224   :  { %9063 = vst [vmem:[#allocation52_spill] sm:$0xff] %v7934_v11  ;;  %v3894_v47 = vmul.f32 %v7934_v11, %v7934_v11  ;;  %v3783_v40 = vadd.f32 %v3782_v19, %v7934_v11 }
 0x225   :  { %v7946_v26 = vpop.f32.mrf.mxu0  ;;  %v7959_v8 = vpop.f32.mrf.mxu1 }
 0x226   :  { %9065 = vst [vmem:[#allocation54_spill] sm:$0xff] %v7946_v26  ;;  %9068 = vst [vmem:[#allocation57_spill] sm:$0xff] %v7959_v8  ;;  %v3999_v32 = vadd.f32 %v3998_v56, %v3894_v47  ;;  %v3895_v16 = vmul.f32 %v7946_v26, %v7946_v26  ;;  %v3784_v27 = vadd.f32 %v3783_v40, %v7946_v26 }
 0x227   :  { %v7957_v36 = vpop.f32.mrf.mxu0  ;;  %v7970_v19 = vpop.f32.mrf.mxu1  ;;  %v3896_v12 = vmul.f32 %v7959_v8, %v7959_v8  ;;  %v3933_v47 = vmul.f32 %v7820_v20, %v7820_v20  ;;  %v3936_v26 = vmul.f32 %v7848_v29, %v7848_v29 }
 0x228   :  { %9067 = vst [vmem:[#allocation56_spill] sm:$0xff] %v7957_v36  ;;  %v3837_v59 = vadd.f32 %v3836_v42, %v7957_v36  ;;  %9070 = vst [vmem:[#allocation59_spill] sm:$0xff] %v7970_v19  ;;  %v4000_v11 = vadd.f32 %v3999_v32, %v3895_v16  ;;  %v3785_v9 = vadd.f32 %v3784_v27, %v7959_v8 }
 0x229   :  { %v7968_v5 = vpop.f32.mrf.mxu0  ;;  %v7980_v56 = vpop.f32.mrf.mxu1  ;;  %v3897_v42 = vmul.f32 %v7970_v19, %v7970_v19  ;;  %v3934_v32 = vmul.f32 %v7832_v41, %v7832_v41  ;;  %v4039_v44 = vadd.f32 %v4038_v54, %v3933_v47 }
 0x22a   :  { %9069 = vst [vmem:[#allocation58_spill] sm:$0xff] %v7968_v5  ;;  %v3838_v40 = vadd.f32 %v3837_v59, %v7968_v5  ;;  %9072 = vst [vmem:[#allocation61_spill] sm:$0xff] %v7980_v56  ;;  %v4001_v14 = vadd.f32 %v4000_v11, %v3896_v12  ;;  %v3786_v51 = vadd.f32 %v3785_v9, %v7970_v19 }
 0x22b   :  { %v7992_v59 = vpop.f32.mrf.mxu1  ;;  %v3935_v11 = vmul.f32 %v7837_v3, %v7837_v3  ;;  %v4040_v54 = vadd.f32 %v4039_v44, %v3934_v32 }
 0x22c   :  { %v3839_v34 = vadd.f32 %v3838_v40, %v7980_v56  ;;  %9074 = vst [vmem:[#allocation63_spill] sm:$0xff] %v7992_v59  ;;  %v4002_v12 = vadd.f32 %v4001_v14, %v3897_v42 }
 0x22d   :  { %v4041_v19 = vadd.f32 %v4040_v54, %v3935_v11 }
 0x22e   :  { %v3840_v47 = vadd.f32 %v3839_v34, %v7992_v59 }
 0x22f   :  { %v4042_v34 = vadd.f32 %v4041_v19, %v3936_v26 }
 0x243   :  { %v7974_v52 = vpop.f32.mrf.mxu0 }
 0x244   :  { %9071 = vst [vmem:[#allocation60_spill] sm:$0xff] %v7974_v52  ;;  %v3898_v27 = vmul.f32 %v7974_v52, %v7974_v52  ;;  %v3787_v20 = vadd.f32 %v3786_v51, %v7974_v52 }
 0x245   :  { %v7986_v16 = vpop.f32.mrf.mxu0  ;;  %v7999_v41 = vpop.f32.mrf.mxu1 }
 0x246   :  { %9073 = vst [vmem:[#allocation62_spill] sm:$0xff] %v7986_v16  ;;  %9076 = vst [vmem:[#allocation65_spill] sm:$0xff] %v7999_v41  ;;  %v4003_v9 = vadd.f32 %v4002_v12, %v3898_v27  ;;  %v3899_v40 = vmul.f32 %v7986_v16, %v7986_v16  ;;  %v3788_v3 = vadd.f32 %v3787_v20, %v7986_v16 }
 0x247   :  { %v7997_v8 = vpop.f32.mrf.mxu0  ;;  %v8010_v51 = vpop.f32.mrf.mxu1  ;;  %v3900_v44 = vmul.f32 %v7999_v41, %v7999_v41  ;;  %v3937_v27 = vmul.f32 %v7860_v49, %v7860_v49  ;;  %v3940_v16 = vmul.f32 %v7888_v2, %v7888_v2 }
 0x248   :  { %9075 = vst [vmem:[#allocation64_spill] sm:$0xff] %v7997_v8  ;;  %v3841_v14 = vadd.f32 %v3840_v47, %v7997_v8  ;;  %9078 = vst [vmem:[#allocation67_spill] sm:$0xff] %v8010_v51  ;;  %v4004_v52 = vadd.f32 %v4003_v9, %v3899_v40  ;;  %v3789_v11 = vadd.f32 %v3788_v3, %v7999_v41 }
 0x249   :  { %v8008_v42 = vpop.f32.mrf.mxu0  ;;  %v8020_v12 = vpop.f32.mrf.mxu1  ;;  %v3901_v47 = vmul.f32 %v8010_v51, %v8010_v51  ;;  %v3938_v9 = vmul.f32 %v7872_v28, %v7872_v28  ;;  %v4043_v29 = vadd.f32 %v4042_v34, %v3937_v27 }
 0x24a   :  { %9077 = vst [vmem:[#allocation66_spill] sm:$0xff] %v8008_v42  ;;  %v3842_v20 = vadd.f32 %v3841_v14, %v8008_v42  ;;  %9080 = vst [vmem:[#allocation69_spill] sm:$0xff] %v8020_v12  ;;  %v4005_v54 = vadd.f32 %v4004_v52, %v3900_v44  ;;  %v3790_v26 = vadd.f32 %v3789_v11, %v8010_v51 }
 0x24b   :  { %v8032_v14 = vpop.f32.mrf.mxu1  ;;  %v3939_v52 = vmul.f32 %v7877_v0, %v7877_v0  ;;  %v4044_v34 = vadd.f32 %v4043_v29, %v3938_v9 }
 0x24c   :  { %v3843_v19 = vadd.f32 %v3842_v20, %v8020_v12  ;;  %9081 = vst [vmem:[#allocation70_spill] sm:$0xff] %v8032_v14  ;;  %v4006_v44 = vadd.f32 %v4005_v54, %v3901_v47 }
 0x24d   :  { %v4045_v51 = vadd.f32 %v4044_v34, %v3939_v52 }
 0x24e   :  { %v3844_v27 = vadd.f32 %v3843_v19, %v8032_v14  ;;  %v3941_v19 = vmul.f32 %v7900_v45, %v7900_v45 }
 0x24f   :  { %v4046_v9 = vadd.f32 %v4045_v51, %v3940_v16 }
 0x263   :  { %v8014_v32 = vpop.f32.mrf.mxu0 }
 0x264   :  { %9079 = vst [vmem:[#allocation68_spill] sm:$0xff] %v8014_v32  ;;  %v3902_v3 = vmul.f32 %v8014_v32, %v8014_v32  ;;  %v3791_v49 = vadd.f32 %v3790_v26, %v8014_v32 }
 0x265   :  { %v8026_v40 = vpop.f32.mrf.mxu0  ;;  %v8039_v28 = vpop.f32.mrf.mxu1 }
 0x266   :  { %9083 = vst [vmem:[#allocation72_spill] sm:$0xff] %v8039_v28  ;;  %v4007_v11 = vadd.f32 %v4006_v44, %v3902_v3  ;;  %v3903_v20 = vmul.f32 %v8026_v40, %v8026_v40  ;;  %v3792_v0 = vadd.f32 %v3791_v49, %v8026_v40  ;;  %v3904_v29 = vmul.f32 %v8039_v28, %v8039_v28 }
 0x267   :  { %v8037_v41 = vpop.f32.mrf.mxu0  ;;  %v8050_v26 = vpop.f32.mrf.mxu1 }
 0x268   :  { %9082 = vst [vmem:[#allocation71_spill] sm:$0xff] %v8037_v41  ;;  %v3845_v54 = vadd.f32 %v3844_v27, %v8037_v41  ;;  %9085 = vst [vmem:[#allocation74_spill] sm:$0xff] %v8050_v26  ;;  %v4008_v32 = vadd.f32 %v4007_v11, %v3903_v20  ;;  %v3793_v3 = vadd.f32 %v3792_v0, %v8039_v28 }
 0x269   :  { %v8048_v47 = vpop.f32.mrf.mxu0  ;;  %v8058_v44 = vpop.f32.mrf.mxu1  ;;  %v3905_v49 = vmul.f32 %v8050_v26, %v8050_v26  ;;  %v4047_v27 = vadd.f32 %v4046_v9, %v3941_v19  ;;  %v3942_v11 = vmul.f32 %v7912_v62, %v7912_v62  ;;  %v3943_v0 = vmul.f32 %v7917_v37, %v7917_v37 }
 0x26a   :  { %9084 = vst [vmem:[#allocation73_spill] sm:$0xff] %v8048_v47  ;;  %v3846_v52 = vadd.f32 %v3845_v54, %v8048_v47  ;;  %9086 = vst [vmem:[#allocation75_spill] sm:$0xff] %v8058_v44  ;;  %v4009_v34 = vadd.f32 %v4008_v32, %v3904_v29  ;;  %v3794_v16 = vadd.f32 %v3793_v3, %v8050_v26 }
 0x26b   :  { %v8066_v51 = vpop.f32.mrf.mxu1  ;;  %v4048_v19 = vadd.f32 %v4047_v27, %v3942_v11  ;;  %v3944_v26 = vmul.f32 %v7928_v38, %v7928_v38  ;;  %v3946_v27 = vmul.f32 %v7952_v21, %v7952_v21  ;;  %v3947_v11 = vmul.f32 %v7957_v36, %v7957_v36 }
 0x26c   :  { %v3847_v20 = vadd.f32 %v3846_v52, %v8058_v44  ;;  %9087 = vst [vmem:[#allocation76_spill] sm:$0xff] %v8066_v51  ;;  %v4010_v29 = vadd.f32 %v4009_v34, %v3905_v49  ;;  %v3945_v49 = vmul.f32 %v7940_v17, %v7940_v17 }
 0x26d   :  { %v4049_v2 = vadd.f32 %v4048_v19, %v3943_v0 }
 0x26e   :  { %v3848_v62 = vadd.f32 %v3847_v20, %v8066_v51 }
 0x26f   :  { %v4050_v28 = vadd.f32 %v4049_v2, %v3944_v26  ;;  %v6218_v26 = vmov 1  }
 0x271   :  { %v4051_v34 = vadd.f32 %v4050_v28, %v3945_v49  ;;  %v3949_v28 = vmul.f32 %v7980_v56, %v7980_v56 }
 0x273   :  { %v4052_v20 = vadd.f32 %v4051_v34, %v3946_v27  ;;  %v3953_v34 = vmul.f32 %v8020_v12, %v8020_v12 }
 0x275   :  { %v4053_v0 = vadd.f32 %v4052_v20, %v3947_v11  ;;  %v3954_v11 = vmul.f32 %v8032_v14, %v8032_v14  ;;  %v3955_v20 = vmul.f32 %v8037_v41, %v8037_v41 }
 0x283   :  { %v8068_v45 = vpop.f32.mrf.mxu0 }
 0x284   :  { %v3795_v54 = vadd.f32 %v3794_v16, %v8068_v45  ;;  %v3906_v32 = vmul.f32 %v8068_v45, %v8068_v45 }
 0x285   :  { %v5566_v9 = vpop.f32.mrf.mxu0 }
 0x286   :  { %3796 = vadd.xlane.f32.xlu0 %v3795_v54  ;;  %v4011_v52 = vadd.f32 %v4010_v29, %v3906_v32  ;;  %v3948_v54 = vmul.f32 %v7968_v5, %v7968_v5  ;;  %v3950_v29 = vmul.f32 %v7992_v59, %v7992_v59  ;;  %v3951_v9 = vmul.f32 %v7997_v8, %v7997_v8 }
 0x287   :  { %v8076_v3 = vpop.f32.mrf.mxu0 }
 0x288   :  { %9088 = vst [vmem:[#allocation77_spill] sm:$0xff] %v8076_v3  ;;  %4012 = vadd.xlane.f32.xlu1 %v4011_v52  ;;  %v3849_v37 = vadd.f32 %v3848_v62, %v8076_v3  ;;  %v4054_v2 = vadd.f32 %v4053_v0, %v3948_v54  ;;  %v3742_v62 = vld [vmem:[%s8932_s2] sm:$0xff] }
 0x289   :  { %v5567_v16 = vpop.f32.mrf.mxu0 }
 0x28a   :  { %3850 = vadd.xlane.f32.xlu0 %v3849_v37  ;;  %v3743_v37 = vld [vmem:[%s8932_s2 + $0x8] sm:$0xff]  ;;  %v4055_v32 = vadd.f32 %v4054_v2, %v3949_v28  ;;  %v3952_v16 = vmul.f32 %v8008_v42, %v8008_v42  ;;  %v3956_v2 = vmul.f32 %v8048_v47, %v8048_v47 }
 0x28c   :  { %v4056_v19 = vadd.f32 %v4055_v32, %v3950_v29  ;;  %v3959_v29 = vmul.f32 %v8076_v3, %v8076_v3 }
 0x28e   :  { %v4057_v52 = vadd.f32 %v4056_v19, %v3951_v9 }
 0x290   :  { %v4058_v49 = vadd.f32 %v4057_v52, %v3952_v16 }
 0x292   :  { %v4059_v27 = vadd.f32 %v4058_v49, %v3953_v34 }
 0x294   :  { %v4060_v0 = vadd.f32 %v4059_v27, %v3954_v11 }
 0x296   :  { %v4061_v54 = vadd.f32 %v4060_v0, %v3955_v20 }
 0x298   :  { %v4062_v28 = vadd.f32 %v4061_v54, %v3956_v2 }
 0x299   :  { %4299 = vperm.xlu1 %5573, %v3743_v37  }
 0x29d   :  { %5574 = vset.pattern.permute.xlu1 %v6218_v26 }
 0x29e   :  { %4409 = vperm.xlu1 %5574, %v3742_v62  }
 0x2a0   :  { %4294 = vperm.xlu0 %5572, %v3742_v62   ;;  %v3957_v62 = vmul.f32 %v8058_v44, %v8058_v44 }
 0x2a2   :  { %v4063_v32 = vadd.f32 %v4062_v28, %v3957_v62 }
 0x2a4   :  { %5575 = vset.pattern.permute.xlu0 %v6218_v26  ;;  %v3958_v26 = vmul.f32 %v8066_v51, %v8066_v51 }
 0x2a6   :  { %v4064_v9 = vadd.f32 %v4063_v32, %v3958_v26 }
 0x2a8   :  { %v4065_v19 = vadd.f32 %v4064_v9, %v3959_v29 }
 0x2c2   :  { %4066 = vadd.xlane.f32.xlu1 %v4065_v19 }
 0x2d3   :  { %4413 = vperm.xlu1 %5574, %v3743_v37  }
 0x30f   :  { %v3797_v52 = vpop.xlane.xlu0 %3796 }
 0x310   :  { %v8117_v16 = vmul.f32 0.00014863258, %v3797_v52 }
 0x311   :  { %v4013_v49 = vpop.xlane.xlu1 %4012 }
 0x312   :  { %v4068_v34 = vmul.f32 0.00014863258, %v4013_v49  ;;  %v4070_v27 = vmul.f32 %v8117_v16, %v8117_v16  ;;  %v4076_v2 = vsub.f32 %v7581_v53, %v8117_v16  ;;  %v4077_v28 = vsub.f32 %v7583_v10, %v8117_v16 }
 0x313   :  { %v3851_v54 = vpop.xlane.xlu0 %3850  ;;  %v4078_v37 = vsub.f32 %v7587_v55, %v8117_v16  ;;  %v4079_v26 = vsub.f32 %v7597_v60, %v8117_v16  ;;  %v4080_v32 = vsub.f32 %v7601_v63, %v8117_v16  ;;  %v4081_v29 = vsub.f32 %v7610_v6, %v8117_v16 }
 0x314   :  { %v4072_v11 = vsub.f32 %v4068_v34, %v4070_v27  ;;  %v8127_v62 = vmul.f32 0.00014863258, %v3851_v54  ;;  %v4082_v53 = vsub.f32 %v7621_v15, %v8117_v16  ;;  %v4083_v10 = vsub.f32 %v7630_v22, %v8117_v16 }
 0x315   :  { %v4084_v55 = vsub.f32 %v7634_v1, %v8117_v16  ;;  %v4085_v9 = vsub.f32 %v7642_v30, %v8117_v16  ;;  %v4086_v60 = vsub.f32 %v7653_v39, %v8117_v16  ;;  %v4087_v63 = vsub.f32 %v7662_v46, %v8117_v16 }
 0x316   :  { %v4074_v20 = vmax.f32 %v4072_v11, 0.0  ;;  %9089 = vst [vmem:[#allocation78_spill] sm:$0xff] %v8127_v62  ;;  %v4088_v6 = vsub.f32 %v7666_v33, %v8117_v16  ;;  %v4089_v15 = vsub.f32 %v7674_v57, %v8117_v16  ;;  %v4090_v22 = vsub.f32 %v7685_v7, %v8117_v16 }
 0x317   :  { %v4091_v1 = vsub.f32 %v7694_v18, %v8117_v16  ;;  %v4092_v30 = vsub.f32 %v7698_v23, %v8117_v16  ;;  %v4093_v39 = vsub.f32 %v7706_v31, %v8117_v16  ;;  %v4094_v46 = vsub.f32 %v7717_v43, %v8117_v16 }
 0x318   :  { %v4182_v0 = vadd.f32 1e-05, %v4074_v20  ;;  %v4095_v33 = vsub.f32 %v7728_v58, %v8117_v16  ;;  %v4096_v57 = vsub.f32 %v7734_v4, %v8117_v16  ;;  %v4097_v7 = vsub.f32 %v7746_v25, %v8117_v16  ;;  %v9090_v25 = vld [vmem:[#allocation28_spill] sm:$0xff] }
 0x319   :  { %v4098_v18 = vsub.f32 %v7759_v48, %v8117_v16  ;;  %v4099_v23 = vsub.f32 %v7770_v13, %v8117_v16  ;;  %v4100_v31 = vsub.f32 %v7774_v24, %v8117_v16  ;;  %v4101_v43 = vsub.f32 %v7786_v50, %v8117_v16  ;;  %v9091_v48 = vld [vmem:[#allocation30_spill] sm:$0xff]  ;;  %v9092_v13 = vld [vmem:[#allocation33_spill] sm:$0xff]  ;;  %v9093_v24 = vld [vmem:[#allocation35_spill] sm:$0xff] }
 0x31a   :  { %6209 = vrsqrt.f32 %v4182_v0  ;;  %v4102_v58 = vsub.f32 %v7799_v35, %v8117_v16  ;;  %v4103_v4 = vsub.f32 %v7810_v61, %v8117_v16  ;;  %v4104_v19 = vsub.f32 %v9090_v25, %v8117_v16  ;;  %v9094_v50 = vld [vmem:[#allocation36_spill] sm:$0xff]  ;;  %v9095_v35 = vld [vmem:[#allocation38_spill] sm:$0xff]  ;;  %v9096_v61 = vld [vmem:[#allocation41_spill] sm:$0xff] }
 0x31b   :  { %v4105_v52 = vsub.f32 %v9091_v48, %v8117_v16  ;;  %v4106_v49 = vsub.f32 %v9092_v13, %v8117_v16  ;;  %v4107_v34 = vsub.f32 %v9093_v24, %v8117_v16  ;;  %v4108_v27 = vsub.f32 %v9094_v50, %v8117_v16  ;;  %v9097_v0 = vld [vmem:[#allocation43_spill] sm:$0xff]  ;;  %v9098_v25 = vld [vmem:[#allocation44_spill] sm:$0xff]  ;;  %v9099_v13 = vld [vmem:[#allocation46_spill] sm:$0xff] }
 0x31c   :  { %v4109_v11 = vsub.f32 %v9095_v35, %v8117_v16  ;;  %v4110_v20 = vsub.f32 %v9096_v61, %v8117_v16  ;;  %v4111_v54 = vsub.f32 %v9097_v0, %v8117_v16  ;;  %v4112_v48 = vsub.f32 %v9098_v25, %v8117_v16  ;;  %v9100_v24 = vld [vmem:[#allocation49_spill] sm:$0xff]  ;;  %v9101_v50 = vld [vmem:[#allocation51_spill] sm:$0xff]  ;;  %v9102_v35 = vld [vmem:[#allocation52_spill] sm:$0xff] }
 0x31d   :  { %v4113_v3 = vsub.f32 %v9099_v13, %v8117_v16  ;;  %v4114_v51 = vsub.f32 %v9100_v24, %v8117_v16  ;;  %v4115_v44 = vsub.f32 %v9101_v50, %v8117_v16  ;;  %v4116_v47 = vsub.f32 %v9102_v35, %v8117_v16  ;;  %v9103_v61 = vld [vmem:[#allocation54_spill] sm:$0xff]  ;;  %v9104_v0 = vld [vmem:[#allocation57_spill] sm:$0xff]  ;;  %v9105_v25 = vld [vmem:[#allocation59_spill] sm:$0xff] }
 0x31e   :  { %v4117_v41 = vsub.f32 %v9103_v61, %v8117_v16  ;;  %v4118_v14 = vsub.f32 %v9104_v0, %v8117_v16  ;;  %v4119_v12 = vsub.f32 %v9105_v25, %v8117_v16  ;;  %v9106_v13 = vld [vmem:[#allocation60_spill] sm:$0xff]  ;;  %v9107_v24 = vld [vmem:[#allocation62_spill] sm:$0xff]  ;;  %v9108_v50 = vld [vmem:[#allocation65_spill] sm:$0xff]  ;;  %v4125_v0 = vsub.f32 %v8026_v40, %v8117_v16 }
 0x31f   :  { %v4120_v42 = vsub.f32 %v9106_v13, %v8117_v16  ;;  %v4121_v8 = vsub.f32 %v9107_v24, %v8117_v16  ;;  %v4122_v59 = vsub.f32 %v9108_v50, %v8117_v16  ;;  %v9109_v35 = vld [vmem:[#allocation67_spill] sm:$0xff]  ;;  %v9110_v61 = vld [vmem:[#allocation68_spill] sm:$0xff]  ;;  %v9112_v13 = vld [vmem:[#allocation74_spill] sm:$0xff]  ;;  %v4128_v24 = vsub.f32 %v8068_v45, %v8117_v16 }
 0x320   :  { %v4123_v56 = vsub.f32 %v9109_v35, %v8117_v16  ;;  %v4124_v5 = vsub.f32 %v9110_v61, %v8117_v16  ;;  %v9111_v25 = vld [vmem:[#allocation72_spill] sm:$0xff]  ;;  %v4127_v17 = vsub.f32 %v9112_v13, %v8117_v16  ;;  %v8231_v50 = vmul.f32 %v8127_v62, %v8127_v62 }
 0x321   :  { %v4126_v21 = vsub.f32 %v9111_v25, %v8117_v16 }
 0x322   :  { %9113 = vst [vmem:[#allocation28_spill] sm:$0xff] %v8231_v50 }
 0x327   :  { %v6210_v36 = vpop.eup %6209 }
 0x328   :  { %v4186_v35 = vmul.f32 %v6210_v36, %v4076_v2  ;;  %v4187_v38 = vmul.f32 %v6210_v36, %v4077_v28  ;;  %v4188_v61 = vmul.f32 %v6210_v36, %v4078_v37  ;;  %v4189_v40 = vmul.f32 %v6210_v36, %v4079_v26 }
 0x329   :  { %v4190_v25 = vmul.f32 %v6210_v36, %v4080_v32  ;;  %v4191_v13 = vmul.f32 %v6210_v36, %v4081_v29  ;;  %v4192_v16 = vmul.f32 %v6210_v36, %v4082_v53  ;;  %v4193_v45 = vmul.f32 %v6210_v36, %v4083_v10 }
 0x32a   :  { %v4194_v62 = vmul.f32 %v6210_v36, %v4084_v55  ;;  %v4195_v50 = vmul.f32 %v6210_v36, %v4085_v9  ;;  %v4196_v2 = vmul.f32 %v6210_v36, %v4086_v60  ;;  %v4197_v28 = vmul.f32 %v6210_v36, %v4087_v63 }
 0x32b   :  { %v4198_v37 = vmul.f32 %v6210_v36, %v4088_v6  ;;  %v4199_v26 = vmul.f32 %v6210_v36, %v4089_v15  ;;  %v4200_v32 = vmul.f32 %v6210_v36, %v4090_v22  ;;  %v4201_v29 = vmul.f32 %v6210_v36, %v4091_v1 }
 0x32c   :  { %v4202_v53 = vmul.f32 %v6210_v36, %v4092_v30  ;;  %v4203_v10 = vmul.f32 %v6210_v36, %v4093_v39  ;;  %v4204_v55 = vmul.f32 %v6210_v36, %v4094_v46  ;;  %v4205_v9 = vmul.f32 %v6210_v36, %v4095_v33 }
 0x32d   :  { %v4206_v60 = vmul.f32 %v6210_v36, %v4096_v57  ;;  %v4207_v63 = vmul.f32 %v6210_v36, %v4097_v7  ;;  %v4208_v6 = vmul.f32 %v6210_v36, %v4098_v18  ;;  %v4209_v15 = vmul.f32 %v6210_v36, %v4099_v23 }
 0x32e   :  { %v4210_v22 = vmul.f32 %v6210_v36, %v4100_v31  ;;  %v4211_v1 = vmul.f32 %v6210_v36, %v4101_v43  ;;  %v4212_v30 = vmul.f32 %v6210_v36, %v4102_v58  ;;  %v4213_v39 = vmul.f32 %v6210_v36, %v4103_v4 }
 0x32f   :  { %v4214_v46 = vmul.f32 %v6210_v36, %v4104_v19  ;;  %v4215_v33 = vmul.f32 %v6210_v36, %v4105_v52  ;;  %v4216_v57 = vmul.f32 %v6210_v36, %v4106_v49  ;;  %v4217_v7 = vmul.f32 %v6210_v36, %v4107_v34 }
 0x330   :  { %v4218_v18 = vmul.f32 %v6210_v36, %v4108_v27  ;;  %v4219_v23 = vmul.f32 %v6210_v36, %v4109_v11  ;;  %v4220_v31 = vmul.f32 %v6210_v36, %v4110_v20  ;;  %v4221_v43 = vmul.f32 %v6210_v36, %v4111_v54  ;;  %v8233_v20 = vpop.permute.xlu0 %4294 }
 0x331   :  { %v4222_v58 = vmul.f32 %v6210_v36, %v4112_v48  ;;  %v4223_v4 = vmul.f32 %v6210_v36, %v4113_v3  ;;  %v4224_v19 = vmul.f32 %v6210_v36, %v4114_v51  ;;  %v4225_v52 = vmul.f32 %v6210_v36, %v4115_v44 }
 0x332   :  { %v4226_v49 = vmul.f32 %v6210_v36, %v4116_v47  ;;  %v4227_v34 = vmul.f32 %v6210_v36, %v4117_v41  ;;  %v4228_v27 = vmul.f32 %v6210_v36, %v4118_v14  ;;  %v4229_v11 = vmul.f32 %v6210_v36, %v4119_v12 }
 0x333   :  { %v4230_v54 = vmul.f32 %v6210_v36, %v4120_v42  ;;  %v4231_v48 = vmul.f32 %v6210_v36, %v4121_v8  ;;  %v4232_v3 = vmul.f32 %v6210_v36, %v4122_v59  ;;  %v4233_v51 = vmul.f32 %v6210_v36, %v4123_v56 }
 0x334   :  { %v4234_v44 = vmul.f32 %v6210_v36, %v4124_v5  ;;  %v4235_v47 = vmul.f32 %v6210_v36, %v4125_v0  ;;  %v4236_v41 = vmul.f32 %v6210_v36, %v4126_v21  ;;  %v4237_v14 = vmul.f32 %v6210_v36, %v4127_v17 }
 0x335   :  { %v4238_v12 = vmul.f32 %v6210_v36, %v4128_v24  ;;  %v4302_v42 = vmul.f32 %v8233_v20, %v4186_v35  ;;  %v4303_v8 = vmul.f32 %v8233_v20, %v4187_v38  ;;  %v4304_v59 = vmul.f32 %v8233_v20, %v4188_v61 }
 0x336   :  { %v4305_v56 = vmul.f32 %v8233_v20, %v4189_v40  ;;  %v4306_v5 = vmul.f32 %v8233_v20, %v4190_v25  ;;  %v4307_v0 = vmul.f32 %v8233_v20, %v4191_v13  ;;  %v4308_v21 = vmul.f32 %v8233_v20, %v4192_v16 }
 0x337   :  { %v4309_v17 = vmul.f32 %v8233_v20, %v4193_v45  ;;  %v4310_v24 = vmul.f32 %v8233_v20, %v4194_v62  ;;  %v4311_v36 = vmul.f32 %v8233_v20, %v4195_v50  ;;  %v4312_v35 = vmul.f32 %v8233_v20, %v4196_v2 }
 0x338   :  { %v4313_v38 = vmul.f32 %v8233_v20, %v4197_v28  ;;  %v4314_v61 = vmul.f32 %v8233_v20, %v4198_v37  ;;  %v4315_v40 = vmul.f32 %v8233_v20, %v4199_v26  ;;  %v4316_v25 = vmul.f32 %v8233_v20, %v4200_v32  ;;  %v8258_v26 = vpop.permute.xlu1 %4299 }
 0x339   :  { %v4317_v13 = vmul.f32 %v8233_v20, %v4201_v29  ;;  %v4318_v16 = vmul.f32 %v8233_v20, %v4202_v53  ;;  %v4319_v45 = vmul.f32 %v8233_v20, %v4203_v10  ;;  %v4320_v62 = vmul.f32 %v8233_v20, %v4204_v55  ;;  %9114 = vst [vmem:[#allocation30_spill] sm:$0xff] %v8258_v26 }
 0x33a   :  { %v4321_v50 = vmul.f32 %v8233_v20, %v4205_v9  ;;  %v4322_v2 = vmul.f32 %v8233_v20, %v4206_v60  ;;  %v4323_v28 = vmul.f32 %v8233_v20, %v4207_v63  ;;  %v4324_v37 = vmul.f32 %v8233_v20, %v4208_v6 }
 0x33b   :  { %v4325_v32 = vmul.f32 %v8233_v20, %v4209_v15  ;;  %v4326_v29 = vmul.f32 %v8233_v20, %v4210_v22  ;;  %v4327_v53 = vmul.f32 %v8233_v20, %v4211_v1  ;;  %v4328_v10 = vmul.f32 %v8233_v20, %v4212_v30 }
 0x33c   :  { %v4329_v55 = vmul.f32 %v8233_v20, %v4213_v39  ;;  %v4330_v9 = vmul.f32 %v8233_v20, %v4214_v46  ;;  %v4331_v60 = vmul.f32 %v8233_v20, %v4215_v33  ;;  %v4332_v63 = vmul.f32 %v8233_v20, %v4216_v57 }
 0x33d   :  { %v4333_v6 = vmul.f32 %v8233_v20, %v4217_v7  ;;  %v4334_v26 = vmul.f32 %v8233_v20, %v4218_v18  ;;  %v4335_v15 = vmul.f32 %v8233_v20, %v4219_v23  ;;  %v4336_v22 = vmul.f32 %v8233_v20, %v4220_v31 }
 0x33e   :  { %v4337_v1 = vmul.f32 %v8233_v20, %v4221_v43  ;;  %v4338_v30 = vmul.f32 %v8233_v20, %v4222_v58  ;;  %v4339_v39 = vmul.f32 %v8233_v20, %v4223_v4  ;;  %v4340_v46 = vmul.f32 %v8233_v20, %v4224_v19  ;;  %v4410_v4 = vpop.permute.xlu1 %4409 }
 0x33f   :  { %v4341_v33 = vmul.f32 %v8233_v20, %v4225_v52  ;;  %v4342_v57 = vmul.f32 %v8233_v20, %v4226_v49  ;;  %v4343_v7 = vmul.f32 %v8233_v20, %v4227_v34  ;;  %v4344_v18 = vmul.f32 %v8233_v20, %v4228_v27 }
 0x340   :  { %v4345_v23 = vmul.f32 %v8233_v20, %v4229_v11  ;;  %v4346_v31 = vmul.f32 %v8233_v20, %v4230_v54  ;;  %v4347_v43 = vmul.f32 %v8233_v20, %v4231_v48  ;;  %v4348_v58 = vmul.f32 %v8233_v20, %v4232_v3 }
 0x341   :  { %v4349_v19 = vmul.f32 %v8233_v20, %v4233_v51  ;;  %v4350_v52 = vmul.f32 %v8233_v20, %v4234_v44  ;;  %v4351_v49 = vmul.f32 %v8233_v20, %v4235_v47  ;;  %v4352_v34 = vmul.f32 %v8233_v20, %v4236_v41 }
 0x342   :  { %v4353_v27 = vmul.f32 %v8233_v20, %v4237_v14  ;;  %v4354_v11 = vmul.f32 %v8233_v20, %v4238_v12  ;;  %v8290_v54 = vadd.f32 %v4410_v4, %v4302_v42  ;;  %v8292_v48 = vadd.f32 %v4410_v4, %v4303_v8 }
 0x343   :  { %v8294_v3 = vadd.f32 %v4410_v4, %v4304_v59  ;;  %v8296_v51 = vadd.f32 %v4410_v4, %v4305_v56  ;;  %v8298_v44 = vadd.f32 %v4410_v4, %v4306_v5  ;;  %v8300_v47 = vadd.f32 %v4410_v4, %v4307_v0 }
 0x344   :  { %v8302_v41 = vadd.f32 %v4410_v4, %v4308_v21  ;;  %v8304_v14 = vadd.f32 %v4410_v4, %v4309_v17  ;;  %v8306_v12 = vadd.f32 %v4410_v4, %v4310_v24  ;;  %v8308_v20 = vadd.f32 %v4410_v4, %v4311_v36 }
 0x345   :  { %v8310_v42 = vadd.f32 %v4410_v4, %v4312_v35  ;;  %v8312_v8 = vadd.f32 %v4410_v4, %v4313_v38  ;;  %v8314_v59 = vadd.f32 %v4410_v4, %v4314_v61  ;;  %v8316_v56 = vadd.f32 %v4410_v4, %v4315_v40 }
 0x346   :  { %v8318_v5 = vadd.f32 %v4410_v4, %v4316_v25  ;;  %v8320_v0 = vadd.f32 %v4410_v4, %v4317_v13  ;;  %v8322_v21 = vadd.f32 %v4410_v4, %v4318_v16  ;;  %v8324_v17 = vadd.f32 %v4410_v4, %v4319_v45 }
 0x347   :  { %v8326_v24 = vadd.f32 %v4410_v4, %v4320_v62  ;;  %v8328_v36 = vadd.f32 %v4410_v4, %v4321_v50  ;;  %v8330_v35 = vadd.f32 %v4410_v4, %v4322_v2  ;;  %v8332_v38 = vadd.f32 %v4410_v4, %v4323_v28 }
 0x348   :  { %v8334_v61 = vadd.f32 %v4410_v4, %v4324_v37  ;;  %v8336_v40 = vadd.f32 %v4410_v4, %v4325_v32  ;;  %v8338_v25 = vadd.f32 %v4410_v4, %v4326_v29  ;;  %v8340_v13 = vadd.f32 %v4410_v4, %v4327_v53 }
 0x349   :  { %v8342_v16 = vadd.f32 %v4410_v4, %v4328_v10  ;;  %v8344_v45 = vadd.f32 %v4410_v4, %v4329_v55  ;;  %v8346_v62 = vadd.f32 %v4410_v4, %v4330_v9  ;;  %v8348_v50 = vadd.f32 %v4410_v4, %v4331_v60 }
 0x34a   :  { %v8350_v2 = vadd.f32 %v4410_v4, %v4332_v63  ;;  %v8352_v28 = vadd.f32 %v4410_v4, %v4333_v6  ;;  %v8354_v37 = vadd.f32 %v4410_v4, %v4334_v26  ;;  %v8356_v32 = vadd.f32 %v4410_v4, %v4335_v15 }
 0x34b   :  { %v8358_v29 = vadd.f32 %v4410_v4, %v4336_v22  ;;  %v8360_v53 = vadd.f32 %v4410_v4, %v4337_v1  ;;  %v8362_v10 = vadd.f32 %v4410_v4, %v4338_v30  ;;  %v8364_v55 = vadd.f32 %v4410_v4, %v4339_v39 }
 0x34c   :  { %v8366_v9 = vadd.f32 %v4410_v4, %v4340_v46  ;;  %v8368_v60 = vadd.f32 %v4410_v4, %v4341_v33  ;;  %v8370_v63 = vadd.f32 %v4410_v4, %v4342_v57  ;;  %v8372_v6 = vadd.f32 %v4410_v4, %v4343_v7 }
 0x34d   :  { %v8374_v26 = vadd.f32 %v4410_v4, %v4344_v18  ;;  %v8376_v15 = vadd.f32 %v4410_v4, %v4345_v23  ;;  %v8378_v22 = vadd.f32 %v4410_v4, %v4346_v31  ;;  %v8380_v1 = vadd.f32 %v4410_v4, %v4347_v43 }
 0x34e   :  { %v8382_v30 = vadd.f32 %v4410_v4, %v4348_v58  ;;  %v8384_v39 = vadd.f32 %v4410_v4, %v4349_v19  ;;  %v8386_v46 = vadd.f32 %v4410_v4, %v4350_v52  ;;  %v8388_v33 = vadd.f32 %v4410_v4, %v4351_v49 }
 0x34f   :  { %v8390_v57 = vadd.f32 %v4410_v4, %v4352_v34  ;;  %v8392_v7 = vadd.f32 %v4410_v4, %v4353_v27  ;;  %v8394_v18 = vadd.f32 %v4410_v4, %v4354_v11  ;;  %v4522_v23 = vmax.f32 %v8290_v54, 0.0 }
 0x350   :  { %v4523_v31 = vmax.f32 %v8292_v48, 0.0  ;;  %v4524_v43 = vmax.f32 %v8294_v3, 0.0  ;;  %v4525_v58 = vmax.f32 %v8296_v51, 0.0  ;;  %v4526_v19 = vmax.f32 %v8298_v44, 0.0 }
 0x351   :  { %v4527_v52 = vmax.f32 %v8300_v47, 0.0  ;;  %v4528_v49 = vmax.f32 %v8302_v41, 0.0  ;;  %v4529_v34 = vmax.f32 %v8304_v14, 0.0  ;;  %v4530_v27 = vmax.f32 %v8306_v12, 0.0 }
 0x352   :  { %v4531_v4 = vmax.f32 %v8308_v20, 0.0  ;;  %v4532_v11 = vmax.f32 %v8310_v42, 0.0  ;;  %v4533_v54 = vmax.f32 %v8312_v8, 0.0  ;;  %v4534_v48 = vmax.f32 %v8314_v59, 0.0 }
 0x353   :  { %v4535_v3 = vmax.f32 %v8316_v56, 0.0  ;;  %v4536_v51 = vmax.f32 %v8318_v5, 0.0  ;;  %v4537_v44 = vmax.f32 %v8320_v0, 0.0  ;;  %v4538_v47 = vmax.f32 %v8322_v21, 0.0 }
 0x354   :  { %v4539_v41 = vmax.f32 %v8324_v17, 0.0  ;;  %v4540_v14 = vmax.f32 %v8326_v24, 0.0  ;;  %v4541_v12 = vmax.f32 %v8328_v36, 0.0  ;;  %v4542_v20 = vmax.f32 %v8330_v35, 0.0 }
 0x355   :  { %v4543_v42 = vmax.f32 %v8332_v38, 0.0  ;;  %v4544_v8 = vmax.f32 %v8334_v61, 0.0  ;;  %v4545_v59 = vmax.f32 %v8336_v40, 0.0  ;;  %v4546_v56 = vmax.f32 %v8338_v25, 0.0 }
 0x356   :  { %v4547_v5 = vmax.f32 %v8340_v13, 0.0  ;;  %v4548_v0 = vmax.f32 %v8342_v16, 0.0  ;;  %v4549_v21 = vmax.f32 %v8344_v45, 0.0  ;;  %v4550_v17 = vmax.f32 %v8346_v62, 0.0 }
 0x357   :  { %v4551_v24 = vmax.f32 %v8348_v50, 0.0  ;;  %v4552_v36 = vmax.f32 %v8350_v2, 0.0  ;;  %v4553_v35 = vmax.f32 %v8352_v28, 0.0  ;;  %v4554_v38 = vmax.f32 %v8354_v37, 0.0 }
 0x358   :  { %v4555_v61 = vmax.f32 %v8356_v32, 0.0  ;;  %v4556_v40 = vmax.f32 %v8358_v29, 0.0  ;;  %v4557_v25 = vmax.f32 %v8360_v53, 0.0  ;;  %v4558_v13 = vmax.f32 %v8362_v10, 0.0 }
 0x359   :  { %v4559_v16 = vmax.f32 %v8364_v55, 0.0  ;;  %v4560_v45 = vmax.f32 %v8366_v9, 0.0  ;;  %v4561_v62 = vmax.f32 %v8368_v60, 0.0  ;;  %v4562_v50 = vmax.f32 %v8370_v63, 0.0 }
 0x35a   :  { %v4563_v2 = vmax.f32 %v8372_v6, 0.0  ;;  %v4564_v28 = vmax.f32 %v8374_v26, 0.0  ;;  %v4565_v37 = vmax.f32 %v8376_v15, 0.0  ;;  %v4566_v32 = vmax.f32 %v8378_v22, 0.0 }
 0x35b   :  { %v4567_v29 = vmax.f32 %v8380_v1, 0.0  ;;  %v4568_v53 = vmax.f32 %v8382_v30, 0.0  ;;  %v4569_v10 = vmax.f32 %v8384_v39, 0.0  ;;  %v4570_v55 = vmax.f32 %v8386_v46, 0.0 }
 0x35c   :  { %v4571_v9 = vmax.f32 %v8388_v33, 0.0  ;;  %v4572_v60 = vmax.f32 %v8390_v57, 0.0  ;;  %v4573_v63 = vmax.f32 %v8392_v7, 0.0  ;;  %v4574_v6 = vmax.f32 %v8394_v18, 0.0 }
 0x35d   :  { %v5485_v26 = vpack.c.bf16 %v4523_v31, %v4522_v23  ;;  %v5486_v15 = vpack.c.bf16 %v4525_v58, %v4524_v43  ;;  %v5487_v22 = vpack.c.bf16 %v4527_v52, %v4526_v19  ;;  %v5488_v1 = vpack.c.bf16 %v4529_v34, %v4528_v49  ;;  %v4067_v52 = vpop.xlane.xlu1 %4066 }
 0x35e   :  { %v5489_v30 = vpack.c.bf16 %v4531_v4, %v4530_v27  ;;  %v5490_v39 = vpack.c.bf16 %v4533_v54, %v4532_v11  ;;  %v5491_v46 = vpack.c.bf16 %v4535_v3, %v4534_v48  ;;  %v5492_v33 = vpack.c.bf16 %v4537_v44, %v4536_v51 }
 0x35f   :  { %v5493_v57 = vpack.c.bf16 %v4539_v41, %v4538_v47  ;;  %v5494_v7 = vpack.c.bf16 %v4541_v12, %v4540_v14  ;;  %v5495_v18 = vpack.c.bf16 %v4543_v42, %v4542_v20  ;;  %v5496_v23 = vpack.c.bf16 %v4545_v59, %v4544_v8  ;;  %4948 = vst [vmem:[%s8933_s3] sm:$0xff] %v5485_v26  ;;  %v9115_v14 = vld [vmem:[#allocation28_spill] sm:$0xff]  ;;  %v9116_v8 = vld [vmem:[#allocation78_spill] sm:$0xff]  ;;  %v9132_v26 = vld [vmem:[#allocation17_spill] sm:$0xff] }
 0x360   :  { %4949 = vst [vmem:[%s8933_s3 + $0x8] sm:$0xff] %v5486_v15  ;;  %4950 = vst [vmem:[%s8933_s3 + $0x10] sm:$0xff] %v5487_v22  ;;  %v5497_v31 = vpack.c.bf16 %v4547_v5, %v4546_v56  ;;  %v5498_v43 = vpack.c.bf16 %v4549_v21, %v4548_v0  ;;  %v5499_v58 = vpack.c.bf16 %v4551_v24, %v4550_v17  ;;  %v4069_v41 = vmul.f32 0.00014863258, %v4067_v52  ;;  %v9117_v59 = vld [vmem:[#allocation2_spill] sm:$0xff]  ;;  %v9118_v5 = vld [vmem:[#allocation3_spill] sm:$0xff] }
 0x361   :  { %4951 = vst [vmem:[%s8933_s3 + $0x18] sm:$0xff] %v5488_v1  ;;  %v5500_v19 = vpack.c.bf16 %v4553_v35, %v4552_v36  ;;  %4952 = vst [vmem:[%s8933_s3 + $0x20] sm:$0xff] %v5489_v30  ;;  %v5501_v49 = vpack.c.bf16 %v4555_v61, %v4554_v38  ;;  %v5502_v34 = vpack.c.bf16 %v4557_v25, %v4556_v40  ;;  %v9119_v21 = vld [vmem:[#allocation4_spill] sm:$0xff]  ;;  %v9120_v24 = vld [vmem:[#allocation5_spill] sm:$0xff] }
 0x362   :  { %4953 = vst [vmem:[%s8933_s3 + $0x28] sm:$0xff] %v5490_v39  ;;  %4954 = vst [vmem:[%s8933_s3 + $0x30] sm:$0xff] %v5491_v46  ;;  %v5503_v27 = vpack.c.bf16 %v4559_v16, %v4558_v13  ;;  %v5504_v4 = vpack.c.bf16 %v4561_v62, %v4560_v45  ;;  %v5505_v11 = vpack.c.bf16 %v4563_v2, %v4562_v50  ;;  %v9121_v35 = vld [vmem:[#allocation6_spill] sm:$0xff]  ;;  %v9122_v61 = vld [vmem:[#allocation7_spill] sm:$0xff] }
 0x363   :  { %4955 = vst [vmem:[%s8933_s3 + $0x38] sm:$0xff] %v5492_v33  ;;  %4956 = vst [vmem:[%s8933_s3 + $0x40] sm:$0xff] %v5493_v57  ;;  %v5506_v54 = vpack.c.bf16 %v4565_v37, %v4564_v28  ;;  %v5507_v48 = vpack.c.bf16 %v4567_v29, %v4566_v32  ;;  %v5508_v3 = vpack.c.bf16 %v4569_v10, %v4568_v53  ;;  %v9123_v25 = vld [vmem:[#allocation8_spill] sm:$0xff]  ;;  %v9124_v16 = vld [vmem:[#allocation9_spill] sm:$0xff] }
 0x364   :  { %4957 = vst [vmem:[%s8933_s3 + $0x48] sm:$0xff] %v5494_v7  ;;  %4958 = vst [vmem:[%s8933_s3 + $0x50] sm:$0xff] %v5495_v18  ;;  %v5509_v51 = vpack.c.bf16 %v4571_v9, %v4570_v55  ;;  %v5510_v44 = vpack.c.bf16 %v4573_v63, %v4572_v60  ;;  %v5511_v47 = vpack.c.bf16 %v4574_v6, %v4574_v6  ;;  %v9125_v62 = vld [vmem:[#allocation10_spill] sm:$0xff]  ;;  %v9126_v2 = vld [vmem:[#allocation11_spill] sm:$0xff] }
 0x365   :  { %4959 = vst [vmem:[%s8933_s3 + $0x58] sm:$0xff] %v5496_v23  ;;  %4960 = vst [vmem:[%s8933_s3 + $0x60] sm:$0xff] %v5497_v31  ;;  %v4073_v12 = vsub.f32 %v4069_v41, %v9115_v14  ;;  %v4129_v56 = vsub.f32 %v9117_v59, %v9116_v8  ;;  %v4130_v0 = vsub.f32 %v9118_v5, %v9116_v8  ;;  %v9127_v37 = vld [vmem:[#allocation12_spill] sm:$0xff]  ;;  %v9128_v29 = vld [vmem:[#allocation13_spill] sm:$0xff] }
 0x366   :  { %4961 = vst [vmem:[%s8933_s3 + $0x68] sm:$0xff] %v5498_v43  ;;  %4962 = vst [vmem:[%s8933_s3 + $0x70] sm:$0xff] %v5499_v58  ;;  %v4131_v17 = vsub.f32 %v9119_v21, %v9116_v8  ;;  %v4132_v36 = vsub.f32 %v9120_v24, %v9116_v8  ;;  %v4133_v38 = vsub.f32 %v9121_v35, %v9116_v8  ;;  %v9129_v10 = vld [vmem:[#allocation14_spill] sm:$0xff]  ;;  %v9130_v9 = vld [vmem:[#allocation15_spill] sm:$0xff] }
 0x367   :  { %4963 = vst [vmem:[%s8933_s3 + $0x78] sm:$0xff] %v5500_v19  ;;  %4964 = vst [vmem:[%s8933_s3 + $0x80] sm:$0xff] %v5501_v49  ;;  %v4075_v20 = vmax.f32 %v4073_v12, 0.0  ;;  %v4134_v40 = vsub.f32 %v9122_v61, %v9116_v8  ;;  %v4135_v13 = vsub.f32 %v9123_v25, %v9116_v8  ;;  %v4136_v45 = vsub.f32 %v9124_v16, %v9116_v8  ;;  %v9131_v63 = vld [vmem:[#allocation16_spill] sm:$0xff]  ;;  %v9133_v22 = vld [vmem:[#allocation18_spill] sm:$0xff] }
 0x368   :  { %4965 = vst [vmem:[%s8933_s3 + $0x88] sm:$0xff] %v5502_v34  ;;  %4966 = vst [vmem:[%s8933_s3 + $0x90] sm:$0xff] %v5503_v27  ;;  %v4137_v50 = vsub.f32 %v9125_v62, %v9116_v8  ;;  %v4138_v28 = vsub.f32 %v9126_v2, %v9116_v8  ;;  %v4139_v32 = vsub.f32 %v9127_v37, %v9116_v8  ;;  %v9134_v30 = vld [vmem:[#allocation19_spill] sm:$0xff]  ;;  %v9135_v46 = vld [vmem:[#allocation20_spill] sm:$0xff] }
 0x369   :  { %4967 = vst [vmem:[%s8933_s3 + $0x98] sm:$0xff] %v5504_v4  ;;  %4968 = vst [vmem:[%s8933_s3 + $0xa0] sm:$0xff] %v5505_v11  ;;  %v4183_v42 = vadd.f32 1e-05, %v4075_v20  ;;  %v4140_v53 = vsub.f32 %v9128_v29, %v9116_v8  ;;  %v4141_v55 = vsub.f32 %v9129_v10, %v9116_v8  ;;  %v4142_v60 = vsub.f32 %v9130_v9, %v9116_v8  ;;  %v9136_v57 = vld [vmem:[#allocation21_spill] sm:$0xff]  ;;  %v9137_v18 = vld [vmem:[#allocation22_spill] sm:$0xff] }
 0x36a   :  { %4969 = vst [vmem:[%s8933_s3 + $0xa8] sm:$0xff] %v5506_v54  ;;  %4970 = vst [vmem:[%s8933_s3 + $0xb0] sm:$0xff] %v5507_v48  ;;  %v4143_v6 = vsub.f32 %v9131_v63, %v9116_v8  ;;  %v4144_v15 = vsub.f32 %v9132_v26, %v9116_v8  ;;  %v4145_v1 = vsub.f32 %v9133_v22, %v9116_v8  ;;  %v9138_v31 = vld [vmem:[#allocation23_spill] sm:$0xff]  ;;  %v9139_v58 = vld [vmem:[#allocation24_spill] sm:$0xff] }
 0x36b   :  { %4971 = vst [vmem:[%s8933_s3 + $0xb8] sm:$0xff] %v5508_v3  ;;  %4972 = vst [vmem:[%s8933_s3 + $0xc0] sm:$0xff] %v5509_v51  ;;  %6211 = vrsqrt.f32 %v4183_v42  ;;  %v4146_v39 = vsub.f32 %v9134_v30, %v9116_v8  ;;  %v4147_v33 = vsub.f32 %v9135_v46, %v9116_v8  ;;  %v4148_v7 = vsub.f32 %v9136_v57, %v9116_v8  ;;  %v9140_v52 = vld [vmem:[#allocation25_spill] sm:$0xff]  ;;  %v9141_v34 = vld [vmem:[#allocation26_spill] sm:$0xff] }
 0x36c   :  { %4973 = vst [vmem:[%s8933_s3 + $0xc8] sm:$0xff] %v5510_v44  ;;  %4974 = vst [vmem:[%s8933_s3 + $0xd0] sm:$0xf] %v5511_v47  ;;  %v4149_v23 = vsub.f32 %v9137_v18, %v9116_v8  ;;  %v4150_v43 = vsub.f32 %v9138_v31, %v9116_v8  ;;  %v4151_v19 = vsub.f32 %v9139_v58, %v9116_v8  ;;  %v9142_v4 = vld [vmem:[#allocation27_spill] sm:$0xff]  ;;  %v9143_v54 = vld [vmem:[#allocation29_spill] sm:$0xff] }
 0x36d   :  { %v4152_v49 = vsub.f32 %v9140_v52, %v9116_v8  ;;  %v4153_v27 = vsub.f32 %v9141_v34, %v9116_v8  ;;  %v4154_v11 = vsub.f32 %v9142_v4, %v9116_v8  ;;  %v4155_v48 = vsub.f32 %v9143_v54, %v9116_v8  ;;  %v9144_v3 = vld [vmem:[#allocation31_spill] sm:$0xff]  ;;  %v9145_v44 = vld [vmem:[#allocation32_spill] sm:$0xff]  ;;  %v9146_v41 = vld [vmem:[#allocation34_spill] sm:$0xff] }
 0x36e   :  { %v4156_v51 = vsub.f32 %v9144_v3, %v9116_v8  ;;  %v4157_v47 = vsub.f32 %v9145_v44, %v9116_v8  ;;  %v4158_v14 = vsub.f32 %v9146_v41, %v9116_v8  ;;  %v9147_v12 = vld [vmem:[#allocation37_spill] sm:$0xff]  ;;  %v9148_v42 = vld [vmem:[#allocation39_spill] sm:$0xff]  ;;  %v9149_v5 = vld [vmem:[#allocation40_spill] sm:$0xff] }
 0x36f   :  { %v4159_v20 = vsub.f32 %v9147_v12, %v9116_v8  ;;  %v4160_v59 = vsub.f32 %v9148_v42, %v9116_v8  ;;  %v4161_v21 = vsub.f32 %v9149_v5, %v9116_v8  ;;  %v9150_v24 = vld [vmem:[#allocation42_spill] sm:$0xff]  ;;  %v9151_v61 = vld [vmem:[#allocation45_spill] sm:$0xff]  ;;  %v9152_v16 = vld [vmem:[#allocation47_spill] sm:$0xff] }
 0x370   :  { %v4162_v35 = vsub.f32 %v9150_v24, %v9116_v8  ;;  %v4163_v25 = vsub.f32 %v9151_v61, %v9116_v8  ;;  %v4164_v62 = vsub.f32 %v9152_v16, %v9116_v8  ;;  %v9153_v2 = vld [vmem:[#allocation48_spill] sm:$0xff]  ;;  %v9154_v29 = vld [vmem:[#allocation50_spill] sm:$0xff]  ;;  %v9155_v9 = vld [vmem:[#allocation53_spill] sm:$0xff] }
 0x371   :  { %v4165_v37 = vsub.f32 %v9153_v2, %v9116_v8  ;;  %v4166_v10 = vsub.f32 %v9154_v29, %v9116_v8  ;;  %v4167_v63 = vsub.f32 %v9155_v9, %v9116_v8  ;;  %v9156_v26 = vld [vmem:[#allocation55_spill] sm:$0xff]  ;;  %v9157_v30 = vld [vmem:[#allocation56_spill] sm:$0xff]  ;;  %v9158_v57 = vld [vmem:[#allocation58_spill] sm:$0xff] }
 0x372   :  { %v4168_v22 = vsub.f32 %v9156_v26, %v9116_v8  ;;  %v4169_v46 = vsub.f32 %v9157_v30, %v9116_v8  ;;  %v4170_v18 = vsub.f32 %v9158_v57, %v9116_v8  ;;  %v9159_v31 = vld [vmem:[#allocation61_spill] sm:$0xff]  ;;  %v9160_v52 = vld [vmem:[#allocation63_spill] sm:$0xff]  ;;  %v9161_v4 = vld [vmem:[#allocation64_spill] sm:$0xff] }
 0x373   :  { %v4171_v58 = vsub.f32 %v9159_v31, %v9116_v8  ;;  %v4172_v34 = vsub.f32 %v9160_v52, %v9116_v8  ;;  %v4173_v54 = vsub.f32 %v9161_v4, %v9116_v8  ;;  %v9162_v3 = vld [vmem:[#allocation66_spill] sm:$0xff]  ;;  %v9163_v41 = vld [vmem:[#allocation69_spill] sm:$0xff]  ;;  %v9165_v24 = vld [vmem:[#allocation71_spill] sm:$0xff] }
 0x374   :  { %v4174_v44 = vsub.f32 %v9162_v3, %v9116_v8  ;;  %v4175_v12 = vsub.f32 %v9163_v41, %v9116_v8  ;;  %v9164_v42 = vld [vmem:[#allocation70_spill] sm:$0xff]  ;;  %v4177_v61 = vsub.f32 %v9165_v24, %v9116_v8  ;;  %v9166_v2 = vld [vmem:[#allocation73_spill] sm:$0xff]  ;;  %v9167_v9 = vld [vmem:[#allocation75_spill] sm:$0xff] }
 0x375   :  { %v4176_v5 = vsub.f32 %v9164_v42, %v9116_v8  ;;  %v4178_v29 = vsub.f32 %v9166_v2, %v9116_v8  ;;  %v4179_v26 = vsub.f32 %v9167_v9, %v9116_v8  ;;  %v9168_v30 = vld [vmem:[#allocation76_spill] sm:$0xff]  ;;  %v9169_v31 = vld [vmem:[#allocation77_spill] sm:$0xff] }
 0x376   :  { %v4180_v57 = vsub.f32 %v9168_v30, %v9116_v8  ;;  %v4181_v52 = vsub.f32 %v9169_v31, %v9116_v8 }
 0x378   :  { %v6212_v16 = vpop.eup %6211 }
 0x379   :  { %v4239_v4 = vmul.f32 %v6212_v16, %v4129_v56  ;;  %v4240_v3 = vmul.f32 %v6212_v16, %v4130_v0  ;;  %v4241_v41 = vmul.f32 %v6212_v16, %v4131_v17  ;;  %v4242_v42 = vmul.f32 %v6212_v16, %v4132_v36 }
 0x37a   :  { %v4243_v24 = vmul.f32 %v6212_v16, %v4133_v38  ;;  %v4244_v2 = vmul.f32 %v6212_v16, %v4134_v40  ;;  %v4245_v9 = vmul.f32 %v6212_v16, %v4135_v13  ;;  %v4246_v30 = vmul.f32 %v6212_v16, %v4136_v45 }
 0x37b   :  { %v4247_v8 = vmul.f32 %v6212_v16, %v4137_v50  ;;  %v4248_v31 = vmul.f32 %v6212_v16, %v4138_v28  ;;  %v4249_v56 = vmul.f32 %v6212_v16, %v4139_v32  ;;  %v4250_v0 = vmul.f32 %v6212_v16, %v4140_v53 }
 0x37c   :  { %v4251_v17 = vmul.f32 %v6212_v16, %v4141_v55  ;;  %v4252_v36 = vmul.f32 %v6212_v16, %v4142_v60  ;;  %v4253_v38 = vmul.f32 %v6212_v16, %v4143_v6  ;;  %v4254_v40 = vmul.f32 %v6212_v16, %v4144_v15 }
 0x37d   :  { %v4255_v13 = vmul.f32 %v6212_v16, %v4145_v1  ;;  %v4256_v45 = vmul.f32 %v6212_v16, %v4146_v39  ;;  %v4257_v50 = vmul.f32 %v6212_v16, %v4147_v33  ;;  %v4258_v28 = vmul.f32 %v6212_v16, %v4148_v7 }
 0x37e   :  { %v4259_v32 = vmul.f32 %v6212_v16, %v4149_v23  ;;  %v4260_v53 = vmul.f32 %v6212_v16, %v4150_v43  ;;  %v4261_v55 = vmul.f32 %v6212_v16, %v4151_v19  ;;  %v4262_v60 = vmul.f32 %v6212_v16, %v4152_v49 }
 0x37f   :  { %v4263_v6 = vmul.f32 %v6212_v16, %v4153_v27  ;;  %v4264_v15 = vmul.f32 %v6212_v16, %v4154_v11  ;;  %v4265_v1 = vmul.f32 %v6212_v16, %v4155_v48  ;;  %v4266_v39 = vmul.f32 %v6212_v16, %v4156_v51 }
 0x380   :  { %v4267_v33 = vmul.f32 %v6212_v16, %v4157_v47  ;;  %v4268_v7 = vmul.f32 %v6212_v16, %v4158_v14  ;;  %v4269_v23 = vmul.f32 %v6212_v16, %v4159_v20  ;;  %v4270_v43 = vmul.f32 %v6212_v16, %v4160_v59 }
 0x381   :  { %v4271_v19 = vmul.f32 %v6212_v16, %v4161_v21  ;;  %v4272_v49 = vmul.f32 %v6212_v16, %v4162_v35  ;;  %v4273_v27 = vmul.f32 %v6212_v16, %v4163_v25  ;;  %v4274_v11 = vmul.f32 %v6212_v16, %v4164_v62 }
 0x382   :  { %v4275_v48 = vmul.f32 %v6212_v16, %v4165_v37  ;;  %v4276_v51 = vmul.f32 %v6212_v16, %v4166_v10  ;;  %v4277_v47 = vmul.f32 %v6212_v16, %v4167_v63  ;;  %v4278_v14 = vmul.f32 %v6212_v16, %v4168_v22 }
 0x383   :  { %v4279_v20 = vmul.f32 %v6212_v16, %v4169_v46  ;;  %v4280_v59 = vmul.f32 %v6212_v16, %v4170_v18  ;;  %v4281_v21 = vmul.f32 %v6212_v16, %v4171_v58  ;;  %v4282_v35 = vmul.f32 %v6212_v16, %v4172_v34  ;;  %v9170_v34 = vld [vmem:[#allocation30_spill] sm:$0xff] }
 0x384   :  { %v4283_v25 = vmul.f32 %v6212_v16, %v4173_v54  ;;  %v4284_v62 = vmul.f32 %v6212_v16, %v4174_v44  ;;  %v4285_v37 = vmul.f32 %v6212_v16, %v4175_v12  ;;  %v4286_v10 = vmul.f32 %v6212_v16, %v4176_v5 }
 0x385   :  { %v4287_v63 = vmul.f32 %v6212_v16, %v4177_v61  ;;  %v4288_v22 = vmul.f32 %v6212_v16, %v4178_v29  ;;  %v4289_v46 = vmul.f32 %v6212_v16, %v4179_v26  ;;  %v4290_v18 = vmul.f32 %v6212_v16, %v4180_v57 }
 0x386   :  { %v4291_v58 = vmul.f32 %v6212_v16, %v4181_v52  ;;  %v4355_v54 = vmul.f32 %v9170_v34, %v4239_v4  ;;  %v4356_v44 = vmul.f32 %v9170_v34, %v4240_v3  ;;  %v4357_v12 = vmul.f32 %v9170_v34, %v4241_v41 }
 0x387   :  { %v4358_v5 = vmul.f32 %v9170_v34, %v4242_v42  ;;  %v4359_v61 = vmul.f32 %v9170_v34, %v4243_v24  ;;  %v4360_v29 = vmul.f32 %v9170_v34, %v4244_v2  ;;  %v4361_v26 = vmul.f32 %v9170_v34, %v4245_v9 }
 0x388   :  { %v4362_v57 = vmul.f32 %v9170_v34, %v4246_v30  ;;  %v4363_v16 = vmul.f32 %v9170_v34, %v4247_v8  ;;  %v4364_v52 = vmul.f32 %v9170_v34, %v4248_v31  ;;  %v4365_v4 = vmul.f32 %v9170_v34, %v4249_v56 }
 0x389   :  { %v4366_v3 = vmul.f32 %v9170_v34, %v4250_v0  ;;  %v4367_v41 = vmul.f32 %v9170_v34, %v4251_v17  ;;  %v4368_v42 = vmul.f32 %v9170_v34, %v4252_v36  ;;  %v4369_v24 = vmul.f32 %v9170_v34, %v4253_v38 }
 0x38a   :  { %v4370_v2 = vmul.f32 %v9170_v34, %v4254_v40  ;;  %v4371_v9 = vmul.f32 %v9170_v34, %v4255_v13  ;;  %v4372_v30 = vmul.f32 %v9170_v34, %v4256_v45  ;;  %v4373_v8 = vmul.f32 %v9170_v34, %v4257_v50 }
 0x38b   :  { %v4374_v31 = vmul.f32 %v9170_v34, %v4258_v28  ;;  %v4375_v56 = vmul.f32 %v9170_v34, %v4259_v32  ;;  %v4376_v0 = vmul.f32 %v9170_v34, %v4260_v53  ;;  %v4377_v17 = vmul.f32 %v9170_v34, %v4261_v55 }
 0x38c   :  { %v4378_v36 = vmul.f32 %v9170_v34, %v4262_v60  ;;  %v4379_v38 = vmul.f32 %v9170_v34, %v4263_v6  ;;  %v4380_v40 = vmul.f32 %v9170_v34, %v4264_v15  ;;  %v4381_v13 = vmul.f32 %v9170_v34, %v4265_v1 }
 0x38d   :  { %v4382_v45 = vmul.f32 %v9170_v34, %v4266_v39  ;;  %v4383_v50 = vmul.f32 %v9170_v34, %v4267_v33  ;;  %v4384_v28 = vmul.f32 %v9170_v34, %v4268_v7  ;;  %v4385_v32 = vmul.f32 %v9170_v34, %v4269_v23 }
 0x38e   :  { %v4386_v53 = vmul.f32 %v9170_v34, %v4270_v43  ;;  %v4387_v55 = vmul.f32 %v9170_v34, %v4271_v19  ;;  %v4388_v60 = vmul.f32 %v9170_v34, %v4272_v49  ;;  %v4389_v6 = vmul.f32 %v9170_v34, %v4273_v27 }
 0x38f   :  { %v4390_v15 = vmul.f32 %v9170_v34, %v4274_v11  ;;  %v4391_v1 = vmul.f32 %v9170_v34, %v4275_v48  ;;  %v4392_v39 = vmul.f32 %v9170_v34, %v4276_v51  ;;  %v4393_v33 = vmul.f32 %v9170_v34, %v4277_v47  ;;  %v4414_v51 = vpop.permute.xlu1 %4413 }
 0x390   :  { %v4394_v7 = vmul.f32 %v9170_v34, %v4278_v14  ;;  %v4395_v23 = vmul.f32 %v9170_v34, %v4279_v20  ;;  %v4396_v43 = vmul.f32 %v9170_v34, %v4280_v59  ;;  %v4397_v19 = vmul.f32 %v9170_v34, %v4281_v21 }
 0x391   :  { %v4398_v49 = vmul.f32 %v9170_v34, %v4282_v35  ;;  %v4399_v27 = vmul.f32 %v9170_v34, %v4283_v25  ;;  %v4400_v11 = vmul.f32 %v9170_v34, %v4284_v62  ;;  %v4401_v48 = vmul.f32 %v9170_v34, %v4285_v37 }
 0x392   :  { %v4402_v47 = vmul.f32 %v9170_v34, %v4286_v10  ;;  %v4403_v14 = vmul.f32 %v9170_v34, %v4287_v63  ;;  %v4404_v20 = vmul.f32 %v9170_v34, %v4288_v22  ;;  %v4405_v59 = vmul.f32 %v9170_v34, %v4289_v46 }
 0x393   :  { %v4406_v21 = vmul.f32 %v9170_v34, %v4290_v18  ;;  %v4407_v35 = vmul.f32 %v9170_v34, %v4291_v58  ;;  %v8690_v25 = vadd.f32 %v4414_v51, %v4355_v54  ;;  %v8692_v62 = vadd.f32 %v4414_v51, %v4356_v44 }
 0x394   :  { %v8694_v37 = vadd.f32 %v4414_v51, %v4357_v12  ;;  %v8696_v10 = vadd.f32 %v4414_v51, %v4358_v5  ;;  %v8698_v63 = vadd.f32 %v4414_v51, %v4359_v61  ;;  %v8700_v22 = vadd.f32 %v4414_v51, %v4360_v29 }
 0x395   :  { %v8702_v46 = vadd.f32 %v4414_v51, %v4361_v26  ;;  %v8704_v18 = vadd.f32 %v4414_v51, %v4362_v57  ;;  %v8706_v34 = vadd.f32 %v4414_v51, %v4363_v16  ;;  %v8708_v58 = vadd.f32 %v4414_v51, %v4364_v52 }
 0x396   :  { %v8710_v54 = vadd.f32 %v4414_v51, %v4365_v4  ;;  %v8712_v44 = vadd.f32 %v4414_v51, %v4366_v3  ;;  %v8714_v12 = vadd.f32 %v4414_v51, %v4367_v41  ;;  %v8716_v5 = vadd.f32 %v4414_v51, %v4368_v42 }
 0x397   :  { %v8718_v61 = vadd.f32 %v4414_v51, %v4369_v24  ;;  %v8720_v29 = vadd.f32 %v4414_v51, %v4370_v2  ;;  %v8722_v26 = vadd.f32 %v4414_v51, %v4371_v9  ;;  %v8724_v57 = vadd.f32 %v4414_v51, %v4372_v30 }
 0x398   :  { %v8726_v16 = vadd.f32 %v4414_v51, %v4373_v8  ;;  %v8728_v52 = vadd.f32 %v4414_v51, %v4374_v31  ;;  %v8730_v4 = vadd.f32 %v4414_v51, %v4375_v56  ;;  %v8732_v3 = vadd.f32 %v4414_v51, %v4376_v0 }
 0x399   :  { %v8734_v41 = vadd.f32 %v4414_v51, %v4377_v17  ;;  %v8736_v42 = vadd.f32 %v4414_v51, %v4378_v36  ;;  %v8738_v24 = vadd.f32 %v4414_v51, %v4379_v38  ;;  %v8740_v2 = vadd.f32 %v4414_v51, %v4380_v40 }
 0x39a   :  { %v8742_v9 = vadd.f32 %v4414_v51, %v4381_v13  ;;  %v8744_v30 = vadd.f32 %v4414_v51, %v4382_v45  ;;  %v8746_v8 = vadd.f32 %v4414_v51, %v4383_v50  ;;  %v8748_v31 = vadd.f32 %v4414_v51, %v4384_v28 }
 0x39b   :  { %v8750_v56 = vadd.f32 %v4414_v51, %v4385_v32  ;;  %v8752_v0 = vadd.f32 %v4414_v51, %v4386_v53  ;;  %v8754_v17 = vadd.f32 %v4414_v51, %v4387_v55  ;;  %v8756_v36 = vadd.f32 %v4414_v51, %v4388_v60 }
 0x39c   :  { %v8758_v38 = vadd.f32 %v4414_v51, %v4389_v6  ;;  %v8760_v40 = vadd.f32 %v4414_v51, %v4390_v15  ;;  %v8762_v13 = vadd.f32 %v4414_v51, %v4391_v1  ;;  %v8764_v45 = vadd.f32 %v4414_v51, %v4392_v39 }
 0x39d   :  { %v8766_v50 = vadd.f32 %v4414_v51, %v4393_v33  ;;  %v8768_v28 = vadd.f32 %v4414_v51, %v4394_v7  ;;  %v8770_v32 = vadd.f32 %v4414_v51, %v4395_v23  ;;  %v8772_v53 = vadd.f32 %v4414_v51, %v4396_v43 }
 0x39e   :  { %v8774_v55 = vadd.f32 %v4414_v51, %v4397_v19  ;;  %v8776_v60 = vadd.f32 %v4414_v51, %v4398_v49  ;;  %v8778_v6 = vadd.f32 %v4414_v51, %v4399_v27  ;;  %v8780_v15 = vadd.f32 %v4414_v51, %v4400_v11 }
 0x39f   :  { %v8782_v1 = vadd.f32 %v4414_v51, %v4401_v48  ;;  %v8784_v39 = vadd.f32 %v4414_v51, %v4402_v47  ;;  %v8786_v33 = vadd.f32 %v4414_v51, %v4403_v14  ;;  %v8788_v7 = vadd.f32 %v4414_v51, %v4404_v20 }
 0x3a0   :  { %v8790_v23 = vadd.f32 %v4414_v51, %v4405_v59  ;;  %v8792_v43 = vadd.f32 %v4414_v51, %v4406_v21  ;;  %v8794_v19 = vadd.f32 %v4414_v51, %v4407_v35  ;;  %v4575_v49 = vmax.f32 %v8690_v25, 0.0 }
 0x3a1   :  { %v4576_v27 = vmax.f32 %v8692_v62, 0.0  ;;  %v4577_v11 = vmax.f32 %v8694_v37, 0.0  ;;  %v4578_v48 = vmax.f32 %v8696_v10, 0.0  ;;  %v4579_v47 = vmax.f32 %v8698_v63, 0.0 }
 0x3a2   :  { %v4580_v14 = vmax.f32 %v8700_v22, 0.0  ;;  %v4581_v20 = vmax.f32 %v8702_v46, 0.0  ;;  %v4582_v59 = vmax.f32 %v8704_v18, 0.0  ;;  %v4583_v21 = vmax.f32 %v8706_v34, 0.0 }
 0x3a3   :  { %v4584_v51 = vmax.f32 %v8708_v58, 0.0  ;;  %v4585_v35 = vmax.f32 %v8710_v54, 0.0  ;;  %v4586_v25 = vmax.f32 %v8712_v44, 0.0  ;;  %v4587_v62 = vmax.f32 %v8714_v12, 0.0 }
 0x3a4   :  { %v4588_v37 = vmax.f32 %v8716_v5, 0.0  ;;  %v4589_v10 = vmax.f32 %v8718_v61, 0.0  ;;  %v4590_v63 = vmax.f32 %v8720_v29, 0.0  ;;  %v4591_v22 = vmax.f32 %v8722_v26, 0.0 }
 0x3a5   :  { %v4592_v46 = vmax.f32 %v8724_v57, 0.0  ;;  %v4593_v18 = vmax.f32 %v8726_v16, 0.0  ;;  %v4594_v34 = vmax.f32 %v8728_v52, 0.0  ;;  %v4595_v58 = vmax.f32 %v8730_v4, 0.0 }
 0x3a6   :  { %v4596_v54 = vmax.f32 %v8732_v3, 0.0  ;;  %v4597_v44 = vmax.f32 %v8734_v41, 0.0  ;;  %v4598_v12 = vmax.f32 %v8736_v42, 0.0  ;;  %v4599_v5 = vmax.f32 %v8738_v24, 0.0 }
 0x3a7   :  { %v4600_v61 = vmax.f32 %v8740_v2, 0.0  ;;  %v4601_v29 = vmax.f32 %v8742_v9, 0.0  ;;  %v4602_v26 = vmax.f32 %v8744_v30, 0.0  ;;  %v4603_v57 = vmax.f32 %v8746_v8, 0.0 }
 0x3a8   :  { %v4604_v16 = vmax.f32 %v8748_v31, 0.0  ;;  %v4605_v52 = vmax.f32 %v8750_v56, 0.0  ;;  %v4606_v4 = vmax.f32 %v8752_v0, 0.0  ;;  %v4607_v3 = vmax.f32 %v8754_v17, 0.0 }
 0x3a9   :  { %v4608_v41 = vmax.f32 %v8756_v36, 0.0  ;;  %v4609_v42 = vmax.f32 %v8758_v38, 0.0  ;;  %v4610_v24 = vmax.f32 %v8760_v40, 0.0  ;;  %v4611_v2 = vmax.f32 %v8762_v13, 0.0 }
 0x3aa   :  { %v4612_v9 = vmax.f32 %v8764_v45, 0.0  ;;  %v4613_v30 = vmax.f32 %v8766_v50, 0.0  ;;  %v4614_v8 = vmax.f32 %v8768_v28, 0.0  ;;  %v4615_v31 = vmax.f32 %v8770_v32, 0.0 }
 0x3ab   :  { %v4616_v56 = vmax.f32 %v8772_v53, 0.0  ;;  %v4617_v0 = vmax.f32 %v8774_v55, 0.0  ;;  %v4618_v17 = vmax.f32 %v8776_v60, 0.0  ;;  %v4619_v36 = vmax.f32 %v8778_v6, 0.0 }
 0x3ac   :  { %v4620_v38 = vmax.f32 %v8780_v15, 0.0  ;;  %v4621_v40 = vmax.f32 %v8782_v1, 0.0  ;;  %v4622_v13 = vmax.f32 %v8784_v39, 0.0  ;;  %v4623_v45 = vmax.f32 %v8786_v33, 0.0 }
 0x3ad   :  { %v4624_v50 = vmax.f32 %v8788_v7, 0.0  ;;  %v4625_v28 = vmax.f32 %v8790_v23, 0.0  ;;  %v4626_v32 = vmax.f32 %v8792_v43, 0.0  ;;  %v4627_v53 = vmax.f32 %v8794_v19, 0.0 }
 0x3ae   :  { %v5512_v55 = vpack.c.bf16 %v4576_v27, %v4575_v49  ;;  %v5513_v60 = vpack.c.bf16 %v4578_v48, %v4577_v11  ;;  %v5514_v6 = vpack.c.bf16 %v4580_v14, %v4579_v47  ;;  %v5515_v15 = vpack.c.bf16 %v4582_v59, %v4581_v20 }
 0x3af   :  { %v5516_v1 = vpack.c.bf16 %v4584_v51, %v4583_v21  ;;  %v5517_v39 = vpack.c.bf16 %v4586_v25, %v4585_v35  ;;  %v5518_v33 = vpack.c.bf16 %v4588_v37, %v4587_v62  ;;  %v5519_v7 = vpack.c.bf16 %v4590_v63, %v4589_v10 }
 0x3b0   :  { %v5520_v23 = vpack.c.bf16 %v4592_v46, %v4591_v22  ;;  %v5521_v43 = vpack.c.bf16 %v4594_v34, %v4593_v18  ;;  %v5522_v19 = vpack.c.bf16 %v4596_v54, %v4595_v58  ;;  %v5523_v27 = vpack.c.bf16 %v4598_v12, %v4597_v44  ;;  %4975 = vst [vmem:[%s8933_s3 + $0xd4] sm:$0xff] %v5512_v55 }
 0x3b1   :  { %4976 = vst [vmem:[%s8933_s3 + $0xdc] sm:$0xff] %v5513_v60  ;;  %4977 = vst [vmem:[%s8933_s3 + $0xe4] sm:$0xff] %v5514_v6  ;;  %v5524_v49 = vpack.c.bf16 %v4600_v61, %v4599_v5  ;;  %v5525_v11 = vpack.c.bf16 %v4602_v26, %v4601_v29  ;;  %v5526_v48 = vpack.c.bf16 %v4604_v16, %v4603_v57 }
 0x3b2   :  { %4978 = vst [vmem:[%s8933_s3 + $0xec] sm:$0xff] %v5515_v15  ;;  %v5527_v47 = vpack.c.bf16 %v4606_v4, %v4605_v52  ;;  %4979 = vst [vmem:[%s8933_s3 + $0xf4] sm:$0xff] %v5516_v1  ;;  %v5528_v14 = vpack.c.bf16 %v4608_v41, %v4607_v3  ;;  %v5529_v20 = vpack.c.bf16 %v4610_v24, %v4609_v42 }
 0x3b3   :  { %4980 = vst [vmem:[%s8933_s3 + $0xfc] sm:$0xff] %v5517_v39  ;;  %4981 = vst [vmem:[%s8933_s3 + $0x104] sm:$0xff] %v5518_v33  ;;  %v5530_v59 = vpack.c.bf16 %v4612_v9, %v4611_v2  ;;  %v5531_v21 = vpack.c.bf16 %v4614_v8, %v4613_v30  ;;  %v5532_v51 = vpack.c.bf16 %v4616_v56, %v4615_v31 }
 0x3b4   :  { %4982 = vst [vmem:[%s8933_s3 + $0x10c] sm:$0xff] %v5519_v7  ;;  %4983 = vst [vmem:[%s8933_s3 + $0x114] sm:$0xff] %v5520_v23  ;;  %v5533_v35 = vpack.c.bf16 %v4618_v17, %v4617_v0  ;;  %v5534_v25 = vpack.c.bf16 %v4620_v38, %v4619_v36  ;;  %v5535_v62 = vpack.c.bf16 %v4622_v13, %v4621_v40 }
 0x3b5   :  { %4984 = vst [vmem:[%s8933_s3 + $0x11c] sm:$0xff] %v5521_v43  ;;  %4985 = vst [vmem:[%s8933_s3 + $0x124] sm:$0xff] %v5522_v19  ;;  %v5536_v37 = vpack.c.bf16 %v4624_v50, %v4623_v45  ;;  %v5537_v10 = vpack.c.bf16 %v4626_v32, %v4625_v28  ;;  %v5538_v63 = vpack.c.bf16 %v4627_v53, %v4627_v53 }
 0x3b6   :  { %4986 = vst [vmem:[%s8933_s3 + $0x12c] sm:$0xff] %v5523_v27  ;;  %4987 = vst [vmem:[%s8933_s3 + $0x134] sm:$0xff] %v5524_v49 }
 0x3b7   :  { %4988 = vst [vmem:[%s8933_s3 + $0x13c] sm:$0xff] %v5525_v11  ;;  %4989 = vst [vmem:[%s8933_s3 + $0x144] sm:$0xff] %v5526_v48 }
 0x3b8   :  { %4990 = vst [vmem:[%s8933_s3 + $0x14c] sm:$0xff] %v5527_v47  ;;  %4991 = vst [vmem:[%s8933_s3 + $0x154] sm:$0xff] %v5528_v14 }
 0x3b9   :  { %4992 = vst [vmem:[%s8933_s3 + $0x15c] sm:$0xff] %v5529_v20  ;;  %4993 = vst [vmem:[%s8933_s3 + $0x164] sm:$0xff] %v5530_v59 }
 0x3ba   :  { %4994 = vst [vmem:[%s8933_s3 + $0x16c] sm:$0xff] %v5531_v21  ;;  %4995 = vst [vmem:[%s8933_s3 + $0x174] sm:$0xff] %v5532_v51 }
 0x3bb   :  { %4996 = vst [vmem:[%s8933_s3 + $0x17c] sm:$0xff] %v5533_v35  ;;  %4997 = vst [vmem:[%s8933_s3 + $0x184] sm:$0xff] %v5534_v25 }
 0x3bc   :  { %4998 = vst [vmem:[%s8933_s3 + $0x18c] sm:$0xff] %v5535_v62  ;;  %4999 = vst [vmem:[%s8933_s3 + $0x194] sm:$0xff] %v5536_v37 }
 0x3bd   :  { %5000 = vst [vmem:[%s8933_s3 + $0x19c] sm:$0xff] %v5537_v10  ;;  %5001 = vst [vmem:[%s8933_s3 + $0x1a4] sm:$0xf] %v5538_v63 }

// kernel: reward_predictor_ensemble_forward.4
= control target key start
LH: loop header
LB: loop body
LE: loop exit
PB: predicated region body
PF: predicated region fallthrough
CT: control target
= control target key end

     0   :  { %s2489_s12 = smov 0   ;;  %s2881_s0 = inlined_call_operand.vmem [shape: bf16[2,256,1408], index: 0, kind: input, shape index: {}]   ;;  %s2882_s1 = inlined_call_operand.vmem [shape: bf16[2,16,256], index: 1, kind: input, shape index: {}]   ;;  %s2883_s2 = inlined_call_operand.vmem [shape: f32[2,16,2], index: 2, kind: input, shape index: {}]   ;;  %s2884_s3 = inlined_call_operand.vmem [shape: bf16[2,16,1408], index: 3, kind: output, shape index: {}]  }
   0x1 LB: > { %s1941_s13 = sadd.s32 4294967295, %s2465_s12   ;;  %p1945_p0 = scmp.ge.s32.totalorder %s2465_s12, 1  ;;  %s2465_s12 = sphi %s2489_s12, %s13_s12  }
   0x2   : > { %p157_p1 = scmp.lt.s32.totalorder %s2465_s12, 3 }
   0x4   : > { %p158_p2 = pnand %p1945_p0, %p157_p1 }
   0x5   : > { %p191_p3 = scmp.lt.s32.totalorder (!%p158_p2), %s1941_s13, 1 }
   0x6   : > { %161 = sbr.rel (%p158_p2) target bundleno = 643 (0x283), region = 32 }
   0xb   : > { %s2886_s13 = smov (!%p191_p3, %s1941_s13), 1 }
   0xc   : > { %s2180_s14 = smul.u32 1408, %s2886_s13  ;;  %s2144_s15 = sshll.u32 %s2886_s13, 4 }
   0xd   : > { %s2506_s18 = scalar_lea.vmem %s2882_s1, %s2144_s15  ;;  %s205_s24 = scalar_lea.vmem %s2883_s2, %s2144_s15 }
   0xe   : > { %s2511_s21 = scalar_lea.vmem %s2881_s0, %s2180_s14  ;;  %v2514_v0 = vld [vmem:[%s2506_s18 + $0x4] ss:$8 sps:$4 sm:$0xff]   ;;  %s2181_s25 = smul.u32 88, %s2886_s13 }
   0xf   : > { %v2196_v1 = vld [vmem:[%s2511_s21 + $0x26c] ss:$44 sps:$4 sm:$0xff]   ;;  %v2198_v2 = vld [vmem:[%s2511_s21 + $0x268] ss:$44 sps:$4 sm:$0xff]   ;;  %1344 = vmatprep.mubr.bf16.mxu0 %v2514_v0  ;;  %1387 = vmatprep.mubr.bf16.mxu1 %v2514_v0  ;;  %v2203_v5 = vld [vmem:[%s2511_s21 + $0x210] ss:$44 sps:$4 sm:$0xff]  }
  0x10   : > { %1312 = vmatprep.subr.bf16.mxu0 %v2196_v1  ;;  %v2199_v3 = vld [vmem:[%s2511_s21 + $0x214] ss:$44 sps:$4 sm:$0xff]   ;;  %v2204_v6 = vld [vmem:[%s2511_s21 + $0x270] ss:$44 sps:$4 sm:$0xff]   ;;  %v2210_v9 = vld [vmem:[%s2511_s21 + $0x218] ss:$44 sps:$4 sm:$0xff]   ;;  %s2841_s28 = scalar_lea.vmem %s2884_s3, %s2181_s25 }
  0x11   : > { %1313 = vmatpush1.bf16.msra.mxu0 %v2198_v2  ;;  %v2201_v4 = vld [vmem:[%s2511_s21 + $0x274] ss:$44 sps:$4 sm:$0xff]   ;;  %v2205_v7 = vld [vmem:[%s2511_s21 + $0x1bc] ss:$44 sps:$4 sm:$0xff]   ;;  %v2209_v10 = vld [vmem:[%s2511_s21 + $0x1b8] ss:$44 sps:$4 sm:$0xff]  }
  0x12   : > { %1314 = vmatprep.subr.bf16.mxu0 %v2199_v3  ;;  %1355 = vmatprep.subr.bf16.mxu1 %v2201_v4  ;;  %v2207_v8 = vld [vmem:[%s2511_s21 + $0x21c] ss:$44 sps:$4 sm:$0xff]   ;;  %v2211_v11 = vld [vmem:[%s2511_s21 + $0x164] ss:$44 sps:$4 sm:$0xff]   ;;  %v2216_v13 = vld [vmem:[%s2511_s21 + $0x1c0] ss:$44 sps:$4 sm:$0xff]  }
  0x13   : > { %1356 = vmatpush1.bf16.msra.mxu1 %v2204_v6  ;;  %v2213_v12 = vld [vmem:[%s2511_s21 + $0x1c4] ss:$44 sps:$4 sm:$0xff]   ;;  %v2215_v14 = vld [vmem:[%s2511_s21 + $0x160] ss:$44 sps:$4 sm:$0xff]   ;;  %v2221_v17 = vld [vmem:[%s2511_s21 + $0x108] ss:$44 sps:$4 sm:$0xff]  }
  0x14   : > { %1357 = vmatprep.subr.bf16.mxu1 %v2207_v8  ;;  %v2219_v15 = vld [vmem:[%s2511_s21 + $0x16c] ss:$44 sps:$4 sm:$0xff]   ;;  %v2222_v18 = vld [vmem:[%s2511_s21 + $0x168] ss:$44 sps:$4 sm:$0xff]   ;;  %v2228_v21 = vld [vmem:[%s2511_s21 + $0x110] ss:$44 sps:$4 sm:$0xff]  }
  0x15   : > { %1315 = vmatpush1.bf16.msra.mxu0 %v2203_v5  ;;  %v2217_v16 = vld [vmem:[%s2511_s21 + $0x10c] ss:$44 sps:$4 sm:$0xff]   ;;  %v2225_v19 = vld [vmem:[%s2511_s21 + $0x114] ss:$44 sps:$4 sm:$0xff]   ;;  %v2227_v22 = vld [vmem:[%s2511_s21 + $0xb0] ss:$44 sps:$4 sm:$0xff]  }
  0x16   : > { %1316 = vmatprep.subr.bf16.mxu0 %v2205_v7  ;;  %v2223_v20 = vld [vmem:[%s2511_s21 + $0xb4] ss:$44 sps:$4 sm:$0xff]   ;;  %v2231_v23 = vld [vmem:[%s2511_s21 + $0xbc] ss:$44 sps:$4 sm:$0xff]   ;;  %v2233_v25 = vld [vmem:[%s2511_s21 + $0x58] ss:$44 sps:$4 sm:$0xff]  }
  0x17   : > { %1358 = vmatpush1.bf16.msra.mxu1 %v2210_v9  ;;  %v2229_v24 = vld [vmem:[%s2511_s21 + $0x5c] ss:$44 sps:$4 sm:$0xff]   ;;  %v2234_v26 = vld [vmem:[%s2511_s21 + $0xb8] ss:$44 sps:$4 sm:$0xff]   ;;  %v2240_v29 = vld [vmem:[%s2511_s21 + $0x60] ss:$44 sps:$4 sm:$0xff]  }
  0x18   : > { %1359 = vmatprep.subr.bf16.mxu1 %v2213_v12  ;;  %v2237_v27 = vld [vmem:[%s2511_s21 + $0x64] ss:$44 sps:$4 sm:$0xff]   ;;  %v2239_v30 = vld [vmem:[%s2511_s21] ss:$44 sps:$4 sm:$0xff]   ;;  %v2245_v33 = vld [vmem:[%s2511_s21 + $0x528] ss:$44 sps:$4 sm:$0xff]  }
  0x19   : > { %1317 = vmatpush1.bf16.msra.mxu0 %v2209_v10  ;;  %v2235_v28 = vld [vmem:[%s2511_s21 + $0x4] ss:$44 sps:$4 sm:$0xff]   ;;  %v2243_v31 = vld [vmem:[%s2511_s21 + $0xc] ss:$44 sps:$4 sm:$0xff]   ;;  %v2246_v34 = vld [vmem:[%s2511_s21 + $0x8] ss:$44 sps:$4 sm:$0xff]  }
  0x1a   : > { %1318 = vmatprep.subr.bf16.mxu0 %v2211_v11  ;;  %v2241_v32 = vld [vmem:[%s2511_s21 + $0x52c] ss:$44 sps:$4 sm:$0xff]   ;;  %v2249_v35 = vld [vmem:[%s2511_s21 + $0x534] ss:$44 sps:$4 sm:$0xff]   ;;  %v2252_v37 = vld [vmem:[%s2511_s21 + $0x530] ss:$44 sps:$4 sm:$0xff]  }
  0x1b   : > { %1360 = vmatpush1.bf16.msra.mxu1 %v2216_v13  ;;  %v2247_v36 = vld [vmem:[%s2511_s21 + $0x4d4] ss:$44 sps:$4 sm:$0xff]   ;;  %v2251_v38 = vld [vmem:[%s2511_s21 + $0x4d0] ss:$44 sps:$4 sm:$0xff]   ;;  %v2257_v41 = vld [vmem:[%s2511_s21 + $0x478] ss:$44 sps:$4 sm:$0xff]  }
  0x1c   : > { %1361 = vmatprep.subr.bf16.mxu1 %v2219_v15  ;;  %v2255_v39 = vld [vmem:[%s2511_s21 + $0x4dc] ss:$44 sps:$4 sm:$0xff]   ;;  %v2258_v42 = vld [vmem:[%s2511_s21 + $0x4d8] ss:$44 sps:$4 sm:$0xff]   ;;  %v2264_v45 = vld [vmem:[%s2511_s21 + $0x480] ss:$44 sps:$4 sm:$0xff]  }
  0x1d   : > { %1319 = vmatpush1.bf16.msra.mxu0 %v2215_v14  ;;  %v2253_v40 = vld [vmem:[%s2511_s21 + $0x47c] ss:$44 sps:$4 sm:$0xff]   ;;  %v2261_v43 = vld [vmem:[%s2511_s21 + $0x484] ss:$44 sps:$4 sm:$0xff]   ;;  %v2263_v46 = vld [vmem:[%s2511_s21 + $0x420] ss:$44 sps:$4 sm:$0xff]  }
  0x1e   : > { %1320 = vmatprep.subr.bf16.mxu0 %v2217_v16  ;;  %v2259_v44 = vld [vmem:[%s2511_s21 + $0x424] ss:$44 sps:$4 sm:$0xff]   ;;  %v2267_v47 = vld [vmem:[%s2511_s21 + $0x42c] ss:$44 sps:$4 sm:$0xff]   ;;  %v2269_v49 = vld [vmem:[%s2511_s21 + $0x3c8] ss:$44 sps:$4 sm:$0xff]  }
  0x1f   : > { %1362 = vmatpush1.bf16.msra.mxu1 %v2222_v18  ;;  %v2265_v48 = vld [vmem:[%s2511_s21 + $0x3cc] ss:$44 sps:$4 sm:$0xff]   ;;  %v2270_v50 = vld [vmem:[%s2511_s21 + $0x428] ss:$44 sps:$4 sm:$0xff]   ;;  %v2275_v53 = vld [vmem:[%s2511_s21 + $0x370] ss:$44 sps:$4 sm:$0xff]  }
  0x20   : > { %1363 = vmatprep.subr.bf16.mxu1 %v2225_v19  ;;  %v2273_v51 = vld [vmem:[%s2511_s21 + $0x3d4] ss:$44 sps:$4 sm:$0xff]   ;;  %v2276_v54 = vld [vmem:[%s2511_s21 + $0x3d0] ss:$44 sps:$4 sm:$0xff]   ;;  %v2281_v57 = vld [vmem:[%s2511_s21 + $0x318] ss:$44 sps:$4 sm:$0xff]  }
  0x21   : > { %1321 = vmatpush1.bf16.msra.mxu0 %v2221_v17  ;;  %v2271_v52 = vld [vmem:[%s2511_s21 + $0x374] ss:$44 sps:$4 sm:$0xff]   ;;  %v2279_v55 = vld [vmem:[%s2511_s21 + $0x37c] ss:$44 sps:$4 sm:$0xff]   ;;  %v2282_v58 = vld [vmem:[%s2511_s21 + $0x378] ss:$44 sps:$4 sm:$0xff]  }
  0x22   : > { %1322 = vmatprep.subr.bf16.mxu0 %v2223_v20  ;;  %v2277_v56 = vld [vmem:[%s2511_s21 + $0x31c] ss:$44 sps:$4 sm:$0xff]   ;;  %v2285_v59 = vld [vmem:[%s2511_s21 + $0x324] ss:$44 sps:$4 sm:$0xff]   ;;  %v2287_v61 = vld [vmem:[%s2511_s21 + $0x2c0] ss:$44 sps:$4 sm:$0xff]  }
  0x23   : > { %1364 = vmatpush1.bf16.msra.mxu1 %v2228_v21  ;;  %v2283_v60 = vld [vmem:[%s2511_s21 + $0x2c4] ss:$44 sps:$4 sm:$0xff]   ;;  %v2288_v62 = vld [vmem:[%s2511_s21 + $0x320] ss:$44 sps:$4 sm:$0xff]   ;;  %v2296_v1 = vld [vmem:[%s2511_s21 + $0x27c] ss:$44 sps:$4 sm:$0xff]  }
  0x24   : > { %1365 = vmatprep.subr.bf16.mxu1 %v2231_v23  ;;  %v2292_v63 = vld [vmem:[%s2511_s21 + $0x2cc] ss:$44 sps:$4 sm:$0xff]   ;;  %v2583_v2 = vld [vmem:[%s2506_s18] ss:$8 sps:$4 sm:$0xff]   ;;  %v2303_v5 = vld [vmem:[%s2511_s21 + $0x284] ss:$44 sps:$4 sm:$0xff]  }
  0x25   : > { %1323 = vmatpush1.bf16.msra.mxu0 %v2227_v22  ;;  %v2294_v3 = vld [vmem:[%s2511_s21 + $0x278] ss:$44 sps:$4 sm:$0xff]   ;;  %v2297_v4 = vld [vmem:[%s2511_s21 + $0x2c8] ss:$44 sps:$4 sm:$0xff]   ;;  %v2298_v7 = vld [vmem:[%s2511_s21 + $0x220] ss:$44 sps:$4 sm:$0xff]  }
  0x26   : > { %1324 = vmatprep.subr.bf16.mxu0 %v2229_v24  ;;  %v2300_v6 = vld [vmem:[%s2511_s21 + $0x224] ss:$44 sps:$4 sm:$0xff]   ;;  %v2301_v8 = vld [vmem:[%s2511_s21 + $0x280] ss:$44 sps:$4 sm:$0xff]   ;;  %v2304_v11 = vld [vmem:[%s2511_s21 + $0x1c8] ss:$44 sps:$4 sm:$0xff]  }
  0x27   : > { %1366 = vmatpush1.bf16.msra.mxu1 %v2234_v26  ;;  %v2309_v9 = vld [vmem:[%s2511_s21 + $0x22c] ss:$44 sps:$4 sm:$0xff]   ;;  %v2307_v12 = vld [vmem:[%s2511_s21 + $0x228] ss:$44 sps:$4 sm:$0xff]   ;;  %v2310_v15 = vld [vmem:[%s2511_s21 + $0x170] ss:$44 sps:$4 sm:$0xff]  }
  0x28   : > { %1367 = vmatprep.subr.bf16.mxu1 %v2237_v27  ;;  %v2306_v10 = vld [vmem:[%s2511_s21 + $0x1cc] ss:$44 sps:$4 sm:$0xff]   ;;  %v2315_v13 = vld [vmem:[%s2511_s21 + $0x1d4] ss:$44 sps:$4 sm:$0xff]   ;;  %v2313_v16 = vld [vmem:[%s2511_s21 + $0x1d0] ss:$44 sps:$4 sm:$0xff]  }
  0x29   : > { %1325 = vmatpush1.bf16.msra.mxu0 %v2233_v25  ;;  %v2312_v14 = vld [vmem:[%s2511_s21 + $0x174] ss:$44 sps:$4 sm:$0xff]   ;;  %v2321_v17 = vld [vmem:[%s2511_s21 + $0x17c] ss:$44 sps:$4 sm:$0xff]   ;;  %v2316_v19 = vld [vmem:[%s2511_s21 + $0x118] ss:$44 sps:$4 sm:$0xff]  }
  0x2a   : > { %1326 = vmatprep.subr.bf16.mxu0 %v2235_v28  ;;  %v2318_v18 = vld [vmem:[%s2511_s21 + $0x11c] ss:$44 sps:$4 sm:$0xff]   ;;  %v2319_v20 = vld [vmem:[%s2511_s21 + $0x178] ss:$44 sps:$4 sm:$0xff]   ;;  %v2322_v23 = vld [vmem:[%s2511_s21 + $0xc0] ss:$44 sps:$4 sm:$0xff]  }
  0x2b   : > { %1368 = vmatpush1.bf16.msra.mxu1 %v2240_v29  ;;  %v2327_v21 = vld [vmem:[%s2511_s21 + $0x124] ss:$44 sps:$4 sm:$0xff]   ;;  %v2325_v24 = vld [vmem:[%s2511_s21 + $0x120] ss:$44 sps:$4 sm:$0xff]   ;;  %v2328_v27 = vld [vmem:[%s2511_s21 + $0x68] ss:$44 sps:$4 sm:$0xff]  }
  0x2c   : > { %1369 = vmatprep.subr.bf16.mxu1 %v2243_v31  ;;  %v2324_v22 = vld [vmem:[%s2511_s21 + $0xc4] ss:$44 sps:$4 sm:$0xff]   ;;  %v2333_v25 = vld [vmem:[%s2511_s21 + $0xcc] ss:$44 sps:$4 sm:$0xff]   ;;  %v2331_v28 = vld [vmem:[%s2511_s21 + $0xc8] ss:$44 sps:$4 sm:$0xff]  }
  0x2d   : > { %1327 = vmatpush1.bf16.msra.mxu0 %v2239_v30  ;;  %v2330_v26 = vld [vmem:[%s2511_s21 + $0x6c] ss:$44 sps:$4 sm:$0xff]   ;;  %v2339_v29 = vld [vmem:[%s2511_s21 + $0x74] ss:$44 sps:$4 sm:$0xff]   ;;  %v2334_v31 = vld [vmem:[%s2511_s21 + $0x10] ss:$44 sps:$4 sm:$0xff]  }
  0x2e   : > { %1328 = vmatprep.subr.bf16.mxu0 %v2241_v32  ;;  %v2336_v30 = vld [vmem:[%s2511_s21 + $0x14] ss:$44 sps:$4 sm:$0xff]   ;;  %v2337_v32 = vld [vmem:[%s2511_s21 + $0x70] ss:$44 sps:$4 sm:$0xff]  }
  0x2f   : > { %1370 = vmatpush1.bf16.msra.mxu1 %v2246_v34  ;;  %v2342_v34 = vld [vmem:[%s2511_s21 + $0x53c] ss:$44 sps:$4 sm:$0xff]  }
  0x30   : > { %1371 = vmatprep.subr.bf16.mxu1 %v2249_v35  ;;  %v2340_v35 = vld [vmem:[%s2511_s21 + $0x538] ss:$44 sps:$4 sm:$0xff]  }
  0x31   : > { %1329 = vmatpush2.bf16.msra.mxu0 %v2245_v33  ;;  %v2345_v33 = vld [vmem:[%s2511_s21 + $0x1c] ss:$44 sps:$4 sm:$0xff]  }
  0x32   : > { %1330 = vmatprep.subr.bf16.mxu0 %v2247_v36  ;;  %v2343_v36 = vld [vmem:[%s2511_s21 + $0x18] ss:$44 sps:$4 sm:$0xff]  }
  0x33   : > { %1372 = vmatpush2.bf16.msra.mxu1 %v2252_v37  ;;  %v2351_v37 = vld [vmem:[%s2511_s21 + $0x544] ss:$44 sps:$4 sm:$0xff]  }
  0x34   : > { %1373 = vmatprep.subr.bf16.mxu1 %v2255_v39  ;;  %v2346_v39 = vld [vmem:[%s2511_s21 + $0x4e0] ss:$44 sps:$4 sm:$0xff]  }
  0x35   : > { %1331 = vmatpush2.bf16.msra.mxu0 %v2251_v38  ;;  %v2348_v38 = vld [vmem:[%s2511_s21 + $0x4e4] ss:$44 sps:$4 sm:$0xff]  }
  0x36   : > { %1332 = vmatprep.subr.bf16.mxu0 %v2253_v40  ;;  %v2349_v40 = vld [vmem:[%s2511_s21 + $0x540] ss:$44 sps:$4 sm:$0xff]  }
  0x37   : > { %1374 = vmatpush2.bf16.msra.mxu1 %v2258_v42  ;;  %v2354_v42 = vld [vmem:[%s2511_s21 + $0x48c] ss:$44 sps:$4 sm:$0xff]  }
  0x38   : > { %1375 = vmatprep.subr.bf16.mxu1 %v2261_v43  ;;  %v2352_v43 = vld [vmem:[%s2511_s21 + $0x488] ss:$44 sps:$4 sm:$0xff]  }
  0x39   : > { %1333 = vmatpush2.bf16.msra.mxu0 %v2257_v41  ;;  %v2357_v41 = vld [vmem:[%s2511_s21 + $0x4ec] ss:$44 sps:$4 sm:$0xff]  }
  0x3a   : > { %1334 = vmatprep.subr.bf16.mxu0 %v2259_v44  ;;  %v2355_v44 = vld [vmem:[%s2511_s21 + $0x4e8] ss:$44 sps:$4 sm:$0xff]  }
  0x3b   : > { %1376 = vmatpush2.bf16.msra.mxu1 %v2264_v45  ;;  %v2363_v45 = vld [vmem:[%s2511_s21 + $0x494] ss:$44 sps:$4 sm:$0xff]  }
  0x3c   : > { %1377 = vmatprep.subr.bf16.mxu1 %v2267_v47  ;;  %v2358_v47 = vld [vmem:[%s2511_s21 + $0x430] ss:$44 sps:$4 sm:$0xff]  }
  0x3d   : > { %1335 = vmatpush2.bf16.msra.mxu0 %v2263_v46  ;;  %v2360_v46 = vld [vmem:[%s2511_s21 + $0x434] ss:$44 sps:$4 sm:$0xff]  }
  0x3e   : > { %1336 = vmatprep.subr.bf16.mxu0 %v2265_v48  ;;  %v2361_v48 = vld [vmem:[%s2511_s21 + $0x490] ss:$44 sps:$4 sm:$0xff]  }
  0x3f   : > { %1378 = vmatpush2.bf16.msra.mxu1 %v2270_v50  ;;  %v2366_v50 = vld [vmem:[%s2511_s21 + $0x3dc] ss:$44 sps:$4 sm:$0xff]  }
  0x40   : > { %1379 = vmatprep.subr.bf16.mxu1 %v2273_v51  ;;  %v2367_v51 = vld [vmem:[%s2511_s21 + $0x438] ss:$44 sps:$4 sm:$0xff]  }
  0x41   : > { %1337 = vmatpush2.bf16.msra.mxu0 %v2269_v49  ;;  %v2369_v49 = vld [vmem:[%s2511_s21 + $0x43c] ss:$44 sps:$4 sm:$0xff]  }
  0x42   : > { %1338 = vmatprep.subr.bf16.mxu0 %v2271_v52  ;;  %v2364_v52 = vld [vmem:[%s2511_s21 + $0x3d8] ss:$44 sps:$4 sm:$0xff]  }
  0x43   : > { %1380 = vmatpush2.bf16.msra.mxu1 %v2276_v54  ;;  %v2372_v54 = vld [vmem:[%s2511_s21 + $0x384] ss:$44 sps:$4 sm:$0xff]  }
  0x44   : > { %1381 = vmatprep.subr.bf16.mxu1 %v2279_v55  ;;  %v2370_v55 = vld [vmem:[%s2511_s21 + $0x380] ss:$44 sps:$4 sm:$0xff]  }
  0x45   : > { %1339 = vmatpush2.bf16.msra.mxu0 %v2275_v53  ;;  %v2375_v53 = vld [vmem:[%s2511_s21 + $0x3e4] ss:$44 sps:$4 sm:$0xff]  }
  0x46   : > { %1340 = vmatprep.subr.bf16.mxu0 %v2277_v56  ;;  %v2373_v56 = vld [vmem:[%s2511_s21 + $0x3e0] ss:$44 sps:$4 sm:$0xff]  }
  0x47   : > { %1382 = vmatpush2.bf16.msra.mxu1 %v2282_v58  ;;  %v2378_v58 = vld [vmem:[%s2511_s21 + $0x32c] ss:$44 sps:$4 sm:$0xff]  }
  0x48   : > { %1383 = vmatprep.subr.bf16.mxu1 %v2285_v59  ;;  %v2376_v59 = vld [vmem:[%s2511_s21 + $0x328] ss:$44 sps:$4 sm:$0xff]  }
  0x49   : > { %1341 = vmatpush2.bf16.msra.mxu0 %v2281_v57  ;;  %v2381_v57 = vld [vmem:[%s2511_s21 + $0x38c] ss:$44 sps:$4 sm:$0xff]  }
  0x4a   : > { %1342 = vmatprep.subr.bf16.mxu0 %v2283_v60  ;;  %v2379_v60 = vld [vmem:[%s2511_s21 + $0x388] ss:$44 sps:$4 sm:$0xff]  }
  0x4b   : > { %1384 = vmatpush2.bf16.msra.mxu1 %v2288_v62  ;;  %v2384_v62 = vld [vmem:[%s2511_s21 + $0x2d4] ss:$44 sps:$4 sm:$0xff]  }
  0x4c   : > { %1385 = vmatprep.subr.bf16.mxu1 %v2292_v63  ;;  %v2385_v63 = vld [vmem:[%s2511_s21 + $0x330] ss:$44 sps:$4 sm:$0xff]  }
  0x4d   : > { %1343 = vmatpush2.bf16.msra.mxu0 %v2287_v61  ;;  %v2387_v61 = vld [vmem:[%s2511_s21 + $0x334] ss:$44 sps:$4 sm:$0xff]  }
  0x4e   : > { %1398 = vmatprep.subr.bf16.mxu0 %v2296_v1  ;;  %v2382_v1 = vld [vmem:[%s2511_s21 + $0x2d0] ss:$44 sps:$4 sm:$0xff]  }
  0x4f   : > { %1386 = vmatpush2.bf16.msra.mxu1 %v2297_v4  ;;  %v2393_v4 = vld [vmem:[%s2511_s21 + $0x28c] ss:$44 sps:$4 sm:$0xff]  }
  0x50   : > { %1345 = vmatmul.mubr.bf16.vlgmr.msra.gmra.mxu0 %v2583_v2  ;;  %1441 = vmatprep.subr.bf16.mxu1 %v2303_v5  ;;  %v2388_v5 = vld [vmem:[%s2511_s21 + $0x2d8] ss:$44 sps:$4 sm:$0xff]  }
  0x51   : > { %1399 = vmatpush1.bf16.msra.mxu0 %v2294_v3  ;;  %1430 = vmatprep.mubr.bf16.mxu0 %v2514_v0  ;;  %v2390_v3 = vld [vmem:[%s2511_s21 + $0x2dc] ss:$44 sps:$4 sm:$0xff]  }
  0x52   : > { %1400 = vmatprep.subr.bf16.mxu0 %v2300_v6  ;;  %1388 = vmatmul.mubr.bf16.vlgmr.msra.gmra.mxu1 %v2583_v2  ;;  %v2391_v6 = vld [vmem:[%s2511_s21 + $0x288] ss:$44 sps:$4 sm:$0xff]  }
  0x53   : > { %1442 = vmatpush1.bf16.msra.mxu1 %v2301_v8  ;;  %1473 = vmatprep.mubr.bf16.mxu1 %v2514_v0  ;;  %v2396_v8 = vld [vmem:[%s2511_s21 + $0x234] ss:$44 sps:$4 sm:$0xff]  }
  0x54   : > { %1443 = vmatprep.subr.bf16.mxu1 %v2309_v9  ;;  %v2413_v9 = vld [vmem:[%s2511_s21 + $0x290] ss:$44 sps:$4 sm:$0xff]  }
  0x55   : > { %1401 = vmatpush1.bf16.msra.mxu0 %v2298_v7  ;;  %v2412_v7 = vld [vmem:[%s2511_s21 + $0x550] ss:$44 sps:$4 sm:$0xff]  }
  0x56   : > { %1402 = vmatprep.subr.bf16.mxu0 %v2306_v10  ;;  %v2394_v10 = vld [vmem:[%s2511_s21 + $0x230] ss:$44 sps:$4 sm:$0xff]  }
  0x57   : > { %1444 = vmatpush1.bf16.msra.mxu1 %v2307_v12  ;;  %v2399_v12 = vld [vmem:[%s2511_s21 + $0x1dc] ss:$44 sps:$4 sm:$0xff]  }
  0x58   : > { %1445 = vmatprep.subr.bf16.mxu1 %v2315_v13  ;;  %v2418_v13 = vld [vmem:[%s2511_s21 + $0x238] ss:$44 sps:$4 sm:$0xff]  }
  0x59   : > { %1403 = vmatpush1.bf16.msra.mxu0 %v2304_v11  ;;  %v2417_v11 = vld [vmem:[%s2511_s21 + $0x4f8] ss:$44 sps:$4 sm:$0xff]  }
  0x5a   : > { %1404 = vmatprep.subr.bf16.mxu0 %v2312_v14  ;;  %v2397_v14 = vld [vmem:[%s2511_s21 + $0x1d8] ss:$44 sps:$4 sm:$0xff]  }
  0x5b   : > { %1446 = vmatpush1.bf16.msra.mxu1 %v2313_v16  ;;  %v2402_v16 = vld [vmem:[%s2511_s21 + $0x184] ss:$44 sps:$4 sm:$0xff]  }
  0x5c   : > { %1447 = vmatprep.subr.bf16.mxu1 %v2321_v17  ;;  %v2423_v17 = vld [vmem:[%s2511_s21 + $0x1e0] ss:$44 sps:$4 sm:$0xff]  }
  0x5d   : > { %1405 = vmatpush1.bf16.msra.mxu0 %v2310_v15  ;;  %v2422_v15 = vld [vmem:[%s2511_s21 + $0x4a0] ss:$44 sps:$4 sm:$0xff]  }
  0x5e   : > { %1406 = vmatprep.subr.bf16.mxu0 %v2318_v18  ;;  %v2400_v18 = vld [vmem:[%s2511_s21 + $0x180] ss:$44 sps:$4 sm:$0xff]  }
  0x5f   : > { %1448 = vmatpush1.bf16.msra.mxu1 %v2319_v20  ;;  %v2428_v20 = vld [vmem:[%s2511_s21 + $0x188] ss:$44 sps:$4 sm:$0xff]  }
  0x60   : > { %1449 = vmatprep.subr.bf16.mxu1 %v2327_v21  ;;  %v2403_v21 = vld [vmem:[%s2511_s21 + $0x128] ss:$44 sps:$4 sm:$0xff]  }
  0x61   : > { %1407 = vmatpush1.bf16.msra.mxu0 %v2316_v19  ;;  %v2427_v19 = vld [vmem:[%s2511_s21 + $0x448] ss:$44 sps:$4 sm:$0xff]  }
  0x62   : > { %1408 = vmatprep.subr.bf16.mxu0 %v2324_v22  ;;  %v2432_v22 = vld [vmem:[%s2511_s21 + $0x3f0] ss:$44 sps:$4 sm:$0xff]  }
  0x63   : > { %1450 = vmatpush1.bf16.msra.mxu1 %v2325_v24  ;;  %v2433_v24 = vld [vmem:[%s2511_s21 + $0x130] ss:$44 sps:$4 sm:$0xff]  }
  0x64   : > { %1451 = vmatprep.subr.bf16.mxu1 %v2333_v25  ;;  %v2406_v25 = vld [vmem:[%s2511_s21 + $0xd0] ss:$44 sps:$4 sm:$0xff]  }
  0x65   : > { %1409 = vmatpush1.bf16.msra.mxu0 %v2322_v23  ;;  %v2408_v23 = vld [vmem:[%s2511_s21 + $0xd4] ss:$44 sps:$4 sm:$0xff]  }
  0x66   : > { %1410 = vmatprep.subr.bf16.mxu0 %v2330_v26  ;;  %v2437_v26 = vld [vmem:[%s2511_s21 + $0x398] ss:$44 sps:$4 sm:$0xff]  }
  0x67   : > { %1452 = vmatpush1.bf16.msra.mxu1 %v2331_v28  ;;  %v2438_v28 = vld [vmem:[%s2511_s21 + $0xd8] ss:$44 sps:$4 sm:$0xff]  }
  0x68   : > { %1453 = vmatprep.subr.bf16.mxu1 %v2339_v29  ;;  %v2409_v29 = vld [vmem:[%s2511_s21 + $0x78] ss:$44 sps:$4 sm:$0xff]  }
  0x69   : > { %1411 = vmatpush1.bf16.msra.mxu0 %v2328_v27  ;;  %v2411_v27 = vld [vmem:[%s2511_s21 + $0x7c] ss:$44 sps:$4 sm:$0xff]  }
  0x6a   : > { %1412 = vmatprep.subr.bf16.mxu0 %v2336_v30  ;;  %v2442_v30 = vld [vmem:[%s2511_s21 + $0x340] ss:$44 sps:$4 sm:$0xff]  }
  0x6b   : > { %1454 = vmatpush1.bf16.msra.mxu1 %v2337_v32  ;;  %v2443_v32 = vld [vmem:[%s2511_s21 + $0x80] ss:$44 sps:$4 sm:$0xff]  }
  0x6c   : > { %1455 = vmatprep.subr.bf16.mxu1 %v2345_v33  ;;  %v2414_v33 = vld [vmem:[%s2511_s21 + $0x20] ss:$44 sps:$4 sm:$0xff]  }
  0x6d   : > { %1413 = vmatpush1.bf16.msra.mxu0 %v2334_v31  ;;  %v2416_v31 = vld [vmem:[%s2511_s21 + $0x24] ss:$44 sps:$4 sm:$0xff]  }
  0x6e   : > { %1414 = vmatprep.subr.bf16.mxu0 %v2342_v34  ;;  %v2447_v34 = vld [vmem:[%s2511_s21 + $0x2e8] ss:$44 sps:$4 sm:$0xff]  }
  0x6f   : > { %1456 = vmatpush1.bf16.msra.mxu1 %v2343_v36  ;;  %v2448_v36 = vld [vmem:[%s2511_s21 + $0x28] ss:$44 sps:$4 sm:$0xff]  }
  0x70   : > { %1457 = vmatprep.subr.bf16.mxu1 %v2351_v37  ;;  %v2419_v37 = vld [vmem:[%s2511_s21 + $0x548] ss:$44 sps:$4 sm:$0xff]  }
  0x71   : > { %1415 = vmatpush2.bf16.msra.mxu0 %v2340_v35  ;;  %v2421_v35 = vld [vmem:[%s2511_s21 + $0x54c] ss:$44 sps:$4 sm:$0xff]  }
  0x72   : > { %1416 = vmatprep.subr.bf16.mxu0 %v2348_v38  ;;  %v2426_v38 = vld [vmem:[%s2511_s21 + $0x4f4] ss:$44 sps:$4 sm:$0xff]  }
  0x73   : > { %1458 = vmatpush2.bf16.msra.mxu1 %v2349_v40  ;;  %v2431_v40 = vld [vmem:[%s2511_s21 + $0x49c] ss:$44 sps:$4 sm:$0xff]  }
  0x74   : > { %1459 = vmatprep.subr.bf16.mxu1 %v2357_v41  ;;  %v2429_v41 = vld [vmem:[%s2511_s21 + $0x498] ss:$44 sps:$4 sm:$0xff]  }
  0x75   : > { %1417 = vmatpush2.bf16.msra.mxu0 %v2346_v39  ;;  %v2424_v39 = vld [vmem:[%s2511_s21 + $0x4f0] ss:$44 sps:$4 sm:$0xff]  }
  0x76   : > { %1418 = vmatprep.subr.bf16.mxu0 %v2354_v42  ;;  %v2436_v42 = vld [vmem:[%s2511_s21 + $0x444] ss:$44 sps:$4 sm:$0xff]  }
  0x77   : > { %1460 = vmatpush2.bf16.msra.mxu1 %v2355_v44  ;;  %v2441_v44 = vld [vmem:[%s2511_s21 + $0x3ec] ss:$44 sps:$4 sm:$0xff]  }
  0x78   : > { %1461 = vmatprep.subr.bf16.mxu1 %v2363_v45  ;;  %v2439_v45 = vld [vmem:[%s2511_s21 + $0x3e8] ss:$44 sps:$4 sm:$0xff]  }
  0x79   : > { %1419 = vmatpush2.bf16.msra.mxu0 %v2352_v43  ;;  %v2434_v43 = vld [vmem:[%s2511_s21 + $0x440] ss:$44 sps:$4 sm:$0xff]  }
  0x7a   : > { %1420 = vmatprep.subr.bf16.mxu0 %v2360_v46  ;;  %v2446_v46 = vld [vmem:[%s2511_s21 + $0x394] ss:$44 sps:$4 sm:$0xff]  }
  0x7b   : > { %1462 = vmatpush2.bf16.msra.mxu1 %v2361_v48  ;;  %v2451_v48 = vld [vmem:[%s2511_s21 + $0x33c] ss:$44 sps:$4 sm:$0xff]  }
  0x7c   : > { %1463 = vmatprep.subr.bf16.mxu1 %v2369_v49  ;;  %v2449_v49 = vld [vmem:[%s2511_s21 + $0x338] ss:$44 sps:$4 sm:$0xff]  }
  0x7d   : > { %1421 = vmatpush2.bf16.msra.mxu0 %v2358_v47  ;;  %v2444_v47 = vld [vmem:[%s2511_s21 + $0x390] ss:$44 sps:$4 sm:$0xff]  }
  0x7e   : > { %1422 = vmatprep.subr.bf16.mxu0 %v2366_v50  ;;  %v2454_v50 = vld [vmem:[%s2511_s21 + $0x2e4] ss:$44 sps:$4 sm:$0xff]  }
  0x7f   : > { %1464 = vmatpush2.bf16.msra.mxu1 %v2367_v51  ;;  %v2452_v51 = vld [vmem:[%s2511_s21 + $0x2e0] ss:$44 sps:$4 sm:$0xff]  }
  0x80   : > { %1465 = vmatprep.subr.bf16.mxu1 %v2375_v53 }
  0x81   : > { %1423 = vmatpush2.bf16.msra.mxu0 %v2364_v52  ;;  %v2467_v52 = vmov 0  }
  0x82   : > { %1424 = vmatprep.subr.bf16.mxu0 %v2372_v54  ;;  %2193 = vset.pattern.permute.xlu1 %v2467_v52 }
  0x83   : > { %1466 = vmatpush2.bf16.msra.mxu1 %v2373_v56  ;;  %2192 = vset.pattern.permute.xlu0 %v2467_v52 }
  0x84   : > { %1467 = vmatprep.subr.bf16.mxu1 %v2381_v57 }
  0x85   : > { %1425 = vmatpush2.bf16.msra.mxu0 %v2370_v55 }
  0x86   : > { %1426 = vmatprep.subr.bf16.mxu0 %v2378_v58 }
  0x87   : > { %1468 = vmatpush2.bf16.msra.mxu1 %v2379_v60 }
  0x88   : > { %1469 = vmatprep.subr.bf16.mxu1 %v2387_v61 }
  0x89   : > { %1427 = vmatpush2.bf16.msra.mxu0 %v2376_v59 }
  0x8a   : > { %1428 = vmatprep.subr.bf16.mxu0 %v2384_v62 }
  0x8b   : > { %1470 = vmatpush2.bf16.msra.mxu1 %v2385_v63 }
  0x8c   : > { %1471 = vmatprep.subr.bf16.mxu1 %v2390_v3 }
  0x8d   : > { %1429 = vmatpush2.bf16.msra.mxu0 %v2382_v1 }
  0x8e   : > { %1484 = vmatprep.subr.bf16.mxu0 %v2393_v4 }
  0x8f   : > { %1472 = vmatpush2.bf16.msra.mxu1 %v2388_v5 }
  0x90   : > { %1431 = vmatmul.mubr.bf16.vlgmr.msra.gmra.mxu0 %v2583_v2  ;;  %2158 = vmatprep.subr.bf16.mxu1 %v2412_v7 }
  0x91   : > { %1485 = vmatpush1.bf16.msra.mxu0 %v2391_v6  ;;  %1516 = vmatprep.mubr.bf16.mxu0 %v2514_v0 }
  0x92   : > { %1486 = vmatprep.subr.bf16.mxu0 %v2396_v8  ;;  %1474 = vmatmul.mubr.bf16.vlgmr.msra.gmra.mxu1 %v2583_v2 }
  0x93   : > { %2159 = vmatpush3.bf16.msra.mxu1 %v2413_v9  ;;  %1559 = vmatprep.mubr.bf16.mxu1 %v2514_v0  ;;  %v2405_v0 = vld [vmem:[%s2511_s21 + $0x12c] ss:$44 sps:$4 sm:$0xff]  }
  0x94   : > { %2160 = vmatprep.subr.bf16.mxu1 %v2417_v11 }
  0x95   : > { %1487 = vmatpush1.bf16.msra.mxu0 %v2394_v10 }
  0x96   : > { %1488 = vmatprep.subr.bf16.mxu0 %v2399_v12 }
  0x97   : > { %2161 = vmatpush3.bf16.msra.mxu1 %v2418_v13 }
  0x98   : > { %2162 = vmatprep.subr.bf16.mxu1 %v2422_v15 }
  0x99   : > { %1489 = vmatpush1.bf16.msra.mxu0 %v2397_v14 }
  0x9a   : > { %1490 = vmatprep.subr.bf16.mxu0 %v2402_v16 }
  0x9b   : > { %2163 = vmatpush3.bf16.msra.mxu1 %v2423_v17 }
  0x9c   : > { %2164 = vmatprep.subr.bf16.mxu1 %v2427_v19 }
  0x9d   : > { %1491 = vmatpush1.bf16.msra.mxu0 %v2400_v18 }
  0x9e   : > { %1492 = vmatprep.subr.bf16.mxu0 %v2405_v0 }
  0x9f   : > { %2165 = vmatpush3.bf16.msra.mxu1 %v2428_v20 }
  0xa0   : > { %2166 = vmatprep.subr.bf16.mxu1 %v2432_v22 }
  0xa1   : > { %1493 = vmatpush1.bf16.msra.mxu0 %v2403_v21 }
  0xa2   : > { %1494 = vmatprep.subr.bf16.mxu0 %v2408_v23 }
  0xa3   : > { %2167 = vmatpush3.bf16.msra.mxu1 %v2433_v24 }
  0xa4   : > { %2168 = vmatprep.subr.bf16.mxu1 %v2437_v26 }
  0xa5   : > { %1495 = vmatpush1.bf16.msra.mxu0 %v2406_v25 }
  0xa6   : > { %1496 = vmatprep.subr.bf16.mxu0 %v2411_v27 }
  0xa7   : > { %2169 = vmatpush3.bf16.msra.mxu1 %v2438_v28 }
  0xa8   : > { %2170 = vmatprep.subr.bf16.mxu1 %v2442_v30 }
  0xa9   : > { %1497 = vmatpush1.bf16.msra.mxu0 %v2409_v29 }
  0xaa   : > { %1498 = vmatprep.subr.bf16.mxu0 %v2416_v31 }
  0xab   : > { %2171 = vmatpush3.bf16.msra.mxu1 %v2443_v32 }
  0xac   : > { %2172 = vmatprep.subr.bf16.mxu1 %v2447_v34 }
  0xad   : > { %1499 = vmatpush1.bf16.msra.mxu0 %v2414_v33 }
  0xae   : > { %1500 = vmatprep.subr.bf16.mxu0 %v2421_v35 }
  0xaf   : > { %2173 = vmatpush3.bf16.msra.mxu1 %v2448_v36 }
  0xb1   : > { %1501 = vmatpush2.bf16.msra.mxu0 %v2419_v37 }
  0xb2   : > { %1502 = vmatprep.subr.bf16.mxu0 %v2426_v38  ;;  %1560 = vmatmul.mubr.bf16.vlgmr.msra.gmra.mxu1 %v2583_v2 }
  0xb5   : > { %1503 = vmatpush2.bf16.msra.mxu0 %v2424_v39 }
  0xb6   : > { %1504 = vmatprep.subr.bf16.mxu0 %v2431_v40 }
  0xb9   : > { %1505 = vmatpush2.bf16.msra.mxu0 %v2429_v41 }
  0xba   : > { %1506 = vmatprep.subr.bf16.mxu0 %v2436_v42 }
  0xbd   : > { %1507 = vmatpush2.bf16.msra.mxu0 %v2434_v43 }
  0xbe   : > { %1508 = vmatprep.subr.bf16.mxu0 %v2441_v44 }
  0xc1   : > { %1509 = vmatpush2.bf16.msra.mxu0 %v2439_v45 }
  0xc2   : > { %1510 = vmatprep.subr.bf16.mxu0 %v2446_v46 }
  0xc5   : > { %1511 = vmatpush2.bf16.msra.mxu0 %v2444_v47 }
  0xc6   : > { %1512 = vmatprep.subr.bf16.mxu0 %v2451_v48 }
  0xc9   : > { %1513 = vmatpush2.bf16.msra.mxu0 %v2449_v49 }
  0xca   : > { %1514 = vmatprep.subr.bf16.mxu0 %v2454_v50 }
  0xcd   : > { %1515 = vmatpush2.bf16.msra.mxu0 %v2452_v51 }
  0xd0   : > { %1517 = vmatmul.mubr.bf16.vlgmr.msra.gmra.mxu0 %v2583_v2 }
 0x110   : > { %v2709_v54 = vpop.f32.mrf.mxu0 }
 0x111   : > { %v1596_v59 = vmul.f32 %v2709_v54, %v2709_v54 }
 0x112   : > { %v2707_v53 = vpop.f32.mrf.mxu1  ;;  %v2713_v56 = vpop.f32.mrf.mxu0 }
 0x113   : > { %v1597_v2 = vmul.f32 %v2713_v56, %v2713_v56  ;;  %v1570_v61 = vadd.f32 %v2713_v56, %v2709_v54  ;;  %v1598_v3 = vmul.f32 %v2707_v53, %v2707_v53 }
 0x114   : > { %v2711_v55 = vpop.f32.mrf.mxu1  ;;  %v2717_v58 = vpop.f32.mrf.mxu0 }
 0x115   : > { %v1618_v1 = vadd.f32 %v1597_v2, %v1596_v59  ;;  %v1571_v5 = vadd.f32 %v1570_v61, %v2707_v53  ;;  %v1599_v9 = vmul.f32 %v2711_v55, %v2711_v55 }
 0x116   : > { %v2715_v57 = vpop.f32.mrf.mxu1  ;;  %v2727_v62 = vpop.f32.mrf.mxu0 }
 0x117   : > { %v1582_v6 = vadd.f32 %v2727_v62, %v2717_v58  ;;  %v1619_v8 = vadd.f32 %v1618_v1, %v1598_v3  ;;  %v1572_v11 = vadd.f32 %v1571_v5, %v2711_v55  ;;  %v1569_v1 = vld [vmem:[%s205_s24 + $0x8] sm:$0xff]  ;;  %v1568_v3 = vld [vmem:[%s205_s24] sm:$0xff]  ;;  %v1608_v5 = vmul.f32 %v2727_v62, %v2727_v62 }
 0x118   : > { %v2723_v60 = vpop.f32.mrf.mxu1 }
 0x119   : > { %v1583_v12 = vadd.f32 %v1582_v6, %v2715_v57  ;;  %v1620_v15 = vadd.f32 %v1619_v8, %v1599_v9  ;;  %v2468_v6 = vmov 1   ;;  %v1607_v8 = vmul.f32 %v2717_v58, %v2717_v58 }
 0x11b   : > { %v1584_v18 = vadd.f32 %v1583_v12, %v2723_v60  ;;  %v1630_v9 = vadd.f32 %v1608_v5, %v1607_v8 }
 0x150   : > { %v2733_v4 = vpop.f32.mrf.mxu0 }
 0x151   : > { %v1600_v13 = vmul.f32 %v2733_v4, %v2733_v4  ;;  %v1573_v16 = vadd.f32 %v1572_v11, %v2733_v4  ;;  %v1609_v11 = vmul.f32 %v2715_v57, %v2715_v57 }
 0x152   : > { %v2729_v63 = vpop.f32.mrf.mxu1  ;;  %v2742_v10 = vpop.f32.mrf.mxu0 }
 0x153   : > { %v1621_v19 = vadd.f32 %v1620_v15, %v1600_v13  ;;  %v1601_v0 = vmul.f32 %v2742_v10, %v2742_v10  ;;  %v1574_v21 = vadd.f32 %v1573_v16, %v2742_v10  ;;  %v1602_v26 = vmul.f32 %v2729_v63, %v2729_v63 }
 0x154   : > { %v2738_v7 = vpop.f32.mrf.mxu1  ;;  %v2751_v17 = vpop.f32.mrf.mxu0  ;;  %v1631_v12 = vadd.f32 %v1630_v9, %v1609_v11  ;;  %v1610_v13 = vmul.f32 %v2723_v60, %v2723_v60 }
 0x155   : > { %v1585_v22 = vadd.f32 %v1584_v18, %v2751_v17  ;;  %v1622_v25 = vadd.f32 %v1621_v19, %v1601_v0  ;;  %v1575_v27 = vadd.f32 %v1574_v21, %v2729_v63  ;;  %v1603_v31 = vmul.f32 %v2738_v7, %v2738_v7 }
 0x156   : > { %v2748_v14 = vpop.f32.mrf.mxu1  ;;  %v2760_v23 = vpop.f32.mrf.mxu0  ;;  %v1611_v15 = vmul.f32 %v2751_v17, %v2751_v17  ;;  %v1632_v16 = vadd.f32 %v1631_v12, %v1610_v13 }
 0x157   : > { %v1586_v28 = vadd.f32 %v1585_v22, %v2760_v23  ;;  %v1623_v30 = vadd.f32 %v1622_v25, %v1602_v26  ;;  %v1576_v32 = vadd.f32 %v1575_v27, %v2738_v7  ;;  %v1612_v19 = vmul.f32 %v2760_v23, %v2760_v23 }
 0x158   : > { %v2756_v20 = vpop.f32.mrf.mxu1  ;;  %v1633_v18 = vadd.f32 %v1632_v16, %v1611_v15  ;;  %v1613_v21 = vmul.f32 %v2748_v14, %v2748_v14 }
 0x159   : > { %v1587_v33 = vadd.f32 %v1586_v28, %v2748_v14  ;;  %v1624_v36 = vadd.f32 %v1623_v30, %v1603_v31 }
 0x15a   : > { %v1634_v0 = vadd.f32 %v1633_v18, %v1612_v19 }
 0x15b   : > { %v1588_v41 = vadd.f32 %v1587_v33, %v2756_v20 }
 0x15c   : > { %v1635_v22 = vadd.f32 %v1634_v0, %v1613_v21 }
 0x172   : > { %v2174_v24 = vpop.f32.mrf.mxu1 }
 0x174   : > { %v2175_v29 = vpop.f32.mrf.mxu1 }
 0x175   : > { %v2772_v37 = vadd.f32 %v2175_v29, %v2174_v24  ;;  %v1614_v24 = vmul.f32 %v2756_v20, %v2756_v20 }
 0x176   : > { %v2177_v34 = vpop.f32.mrf.mxu1 }
 0x177   : > { %v1606_v49 = vmul.f32 %v2772_v37, %v2772_v37  ;;  %v1636_v26 = vadd.f32 %v1635_v22, %v1614_v24 }
 0x178   : > { %v2178_v45 = vpop.f32.mrf.mxu1 }
 0x179   : > { %v2791_v52 = vadd.f32 %v2178_v45, %v2177_v34 }
 0x17b   : > { %v1617_v30 = vmul.f32 %v2791_v52, %v2791_v52 }
 0x190   : > { %v2770_v35 = vpop.f32.mrf.mxu0 }
 0x191   : > { %v1577_v38 = vadd.f32 %v1576_v32, %v2770_v35  ;;  %v1604_v39 = vmul.f32 %v2770_v35, %v2770_v35 }
 0x192   : > { %v2777_v40 = vpop.f32.mrf.mxu0 }
 0x193   : > { %v1605_v42 = vmul.f32 %v2777_v40, %v2777_v40  ;;  %v1578_v43 = vadd.f32 %v1577_v38, %v2777_v40  ;;  %v1625_v44 = vadd.f32 %v1624_v36, %v1604_v39 }
 0x194   : > { %v2783_v46 = vpop.f32.mrf.mxu0 }
 0x195   : > { %v1589_v47 = vadd.f32 %v1588_v41, %v2783_v46  ;;  %v1579_v48 = vadd.f32 %v2772_v37, %v1578_v43  ;;  %v1626_v50 = vadd.f32 %v1625_v44, %v1605_v42  ;;  %v1615_v25 = vmul.f32 %v2783_v46, %v2783_v46 }
 0x196   : > { %v2789_v51 = vpop.f32.mrf.mxu0 }
 0x197   : > { %v1590_v59 = vadd.f32 %v1589_v47, %v2789_v51  ;;  %1580 = vadd.xlane.f32.xlu0 %v1579_v48  ;;  %v1627_v2 = vadd.f32 %v1626_v50, %v1606_v49  ;;  %v1616_v27 = vmul.f32 %v2789_v51, %v2789_v51  ;;  %v1637_v28 = vadd.f32 %v1636_v26, %v1615_v25 }
 0x199   : > { %1628 = vadd.xlane.f32.xlu1 %v1627_v2  ;;  %v1591_v61 = vadd.f32 %v2791_v52, %v1590_v59  ;;  %v1638_v29 = vadd.f32 %v1637_v28, %v1616_v27 }
 0x19b   : > { %1592 = vadd.xlane.f32.xlu0 %v1591_v61  ;;  %v1639_v31 = vadd.f32 %v1638_v29, %v1617_v30 }
 0x1aa   : > { %1705 = vperm.xlu1 %2193, %v1569_v1  }
 0x1ae   : > { %2194 = vset.pattern.permute.xlu1 %v2468_v6 }
 0x1af   : > { %1731 = vperm.xlu1 %2194, %v1568_v3  }
 0x1b1   : > { %1700 = vperm.xlu0 %2192, %v1568_v3  }
 0x1b5   : > { %2195 = vset.pattern.permute.xlu0 %v2468_v6 }
 0x1d3   : > { %1640 = vadd.xlane.f32.xlu1 %v1639_v31 }
 0x1e4   : > { %1735 = vperm.xlu1 %2194, %v1569_v1  }
 0x220   : > { %v1581_v32 = vpop.xlane.xlu0 %1580 }
 0x221   : > { %v1594_v33 = vmul.f32 0.000739645, %v1581_v32 }
 0x222   : > { %v1629_v34 = vpop.xlane.xlu1 %1628 }
 0x223   : > { %v1642_v36 = vmul.f32 0.000739645, %v1629_v34  ;;  %v1644_v38 = vmul.f32 %v1594_v33, %v1594_v33  ;;  %v1650_v44 = vsub.f32 %v2709_v54, %v1594_v33  ;;  %v1651_v45 = vsub.f32 %v2713_v56, %v1594_v33 }
 0x224   : > { %v2822_v43 = vpop.xlane.xlu0 %1592  ;;  %v1652_v47 = vsub.f32 %v2707_v53, %v1594_v33  ;;  %v1653_v49 = vsub.f32 %v2711_v55, %v1594_v33  ;;  %v1654_v50 = vsub.f32 %v2733_v4, %v1594_v33  ;;  %v1655_v59 = vsub.f32 %v2742_v10, %v1594_v33 }
 0x225   : > { %v1646_v39 = vsub.f32 %v1642_v36, %v1644_v38  ;;  %v1656_v2 = vsub.f32 %v2729_v63, %v1594_v33  ;;  %v1657_v1 = vsub.f32 %v2738_v7, %v1594_v33  ;;  %v1658_v3 = vsub.f32 %v2770_v35, %v1594_v33 }
 0x226   : > { %v2827_v48 = vpop.permute.xlu1 %1705  ;;  %v1659_v54 = vsub.f32 %v2777_v40, %v1594_v33  ;;  %v1660_v56 = vsub.f32 %v2772_v37, %v1594_v33 }
 0x227   : > { %v1648_v41 = vmax.f32 %v1646_v39, 0.0 }
 0x229   : > { %v1672_v42 = vadd.f32 1e-05, %v1648_v41 }
 0x22a   : > { %v1732_v18 = vpop.permute.xlu1 %1731 }
 0x22b   : > { %2455 = vrsqrt.f32 %v1672_v42 }
 0x22c   : > { %v1701_v53 = vpop.permute.xlu0 %1700 }
 0x238   : > { %v2456_v61 = vpop.eup %2455 }
 0x239   : > { %v1676_v5 = vmul.f32 %v2456_v61, %v1650_v44  ;;  %v1677_v6 = vmul.f32 %v2456_v61, %v1651_v45  ;;  %v1678_v8 = vmul.f32 %v2456_v61, %v1652_v47  ;;  %v1679_v55 = vmul.f32 %v2456_v61, %v1653_v49 }
 0x23a   : > { %v1680_v9 = vmul.f32 %v2456_v61, %v1654_v50  ;;  %v1681_v4 = vmul.f32 %v2456_v61, %v1655_v59  ;;  %v1682_v11 = vmul.f32 %v2456_v61, %v1656_v2  ;;  %v1683_v10 = vmul.f32 %v2456_v61, %v1657_v1 }
 0x23b   : > { %v1684_v12 = vmul.f32 %v2456_v61, %v1658_v3  ;;  %v1685_v63 = vmul.f32 %v2456_v61, %v1659_v54  ;;  %v1686_v13 = vmul.f32 %v2456_v61, %v1660_v56  ;;  %v1708_v7 = vmul.f32 %v1701_v53, %v1676_v5 }
 0x23c   : > { %v1709_v15 = vmul.f32 %v1701_v53, %v1677_v6  ;;  %v1710_v35 = vmul.f32 %v1701_v53, %v1678_v8  ;;  %v1711_v16 = vmul.f32 %v1701_v53, %v1679_v55  ;;  %v1712_v40 = vmul.f32 %v1701_v53, %v1680_v9 }
 0x23d   : > { %v1713_v37 = vmul.f32 %v1701_v53, %v1681_v4  ;;  %v1714_v19 = vmul.f32 %v1701_v53, %v1682_v11  ;;  %v1715_v0 = vmul.f32 %v1701_v53, %v1683_v10  ;;  %v1716_v21 = vmul.f32 %v1701_v53, %v1684_v12 }
 0x23e   : > { %v1717_v22 = vmul.f32 %v1701_v53, %v1685_v63  ;;  %v1718_v24 = vmul.f32 %v1701_v53, %v1686_v13  ;;  %v1738_v25 = vadd.f32 %v1732_v18, %v1708_v7  ;;  %v1739_v26 = vadd.f32 %v1732_v18, %v1709_v15 }
 0x23f   : > { %v1740_v27 = vadd.f32 %v1732_v18, %v1710_v35  ;;  %v1741_v28 = vadd.f32 %v1732_v18, %v1711_v16  ;;  %v1742_v29 = vadd.f32 %v1732_v18, %v1712_v40  ;;  %v1743_v30 = vadd.f32 %v1732_v18, %v1713_v37 }
 0x240   : > { %v1744_v31 = vadd.f32 %v1732_v18, %v1714_v19  ;;  %v1745_v32 = vadd.f32 %v1732_v18, %v1715_v0  ;;  %v1746_v33 = vadd.f32 %v1732_v18, %v1716_v21  ;;  %v1747_v34 = vadd.f32 %v1732_v18, %v1717_v22 }
 0x241   : > { %v1748_v36 = vadd.f32 %v1732_v18, %v1718_v24  ;;  %v1760_v38 = vmax.f32 %v1738_v25, 0.0  ;;  %v1761_v39 = vmax.f32 %v1739_v26, 0.0  ;;  %v1762_v41 = vmax.f32 %v1740_v27, 0.0 }
 0x242   : > { %v1763_v42 = vmax.f32 %v1741_v28, 0.0  ;;  %v1764_v44 = vmax.f32 %v1742_v29, 0.0  ;;  %v1765_v45 = vmax.f32 %v1743_v30, 0.0  ;;  %v1766_v47 = vmax.f32 %v1744_v31, 0.0 }
 0x243   : > { %v1767_v49 = vmax.f32 %v1745_v32, 0.0  ;;  %v1768_v50 = vmax.f32 %v1746_v33, 0.0  ;;  %v1769_v59 = vmax.f32 %v1747_v34, 0.0  ;;  %v1770_v2 = vmax.f32 %v1748_v36, 0.0 }
 0x244   : > { %v2146_v61 = vpack.c.bf16 %v1761_v39, %v1760_v38  ;;  %v2147_v1 = vpack.c.bf16 %v1763_v42, %v1762_v41  ;;  %v2148_v3 = vpack.c.bf16 %v1765_v45, %v1764_v44  ;;  %v1595_v5 = vmul.f32 0.000739645, %v2822_v43 }
 0x245   : > { %v2149_v54 = vpack.c.bf16 %v1767_v49, %v1766_v47  ;;  %v2150_v56 = vpack.c.bf16 %v1769_v59, %v1768_v50  ;;  %v2151_v53 = vpack.c.bf16 %v1770_v2, %v1770_v2 }
 0x246   : > { %1850 = vst [vmem:[%s2841_s28] sm:$0xff] %v2146_v61  ;;  %1851 = vst [vmem:[%s2841_s28 + $0x8] sm:$0xff] %v2147_v1  ;;  %v1645_v55 = vmul.f32 %v1595_v5, %v1595_v5  ;;  %v1661_v10 = vsub.f32 %v2717_v58, %v1595_v5  ;;  %v1662_v12 = vsub.f32 %v2727_v62, %v1595_v5 }
 0x247   : > { %1852 = vst [vmem:[%s2841_s28 + $0x10] sm:$0xff] %v2148_v3  ;;  %1853 = vst [vmem:[%s2841_s28 + $0x18] sm:$0xff] %v2149_v54  ;;  %v1663_v63 = vsub.f32 %v2715_v57, %v1595_v5  ;;  %v1664_v13 = vsub.f32 %v2723_v60, %v1595_v5  ;;  %v1665_v7 = vsub.f32 %v2751_v17, %v1595_v5 }
 0x248   : > { %1854 = vst [vmem:[%s2841_s28 + $0x20] sm:$0xff] %v2150_v56  ;;  %1855 = vst [vmem:[%s2841_s28 + $0x28] sm:$0xf] %v2151_v53  ;;  %v1666_v15 = vsub.f32 %v2760_v23, %v1595_v5  ;;  %v1667_v43 = vsub.f32 %v2748_v14, %v1595_v5  ;;  %v1668_v16 = vsub.f32 %v2756_v20, %v1595_v5 }
 0x249   : > { %v1669_v40 = vsub.f32 %v2783_v46, %v1595_v5  ;;  %v1670_v18 = vsub.f32 %v2789_v51, %v1595_v5  ;;  %v1671_v58 = vsub.f32 %v2791_v52, %v1595_v5 }
 0x25c   : > { %v1641_v6 = vpop.xlane.xlu1 %1640 }
 0x25d   : > { %v1643_v8 = vmul.f32 0.000739645, %v1641_v6 }
 0x25f   : > { %v1647_v9 = vsub.f32 %v1643_v8, %v1645_v55 }
 0x260   : > { %v1736_v25 = vpop.permute.xlu1 %1735 }
 0x261   : > { %v1649_v4 = vmax.f32 %v1647_v9, 0.0 }
 0x263   : > { %v1673_v11 = vadd.f32 1e-05, %v1649_v4 }
 0x265   : > { %2457 = vrsqrt.f32 %v1673_v11 }
 0x272   : > { %v2458_v35 = vpop.eup %2457 }
 0x273   : > { %v1687_v62 = vmul.f32 %v2458_v35, %v1661_v10  ;;  %v1688_v37 = vmul.f32 %v2458_v35, %v1662_v12  ;;  %v1689_v57 = vmul.f32 %v2458_v35, %v1663_v63  ;;  %v1690_v19 = vmul.f32 %v2458_v35, %v1664_v13 }
 0x274   : > { %v1691_v60 = vmul.f32 %v2458_v35, %v1665_v7  ;;  %v1692_v0 = vmul.f32 %v2458_v35, %v1666_v15  ;;  %v1693_v17 = vmul.f32 %v2458_v35, %v1667_v43  ;;  %v1694_v21 = vmul.f32 %v2458_v35, %v1668_v16 }
 0x275   : > { %v1695_v23 = vmul.f32 %v2458_v35, %v1669_v40  ;;  %v1696_v22 = vmul.f32 %v2458_v35, %v1670_v18  ;;  %v1697_v14 = vmul.f32 %v2458_v35, %v1671_v58  ;;  %v1719_v24 = vmul.f32 %v2827_v48, %v1687_v62 }
 0x276   : > { %v1720_v20 = vmul.f32 %v2827_v48, %v1688_v37  ;;  %v1721_v46 = vmul.f32 %v2827_v48, %v1689_v57  ;;  %v1722_v51 = vmul.f32 %v2827_v48, %v1690_v19  ;;  %v1723_v52 = vmul.f32 %v2827_v48, %v1691_v60 }
 0x277   : > { %v1724_v26 = vmul.f32 %v2827_v48, %v1692_v0  ;;  %v1725_v27 = vmul.f32 %v2827_v48, %v1693_v17  ;;  %v1726_v28 = vmul.f32 %v2827_v48, %v1694_v21  ;;  %v1727_v29 = vmul.f32 %v2827_v48, %v1695_v23 }
 0x278   : > { %v1728_v30 = vmul.f32 %v2827_v48, %v1696_v22  ;;  %v1729_v31 = vmul.f32 %v2827_v48, %v1697_v14  ;;  %v1749_v32 = vadd.f32 %v1736_v25, %v1719_v24  ;;  %v1750_v33 = vadd.f32 %v1736_v25, %v1720_v20 }
 0x279   : > { %v1751_v34 = vadd.f32 %v1736_v25, %v1721_v46  ;;  %v1752_v36 = vadd.f32 %v1736_v25, %v1722_v51  ;;  %v1753_v38 = vadd.f32 %v1736_v25, %v1723_v52  ;;  %v1754_v39 = vadd.f32 %v1736_v25, %v1724_v26 }
 0x27a   : > { %v1755_v41 = vadd.f32 %v1736_v25, %v1725_v27  ;;  %v1756_v42 = vadd.f32 %v1736_v25, %v1726_v28  ;;  %v1757_v44 = vadd.f32 %v1736_v25, %v1727_v29  ;;  %v1758_v45 = vadd.f32 %v1736_v25, %v1728_v30 }
 0x27b   : > { %v1759_v47 = vadd.f32 %v1736_v25, %v1729_v31  ;;  %v1771_v49 = vmax.f32 %v1749_v32, 0.0  ;;  %v1772_v50 = vmax.f32 %v1750_v33, 0.0  ;;  %v1773_v59 = vmax.f32 %v1751_v34, 0.0 }
 0x27c   : > { %v1774_v2 = vmax.f32 %v1752_v36, 0.0  ;;  %v1775_v61 = vmax.f32 %v1753_v38, 0.0  ;;  %v1776_v48 = vmax.f32 %v1754_v39, 0.0  ;;  %v1777_v1 = vmax.f32 %v1755_v41, 0.0 }
 0x27d   : > { %v1778_v3 = vmax.f32 %v1756_v42, 0.0  ;;  %v1779_v54 = vmax.f32 %v1757_v44, 0.0  ;;  %v1780_v56 = vmax.f32 %v1758_v45, 0.0  ;;  %v1781_v53 = vmax.f32 %v1759_v47, 0.0 }
 0x27e   : > { %v2152_v5 = vpack.c.bf16 %v1772_v50, %v1771_v49  ;;  %v2153_v6 = vpack.c.bf16 %v1774_v2, %v1773_v59  ;;  %v2154_v8 = vpack.c.bf16 %v1776_v48, %v1775_v61 }
 0x27f   : > { %v2155_v55 = vpack.c.bf16 %v1778_v3, %v1777_v1  ;;  %v2156_v9 = vpack.c.bf16 %v1780_v56, %v1779_v54  ;;  %v2157_v4 = vpack.c.bf16 %v1781_v53, %v1781_v53 }
 0x280   : > { %1856 = vst [vmem:[%s2841_s28 + $0x2c] sm:$0xff] %v2152_v5  ;;  %1857 = vst [vmem:[%s2841_s28 + $0x34] sm:$0xff] %v2153_v6 }
 0x281   : > { %1858 = vst [vmem:[%s2841_s28 + $0x3c] sm:$0xff] %v2154_v8  ;;  %1859 = vst [vmem:[%s2841_s28 + $0x44] sm:$0xff] %v2155_v55 }
 0x282   : > { %1860 = vst [vmem:[%s2841_s28 + $0x4c] sm:$0xff] %v2156_v9  ;;  %1861 = vst [vmem:[%s2841_s28 + $0x54] sm:$0xf] %v2157_v4 }
 0x283 PF: > { %s13_s12 = sadd.s32 1, %s2465_s12  }
 0x284   : > { %p10_p4 = scmp.ge.s32.totalorder %s13_s12, 4  }
 0x286   :  { %12 = sbr.rel (!%p10_p4) target bundleno = 1 (0x1), region = 68 }

// kernel: reward_predictor_ensemble_forward.5
= control target key start
LH: loop header
LB: loop body
LE: loop exit
PB: predicated region body
PF: predicated region fallthrough
CT: control target
= control target key end

     0   :  { %s2672_s18 = smov 0   ;;  %s3060_s0 = inlined_call_operand.vmem [shape: bf16[2,512,256], index: 0, kind: input, shape index: {}]   ;;  %s3061_s1 = inlined_call_operand.vmem [shape: bf16[2,32,1408], index: 1, kind: input, shape index: {}]   ;;  %s3062_s2 = inlined_call_operand.vmem [shape: f32[2,64,2], index: 2, kind: input, shape index: {}]   ;;  %s3063_s3 = inlined_call_operand.vmem [shape: bf16[2,16,32], index: 3, kind: input, shape index: {}]   ;;  %s3064_s4 = inlined_call_operand.vmem [shape: f32[2,16,3], index: 4, kind: input, shape index: {}]   ;;  %s3065_s5 = inlined_call_operand.vmem [shape: f32[2,8,128], index: 5, kind: output, shape index: {}]  }
   0x1 LB: > { %s1966_s19 = sadd.s32 4294967295, %s2617_s18   ;;  %p1970_p0 = scmp.ge.s32.totalorder %s2617_s18, 1  ;;  %s2617_s18 = sphi %s2672_s18, %s15_s18  }
   0x2   : > { %p227_p1 = scmp.lt.s32.totalorder %s2617_s18, 3 }
   0x4   : > { %p228_p2 = pnand %p1970_p0, %p227_p1 }
   0x5   : > { %p274_p3 = scmp.lt.s32.totalorder (!%p228_p2), %s1966_s19, 1  ;;  %s2621_s7 = smov (!%p228_p2), 104  }
   0x6   : > { %231 = sbr.rel (%p228_p2) target bundleno = 1713 (0x6b1), region = 40  ;;  %s2622_s8 = smov (!%p228_p2), 72  }
   0x7   : > { %s2623_s9 = smov (!%p228_p2), 112   ;;  %s2624_s10 = smov (!%p228_p2), 80  }
   0x8   : > { %s2625_s11 = smov (!%p228_p2), 120   ;;  %s2626_s12 = smov (!%p228_p2), 88  }
   0x9   : > { %s2627_s13 = smov (!%p228_p2), 96   ;;  %s2628_s14 = smov (!%p228_p2), 8  }
   0xa   : > { %s2629_s15 = smov (!%p228_p2), 40   ;;  %s2630_s16 = smov (!%p228_p2), 16  }
   0xb   : > { %s3067_s19 = smov (!%p274_p3, %s1966_s19), 1  ;;  %s2631_s17 = smov 48   ;;  %vm1605_vm0 = vcmask 64512   ;;  %vm2637_vm1 = vmmov 0   ;;  %vm1739_vm2 = vcmask 261120   ;;  %vm1810_vm3 = vcmask 8192  }
   0xc   : > { %s2071_s20 = sshll.u32 %s3067_s19, 9  ;;  %s2182_s24 = smul.u32 176, %s3067_s19  ;;  %vm1833_vm4 = vcmask 7168   ;;  %vm1848_vm5 = vcmask 15360   ;;  %vm1858_vm6 = vcmask 1040384   ;;  %vm1860_vm7 = vcmask 1041408  }
   0xd   : > { %s2686_s23 = scalar_lea.vmem %s3060_s0, %s2071_s20  ;;  %s2072_s28 = sshll.u32 %s3067_s19, 6  ;;  %vm1862_vm8 = vcmask 1042432  }
   0xe   : > { %v2460_v0 = vld [vmem:[%s2686_s23 + $0x74] ss:$8 sps:$4 sm:$0xff]   ;;  %v2464_v2 = vld [vmem:[%s2686_s23 + $0x70] ss:$8 sps:$4 sm:$0xff]   ;;  %v2466_v4 = vld [vmem:[%s2686_s23 + $0x64] ss:$8 sps:$4 sm:$0xff]   ;;  %s2737_s27 = scalar_lea.vmem %s3061_s1, %s2182_s24  ;;  %s2808_s6 = scalar_lea.vmem %s3062_s2, %s2072_s28 }
   0xf   : > { %v2462_v1 = vld [vmem:[%s2686_s23 + $0x174] ss:$8 sps:$4 sm:$0xff]   ;;  %760 = vmatprep.subr.bf16.mxu0 %v2460_v0  ;;  %v2465_v3 = vld [vmem:[%s2686_s23 + $0x170] ss:$8 sps:$4 sm:$0xff]   ;;  %v2468_v5 = vld [vmem:[%s2686_s23 + $0x164] ss:$8 sps:$4 sm:$0xff]  }
  0x10   : > { %813 = vmatprep.subr.bf16.mxu1 %v2462_v1  ;;  %761 = vmatpush1.bf16.msra.mxu0 %v2464_v2  ;;  %v2470_v6 = vld [vmem:[%s2686_s23 + $0x60] ss:$8 sps:$4 sm:$0xff]   ;;  %v2472_v8 = vld [vmem:[%s2686_s23 + $0x54] ss:$8 sps:$4 sm:$0xff]   ;;  %v2476_v10 = vld [vmem:[%s2686_s23 + $0x50] ss:$8 sps:$4 sm:$0xff]  }
  0x11   : > { %814 = vmatpush1.bf16.msra.mxu1 %v2465_v3  ;;  %762 = vmatprep.subr.bf16.mxu0 %v2466_v4  ;;  %v2471_v7 = vld [vmem:[%s2686_s23 + $0x160] ss:$8 sps:$4 sm:$0xff]   ;;  %v2474_v9 = vld [vmem:[%s2686_s23 + $0x154] ss:$8 sps:$4 sm:$0xff]   ;;  %v2477_v11 = vld [vmem:[%s2686_s23 + $0x150] ss:$8 sps:$4 sm:$0xff]  }
  0x12   : > { %815 = vmatprep.subr.bf16.mxu1 %v2468_v5  ;;  %v2478_v12 = vld [vmem:[%s2686_s23 + $0x44] ss:$8 sps:$4 sm:$0xff]   ;;  %v2482_v14 = vld [vmem:[%s2686_s23 + $0x40] ss:$8 sps:$4 sm:$0xff]   ;;  %v2484_v16 = vld [vmem:[%s2686_s23 + $0x34] ss:$8 sps:$4 sm:$0xff]  }
  0x13   : > { %v2480_v13 = vld [vmem:[%s2686_s23 + $0x144] ss:$8 sps:$4 sm:$0xff]   ;;  %v2483_v15 = vld [vmem:[%s2686_s23 + $0x140] ss:$8 sps:$4 sm:$0xff]   ;;  %v2486_v17 = vld [vmem:[%s2686_s23 + $0x134] ss:$8 sps:$4 sm:$0xff]  }
  0x14   : > { %763 = vmatpush1.bf16.msra.mxu0 %v2470_v6  ;;  %v2488_v18 = vld [vmem:[%s2686_s23 + $0x30] ss:$8 sps:$4 sm:$0xff]   ;;  %v2490_v20 = vld [vmem:[%s2686_s23 + $0x24] ss:$8 sps:$4 sm:$0xff]   ;;  %v2494_v22 = vld [vmem:[%s2686_s23 + $0x20] ss:$8 sps:$4 sm:$0xff]  }
  0x15   : > { %816 = vmatpush1.bf16.msra.mxu1 %v2471_v7  ;;  %764 = vmatprep.subr.bf16.mxu0 %v2472_v8  ;;  %v2489_v19 = vld [vmem:[%s2686_s23 + $0x130] ss:$8 sps:$4 sm:$0xff]   ;;  %v2492_v21 = vld [vmem:[%s2686_s23 + $0x124] ss:$8 sps:$4 sm:$0xff]   ;;  %v2495_v23 = vld [vmem:[%s2686_s23 + $0x120] ss:$8 sps:$4 sm:$0xff]  }
  0x16   : > { %817 = vmatprep.subr.bf16.mxu1 %v2474_v9  ;;  %v2496_v24 = vld [vmem:[%s2686_s23 + $0x14] ss:$8 sps:$4 sm:$0xff]   ;;  %v2500_v26 = vld [vmem:[%s2686_s23 + $0x10] ss:$8 sps:$4 sm:$0xff]   ;;  %v2502_v28 = vld [vmem:[%s2686_s23 + $0x4] ss:$8 sps:$4 sm:$0xff]  }
  0x17   : > { %v2498_v25 = vld [vmem:[%s2686_s23 + $0x114] ss:$8 sps:$4 sm:$0xff]   ;;  %v2501_v27 = vld [vmem:[%s2686_s23 + $0x110] ss:$8 sps:$4 sm:$0xff]   ;;  %v2504_v29 = vld [vmem:[%s2686_s23 + $0x104] ss:$8 sps:$4 sm:$0xff]  }
  0x18   : > { %765 = vmatpush1.bf16.msra.mxu0 %v2476_v10  ;;  %v2506_v30 = vld [vmem:[%s2686_s23] ss:$8 sps:$4 sm:$0xff]   ;;  %v2508_v32 = vld [vmem:[%s2686_s23 + $0xf4] ss:$8 sps:$4 sm:$0xff]   ;;  %v2512_v34 = vld [vmem:[%s2686_s23 + $0xf0] ss:$8 sps:$4 sm:$0xff]  }
  0x19   : > { %818 = vmatpush1.bf16.msra.mxu1 %v2477_v11  ;;  %766 = vmatprep.subr.bf16.mxu0 %v2478_v12  ;;  %v2507_v31 = vld [vmem:[%s2686_s23 + $0x100] ss:$8 sps:$4 sm:$0xff]   ;;  %v2510_v33 = vld [vmem:[%s2686_s23 + $0x1f4] ss:$8 sps:$4 sm:$0xff]   ;;  %v2513_v35 = vld [vmem:[%s2686_s23 + $0x1f0] ss:$8 sps:$4 sm:$0xff]  }
  0x1a   : > { %819 = vmatprep.subr.bf16.mxu1 %v2480_v13  ;;  %v2514_v36 = vld [vmem:[%s2686_s23 + $0xe4] ss:$8 sps:$4 sm:$0xff]   ;;  %v2518_v38 = vld [vmem:[%s2686_s23 + $0xe0] ss:$8 sps:$4 sm:$0xff]   ;;  %v2520_v40 = vld [vmem:[%s2686_s23 + $0xd4] ss:$8 sps:$4 sm:$0xff]  }
  0x1b   : > { %v2516_v37 = vld [vmem:[%s2686_s23 + $0x1e4] ss:$8 sps:$4 sm:$0xff]   ;;  %v2519_v39 = vld [vmem:[%s2686_s23 + $0x1e0] ss:$8 sps:$4 sm:$0xff]   ;;  %v2522_v41 = vld [vmem:[%s2686_s23 + $0x1d4] ss:$8 sps:$4 sm:$0xff]  }
  0x1c   : > { %767 = vmatpush1.bf16.msra.mxu0 %v2482_v14  ;;  %v2524_v42 = vld [vmem:[%s2686_s23 + $0xd0] ss:$8 sps:$4 sm:$0xff]   ;;  %v2526_v44 = vld [vmem:[%s2686_s23 + $0xc4] ss:$8 sps:$4 sm:$0xff]   ;;  %v2530_v46 = vld [vmem:[%s2686_s23 + $0xc0] ss:$8 sps:$4 sm:$0xff]  }
  0x1d   : > { %820 = vmatpush1.bf16.msra.mxu1 %v2483_v15  ;;  %768 = vmatprep.subr.bf16.mxu0 %v2484_v16  ;;  %v2525_v43 = vld [vmem:[%s2686_s23 + $0x1d0] ss:$8 sps:$4 sm:$0xff]   ;;  %v2528_v45 = vld [vmem:[%s2686_s23 + $0x1c4] ss:$8 sps:$4 sm:$0xff]   ;;  %v2531_v47 = vld [vmem:[%s2686_s23 + $0x1c0] ss:$8 sps:$4 sm:$0xff]  }
  0x1e   : > { %821 = vmatprep.subr.bf16.mxu1 %v2486_v17  ;;  %v2532_v48 = vld [vmem:[%s2686_s23 + $0xb4] ss:$8 sps:$4 sm:$0xff]   ;;  %v2558_v49 = vld [vmem:[%s2737_s27 + $0x4] ss:$44 sps:$4 sm:$0xff]   ;;  %v2561_v51 = vld [vmem:[%s2737_s27 + $0xc] ss:$44 sps:$4 sm:$0xff]  }
  0x1f   : > { %v2534_v50 = vld [vmem:[%s2686_s23 + $0x1b4] ss:$8 sps:$4 sm:$0xff]   ;;  %v2536_v52 = vld [vmem:[%s2686_s23 + $0xb0] ss:$8 sps:$4 sm:$0xff]   ;;  %792 = vmatprep.mubr.bf16.mxu0 %v2558_v49  ;;  %v2538_v54 = vld [vmem:[%s2686_s23 + $0xa4] ss:$8 sps:$4 sm:$0xff]   ;;  %845 = vmatprep.mubr.bf16.mxu1 %v2561_v51 }
  0x20   : > { %769 = vmatpush1.bf16.msra.mxu0 %v2488_v18  ;;  %v2537_v53 = vld [vmem:[%s2686_s23 + $0x1b0] ss:$8 sps:$4 sm:$0xff]   ;;  %v2540_v55 = vld [vmem:[%s2686_s23 + $0x1a4] ss:$8 sps:$4 sm:$0xff]   ;;  %v2542_v56 = vld [vmem:[%s2686_s23 + $0xa0] ss:$8 sps:$4 sm:$0xff]  }
  0x21   : > { %822 = vmatpush1.bf16.msra.mxu1 %v2489_v19  ;;  %770 = vmatprep.subr.bf16.mxu0 %v2490_v20  ;;  %v2543_v57 = vld [vmem:[%s2686_s23 + $0x1a0] ss:$8 sps:$4 sm:$0xff]   ;;  %v2544_v58 = vld [vmem:[%s2686_s23 + $0x94] ss:$8 sps:$4 sm:$0xff]   ;;  %v2548_v60 = vld [vmem:[%s2686_s23 + $0x90] ss:$8 sps:$4 sm:$0xff]  }
  0x22   : > { %823 = vmatprep.subr.bf16.mxu1 %v2492_v21  ;;  %v2546_v59 = vld [vmem:[%s2686_s23 + $0x194] ss:$8 sps:$4 sm:$0xff]   ;;  %v2549_v61 = vld [vmem:[%s2686_s23 + $0x190] ss:$8 sps:$4 sm:$0xff]   ;;  %v2550_v62 = vld [vmem:[%s2686_s23 + $0x84] ss:$8 sps:$4 sm:$0xff]  }
  0x23   : > { %v2552_v63 = vld [vmem:[%s2686_s23 + $0x184] ss:$8 sps:$4 sm:$0xff]   ;;  %v2554_v0 = vld [vmem:[%s2686_s23 + $0x80] ss:$8 sps:$4 sm:$0xff]   ;;  %v2619_v8 = vmov 0   ;;  %s2632_s20 = smov 24  }
  0x24   : > { %771 = vmatpush1.bf16.msra.mxu0 %v2494_v22  ;;  %v2555_v1 = vld [vmem:[%s2686_s23 + $0x180] ss:$8 sps:$4 sm:$0xff]   ;;  %v2564_v5 = vld [vmem:[%s2737_s27 + $0x64] ss:$44 sps:$4 sm:$0xff]   ;;  %2215 = vset.pattern.permute.xlu1 %v2619_v8  ;;  %s2633_s21 = smov 56   ;;  %s2634_s22 = smov 64  }
  0x25   : > { %824 = vmatpush1.bf16.msra.mxu1 %v2495_v23  ;;  %772 = vmatprep.subr.bf16.mxu0 %v2496_v24  ;;  %v2556_v2 = vld [vmem:[%s2737_s27] ss:$44 sps:$4 sm:$0xff]   ;;  %v2559_v3 = vld [vmem:[%s2737_s27 + $0x8] ss:$44 sps:$4 sm:$0xff]   ;;  %v2566_v6 = vld [vmem:[%s2737_s27 + $0x58] ss:$44 sps:$4 sm:$0xff]  }
  0x26   : > { %825 = vmatprep.subr.bf16.mxu1 %v2498_v25  ;;  %v2562_v4 = vld [vmem:[%s2737_s27 + $0x5c] ss:$44 sps:$4 sm:$0xff]   ;;  %v2567_v7 = vld [vmem:[%s2737_s27 + $0x60] ss:$44 sps:$4 sm:$0xff]   ;;  %2214 = vset.pattern.permute.xlu0 %v2619_v8  ;;  %s2635_s23 = smov 32   ;;  %s2073_s24 = sshll.u32 %s3067_s19, 3 }
  0x27   : > { %v328_v49 = vld [vmem:[%s2808_s6] sm:$0xff]  ;;  %s2074_s28 = sshll.u32 %s3067_s19, 4 }
  0x28   : > { %773 = vmatpush1.bf16.msra.mxu0 %v2500_v26 }
  0x29   : > { %826 = vmatpush1.bf16.msra.mxu1 %v2501_v27  ;;  %774 = vmatprep.subr.bf16.mxu0 %v2502_v28 }
  0x2a   : > { %827 = vmatprep.subr.bf16.mxu1 %v2504_v29 }
  0x2c   : > { %775 = vmatpush1.bf16.msra.mxu0 %v2506_v30 }
  0x2d   : > { %828 = vmatpush1.bf16.msra.mxu1 %v2507_v31  ;;  %776 = vmatprep.subr.bf16.mxu0 %v2508_v32 }
  0x2e   : > { %829 = vmatprep.subr.bf16.mxu1 %v2510_v33 }
  0x30   : > { %777 = vmatpush2.bf16.msra.mxu0 %v2512_v34 }
  0x31   : > { %830 = vmatpush2.bf16.msra.mxu1 %v2513_v35  ;;  %778 = vmatprep.subr.bf16.mxu0 %v2514_v36 }
  0x32   : > { %831 = vmatprep.subr.bf16.mxu1 %v2516_v37 }
  0x34   : > { %779 = vmatpush2.bf16.msra.mxu0 %v2518_v38 }
  0x35   : > { %832 = vmatpush2.bf16.msra.mxu1 %v2519_v39  ;;  %780 = vmatprep.subr.bf16.mxu0 %v2520_v40 }
  0x36   : > { %833 = vmatprep.subr.bf16.mxu1 %v2522_v41 }
  0x38   : > { %781 = vmatpush2.bf16.msra.mxu0 %v2524_v42 }
  0x39   : > { %834 = vmatpush2.bf16.msra.mxu1 %v2525_v43  ;;  %782 = vmatprep.subr.bf16.mxu0 %v2526_v44 }
  0x3a   : > { %835 = vmatprep.subr.bf16.mxu1 %v2528_v45 }
  0x3c   : > { %783 = vmatpush2.bf16.msra.mxu0 %v2530_v46  ;;  %v331_v46 = vld [vmem:[%s2808_s6 + $0x18] sm:$0xff] }
  0x3d   : > { %836 = vmatpush2.bf16.msra.mxu1 %v2531_v47  ;;  %784 = vmatprep.subr.bf16.mxu0 %v2532_v48  ;;  %v330_v47 = vld [vmem:[%s2808_s6 + $0x10] sm:$0xff]  ;;  %v2620_v48 = vmov 1  }
  0x3e   : > { %837 = vmatprep.subr.bf16.mxu1 %v2534_v50  ;;  %v329_v50 = vld [vmem:[%s2808_s6 + $0x8] sm:$0xff] }
  0x40   : > { %785 = vmatpush2.bf16.msra.mxu0 %v2536_v52 }
  0x41   : > { %838 = vmatpush2.bf16.msra.mxu1 %v2537_v53  ;;  %786 = vmatprep.subr.bf16.mxu0 %v2538_v54 }
  0x42   : > { %839 = vmatprep.subr.bf16.mxu1 %v2540_v55 }
  0x44   : > { %787 = vmatpush2.bf16.msra.mxu0 %v2542_v56 }
  0x45   : > { %840 = vmatpush2.bf16.msra.mxu1 %v2543_v57  ;;  %788 = vmatprep.subr.bf16.mxu0 %v2544_v58 }
  0x46   : > { %841 = vmatprep.subr.bf16.mxu1 %v2546_v59 }
  0x48   : > { %789 = vmatpush2.bf16.msra.mxu0 %v2548_v60 }
  0x49   : > { %842 = vmatpush2.bf16.msra.mxu1 %v2549_v61  ;;  %790 = vmatprep.subr.bf16.mxu0 %v2550_v62 }
  0x4a   : > { %843 = vmatprep.subr.bf16.mxu1 %v2552_v63 }
  0x4c   : > { %791 = vmatpush2.bf16.msra.mxu0 %v2554_v0 }
  0x4d   : > { %844 = vmatpush2.bf16.msra.mxu1 %v2555_v1 }
  0x4f   : > { %793 = vmatmul.mubr.bf16.vlgmr.msra.gmra.mxu0 %v2556_v2 }
  0x50   : > { %846 = vmatmul.mubr.bf16.vlgmr.msra.gmra.mxu1 %v2559_v3  ;;  %802 = vmatprep.mubr.bf16.mxu0 %v2562_v4 }
  0x51   : > { %855 = vmatprep.mubr.bf16.mxu1 %v2564_v5 }
  0x57   : > { %803 = vmatmul.mubr.bf16.gmra.mxu0 %v2566_v6 }
  0x58   : > { %856 = vmatmul.mubr.bf16.gmra.mxu1 %v2567_v7 }
 0x10f   : > { %v794_v9 = vpop.f32.mrf.mxu0 }
 0x110   : > { %v847_v10 = vpop.f32.mrf.mxu1 }
 0x111   : > { %v796_v11 = vpop.f32.mrf.mxu0  ;;  %v2768_v13 = vadd.f32 %v847_v10, %v794_v9 }
 0x112   : > { %v849_v12 = vpop.f32.mrf.mxu1 }
 0x113   : > { %v2770_v14 = vadd.f32 %v849_v12, %v796_v11  ;;  %v798_v15 = vpop.f32.mrf.mxu0  ;;  %v882_v44 = vmul.f32 %v2768_v13, %v2768_v13 }
 0x114   : > { %v851_v16 = vpop.f32.mrf.mxu1 }
 0x115   : > { %v866_v17 = vadd.f32 %v2770_v14, %v2768_v13  ;;  %v800_v18 = vpop.f32.mrf.mxu0  ;;  %v2774_v20 = vadd.f32 %v851_v16, %v798_v15  ;;  %v883_v42 = vmul.f32 %v2770_v14, %v2770_v14 }
 0x116   : > { %v853_v19 = vpop.f32.mrf.mxu1 }
 0x117   : > { %v2776_v21 = vadd.f32 %v853_v19, %v800_v18  ;;  %867 = vadd.xlane.f32.xlu0 %v866_v17  ;;  %v804_v22 = vpop.f32.mrf.mxu0  ;;  %v884_v41 = vmul.f32 %v2774_v20, %v2774_v20  ;;  %v890_v45 = vadd.f32 %v883_v42, %v882_v44 }
 0x118   : > { %v857_v23 = vpop.f32.mrf.mxu1 }
 0x119   : > { %v2778_v24 = vadd.f32 %v857_v23, %v804_v22  ;;  %v869_v25 = vadd.f32 %v2776_v21, %v2774_v20  ;;  %v806_v26 = vpop.f32.mrf.mxu0  ;;  %v885_v39 = vmul.f32 %v2776_v21, %v2776_v21 }
 0x11a   : > { %v859_v27 = vpop.f32.mrf.mxu1 }
 0x11b   : > { %v2782_v28 = vadd.f32 %v859_v27, %v806_v26  ;;  %870 = vadd.xlane.f32.xlu1 %v869_v25  ;;  %v808_v29 = vpop.f32.mrf.mxu0  ;;  %v886_v32 = vmul.f32 %v2778_v24, %v2778_v24  ;;  %v893_v43 = vadd.f32 %v885_v39, %v884_v41 }
 0x11c   : > { %v861_v30 = vpop.f32.mrf.mxu1 }
 0x11d   : > { %v872_v31 = vadd.f32 %v2782_v28, %v2778_v24  ;;  %v887_v33 = vmul.f32 %v2782_v28, %v2782_v28  ;;  %v810_v34 = vpop.f32.mrf.mxu0  ;;  %v2790_v36 = vadd.f32 %v861_v30, %v808_v29 }
 0x11e   : > { %v863_v35 = vpop.f32.mrf.mxu1 }
 0x11f   : > { %v2792_v37 = vadd.f32 %v863_v35, %v810_v34  ;;  %873 = vadd.xlane.f32.xlu0 %v872_v31  ;;  %v896_v38 = vadd.f32 %v887_v33, %v886_v32  ;;  %v888_v52 = vmul.f32 %v2790_v36, %v2790_v36 }
 0x121   : > { %897 = vadd.xlane.f32.xlu1 %v896_v38  ;;  %v875_v40 = vadd.f32 %v2792_v37, %v2790_v36  ;;  %v889_v51 = vmul.f32 %v2792_v37, %v2792_v37 }
 0x123   : > { %876 = vadd.xlane.f32.xlu0 %v875_v40  ;;  %v899_v53 = vadd.f32 %v889_v51, %v888_v52 }
 0x125   : > { %894 = vadd.xlane.f32.xlu1 %v893_v43 }
 0x127   : > { %891 = vadd.xlane.f32.xlu0 %v890_v45 }
 0x136   : > { %959 = vperm.xlu1 %2215, %v331_v46  }
 0x13a   : > { %2216 = vset.pattern.permute.xlu1 %v2620_v48 }
 0x13b   : > { %979 = vperm.xlu1 %2216, %v330_v47  }
 0x13d   : > { %954 = vperm.xlu0 %2214, %v330_v47  }
 0x13f   : > { %983 = vperm.xlu1 %2216, %v331_v46  }
 0x143   : > { %2217 = vset.pattern.permute.xlu1 %v2619_v8 }
 0x144   : > { %944 = vperm.xlu1 %2217, %v328_v49  }
 0x148   : > { %949 = vperm.xlu1 %2217, %v329_v50  }
 0x14c   : > { %2218 = vset.pattern.permute.xlu1 %v2620_v48 }
 0x16c   : > { %900 = vadd.xlane.f32.xlu1 %v899_v53 }
 0x17d   : > { %971 = vperm.xlu1 %2218, %v328_v49  }
 0x181   : > { %975 = vperm.xlu1 %2218, %v329_v50  }
 0x185   : > { %2449 = vset.pattern.permute.xlu1 %v2619_v8 }
 0x1a0   : > { %v868_v54 = vpop.xlane.xlu0 %867 }
 0x1a1   : > { %v878_v61 = vmul.f32 0.005, %v868_v54 }
 0x1a3   : > { %v906_v1 = vmul.f32 %v878_v61, %v878_v61  ;;  %v918_v27 = vsub.f32 %v2768_v13, %v878_v61  ;;  %v919_v41 = vsub.f32 %v2770_v14, %v878_v61 }
 0x1a4   : > { %v871_v56 = vpop.xlane.xlu1 %870 }
 0x1a5   : > { %v879_v62 = vmul.f32 0.005, %v871_v56 }
 0x1a7   : > { %v907_v3 = vmul.f32 %v879_v62, %v879_v62  ;;  %v920_v31 = vsub.f32 %v2774_v20, %v879_v62  ;;  %v921_v35 = vsub.f32 %v2776_v21, %v879_v62 }
 0x1a8   : > { %v874_v55 = vpop.xlane.xlu0 %873 }
 0x1a9   : > { %v880_v15 = vmul.f32 0.005, %v874_v55 }
 0x1aa   : > { %v898_v57 = vpop.xlane.xlu1 %897 }
 0x1ab   : > { %v904_v16 = vmul.f32 0.005, %v898_v57  ;;  %v908_v17 = vmul.f32 %v880_v15, %v880_v15  ;;  %v922_v62 = vsub.f32 %v2778_v24, %v880_v15 }
 0x1ac   : > { %v877_v58 = vpop.xlane.xlu0 %876 }
 0x1ad   : > { %v912_v19 = vsub.f32 %v904_v16, %v908_v17  ;;  %v881_v23 = vmul.f32 0.005, %v877_v58 }
 0x1ae   : > { %v895_v59 = vpop.xlane.xlu1 %894 }
 0x1af   : > { %v903_v0 = vmul.f32 0.005, %v895_v59  ;;  %v916_v26 = vmax.f32 %v912_v19, 0.0  ;;  %v909_v34 = vmul.f32 %v881_v23, %v881_v23 }
 0x1b0   : > { %v892_v60 = vpop.xlane.xlu0 %891 }
 0x1b1   : > { %v902_v63 = vmul.f32 0.005, %v892_v60  ;;  %v911_v5 = vsub.f32 %v903_v0, %v907_v3  ;;  %v928_v38 = vadd.f32 1e-05, %v916_v26  ;;  %v924_v0 = vsub.f32 %v2790_v36, %v881_v23 }
 0x1b2   : > { %v2822_v2 = vpop.permute.xlu1 %959 }
 0x1b3   : > { %v910_v4 = vsub.f32 %v902_v63, %v906_v1  ;;  %v915_v9 = vmax.f32 %v911_v5, 0.0  ;;  %v923_v63 = vsub.f32 %v2782_v28, %v880_v15  ;;  %v925_v1 = vsub.f32 %v2792_v37, %v881_v23 }
 0x1b5   : > { %v914_v6 = vmax.f32 %v910_v4, 0.0  ;;  %v927_v11 = vadd.f32 1e-05, %v915_v9 }
 0x1b6   : > { %v2824_v7 = vpop.permute.xlu1 %979 }
 0x1b7   : > { %v926_v10 = vadd.f32 1e-05, %v914_v6 }
 0x1b8   : > { %v955_v24 = vpop.permute.xlu0 %954 }
 0x1b9   : > { %2589 = vrsqrt.f32 %v926_v10 }
 0x1ba   : > { %v2826_v12 = vpop.permute.xlu1 %983  ;;  %2591 = vrsqrt.f32 %v927_v11 }
 0x1bb   : > { %2593 = vrsqrt.f32 %v928_v38 }
 0x1bf   : > { %v945_v18 = vpop.permute.xlu1 %944 }
 0x1c3   : > { %v950_v22 = vpop.permute.xlu1 %949 }
 0x1c6   : > { %v2590_v25 = vpop.eup %2589 }
 0x1c7   : > { %v2592_v29 = vpop.eup %2591  ;;  %v934_v32 = vmul.f32 %v2590_v25, %v918_v27  ;;  %v935_v13 = vmul.f32 %v2590_v25, %v919_v41  ;;  %v2570_v25 = vld [vmem:[%s2737_s27 + $0x14] ss:$44 sps:$4 sm:$0xff]   ;;  %v2576_v27 = vld [vmem:[%s2737_s27 + $0x1c] ss:$44 sps:$4 sm:$0xff]  }
 0x1c8   : > { %v936_v39 = vmul.f32 %v2592_v29, %v920_v31  ;;  %v937_v42 = vmul.f32 %v2592_v29, %v921_v35  ;;  %v2594_v59 = vpop.eup %2593  ;;  %1441 = vmatprep.mubr.bf16.mxu0 %v2570_v25  ;;  %1490 = vmatprep.mubr.bf16.mxu1 %v2576_v27 }
 0x1c9   : > { %v962_v44 = vmul.f32 %v945_v18, %v934_v32  ;;  %v963_v52 = vmul.f32 %v945_v18, %v935_v13  ;;  %v938_v4 = vmul.f32 %v2594_v59, %v922_v62  ;;  %v939_v5 = vmul.f32 %v2594_v59, %v923_v63 }
 0x1ca   : > { %v964_v46 = vmul.f32 %v950_v22, %v936_v39  ;;  %v965_v20 = vmul.f32 %v950_v22, %v937_v42 }
 0x1cb   : > { %v966_v10 = vmul.f32 %v955_v24, %v938_v4  ;;  %v967_v37 = vmul.f32 %v955_v24, %v939_v5 }
 0x1cd   : > { %v990_v16 = vadd.f32 %v2824_v7, %v966_v10  ;;  %v991_v17 = vadd.f32 %v2824_v7, %v967_v37 }
 0x1cf   : > { %v998_v19 = vmax.f32 %v990_v16, 0.0  ;;  %v999_v22 = vmax.f32 %v991_v17, 0.0 }
 0x1f5   : > { %v901_v30 = vpop.xlane.xlu1 %900 }
 0x1f6   : > { %v905_v33 = vmul.f32 0.005, %v901_v30 }
 0x1f8   : > { %v913_v40 = vsub.f32 %v905_v33, %v909_v34 }
 0x1f9   : > { %v972_v43 = vpop.permute.xlu1 %971 }
 0x1fa   : > { %v917_v45 = vmax.f32 %v913_v40, 0.0  ;;  %v986_v49 = vadd.f32 %v972_v43, %v962_v44  ;;  %v987_v55 = vadd.f32 %v972_v43, %v963_v52 }
 0x1fc   : > { %v929_v47 = vadd.f32 1e-05, %v917_v45  ;;  %v994_v53 = vmax.f32 %v986_v49, 0.0  ;;  %v995_v57 = vmax.f32 %v987_v55, 0.0 }
 0x1fd   : > { %v976_v50 = vpop.permute.xlu1 %975 }
 0x1fe   : > { %2595 = vrsqrt.f32 %v929_v47  ;;  %v988_v51 = vadd.f32 %v976_v50, %v964_v46  ;;  %v989_v21 = vadd.f32 %v976_v50, %v965_v20 }
 0x200   : > { %v996_v54 = vmax.f32 %v988_v51, 0.0  ;;  %v997_v14 = vmax.f32 %v989_v21, 0.0 }
 0x202   : > { %v2832_v56 = vpack.i.bf16 %v996_v54, %v994_v53  ;;  %v2838_v58 = vpack.i.bf16 %v997_v14, %v995_v57  ;;  %v2844_v60 = vpack.c.bf16 %v996_v54, %v994_v53  ;;  %v2846_v61 = vpack.c.bf16 %v997_v14, %v995_v57 }
 0x204   : > { %2225 = vrot.lane.b32.xlu0 %v2832_v56, %s2621_s7  ;;  %2220 = vrot.lane.b32.xlu1 %v2832_v56, %s2622_s8 }
 0x208   : > { %2235 = vrot.lane.b32.xlu0 %v2832_v56, %s2623_s9  ;;  %2230 = vrot.lane.b32.xlu1 %v2832_v56, %s2624_s10 }
 0x20b   : > { %v2596_v3 = vpop.eup %2595 }
 0x20c   : > { %v940_v6 = vmul.f32 %v2596_v3, %v924_v0  ;;  %v941_v9 = vmul.f32 %v2596_v3, %v925_v1  ;;  %2245 = vrot.lane.b32.xlu0 %v2832_v56, %s2625_s11  ;;  %2240 = vrot.lane.b32.xlu1 %v2832_v56, %s2626_s12 }
 0x20e   : > { %v968_v28 = vmul.f32 %v2822_v2, %v940_v6  ;;  %v969_v36 = vmul.f32 %v2822_v2, %v941_v9 }
 0x210   : > { %2250 = vrot.lane.b32.xlu0 %v2832_v56, %s2627_s13  ;;  %2255 = vrot.lane.b32.xlu1 %v2832_v56, %s2628_s14  ;;  %v992_v11 = vadd.f32 %v2826_v12, %v968_v28  ;;  %v993_v15 = vadd.f32 %v2826_v12, %v969_v36 }
 0x212   : > { %v1000_v2 = vmax.f32 %v992_v11, 0.0  ;;  %v1001_v18 = vmax.f32 %v993_v15, 0.0 }
 0x214   : > { %2260 = vrot.lane.b32.xlu0 %v2832_v56, %s2629_s15  ;;  %2265 = vrot.lane.b32.xlu1 %v2838_v58, %s2622_s8  ;;  %v2284_v12 = vpack.i.bf16 %v1000_v2, %v998_v19  ;;  %v2874_v7 = vpack.c.bf16 %v1000_v2, %v998_v19  ;;  %v2876_v23 = vpack.c.bf16 %v1001_v18, %v999_v22 }
 0x215   : > { %v2364_v26 = vpack.i.bf16 %v1001_v18, %v999_v22 }
 0x218   : > { %2270 = vrot.lane.b32.xlu0 %v2838_v58, %s2621_s7  ;;  %2275 = vrot.lane.b32.xlu1 %v2832_v56, %s2630_s16 }
 0x21c   : > { %2285 = vrot.lane.b32.xlu0 %v2284_v12, %s2621_s7  ;;  %2280 = vrot.lane.b32.xlu1 %v2284_v12, %s2622_s8 }
 0x220   : > { %2290 = vrot.lane.b32.xlu0 %v2832_v56, %s2631_s17  ;;  %2295 = vrot.lane.b32.xlu1 %v2838_v58, %s2624_s10 }
 0x224   : > { %2305 = vrot.lane.b32.xlu0 %v2284_v12, %s2623_s9  ;;  %2300 = vrot.lane.b32.xlu1 %v2284_v12, %s2624_s10 }
 0x228   : > { %2310 = vrot.lane.b32.xlu0 %v2838_v58, %s2623_s9  ;;  %2315 = vrot.lane.b32.xlu1 %v2832_v56, %s2632_s20 }
 0x22c   : > { %2325 = vrot.lane.b32.xlu0 %v2284_v12, %s2625_s11  ;;  %2320 = vrot.lane.b32.xlu1 %v2284_v12, %s2626_s12 }
 0x230   : > { %2330 = vrot.lane.b32.xlu0 %v2832_v56, %s2633_s21  ;;  %2335 = vrot.lane.b32.xlu1 %v2838_v58, %s2626_s12 }
 0x234   : > { %2340 = vrot.lane.b32.xlu0 %v2838_v58, %s2625_s11  ;;  %2345 = vrot.lane.b32.xlu1 %v2284_v12, %s2627_s13 }
 0x238   : > { %2355 = vrot.lane.b32.xlu0 %v2284_v12, %s2629_s15  ;;  %2350 = vrot.lane.b32.xlu1 %v2284_v12, %s2628_s14 }
 0x23c   : > { %2365 = vrot.lane.b32.xlu0 %v2364_v26, %s2621_s7  ;;  %2360 = vrot.lane.b32.xlu1 %v2364_v26, %s2622_s8  ;;  %s2639_s7 = smov 124   ;;  %s2640_s8 = smov 126  }
 0x240   : > { %2375 = vrot.lane.b32.xlu0 %v2284_v12, %s2631_s17  ;;  %2370 = vrot.lane.b32.xlu1 %v2284_v12, %s2630_s16 }
 0x244   : > { %2385 = vrot.lane.b32.xlu0 %v2364_v26, %s2623_s9  ;;  %2380 = vrot.lane.b32.xlu1 %v2364_v26, %s2624_s10  ;;  %s2641_s9 = smov 122  }
 0x248   : > { %2395 = vrot.lane.b32.xlu0 %v2284_v12, %s2633_s21  ;;  %2390 = vrot.lane.b32.xlu1 %v2284_v12, %s2632_s20 }
 0x24c   : > { %2405 = vrot.lane.b32.xlu0 %v2364_v26, %s2625_s11  ;;  %2400 = vrot.lane.b32.xlu1 %v2364_v26, %s2626_s12  ;;  %s302_s12 = scalar_lea.vmem %s3065_s5, %s2073_s24 }
 0x250   : > { %2415 = vrot.lane.b32.xlu0 %v2284_v12, %s2634_s22  ;;  %2410 = vrot.lane.b32.xlu1 %v2284_v12, %s2635_s23 }
 0x254   : > { %2420 = vrot.lane.b32.xlu0 %v2832_v56, %s2635_s23  ;;  %2425 = vrot.lane.b32.xlu1 %v2364_v26, %s2627_s13 }
 0x258   : > { %2435 = vrot.lane.b32.xlu0 %v2838_v58, %s2627_s13  ;;  %2430 = vrot.lane.b32.xlu1 %v2832_v56, %s2634_s22 }
 0x25c   : > { %2445 = vrot.lane.b32.xlu0 %v2838_v58, %s2634_s22  ;;  %2440 = vrot.lane.b32.xlu1 %v2364_v26, %s2634_s22 }
 0x276   : > { %v2221_v29 = vpop.permute.xlu1 %2220  ;;  %v2226_v30 = vpop.permute.xlu0 %2225 }
 0x277   : > { %v2223_v43 = vunpack.i.h.bf16 %v2221_v29  ;;  %v2222_v44 = vunpack.i.l.bf16 %v2221_v29  ;;  %v2228_v52 = vunpack.i.h.bf16 %v2226_v30  ;;  %v2227_v21 = vunpack.i.l.bf16 %v2226_v30 }
 0x279   : > { %v1300_v55 = vpack.c.bf16 %v2223_v43, %v2222_v44  ;;  %v1292_v56 = vpack.c.bf16 %v2228_v52, %v2227_v21 }
 0x27a   : > { %v2231_v31 = vpop.permute.xlu1 %2230  ;;  %v2236_v32 = vpop.permute.xlu0 %2235 }
 0x27b   : > { %v2233_v14 = vunpack.i.h.bf16 %v2231_v31  ;;  %v2232_v57 = vunpack.i.l.bf16 %v2231_v31  ;;  %v2238_v5 = vunpack.i.h.bf16 %v2236_v32  ;;  %v2237_v6 = vunpack.i.l.bf16 %v2236_v32 }
 0x27d   : > { %v1298_v28 = vpack.c.bf16 %v2233_v14, %v2232_v57  ;;  %v1290_v36 = vpack.c.bf16 %v2238_v5, %v2237_v6 }
 0x27e   : > { %v2913_v33 = vpop.permute.xlu1 %2240  ;;  %v2915_v34 = vpop.permute.xlu0 %2245 }
 0x27f   : > { %v2243_v10 = vunpack.i.h.bf16 %v2913_v33  ;;  %v2242_v37 = vunpack.i.l.bf16 %v2913_v33  ;;  %v2248_v12 = vunpack.i.h.bf16 %v2915_v34  ;;  %v2247_v25 = vunpack.i.l.bf16 %v2915_v34 }
 0x281   : > { %v1296_v29 = vpack.c.bf16 %v2243_v10, %v2242_v37  ;;  %v1288_v30 = vpack.c.bf16 %v2248_v12, %v2247_v25 }
 0x282   : > { %v2917_v35 = vpop.permute.xlu1 %2255  ;;  %v2919_v38 = vpop.permute.xlu0 %2250 }
 0x283   : > { %v2253_v31 = vunpack.i.h.bf16 %v2919_v38  ;;  %v2252_v32 = vunpack.i.l.bf16 %v2919_v38  ;;  %v2258_v34 = vunpack.i.h.bf16 %v2917_v35 }
 0x286   : > { %v2921_v39 = vpop.permute.xlu1 %2265  ;;  %v2923_v40 = vpop.permute.xlu0 %2260 }
 0x287   : > { %v2268_v14 = vunpack.i.h.bf16 %v2921_v39  ;;  %v2263_v57 = vunpack.i.h.bf16 %v2923_v40 }
 0x28a   : > { %v2925_v41 = vpop.permute.xlu1 %2275  ;;  %v2927_v42 = vpop.permute.xlu0 %2270 }
 0x28b   : > { %v2277_v5 = vunpack.i.l.bf16 %v2925_v41 }
 0x28e   : > { %v2281_v45 = vpop.permute.xlu1 %2280  ;;  %v2286_v13 = vpop.permute.xlu0 %2285 }
 0x28f   : > { %v2283_v46 = vunpack.i.h.bf16 %v2281_v45  ;;  %v2282_v47 = vunpack.i.l.bf16 %v2281_v45  ;;  %v2288_v49 = vunpack.i.h.bf16 %v2286_v13  ;;  %v2287_v20 = vunpack.i.l.bf16 %v2286_v13 }
 0x290   : > { %v2257_v13 = vunpack.i.l.bf16 %v2917_v35  ;;  %v2267_v35 = vunpack.i.l.bf16 %v2921_v39  ;;  %v2273_v39 = vunpack.i.h.bf16 %v2927_v42 }
 0x291   : > { %v1301_v50 = vpack.c.bf16 %v2283_v46, %v2282_v47  ;;  %v1293_v51 = vpack.c.bf16 %v2288_v49, %v2287_v20  ;;  %v1294_v47 = vpack.c.bf16 %v2253_v31, %v2252_v32 }
 0x292   : > { %v2929_v53 = vpop.permute.xlu1 %2295  ;;  %v2931_v54 = vpop.permute.xlu0 %2290  ;;  %v1316_v38 = vpack.c.bf16 %v2258_v34, %v2257_v13  ;;  %v1332_v10 = vpack.c.bf16 %v2268_v14, %v2267_v35  ;;  %v2573_v34 = vld [vmem:[%s2737_s27 + $0x68] ss:$44 sps:$4 sm:$0xff]  }
 0x293   : > { %2075 = vmatprep.subr.bf16.mxu0 %v1301_v50  ;;  %v2297_v12 = vunpack.i.l.bf16 %v2929_v53  ;;  %v2293_v25 = vunpack.i.h.bf16 %v2931_v54 }
 0x294   : > { %2076 = vmatpush3.bf16.msra.mxu0 %v1293_v51 }
 0x295   : > { %2077 = vmatprep.subr.bf16.mxu0 %v1300_v55 }
 0x296   : > { %v2301_v58 = vpop.permute.xlu1 %2300  ;;  %v2306_v59 = vpop.permute.xlu0 %2305 }
 0x297   : > { %v2303_v62 = vunpack.i.h.bf16 %v2301_v58  ;;  %v2302_v63 = vunpack.i.l.bf16 %v2301_v58  ;;  %v2308_v0 = vunpack.i.h.bf16 %v2306_v59  ;;  %v2307_v1 = vunpack.i.l.bf16 %v2306_v59 }
 0x298   : > { %2078 = vmatpush3.bf16.msra.mxu0 %v1292_v56  ;;  %v2262_v58 = vunpack.i.l.bf16 %v2923_v40  ;;  %v2272_v40 = vunpack.i.l.bf16 %v2927_v42 }
 0x299   : > { %v1299_v3 = vpack.c.bf16 %v2303_v62, %v2302_v63  ;;  %v1291_v4 = vpack.c.bf16 %v2308_v0, %v2307_v1 }
 0x29a   : > { %v2933_v9 = vpop.permute.xlu1 %2315  ;;  %v2935_v24 = vpop.permute.xlu0 %2310  ;;  %v1308_v37 = vpack.c.bf16 %v2263_v57, %v2262_v58 }
 0x29b   : > { %2079 = vmatprep.subr.bf16.mxu0 %v1299_v3  ;;  %v2568_v3 = vld [vmem:[%s2737_s27 + $0x10] ss:$44 sps:$4 sm:$0xff]   ;;  %v2318_v13 = vunpack.i.h.bf16 %v2933_v9 }
 0x29c   : > { %2080 = vmatpush3.bf16.msra.mxu0 %v1291_v4  ;;  %v2278_v4 = vunpack.i.h.bf16 %v2925_v41  ;;  %v1324_v41 = vpack.c.bf16 %v2273_v39, %v2272_v40 }
 0x29d   : > { %2081 = vmatprep.subr.bf16.mxu0 %v1298_v28 }
 0x29e   : > { %v2321_v11 = vpop.permute.xlu1 %2320  ;;  %v2326_v15 = vpop.permute.xlu0 %2325 }
 0x29f   : > { %v2323_v16 = vunpack.i.h.bf16 %v2321_v11  ;;  %v2322_v17 = vunpack.i.l.bf16 %v2321_v11  ;;  %v2328_v2 = vunpack.i.h.bf16 %v2326_v15  ;;  %v2327_v18 = vunpack.i.l.bf16 %v2326_v15 }
 0x2a0   : > { %2082 = vmatpush3.bf16.msra.mxu0 %v1290_v36  ;;  %v2571_v36 = vld [vmem:[%s2737_s27 + $0x6c] ss:$44 sps:$4 sm:$0xff]  }
 0x2a1   : > { %v1297_v19 = vpack.c.bf16 %v2323_v16, %v2322_v17  ;;  %v1289_v22 = vpack.c.bf16 %v2328_v2, %v2327_v18 }
 0x2a2   : > { %v2941_v26 = vpop.permute.xlu1 %2335  ;;  %v2943_v27 = vpop.permute.xlu0 %2330 }
 0x2a3   : > { %2083 = vmatprep.subr.bf16.mxu0 %v1297_v19  ;;  %v2338_v58 = vunpack.i.h.bf16 %v2941_v26 }
 0x2a4   : > { %2084 = vmatpush3.bf16.msra.mxu0 %v1289_v22  ;;  %v2298_v22 = vunpack.i.h.bf16 %v2929_v53  ;;  %v2313_v53 = vunpack.i.h.bf16 %v2935_v24 }
 0x2a5   : > { %2085 = vmatprep.subr.bf16.mxu0 %v1296_v29  ;;  %v2292_v29 = vunpack.i.l.bf16 %v2931_v54 }
 0x2a6   : > { %v2346_v33 = vpop.permute.xlu1 %2345  ;;  %v2947_v43 = vpop.permute.xlu0 %2340 }
 0x2a7   : > { %v2348_v44 = vunpack.i.h.bf16 %v2346_v33  ;;  %v2347_v45 = vunpack.i.l.bf16 %v2346_v33 }
 0x2a8   : > { %2086 = vmatpush3.bf16.msra.mxu0 %v1288_v30 }
 0x2a9   : > { %v1295_v46 = vpack.c.bf16 %v2348_v44, %v2347_v45 }
 0x2aa   : > { %v2351_v49 = vpop.permute.xlu1 %2350  ;;  %v2356_v20 = vpop.permute.xlu0 %2355 }
 0x2ab   : > { %v2353_v50 = vunpack.i.h.bf16 %v2351_v49  ;;  %v2352_v51 = vunpack.i.l.bf16 %v2351_v49  ;;  %v2358_v52 = vunpack.i.h.bf16 %v2356_v20  ;;  %v2357_v21 = vunpack.i.l.bf16 %v2356_v20  ;;  %2087 = vmatprep.subr.bf16.mxu0 %v1295_v46  ;;  %v2579_v20 = vld [vmem:[%s2737_s27 + $0x24] ss:$44 sps:$4 sm:$0xff]  }
 0x2ac   : > { %2088 = vmatpush3.bf16.msra.mxu0 %v2874_v7  ;;  %v2317_v46 = vunpack.i.l.bf16 %v2933_v9 }
 0x2ad   : > { %v1317_v55 = vpack.c.bf16 %v2353_v50, %v2352_v51  ;;  %v1309_v56 = vpack.c.bf16 %v2358_v52, %v2357_v21  ;;  %2089 = vmatprep.subr.bf16.mxu0 %v1294_v47  ;;  %v2312_v47 = vunpack.i.l.bf16 %v2935_v24  ;;  %v1330_v50 = vpack.c.bf16 %v2298_v22, %v2297_v12 }
 0x2ae   : > { %v2361_v59 = vpop.permute.xlu1 %2360  ;;  %v2366_v62 = vpop.permute.xlu0 %2365  ;;  %v1306_v51 = vpack.c.bf16 %v2293_v25, %v2292_v29  ;;  %v1312_v9 = vpack.c.bf16 %v2318_v13, %v2317_v46 }
 0x2af   : > { %v2363_v63 = vunpack.i.h.bf16 %v2361_v59  ;;  %v2362_v0 = vunpack.i.l.bf16 %v2361_v59  ;;  %v2368_v1 = vunpack.i.h.bf16 %v2366_v62  ;;  %v2367_v7 = vunpack.i.l.bf16 %v2366_v62  ;;  %2103 = vmatprep.subr.bf16.mxu1 %v1317_v55 }
 0x2b0   : > { %2090 = vmatpush3.bf16.msra.mxu0 %v2844_v60  ;;  %2104 = vmatpush3.bf16.msra.mxu1 %v1309_v56  ;;  %v1314_v60 = vpack.c.bf16 %v2278_v4, %v2277_v5  ;;  %v1322_v35 = vpack.c.bf16 %v2313_v53, %v2312_v47  ;;  %v2337_v59 = vunpack.i.l.bf16 %v2941_v26  ;;  %v2333_v62 = vunpack.i.h.bf16 %v2943_v27  ;;  %v2574_v53 = vld [vmem:[%s2737_s27 + $0x18] ss:$44 sps:$4 sm:$0xff]  }
 0x2b1   : > { %v1333_v6 = vpack.c.bf16 %v2363_v63, %v2362_v0  ;;  %v1325_v28 = vpack.c.bf16 %v2368_v1, %v2367_v7  ;;  %2105 = vmatprep.subr.bf16.mxu1 %v1316_v38  ;;  %v2332_v63 = vunpack.i.l.bf16 %v2943_v27  ;;  %v2343_v26 = vunpack.i.h.bf16 %v2947_v43 }
 0x2b2   : > { %v2371_v11 = vpop.permute.xlu1 %2370  ;;  %v2376_v15 = vpop.permute.xlu0 %2375 }
 0x2b3   : > { %v2373_v16 = vunpack.i.h.bf16 %v2371_v11  ;;  %v2372_v17 = vunpack.i.l.bf16 %v2371_v11  ;;  %v2378_v2 = vunpack.i.h.bf16 %v2376_v15  ;;  %v2377_v18 = vunpack.i.l.bf16 %v2376_v15  ;;  %2131 = vmatprep.subr.bf16.mxu0 %v1333_v6  ;;  %1442 = vmatmul.mubr.bf16.vlgmr.msra.gmra.mxu0 %v2568_v3 }
 0x2b4   : > { %2106 = vmatpush3.bf16.msra.mxu1 %v1308_v37  ;;  %2132 = vmatpush3.bf16.msra.mxu0 %v1325_v28  ;;  %v1328_v6 = vpack.c.bf16 %v2338_v58, %v2337_v59  ;;  %v1304_v28 = vpack.c.bf16 %v2333_v62, %v2332_v63 }
 0x2b5   : > { %v1315_v42 = vpack.c.bf16 %v2373_v16, %v2372_v17  ;;  %v1307_v19 = vpack.c.bf16 %v2378_v2, %v2377_v18  ;;  %2133 = vmatprep.subr.bf16.mxu0 %v1332_v10  ;;  %1449 = vmatprep.mubr.bf16.mxu0 %v2571_v36  ;;  %v2342_v36 = vunpack.i.l.bf16 %v2947_v43 }
 0x2b6   : > { %v2381_v30 = vpop.permute.xlu1 %2380  ;;  %v2386_v31 = vpop.permute.xlu0 %2385 }
 0x2b7   : > { %v2383_v32 = vunpack.i.h.bf16 %v2381_v30  ;;  %v2382_v33 = vunpack.i.l.bf16 %v2381_v30  ;;  %v2388_v44 = vunpack.i.h.bf16 %v2386_v31  ;;  %v2387_v45 = vunpack.i.l.bf16 %v2386_v31  ;;  %2107 = vmatprep.subr.bf16.mxu1 %v1315_v42 }
 0x2b8   : > { %2108 = vmatpush3.bf16.msra.mxu1 %v1307_v19  ;;  %2134 = vmatpush3.bf16.msra.mxu0 %v1324_v41  ;;  %v1320_v18 = vpack.c.bf16 %v2343_v26, %v2342_v36 }
 0x2b9   : > { %v1331_v54 = vpack.c.bf16 %v2383_v32, %v2382_v33  ;;  %v1323_v49 = vpack.c.bf16 %v2388_v44, %v2387_v45  ;;  %2109 = vmatprep.subr.bf16.mxu1 %v1314_v60 }
 0x2ba   : > { %v2391_v52 = vpop.permute.xlu1 %2390  ;;  %v2396_v21 = vpop.permute.xlu0 %2395 }
 0x2bb   : > { %v2393_v38 = vunpack.i.h.bf16 %v2391_v52  ;;  %v2392_v55 = vunpack.i.l.bf16 %v2391_v52  ;;  %v2398_v56 = vunpack.i.h.bf16 %v2396_v21  ;;  %v2397_v14 = vunpack.i.l.bf16 %v2396_v21  ;;  %2135 = vmatprep.subr.bf16.mxu0 %v1331_v54  ;;  %1450 = vmatmul.mubr.bf16.gmra.mxu0 %v2573_v34  ;;  %v2583_v52 = vld [vmem:[%s2737_s27 + $0x7c] ss:$44 sps:$4 sm:$0xff]  }
 0x2bc   : > { %2110 = vmatpush3.bf16.msra.mxu1 %v1306_v51  ;;  %2136 = vmatpush3.bf16.msra.mxu0 %v1323_v49  ;;  %v2580_v51 = vld [vmem:[%s2737_s27 + $0x74] ss:$44 sps:$4 sm:$0xff]  }
 0x2bd   : > { %v1313_v57 = vpack.c.bf16 %v2393_v38, %v2392_v55  ;;  %v1305_v24 = vpack.c.bf16 %v2398_v56, %v2397_v14  ;;  %2137 = vmatprep.subr.bf16.mxu0 %v1330_v50  ;;  %1539 = vmatprep.mubr.bf16.mxu0 %v2579_v20  ;;  %v2577_v50 = vld [vmem:[%s2737_s27 + $0x20] ss:$44 sps:$4 sm:$0xff]   ;;  %v2582_v38 = vld [vmem:[%s2737_s27 + $0x70] ss:$44 sps:$4 sm:$0xff]   ;;  %v2585_v55 = vld [vmem:[%s2737_s27 + $0x78] ss:$44 sps:$4 sm:$0xff]  }
 0x2be   : > { %v2401_v0 = vpop.permute.xlu1 %2400  ;;  %v2406_v1 = vpop.permute.xlu0 %2405  ;;  %v2586_v56 = vld [vmem:[%s2737_s27 + $0x28] ss:$44 sps:$4 sm:$0xff]  }
 0x2bf   : > { %v2403_v7 = vunpack.i.h.bf16 %v2401_v0  ;;  %v2402_v3 = vunpack.i.l.bf16 %v2401_v0  ;;  %v2408_v4 = vunpack.i.h.bf16 %v2406_v1  ;;  %v2407_v5 = vunpack.i.l.bf16 %v2406_v1  ;;  %2111 = vmatprep.subr.bf16.mxu1 %v1313_v57 }
 0x2c0   : > { %2112 = vmatpush3.bf16.msra.mxu1 %v1305_v24  ;;  %2138 = vmatpush3.bf16.msra.mxu0 %v1322_v35 }
 0x2c1   : > { %v1329_v39 = vpack.c.bf16 %v2403_v7, %v2402_v3  ;;  %v1321_v40 = vpack.c.bf16 %v2408_v4, %v2407_v5  ;;  %2113 = vmatprep.subr.bf16.mxu1 %v1312_v9 }
 0x2c2   : > { %v2411_v10 = vpop.permute.xlu1 %2410  ;;  %v2416_v27 = vpop.permute.xlu0 %2415 }
 0x2c3   : > { %v2413_v37 = vunpack.i.h.bf16 %v2411_v10  ;;  %v2412_v11 = vunpack.i.l.bf16 %v2411_v10  ;;  %v2418_v15 = vunpack.i.h.bf16 %v2416_v27  ;;  %v2417_v16 = vunpack.i.l.bf16 %v2416_v27  ;;  %2139 = vmatprep.subr.bf16.mxu0 %v1329_v39 }
 0x2c4   : > { %2114 = vmatpush3.bf16.msra.mxu1 %v1304_v28  ;;  %2140 = vmatpush3.bf16.msra.mxu0 %v1321_v40 }
 0x2c5   : > { %v1311_v17 = vpack.c.bf16 %v2413_v37, %v2412_v11  ;;  %v1303_v2 = vpack.c.bf16 %v2418_v15, %v2417_v16  ;;  %2141 = vmatprep.subr.bf16.mxu0 %v1328_v6 }
 0x2c6   : > { %v2426_v60 = vpop.permute.xlu1 %2425  ;;  %v2421_v41 = vpop.permute.xlu0 %2420 }
 0x2c7   : > { %v2428_v42 = vunpack.i.h.bf16 %v2426_v60  ;;  %v2427_v19 = vunpack.i.l.bf16 %v2426_v60  ;;  %v2423_v22 = vunpack.i.h.bf16 %v2421_v41  ;;  %v2422_v12 = vunpack.i.l.bf16 %v2421_v41  ;;  %2115 = vmatprep.subr.bf16.mxu1 %v1311_v17 }
 0x2c8   : > { %2116 = vmatpush3.bf16.msra.mxu1 %v1303_v2  ;;  %2142 = vmatpush3.bf16.msra.mxu0 %v1320_v18 }
 0x2c9   : > { %v1327_v43 = vpack.c.bf16 %v2428_v42, %v2427_v19  ;;  %v1310_v25 = vpack.c.bf16 %v2423_v22, %v2422_v12 }
 0x2ca   : > { %v2431_v29 = vpop.permute.xlu1 %2430  ;;  %v2436_v30 = vpop.permute.xlu0 %2435 }
 0x2cb   : > { %v2433_v31 = vunpack.i.h.bf16 %v2431_v29  ;;  %v2432_v32 = vunpack.i.l.bf16 %v2431_v29  ;;  %v2438_v33 = vunpack.i.h.bf16 %v2436_v30  ;;  %v2437_v44 = vunpack.i.l.bf16 %v2436_v30  ;;  %2117 = vmatprep.subr.bf16.mxu1 %v1310_v25  ;;  %2143 = vmatprep.subr.bf16.mxu0 %v1327_v43 }
 0x2cc   : > { %2144 = vmatpush3.bf16.msra.mxu0 %v2876_v23 }
 0x2cd   : > { %v1302_v45 = vpack.c.bf16 %v2433_v31, %v2432_v32  ;;  %v1326_v34 = vpack.c.bf16 %v2438_v33, %v2437_v44 }
 0x2ce   : > { %v2441_v13 = vpop.permute.xlu1 %2440  ;;  %v2446_v46 = vpop.permute.xlu0 %2445 }
 0x2cf   : > { %v2443_v47 = vunpack.i.h.bf16 %v2441_v13  ;;  %v2442_v54 = vunpack.i.l.bf16 %v2441_v13  ;;  %v2448_v49 = vunpack.i.h.bf16 %v2446_v46  ;;  %v2447_v20 = vunpack.i.l.bf16 %v2446_v46  ;;  %2118 = vmatpush3.bf16.msra.mxu1 %v1302_v45  ;;  %2145 = vmatprep.subr.bf16.mxu0 %v1326_v34 }
 0x2d0   : > { %2146 = vmatpush3.bf16.msra.mxu0 %v2846_v61  ;;  %v2587_v61 = vld [vmem:[%s2737_s27 + $0x80] ss:$44 sps:$4 sm:$0xff]   ;;  %s3035_s27 = scalar_lea.vmem %s3063_s3, %s2073_s24 }
 0x2d1   : > { %v1335_v23 = vpack.c.bf16 %v2443_v47, %v2442_v54  ;;  %v1334_v21 = vpack.c.bf16 %v2448_v49, %v2447_v20 }
 0x2d2   : > { %1491 = vmatmul.mubr.bf16.vlgmr.msra.gmra.mxu1 %v2574_v53 }
 0x2d3   : > { %2166 = vmatprep.subr.bf16.mxu1 %v1335_v23  ;;  %1540 = vmatmul.mubr.bf16.vlgmr.msra.gmra.mxu0 %v2577_v50 }
 0x2d4   : > { %2167 = vmatpush3.bf16.msra.mxu1 %v1335_v23  ;;  %1498 = vmatprep.mubr.bf16.mxu1 %v2580_v51 }
 0x2d5   : > { %2168 = vmatprep.subr.bf16.mxu1 %v1334_v21  ;;  %1547 = vmatprep.mubr.bf16.mxu0 %v2583_v52 }
 0x2d8   : > { %2169 = vmatpush3.bf16.msra.mxu1 %v1334_v21 }
 0x2da   : > { %1499 = vmatmul.mubr.bf16.gmra.mxu1 %v2582_v38 }
 0x2db   : > { %1548 = vmatmul.mubr.bf16.gmra.mxu0 %v2585_v55  ;;  %2170 = vmatprep.mubr.bf16.mxu1 %v2586_v56 }
 0x2e2   : > { %2171 = vmatmul.mubr.bf16.vlgmr.msra.gmra.mxu1 %v2587_v61 }
 0x373   : > { %v2091_v14 = vpop.f32.mrf.mxu0 }
 0x375   : > { %v2092_v9 = vpop.f32.mrf.mxu0 }
 0x376   : > { %v2093_v36 = vadd.f32 %v2092_v9, %v2091_v14  ;;  %v335_v14 = vld [vmem:[%s2808_s6 + $0x38] sm:$0xff]  ;;  %v334_v9 = vld [vmem:[%s2808_s6 + $0x30] sm:$0xff] }
 0x377   : > { %v2094_v35 = vpop.f32.mrf.mxu0 }
 0x379   : > { %v2095_v57 = vpop.f32.mrf.mxu0 }
 0x37a   : > { %v2096_v42 = vadd.f32 %v2095_v57, %v2094_v35  ;;  %v332_v35 = vld [vmem:[%s2808_s6 + $0x20] sm:$0xff] }
 0x37b   : > { %v2097_v24 = vpop.f32.mrf.mxu0 }
 0x37d   : > { %v2098_v58 = vpop.f32.mrf.mxu0 }
 0x37e   : > { %v2099_v10 = vadd.f32 %v2098_v58, %v2097_v24  ;;  %v333_v58 = vld [vmem:[%s2808_s6 + $0x28] sm:$0xff]  ;;  %s298_s6 = scalar_lea.vmem %s3064_s4, %s2074_s28 }
 0x37f   : > { %v2100_v59 = vpop.f32.mrf.mxu0 }
 0x381   : > { %v2101_v62 = vpop.f32.mrf.mxu0 }
 0x382   : > { %v2102_v31 = vadd.f32 %v2101_v62, %v2100_v59  ;;  %v2636_v59 = vmov 0.0   ;;  %v1719_v62 = vld [vmem:[%s298_s6 + $0x8] sm:$0xff] }
 0x383   : > { %2174 = vmatprep.subr.bf16.mxu1 %v2636_v59  ;;  %2178 = vmatprep.mubr.msk.bf16.mxu1 %vm2637_vm1, %v2636_v59 }
 0x392   : > { %v2119_v63 = vpop.f32.mrf.mxu1 }
 0x393   : > { %v2147_v0 = vpop.f32.mrf.mxu0 }
 0x394   : > { %v2120_v1 = vpop.f32.mrf.mxu1 }
 0x395   : > { %v2148_v7 = vpop.f32.mrf.mxu0  ;;  %v2121_v6 = vadd.f32 %v2120_v1, %v2119_v63  ;;  %v1718_v63 = vld [vmem:[%s298_s6] sm:$0xff] }
 0x396   : > { %v2122_v3 = vpop.f32.mrf.mxu1  ;;  %v2149_v11 = vadd.f32 %v2148_v7, %v2147_v0 }
 0x397   : > { %v2150_v4 = vpop.f32.mrf.mxu0  ;;  %v1493_v16 = vadd.f32 %v2121_v6, %v2093_v36 }
 0x398   : > { %v2123_v5 = vpop.f32.mrf.mxu1 }
 0x399   : > { %v2151_v39 = vpop.f32.mrf.mxu0  ;;  %v2124_v17 = vadd.f32 %v2123_v5, %v2122_v3  ;;  %v1542_v30 = vadd.f32 %v2149_v11, %v1493_v16 }
 0x39a   : > { %v2125_v40 = vpop.f32.mrf.mxu1  ;;  %v2152_v43 = vadd.f32 %v2151_v39, %v2150_v4 }
 0x39b   : > { %v2153_v28 = vpop.f32.mrf.mxu0  ;;  %v1496_v12 = vadd.f32 %v2124_v17, %v2096_v42 }
 0x39c   : > { %v2126_v26 = vpop.f32.mrf.mxu1 }
 0x39d   : > { %v2127_v27 = vadd.f32 %v2126_v26, %v2125_v40  ;;  %v2154_v37 = vpop.f32.mrf.mxu0  ;;  %v1545_v46 = vadd.f32 %v2152_v43, %v1496_v12 }
 0x39e   : > { %v2128_v15 = vpop.f32.mrf.mxu1  ;;  %v2155_v18 = vadd.f32 %v2154_v37, %v2153_v28 }
 0x39f   : > { %v1501_v2 = vadd.f32 %v2127_v27, %v2099_v10  ;;  %v2156_v60 = vpop.f32.mrf.mxu0 }
 0x3a0   : > { %v2129_v41 = vpop.f32.mrf.mxu1 }
 0x3a1   : > { %v2130_v19 = vadd.f32 %v2129_v41, %v2128_v15  ;;  %v2157_v25 = vpop.f32.mrf.mxu0  ;;  %v1550_v29 = vadd.f32 %v2155_v18, %v1501_v2 }
 0x3a2   : > { %v2172_v22 = vpop.f32.mrf.mxu1  ;;  %v2158_v45 = vadd.f32 %v2157_v25, %v2156_v60 }
 0x3a3   : > { %v1504_v44 = vadd.f32 %v2130_v19, %v2102_v31  ;;  %v2991_v13 = vadd.f32 %v2172_v22, %v1550_v29 }
 0x3a4   : > { %v1590_v32 = vpop.f32.mrf.mxu1 }
 0x3a5   : > { %v2989_v33 = vadd.f32 %v1590_v32, %v1542_v30  ;;  %v1553_v20 = vadd.f32 %v2158_v45, %v1504_v44  ;;  %v1624_v52 = vmul.f32 %v2991_v13, %v2991_v13  ;;  %v1612_v56 = vsel %vm1605_vm0, %v2991_v13, 0.0 }
 0x3a6   : > { %v2173_v34 = vpop.f32.mrf.mxu1 }
 0x3a7   : > { %v1606_v53 = vsel %vm1605_vm0, %v2989_v33, 0.0  ;;  %v1622_v47 = vmul.f32 %v2989_v33, %v2989_v33  ;;  %v3006_v21 = vadd.f32 %v2173_v34, %v1553_v20  ;;  %v1632_v55 = vsel %vm1605_vm0, %v1624_v52, 0.0 }
 0x3a8   : > { %v1593_v54 = vpop.f32.mrf.mxu1  ;;  %1607 = vadd.xlane.f32.xlu0 %v1606_v53 }
 0x3a9   : > { %v2997_v49 = vadd.f32 %v1593_v54, %v1545_v46  ;;  %v1626_v51 = vsel %vm1605_vm0, %v1622_v47, 0.0  ;;  %v1615_v61 = vsel %vm1605_vm0, %v3006_v21, 0.0  ;;  %v1625_v57 = vmul.f32 %v3006_v21, %v3006_v21 }
 0x3ab   : > { %v1609_v50 = vsel %vm1605_vm0, %v2997_v49, 0.0  ;;  %v1623_v23 = vmul.f32 %v2997_v49, %v2997_v49  ;;  %v1635_v24 = vsel %vm1605_vm0, %v1625_v57, 0.0 }
 0x3ac   : > { %1610 = vadd.xlane.f32.xlu1 %v1609_v50  ;;  %1627 = vadd.xlane.f32.xlu0 %v1626_v51 }
 0x3ad   : > { %v1629_v38 = vsel %vm1605_vm0, %v1623_v23, 0.0 }
 0x3b0   : > { %1630 = vadd.xlane.f32.xlu1 %v1629_v38  ;;  %1633 = vadd.xlane.f32.xlu0 %v1632_v55 }
 0x3b4   : > { %1613 = vadd.xlane.f32.xlu1 %v1612_v56  ;;  %1616 = vadd.xlane.f32.xlu0 %v1615_v61 }
 0x3c5   : > { %1687 = vperm.xlu1 %2449, %v335_v14  }
 0x3c9   : > { %2450 = vset.pattern.permute.xlu1 %v2620_v48 }
 0x3ca   : > { %1703 = vperm.xlu1 %2450, %v334_v9   ;;  %1682 = vperm.xlu0 %2214, %v334_v9  }
 0x3ce   : > { %2452 = vset.pattern.permute.xlu1 %v2619_v8  ;;  %2451 = vset.pattern.permute.xlu0 %v2620_v48 }
 0x3cf   : > { %1672 = vperm.xlu1 %2452, %v332_v35   ;;  %1707 = vperm.xlu0 %2451, %v335_v14  }
 0x3d3   : > { %1695 = vperm.xlu0 %2451, %v332_v35  }
 0x3d7   : > { %2454 = vset.pattern.permute.xlu0 %v2619_v8 }
 0x3d8   : > { %1726 = vperm.xlu0 %2454, %v1718_v63  }
 0x3dc   : > { %2457 = vset.pattern.permute.xlu0 %v2620_v48 }
 0x3dd   : > { %1791 = vperm.xlu0 %2457, %v1719_v62  }
 0x3f3   : > { %1636 = vadd.xlane.f32.xlu1 %v1635_v24 }
 0x404   : > { %1677 = vperm.xlu1 %2452, %v333_v58  }
 0x408   : > { %2453 = vset.pattern.permute.xlu1 %v2620_v48 }
 0x409   : > { %1699 = vperm.xlu1 %2453, %v333_v58  }
 0x40d   : > { %2455 = vset.pattern.permute.xlu1 %v2619_v8  ;;  %v2638_v8 = vmov 2  }
 0x40e   : > { %1731 = vperm.xlu1 %2455, %v1719_v62   ;;  %2459 = vset.pattern.permute.xlu0 %v2638_v8 }
 0x412   : > { %2456 = vset.pattern.permute.xlu1 %v2620_v48 }
 0x413   : > { %1787 = vperm.xlu1 %2456, %v1718_v63  }
 0x417   : > { %2458 = vset.pattern.permute.xlu1 %v2638_v8 }
 0x418   : > { %1806 = vperm.xlu1 %2458, %v1718_v63  }
 0x431   : > { %v1608_v1 = vpop.xlane.xlu0 %1607 }
 0x432   : > { %v1618_v28 = vmul.f32 0.125, %v1608_v1 }
 0x434   : > { %v1642_v37 = vmul.f32 %v1618_v28, %v1618_v28  ;;  %v1654_v20 = vsub.f32 %v2989_v33, %v1618_v28 }
 0x435   : > { %v1611_v0 = vpop.xlane.xlu1 %1610  ;;  %v1628_v3 = vpop.xlane.xlu0 %1627 }
 0x436   : > { %v1619_v36 = vmul.f32 0.125, %v1611_v0  ;;  %v1638_v10 = vmul.f32 0.125, %v1628_v3  ;;  %v2588_v3 = vld [vmem:[%s3035_s27] sm:$0xff]  }
 0x438   : > { %v1643_v15 = vmul.f32 %v1619_v36, %v1619_v36  ;;  %v1646_v16 = vsub.f32 %v1638_v10, %v1642_v37  ;;  %v1655_v23 = vsub.f32 %v2997_v49, %v1619_v36 }
 0x439   : > { %v1631_v7 = vpop.xlane.xlu1 %1630  ;;  %v1634_v39 = vpop.xlane.xlu0 %1633 }
 0x43a   : > { %v1640_v26 = vmul.f32 0.125, %v1634_v39  ;;  %v1639_v11 = vmul.f32 0.125, %v1631_v7  ;;  %v1650_v41 = vmax.f32 %v1646_v16, 0.0 }
 0x43c   : > { %v1647_v18 = vsub.f32 %v1639_v11, %v1643_v15  ;;  %v1658_v43 = vadd.f32 1e-05, %v1650_v41 }
 0x43d   : > { %v1614_v4 = vpop.xlane.xlu1 %1613  ;;  %v1617_v2 = vpop.xlane.xlu0 %1616 }
 0x43e   : > { %v1620_v5 = vmul.f32 0.125, %v1614_v4  ;;  %v1621_v19 = vmul.f32 0.125, %v1617_v2  ;;  %v1651_v22 = vmax.f32 %v1647_v18, 0.0 }
 0x440   : > { %v1644_v6 = vmul.f32 %v1620_v5, %v1620_v5  ;;  %v1645_v25 = vmul.f32 %v1621_v19, %v1621_v19  ;;  %v1659_v30 = vadd.f32 1e-05, %v1651_v22  ;;  %v1656_v34 = vsub.f32 %v2991_v13, %v1620_v5 }
 0x441   : > { %v1688_v40 = vpop.permute.xlu1 %1687  ;;  %v1657_v52 = vsub.f32 %v3006_v21, %v1621_v19 }
 0x442   : > { %v1648_v48 = vsub.f32 %v1640_v26, %v1644_v6 }
 0x444   : > { %v1652_v17 = vmax.f32 %v1648_v48, 0.0 }
 0x445   : > { %v1704_v27 = vpop.permute.xlu1 %1703  ;;  %v1683_v46 = vpop.permute.xlu0 %1682 }
 0x446   : > { %v1660_v42 = vadd.f32 1e-05, %v1652_v17 }
 0x448   : > { %2597 = vrsqrt.f32 %v1660_v42 }
 0x449   : > { %2599 = vrsqrt.f32 %v1658_v43 }
 0x44a   : > { %v1673_v60 = vpop.permute.xlu1 %1672  ;;  %2601 = vrsqrt.f32 %v1659_v30  ;;  %v1708_v51 = vpop.permute.xlu0 %1707 }
 0x44e   : > { %v1696_v58 = vpop.permute.xlu0 %1695 }
 0x453   : > { %v1727_v5 = vpop.permute.xlu0 %1726 }
 0x455   : > { %v2598_v45 = vpop.eup %2597 }
 0x456   : > { %v1668_v53 = vmul.f32 %v2598_v45, %v1656_v34  ;;  %v2600_v47 = vpop.eup %2599 }
 0x457   : > { %v2602_v50 = vpop.eup %2601  ;;  %v1666_v55 = vmul.f32 %v2600_v47, %v1654_v20 }
 0x458   : > { %v1692_v38 = vmul.f32 %v1683_v46, %v1668_v53  ;;  %v1667_v61 = vmul.f32 %v2602_v50, %v1655_v23 }
 0x459   : > { %v1690_v13 = vmul.f32 %v1673_v60, %v1666_v55 }
 0x45a   : > { %v1712_v35 = vadd.f32 %v1704_v27, %v1692_v38  ;;  %v1792_v27 = vpop.permute.xlu0 %1791 }
 0x45b   : > { %v1710_v8 = vadd.f32 %v1696_v58, %v1690_v13 }
 0x45c   : > { %v1716_v63 = vmax.f32 %v1712_v35, 0.0 }
 0x45d   : > { %v1714_v21 = vmax.f32 %v1710_v8, 0.0 }
 0x47c   : > { %v1637_v12 = vpop.xlane.xlu1 %1636 }
 0x47d   : > { %v1641_v29 = vmul.f32 0.125, %v1637_v12 }
 0x47f   : > { %v1649_v31 = vsub.f32 %v1641_v29, %v1645_v25 }
 0x480   : > { %v1678_v54 = vpop.permute.xlu1 %1677 }
 0x481   : > { %v1653_v32 = vmax.f32 %v1649_v31, 0.0  ;;  %v1691_v57 = vmul.f32 %v1678_v54, %v1667_v61 }
 0x483   : > { %v1661_v44 = vadd.f32 1e-05, %v1653_v32 }
 0x484   : > { %v1700_v9 = vpop.permute.xlu1 %1699 }
 0x485   : > { %2603 = vrsqrt.f32 %v1661_v44  ;;  %v1711_v62 = vadd.f32 %v1700_v9, %v1691_v57 }
 0x487   : > { %v1715_v49 = vmax.f32 %v1711_v62, 0.0 }
 0x489   : > { %v1722_v7 = vpack.c.bf16 %v1715_v49, %v1714_v21  ;;  %v1732_v4 = vpop.permute.xlu1 %1731 }
 0x48e   : > { %v1788_v36 = vpop.permute.xlu1 %1787 }
 0x492   : > { %v2604_v56 = vpop.eup %2603 }
 0x493   : > { %v1669_v14 = vmul.f32 %v2604_v56, %v1657_v52  ;;  %v1807_v19 = vpop.permute.xlu1 %1806 }
 0x495   : > { %v1693_v24 = vmul.f32 %v1688_v40, %v1669_v14 }
 0x497   : > { %v1713_v33 = vadd.f32 %v1708_v51, %v1693_v24 }
 0x499   : > { %v1717_v0 = vmax.f32 %v1713_v33, 0.0 }
 0x49b   : > { %v1723_v1 = vpack.c.bf16 %v1717_v0, %v1716_v63 }
 0x49d   : > { %2175 = vmatpush3.bf16.msra.mxu1 %v1723_v1 }
 0x49e   : > { %2176 = vmatprep.subr.bf16.mxu1 %v2636_v59 }
 0x4a1   : > { %2177 = vmatpush3.bf16.msra.mxu1 %v1722_v7 }
 0x4a4   : > { %2179 = vmatmul.mubr.msk.bf16.vlgmr.msra.gmra.mxu1 %vm1739_vm2, %v2588_v3 }
 0x564   : > { %v1777_v39 = vpop.f32.mrf.mxu1 }
 0x565   : > { %v1778_v40 = vadd.f32 %v1777_v39, %v1727_v5 }
 0x566   : > { %v2180_v6 = vpop.f32.mrf.mxu1 }
 0x567   : > { %v1784_v28 = vmax.f32 %v1778_v40, 0.0 }
 0x568   : > { %v1780_v26 = vpop.f32.mrf.mxu1 }
 0x569   : > { %v1781_v10 = vadd.f32 %v1780_v26, %v1732_v4  ;;  %v1794_v11 = vmul.f32 %v1788_v36, %v1784_v28 }
 0x56a   : > { %v2181_v48 = vpop.f32.mrf.mxu1 }
 0x56b   : > { %v1785_v37 = vmax.f32 %v1781_v10, 0.0  ;;  %v1796_v59 = vsel %vm1605_vm0, %v1794_v11, 0.0 }
 0x56d   : > { %v1795_v15 = vmul.f32 %v1792_v27, %v1785_v37 }
 0x56f   : > { %v1797_v16 = vsel %vm1605_vm0, %v1795_v15, 0.0 }
 0x570   : > { %v1798_v17 = vadd.f32 %v1797_v16, %v1796_v59 }
 0x572   : > { %v1799_v2 = vrot.slane %v1798_v17, 4 }
 0x574   : > { %v1800_v18 = vadd.f32 %v1799_v2, %v1798_v17 }
 0x576   : > { %v1801_v60 = vrot.slane %v1800_v18, 2 }
 0x578   : > { %v1802_v41 = vadd.f32 %v1801_v60, %v1800_v18 }
 0x57a   : > { %v1803_v42 = vrot.slane %v1802_v41, 1 }
 0x57c   : > { %v1804_v22 = vadd.f32 %v1803_v42, %v1802_v41 }
 0x57e   : > { %v1809_v12 = vadd.f32 %v1807_v19, %v1804_v22 }
 0x580   : > { %1821 = vrot.lane.b32.xlu0 %v1809_v12, %s2639_s7  ;;  %1815 = vrot.lane.b32.xlu1 %v1809_v12, %s2640_s8  ;;  %v1811_v43 = vsel %vm1810_vm3, %v1809_v12, 0.0  ;;  %v1846_v58 = vsel %vm1605_vm0, %v1809_v12, 0.0 }
 0x584   : > { %1827 = vrot.lane.b32.xlu1 %v1809_v12, %s2641_s9 }
 0x59f   : > { %1812 = vadd.xlane.f32.xlu0 %v1811_v43 }
 0x5f2   : > { %v1822_v25 = vpop.permute.xlu0 %1821  ;;  %v1816_v29 = vpop.permute.xlu1 %1815 }
 0x5f3   : > { %v1818_v30 = vsel %vm1810_vm3, %v1816_v29, 0.0  ;;  %v1824_v31 = vsel %vm1810_vm3, %v1822_v25, 0.0 }
 0x5f4   : > { %1819 = vadd.xlane.f32.xlu1 %v1818_v30  ;;  %1825 = vadd.xlane.f32.xlu0 %v1824_v31 }
 0x5f6   : > { %v1828_v32 = vpop.permute.xlu1 %1827 }
 0x5f7   : > { %v1830_v44 = vsel %vm1810_vm3, %v1828_v32, 0.0 }
 0x5f8   : > { %1831 = vadd.xlane.f32.xlu0 %v1830_v44 }
 0x628   : > { %v1813_v45 = vpop.xlane.xlu0 %1812 }
 0x67d   : > { %v1826_v34 = vpop.xlane.xlu0 %1825  ;;  %v1820_v46 = vpop.xlane.xlu1 %1819 }
 0x67e   : > { %v1834_v47 = vsel %vm1833_vm4, %v1813_v45, %v1820_v46 }
 0x681   : > { %v1832_v53 = vpop.xlane.xlu0 %1831 }
 0x682   : > { %v1835_v54 = vsel %vm1833_vm4, %v1826_v34, %v1832_v53 }
 0x683   : > { %v1836_v20 = vmax.f32 %v1834_v47, %v1835_v54 }
 0x685   : > { %v1837_v50 = vsub.f32 %v1834_v47, %v1836_v20  ;;  %v1840_v51 = vsub.f32 %v1835_v54, %v1836_v20 }
 0x687   : > { %v1838_v23 = vmul.f32 1.442695, %v1837_v50  ;;  %v1841_v52 = vmul.f32 1.442695, %v1840_v51 }
 0x689   : > { %2605 = vpow2.f32 %v1838_v23 }
 0x68a   : > { %2607 = vpow2.f32 %v1841_v52 }
 0x696   : > { %v2606_v38 = vpop.eup %2605 }
 0x697   : > { %v2608_v55 = vpop.eup %2607 }
 0x698   : > { %v1843_v56 = vadd.f32 %v2608_v55, %v2606_v38 }
 0x69a   : > { %2609 = vrcp.f32 %v1843_v56 }
 0x6a7   : > { %v2610_v61 = vpop.eup %2609 }
 0x6a8   : > { %v1847_v14 = vmul.f32 %v2610_v61, %v2606_v38  ;;  %v1850_v9 = vmul.f32 %v2610_v61, %v2608_v55 }
 0x6aa   : > { %v1849_v35 = vsel %vm1848_vm5, %v1847_v14, 0.0  ;;  %v1851_v13 = vsel %vm1848_vm5, %v1850_v9, 0.0 }
 0x6ab   : > { %v1853_v57 = vrot.slane %v1849_v35, 7  ;;  %v1856_v24 = vrot.slane %v1851_v13, 6 }
 0x6ad   : > { %v1859_v62 = vsel %vm1858_vm6, %v1846_v58, %v1853_v57 }
 0x6ae   : > { %v1861_v33 = vsel %vm1860_vm7, %v1859_v62, %v1856_v24 }
 0x6af   : > { %v1863_v63 = vsel %vm1862_vm8, %v1861_v33, 0.0 }
 0x6b0   : > { %1864 = vst [vmem:[%s302_s12] sm:$0xff] %v1863_v63 }
 0x6b1 PF: > { %s15_s18 = sadd.s32 1, %s2617_s18  }
 0x6b2   : > { %p12_p4 = scmp.ge.s32.totalorder %s15_s18, 4  }
 0x6b4   :  { %14 = sbr.rel (!%p12_p4) target bundleno = 1 (0x1), region = 82 }

</bundles_post_ra>
